<compile_context>
chip_gen: v6e
topology: v6e:2x2x1
jax: 0.10.0
libtpu: 0.0.40
codegen_flags: <defaults>
</compile_context>

<pallas_src>
import functools

import jax
import jax.numpy as jnp
from jax.experimental import pallas as pl
from jax.experimental.pallas import tpu as pltpu

EPS = 1e-5
LANE = 128


def _round_up(x, m):
    return (x + m - 1) // m * m


def _compiler_params():
    try:
        cap = int(pltpu.get_tpu_info().vmem_capacity_bytes)
    except Exception:
        cap = 64 * 1024 * 1024           # conservative (v7x-sized) fallback
    return pltpu.CompilerParams(
        dimension_semantics=("parallel",),                     # megacore over images
        vmem_limit_bytes=min(cap * 3 // 4, 100 * 1024 * 1024),  # ~96MiB v5e/v6e, 48MiB v7x
    )


_CP = _compiler_params()


# ----------------------------- Pallas kernels ------------------------------ #

def conv1_9tap_kernel(ph_ref, w_ref, z_ref, st_ref, acc_ref,
                      *, s, ho, wo, wop, cinp, cp):
    """3x3 stride-s conv of one image as 9 accumulating matmuls + partial BN stats.

    ph_ref: (1, s*s, PH, PW, cinp) bf16 — phase (py,px) holds x_pad[py::s, px::s, :].
    Tap (dy,dx) reads phase (dy%s, dx%s) at static offset (dy//s, dx//s): all in-kernel
    slicing is unit-stride static; nothing is im2col'ed in HBM.
    """
    hw = ho * wop
    for dy in range(3):
        for dx in range(3):
            p = (dy % s) * s + (dx % s)
            r0, c0 = dy // s, dx // s
            win = ph_ref[0, p, r0:r0 + ho]                        # (ho, PW, cinp) bf16
            win = win[:, c0:c0 + wop, :].reshape(hw, cinp)        # static shift, stays bf16
            contrib = jnp.dot(win, w_ref[dy * 3 + dx],
                              preferred_element_type=jnp.float32)
            if dy == 0 and dx == 0:
                acc_ref[...] = contrib                            # VMEM f32 accumulator
            else:
                acc_ref[...] += contrib
    acc = acc_ref[...]
    col = jax.lax.broadcasted_iota(jnp.int32, (hw, 1), 0) % wop
    acc = jnp.where(col < wo, acc, 0.0)                           # zero padded-width cols
    z_ref[0] = acc.astype(z_ref.dtype)
    st_ref[0] = jnp.concatenate(
        [jnp.sum(acc, axis=0, keepdims=True),
         jnp.sum(acc * acc, axis=0, keepdims=True)], axis=0)


def bn_relu_conv2_9tap_kernel(z1_ref, sc1_ref, sh1_ref, w_ref, z2_ref, st_ref, acc_ref,
                              *, ho, wo, wop, cp):
    """Fused: y = relu(scale1*z1 + shift1) (BN1), then 3x3 stride-1 conv as 9 matmuls.

    dy/dx window shifts are built in-kernel with zero-fill concatenates (no pre-shifted
    HBM copies); windows stay bf16; accumulation in a VMEM f32 scratch.
    """
    hw = ho * wop
    col = jax.lax.broadcasted_iota(jnp.int32, (hw, 1), 0) % wop
    y = z1_ref[0].astype(jnp.float32) * sc1_ref[...] + sh1_ref[...]
    y = jnp.maximum(y, 0.0)
    y = jnp.where(col < wo, y, 0.0).astype(jnp.bfloat16)          # conv2's zero padding
    y3 = y.reshape(ho, wop, cp)
    zc = jnp.zeros((ho, 1, cp), jnp.bfloat16)
    zr = jnp.zeros((1, wop, cp), jnp.bfloat16)
    y_dx = (jnp.concatenate([zc, y3[:, :wop - 1, :]], axis=1),    # reads y[., c-1]
            y3,                                                   # reads y[., c  ]
            jnp.concatenate([y3[:, 1:, :], zc], axis=1))          # reads y[., c+1]
    for dy in range(3):
        for dx in range(3):
            ysh = y_dx[dx]
            if dy == 0:
                win = jnp.concatenate([zr, ysh[:ho - 1]], axis=0)
            elif dy == 1:
                win = ysh
            else:
                win = jnp.concatenate([ysh[1:], zr], axis=0)
            contrib = jnp.dot(win.reshape(hw, cp), w_ref[dy * 3 + dx],
                              preferred_element_type=jnp.float32)
            if dy == 0 and dx == 0:
                acc_ref[...] = contrib
            else:
                acc_ref[...] += contrib
    acc = jnp.where(col < wo, acc_ref[...], 0.0)
    z2_ref[0] = acc.astype(z2_ref.dtype)
    st_ref[0] = jnp.concatenate(
        [jnp.sum(acc, axis=0, keepdims=True),
         jnp.sum(acc * acc, axis=0, keepdims=True)], axis=0)


def bn_add_relu_kernel(z_ref, sc_ref, sh_ref, x_ref, o_ref):
    """BN2 affine + identity shortcut + ReLU (bf16 output)."""
    y = z_ref[0].astype(jnp.float32) * sc_ref[...] + sh_ref[...]
    o_ref[0] = jnp.maximum(y + x_ref[0].astype(jnp.float32), 0.0).astype(o_ref.dtype)


def bn_proj_add_relu_kernel(z_ref, sc_ref, sh_ref, x_ref, w3_ref, b3_ref, o_ref):
    """BN2 affine + fused 1x1-conv projection shortcut + ReLU (bf16 output)."""
    y = z_ref[0].astype(jnp.float32) * sc_ref[...] + sh_ref[...]
    proj = jnp.dot(x_ref[0], w3_ref[...], preferred_element_type=jnp.float32) + b3_ref[...]
    o_ref[0] = jnp.maximum(y + proj, 0.0).astype(o_ref.dtype)


# ---------------------------- pallas_call wrappers -------------------------- #

def _conv1(phases, w1m, *, s, ho, wo, wop, cinp, cp):
    n, nph, ph_h, ph_w, _ = phases.shape
    hw = ho * wop
    kern = functools.partial(conv1_9tap_kernel, s=s, ho=ho, wo=wo, wop=wop,
                             cinp=cinp, cp=cp)
    return pl.pallas_call(
        kern,
        out_shape=(jax.ShapeDtypeStruct((n, hw, cp), jnp.bfloat16),
                   jax.ShapeDtypeStruct((n, 2, cp), jnp.float32)),
        grid=(n,),
        in_specs=[pl.BlockSpec((1, nph, ph_h, ph_w, cinp), lambda i: (i, 0, 0, 0, 0)),
                  pl.BlockSpec((9, cinp, cp), lambda i: (0, 0, 0))],     # weights resident
        out_specs=(pl.BlockSpec((1, hw, cp), lambda i: (i, 0, 0)),
                   pl.BlockSpec((1, 2, cp), lambda i: (i, 0, 0))),
        scratch_shapes=[pltpu.VMEM((hw, cp), jnp.float32)],
        compiler_params=_CP,
    )(phases, w1m)


def _bn1_relu_conv2(z1, scale1, shift1, w2m, *, ho, wo, wop, cp):
    n, hw, _ = z1.shape
    kern = functools.partial(bn_relu_conv2_9tap_kernel, ho=ho, wo=wo, wop=wop, cp=cp)
    return pl.pallas_call(
        kern,
        out_shape=(jax.ShapeDtypeStruct((n, hw, cp), jnp.bfloat16),
                   jax.ShapeDtypeStruct((n, 2, cp), jnp.float32)),
        grid=(n,),
        in_specs=[pl.BlockSpec((1, hw, cp), lambda i: (i, 0, 0)),
                  pl.BlockSpec((1, cp), lambda i: (0, 0)),
                  pl.BlockSpec((1, cp), lambda i: (0, 0)),
                  pl.BlockSpec((9, cp, cp), lambda i: (0, 0, 0))],       # weights resident
        out_specs=(pl.BlockSpec((1, hw, cp), lambda i: (i, 0, 0)),
                   pl.BlockSpec((1, 2, cp), lambda i: (i, 0, 0))),
        scratch_shapes=[pltpu.VMEM((hw, cp), jnp.float32)],
        compiler_params=_CP,
    )(z1, scale1, shift1, w2m)


def _bn_add_relu(z2, scale, shift, sc):
    n, hw, cp = z2.shape
    return pl.pallas_call(
        bn_add_relu_kernel,
        out_shape=jax.ShapeDtypeStruct((n, hw, cp), jnp.bfloat16),
        grid=(n,),
        in_specs=[pl.BlockSpec((1, hw, cp), lambda i: (i, 0, 0)),
                  pl.BlockSpec((1, cp), lambda i: (0, 0)),
                  pl.BlockSpec((1, cp), lambda i: (0, 0)),
                  pl.BlockSpec((1, hw, cp), lambda i: (i, 0, 0))],
        out_specs=pl.BlockSpec((1, hw, cp), lambda i: (i, 0, 0)),
        compiler_params=_CP,
    )(z2, scale, shift, sc)


def _bn_proj_add_relu(z2, scale, shift, xsub, w3m, b3):
    n, hw, cp = z2.shape
    cinp = xsub.shape[-1]
    return pl.pallas_call(
        bn_proj_add_relu_kernel,
        out_shape=jax.ShapeDtypeStruct((n, hw, cp), jnp.bfloat16),
        grid=(n,),
        in_specs=[pl.BlockSpec((1, hw, cp), lambda i: (i, 0, 0)),
                  pl.BlockSpec((1, cp), lambda i: (0, 0)),
                  pl.BlockSpec((1, cp), lambda i: (0, 0)),
                  pl.BlockSpec((1, hw, cinp), lambda i: (i, 0, 0)),
                  pl.BlockSpec((cinp, cp), lambda i: (0, 0)),
                  pl.BlockSpec((1, cp), lambda i: (0, 0))],
        out_specs=pl.BlockSpec((1, hw, cp), lambda i: (i, 0, 0)),
        compiler_params=_CP,
    )(z2, scale, shift, xsub, w3m, b3)


# ------------------------------- JAX glue ----------------------------------- #

def _w3x3_to_taps(w_oihw, cin_p, cout_p):
    """(Cout, Cin, 3, 3) -> (9, cin_p, cout_p) bf16, tap index = dy*3 + dx."""
    cout, cin = w_oihw.shape[:2]
    w = jnp.transpose(w_oihw, (2, 3, 1, 0)).reshape(9, cin, cout)
    return jnp.pad(w, ((0, 0), (0, cin_p - cin), (0, cout_p - cout))).astype(jnp.bfloat16)


def _pad_vec(v, cp):
    return jnp.pad(v.astype(jnp.float32), (0, cp - v.shape[0]))


def _fold_bn(stats, gamma, beta, count):
    """Per-image partial (sum, sum_sq) -> folded BN (scale, shift) rows, f32."""
    s = jnp.sum(stats[:, 0, :], axis=0)
    ss = jnp.sum(stats[:, 1, :], axis=0)
    mean = s / count
    var = ss / count - mean * mean                      # biased variance, like torch
    scale = gamma * jax.lax.rsqrt(var + EPS)
    shift = beta - mean * scale
    return scale.reshape(1, -1), shift.reshape(1, -1)


def _make_phases(x_nhwc, s, cinp, ho, wop):
    """Zero-padded (pad=1) input decomposed into s*s stride phases, bf16, channel-padded.

    Phase (py, px)[r, c, :] == x_pad[s*r + py, s*c + px, :]; total HBM prep ~1x the input.
    """
    n, h, w, cin = x_nhwc.shape
    xp = jnp.pad(x_nhwc, ((0, 0), (1, 1), (1, 1), (0, cinp - cin)))
    ph_h = ho + 2 // s
    ph_w = wop + 2 // s
    phases = []
    for py in range(s):
        for px in range(s):
            p = xp[:, py::s, px::s, :][:, :ph_h, :ph_w, :]
            p = jnp.pad(p, ((0, 0), (0, ph_h - p.shape[1]), (0, ph_w - p.shape[2]), (0, 0)))
            phases.append(p)
    return jnp.stack(phases, axis=1).astype(jnp.bfloat16)   # (n, s*s, ph_h, ph_w, cinp)


def init_params(key, input_channels, num_channels, use_1x1conv):
    ks = jax.random.split(key, 6)
    p = {
        "w1": 0.1 * jax.random.normal(ks[0], (num_channels, input_channels, 3, 3), jnp.float32),
        "b1": 0.1 * jax.random.normal(ks[1], (num_channels,), jnp.float32),
        "w2": 0.1 * jax.random.normal(ks[2], (num_channels, num_channels, 3, 3), jnp.float32),
        "b2": 0.1 * jax.random.normal(ks[3], (num_channels,), jnp.float32),
        # BatchNorm params use PyTorch defaults (gamma=1, beta=0).
        "g1": jnp.ones((num_channels,), jnp.float32),
        "be1": jnp.zeros((num_channels,), jnp.float32),
        "g2": jnp.ones((num_channels,), jnp.float32),
        "be2": jnp.zeros((num_channels,), jnp.float32),
    }
    if use_1x1conv:
        p["w3"] = 0.1 * jax.random.normal(ks[4], (num_channels, input_channels, 1, 1), jnp.float32)
        p["b3"] = 0.1 * jax.random.normal(ks[5], (num_channels,), jnp.float32)
    return p


@functools.partial(jax.jit, static_argnames=("use_1x1conv", "strides"))
def residual_forward(x_nchw, params, use_1x1conv=False, strides=1):
    x = jnp.transpose(x_nchw, (0, 2, 3, 1)).astype(jnp.float32)     # NCHW -> NHWC
    n, h, w, cin = x.shape
    cout = params["w1"].shape[0]
    cp = _round_up(cout, LANE)           # lane-dense output channels
    cinp = _round_up(cin, LANE)          # lane-dense contraction (K=128 per tap)
    s = strides
    ho = (h - 1) // s + 1
    wo = (w - 1) // s + 1
    wop = _round_up(wo, 16)              # bf16 sublane packing -> layout-free reshapes
    hw = ho * wop
    m_true = n * ho * wo                 # element count used for BN statistics

    if not use_1x1conv:
        assert s == 1 and cin == cout, "identity shortcut needs stride=1, Cin==Cout"

    # NOTE: conv1/conv2 biases are dropped — per-channel constants cancel exactly in BN.
    # --------- conv1: in-kernel 9-tap conv (no im2col in HBM) + partial BN1 stats -------
    phases = _make_phases(x, s, cinp, ho, wop)
    w1m = _w3x3_to_taps(params["w1"], cinp, cp)
    z1, st1 = _conv1(phases, w1m, s=s, ho=ho, wo=wo, wop=wop, cinp=cinp, cp=cp)
    scale1, shift1 = _fold_bn(st1, _pad_vec(params["g1"], cp), _pad_vec(params["be1"], cp), m_true)

    # --------- conv2: BN1+ReLU fused into the 9-tap conv kernel + partial BN2 stats -----
    w2m = _w3x3_to_taps(params["w2"], cp, cp)
    z2, st2 = _bn1_relu_conv2(z1, scale1, shift1, w2m, ho=ho, wo=wo, wop=wop, cp=cp)
    scale2, shift2 = _fold_bn(st2, _pad_vec(params["g2"], cp), _pad_vec(params["be2"], cp), m_true)

    # --------- BN2 affine + shortcut add + ReLU (fused epilogue, bf16 out) --------------
    if use_1x1conv:
        x_sub = x[:, ::s, ::s, :]                                    # (n, ho, wo, cin)
        x_sub = jnp.pad(x_sub, ((0, 0), (0, 0), (0, wop - wo), (0, cinp - cin)))
        x_sub = x_sub.reshape(n, hw, cinp).astype(jnp.bfloat16)
        w3m = jnp.transpose(params["w3"], (2, 3, 1, 0)).reshape(cin, cout)
        w3m = jnp.pad(w3m, ((0, cinp - cin), (0, cp - cout))).astype(jnp.bfloat16)
        b3 = _pad_vec(params["b3"], cp).reshape(1, cp)
        out = _bn_proj_add_relu(z2, scale2, shift2, x_sub, w3m, b3)
    else:
        sc = jnp.pad(x, ((0, 0), (0, 0), (0, wop - wo), (0, cp - cin)))
        sc = sc.reshape(n, hw, cp).astype(jnp.bfloat16)
        out = _bn_add_relu(z2, scale2, shift2, sc)

    out = out.reshape(n, ho, wop, cp)[:, :, :wo, :cout]
    return jnp.transpose(out, (0, 3, 1, 2)).astype(jnp.float32)     # -> NCHW f32


# -------------------------- pure-JAX reference ------------------------------ #

def residual_reference(x, params, use_1x1conv, strides):
    def conv(x, w, b, s, pad):
        y = jax.lax.conv_general_dilated(
            x, w, (s, s), [(pad, pad), (pad, pad)],
            dimension_numbers=("NCHW", "OIHW", "NCHW"),
            precision=jax.lax.Precision.HIGHEST)
        return y + b[None, :, None, None]

    def bn(y, g, be):
        mean = y.mean(axis=(0, 2, 3), keepdims=True)
        var = jnp.square(y - mean).mean(axis=(0, 2, 3), keepdims=True)
        return (y - mean) / jnp.sqrt(var + EPS) * g[None, :, None, None] + be[None, :, None, None]

    y = jax.nn.relu(bn(conv(x, params["w1"], params["b1"], strides, 1), params["g1"], params["be1"]))
    y = bn(conv(y, params["w2"], params["b2"], 1, 1), params["g2"], params["be2"])
    sc = conv(x, params["w3"], params["b3"], strides, 0) if use_1x1conv else x
    return jax.nn.relu(y + sc)


# ----------------------------------- main ----------------------------------- #

if __name__ == "__main__":
    key = jax.random.PRNGKey(0)
    kx1, kx2, kp1, kp2 = jax.random.split(key, 4)

    # Config A: identity shortcut (use_1x1conv=False, strides=1, Cin==Cout)
    x_a = jax.random.normal(kx1, (2, 8, 16, 16), jnp.float32)
    params_a = init_params(kp1, 8, 8, use_1x1conv=False)
    out_a = jax.block_until_ready(residual_forward(x_a, params_a, use_1x1conv=False, strides=1))
    ref_a = residual_reference(x_a, params_a, False, 1)
    assert out_a.shape == (2, 8, 16, 16)
    assert jnp.allclose(out_a, ref_a, rtol=3e-2, atol=3e-2)   # bf16 matmul-path tolerance

    # Config B: 1x1-conv projection shortcut, stride 2 (Cin=4 -> Cout=8)
    x_b = jax.random.normal(kx2, (2, 4, 16, 16), jnp.float32)
    params_b = init_params(kp2, 4, 8, use_1x1conv=True)
    out_b = jax.block_until_ready(residual_forward(x_b, params_b, use_1x1conv=True, strides=2))
    ref_b = residual_reference(x_b, params_b, True, 2)
    assert out_b.shape == (2, 8, 8, 8)
    assert jnp.allclose(out_b, ref_b, rtol=3e-2, atol=3e-2)

    print("KERNEL_OK")
</pallas_src>

<mosaic_0001>
module attributes {stable_mosaic.version = 11 : i64} {
  func.func @conv1_9tap_kernel(%arg0: i32, %arg1: memref<1x1x18x18x128xbf16, #tpu.memory_space<vmem>>, %arg2: memref<9x128x128xbf16, #tpu.memory_space<vmem>>, %arg3: memref<1x256x128xbf16, #tpu.memory_space<vmem>>, %arg4: memref<1x2x128xf32, #tpu.memory_space<vmem>>, %arg5: memref<256x128xf32, #tpu.memory_space<vmem>>) attributes {dimension_semantics = [#tpu.dimension_semantics<parallel>], iteration_bounds = array<i64: 2>, scalar_prefetch = 0 : i64, scratch_operands = 1 : i64, tpu.core_type = #tpu.core_type<tc>, window_params = [{transform_indices = @transform_0, window_bounds = array<i64: 1, 1, 18, 18, 128>}, {pipeline_mode = #tpu.pipeline_mode<synchronous>, transform_indices = @transform_1, window_bounds = array<i64: 9, 128, 128>}, {transform_indices = @transform_2, window_bounds = array<i64: 1, 256, 128>}, {transform_indices = @transform_3, window_bounds = array<i64: 1, 2, 128>}]} {
    %c0 = arith.constant 0 : index
    %c0_0 = arith.constant 0 : index
    %c0_1 = arith.constant 0 : index
    %c0_2 = arith.constant 0 : index
    %c0_3 = arith.constant 0 : index
    %0 = vector.load %arg1[%c0, %c0_0, %c0_1, %c0_2, %c0_3] : memref<1x1x18x18x128xbf16, #tpu.memory_space<vmem>>, vector<1x1x16x18x128xbf16>
    %1 = vector.shape_cast %0 : vector<1x1x16x18x128xbf16> to vector<16x18x128xbf16>
    %2 = vector.extract_strided_slice %1 {offsets = [0, 0, 0], sizes = [16, 16, 128], strides = [1, 1, 1]} : vector<16x18x128xbf16> to vector<16x16x128xbf16>
    %3 = vector.shape_cast %2 : vector<16x16x128xbf16> to vector<256x128xbf16>
    %c0_4 = arith.constant 0 : index
    %c0_5 = arith.constant 0 : index
    %c0_6 = arith.constant 0 : index
    %4 = vector.load %arg2[%c0_4, %c0_5, %c0_6] : memref<9x128x128xbf16, #tpu.memory_space<vmem>>, vector<1x128x128xbf16>
    %5 = vector.shape_cast %4 : vector<1x128x128xbf16> to vector<128x128xbf16>
    %cst = arith.constant dense<0.000000e+00> : vector<256x128xf32>
    %6 = tpu.matmul %3, %5, %cst {dimension_numbers = #tpu.dot_dimension_numbers<[1], [0], [0], [1], [0, 0, 1, 1], [], []>} : vector<256x128xbf16>, vector<128x128xbf16>, vector<256x128xf32> -> vector<256x128xf32>
    %c0_7 = arith.constant 0 : index
    %c0_8 = arith.constant 0 : index
    %7 = vector.load %arg5[%c0_7, %c0_8] : memref<256x128xf32, #tpu.memory_space<vmem>>, vector<256x128xf32>
    tpu.vector_store %arg5[%c0_7, %c0_8], %6 {strides = array<i32>} : memref<256x128xf32, #tpu.memory_space<vmem>>, vector<256x128xf32>,
    %c0_9 = arith.constant 0 : index
    %c0_10 = arith.constant 0 : index
    %c0_11 = arith.constant 0 : index
    %c0_12 = arith.constant 0 : index
    %c0_13 = arith.constant 0 : index
    %8 = vector.load %arg1[%c0_9, %c0_10, %c0_11, %c0_12, %c0_13] : memref<1x1x18x18x128xbf16, #tpu.memory_space<vmem>>, vector<1x1x16x18x128xbf16>
    %9 = vector.shape_cast %8 : vector<1x1x16x18x128xbf16> to vector<16x18x128xbf16>
    %10 = vector.extract_strided_slice %9 {offsets = [0, 1, 0], sizes = [16, 16, 128], strides = [1, 1, 1]} : vector<16x18x128xbf16> to vector<16x16x128xbf16>
    %11 = vector.shape_cast %10 : vector<16x16x128xbf16> to vector<256x128xbf16>
    %c1 = arith.constant 1 : index
    %c0_14 = arith.constant 0 : index
    %c0_15 = arith.constant 0 : index
    %12 = vector.load %arg2[%c1, %c0_14, %c0_15] : memref<9x128x128xbf16, #tpu.memory_space<vmem>>, vector<1x128x128xbf16>
    %13 = vector.shape_cast %12 : vector<1x128x128xbf16> to vector<128x128xbf16>
    %cst_16 = arith.constant dense<0.000000e+00> : vector<256x128xf32>
    %14 = tpu.matmul %11, %13, %cst_16 {dimension_numbers = #tpu.dot_dimension_numbers<[1], [0], [0], [1], [0, 0, 1, 1], [], []>} : vector<256x128xbf16>, vector<128x128xbf16>, vector<256x128xf32> -> vector<256x128xf32>
    %c0_17 = arith.constant 0 : index
    %c0_18 = arith.constant 0 : index
    %15 = vector.load %arg5[%c0_17, %c0_18] : memref<256x128xf32, #tpu.memory_space<vmem>>, vector<256x128xf32>
    %16 = arith.addf %15, %14 : vector<256x128xf32>
    %c0_19 = arith.constant 0 : index
    %c0_20 = arith.constant 0 : index
    %17 = vector.load %arg5[%c0_19, %c0_20] : memref<256x128xf32, #tpu.memory_space<vmem>>, vector<256x128xf32>
    tpu.vector_store %arg5[%c0_19, %c0_20], %16 {strides = array<i32>} : memref<256x128xf32, #tpu.memory_space<vmem>>, vector<256x128xf32>,
    %c0_21 = arith.constant 0 : index
    %c0_22 = arith.constant 0 : index
    %c0_23 = arith.constant 0 : index
    %c0_24 = arith.constant 0 : index
    %c0_25 = arith.constant 0 : index
    %18 = vector.load %arg1[%c0_21, %c0_22, %c0_23, %c0_24, %c0_25] : memref<1x1x18x18x128xbf16, #tpu.memory_space<vmem>>, vector<1x1x16x18x128xbf16>
    %19 = vector.shape_cast %18 : vector<1x1x16x18x128xbf16> to vector<16x18x128xbf16>
    %20 = vector.extract_strided_slice %19 {offsets = [0, 2, 0], sizes = [16, 16, 128], strides = [1, 1, 1]} : vector<16x18x128xbf16> to vector<16x16x128xbf16>
    %21 = vector.shape_cast %20 : vector<16x16x128xbf16> to vector<256x128xbf16>
    %c2 = arith.constant 2 : index
    %c0_26 = arith.constant 0 : index
    %c0_27 = arith.constant 0 : index
    %22 = vector.load %arg2[%c2, %c0_26, %c0_27] : memref<9x128x128xbf16, #tpu.memory_space<vmem>>, vector<1x128x128xbf16>
    %23 = vector.shape_cast %22 : vector<1x128x128xbf16> to vector<128x128xbf16>
    %cst_28 = arith.constant dense<0.000000e+00> : vector<256x128xf32>
    %24 = tpu.matmul %21, %23, %cst_28 {dimension_numbers = #tpu.dot_dimension_numbers<[1], [0], [0], [1], [0, 0, 1, 1], [], []>} : vector<256x128xbf16>, vector<128x128xbf16>, vector<256x128xf32> -> vector<256x128xf32>
    %c0_29 = arith.constant 0 : index
    %c0_30 = arith.constant 0 : index
    %25 = vector.load %arg5[%c0_29, %c0_30] : memref<256x128xf32, #tpu.memory_space<vmem>>, vector<256x128xf32>
    %26 = arith.addf %25, %24 : vector<256x128xf32>
    %c0_31 = arith.constant 0 : index
    %c0_32 = arith.constant 0 : index
    %27 = vector.load %arg5[%c0_31, %c0_32] : memref<256x128xf32, #tpu.memory_space<vmem>>, vector<256x128xf32>
    tpu.vector_store %arg5[%c0_31, %c0_32], %26 {strides = array<i32>} : memref<256x128xf32, #tpu.memory_space<vmem>>, vector<256x128xf32>,
    %c0_33 = arith.constant 0 : index
    %c0_34 = arith.constant 0 : index
    %c1_35 = arith.constant 1 : index
    %c0_36 = arith.constant 0 : index
    %c0_37 = arith.constant 0 : index
    %28 = vector.load %arg1[%c0_33, %c0_34, %c1_35, %c0_36, %c0_37] : memref<1x1x18x18x128xbf16, #tpu.memory_space<vmem>>, vector<1x1x16x18x128xbf16>
    %29 = vector.shape_cast %28 : vector<1x1x16x18x128xbf16> to vector<16x18x128xbf16>
    %30 = vector.extract_strided_slice %29 {offsets = [0, 0, 0], sizes = [16, 16, 128], strides = [1, 1, 1]} : vector<16x18x128xbf16> to vector<16x16x128xbf16>
    %31 = vector.shape_cast %30 : vector<16x16x128xbf16> to vector<256x128xbf16>
    %c3 = arith.constant 3 : index
    %c0_38 = arith.constant 0 : index
    %c0_39 = arith.constant 0 : index
    %32 = vector.load %arg2[%c3, %c0_38, %c0_39] : memref<9x128x128xbf16, #tpu.memory_space<vmem>>, vector<1x128x128xbf16>
    %33 = vector.shape_cast %32 : vector<1x128x128xbf16> to vector<128x128xbf16>
    %cst_40 = arith.constant dense<0.000000e+00> : vector<256x128xf32>
    %34 = tpu.matmul %31, %33, %cst_40 {dimension_numbers = #tpu.dot_dimension_numbers<[1], [0], [0], [1], [0, 0, 1, 1], [], []>} : vector<256x128xbf16>, vector<128x128xbf16>, vector<256x128xf32> -> vector<256x128xf32>
    %c0_41 = arith.constant 0 : index
    %c0_42 = arith.constant 0 : index
    %35 = vector.load %arg5[%c0_41, %c0_42] : memref<256x128xf32, #tpu.memory_space<vmem>>, vector<256x128xf32>
    %36 = arith.addf %35, %34 : vector<256x128xf32>
    %c0_43 = arith.constant 0 : index
    %c0_44 = arith.constant 0 : index
    %37 = vector.load %arg5[%c0_43, %c0_44] : memref<256x128xf32, #tpu.memory_space<vmem>>, vector<256x128xf32>
    tpu.vector_store %arg5[%c0_43, %c0_44], %36 {strides = array<i32>} : memref<256x128xf32, #tpu.memory_space<vmem>>, vector<256x128xf32>,
    %c0_45 = arith.constant 0 : index
    %c0_46 = arith.constant 0 : index
    %c1_47 = arith.constant 1 : index
    %c0_48 = arith.constant 0 : index
    %c0_49 = arith.constant 0 : index
    %38 = vector.load %arg1[%c0_45, %c0_46, %c1_47, %c0_48, %c0_49] : memref<1x1x18x18x128xbf16, #tpu.memory_space<vmem>>, vector<1x1x16x18x128xbf16>
    %39 = vector.shape_cast %38 : vector<1x1x16x18x128xbf16> to vector<16x18x128xbf16>
    %40 = vector.extract_strided_slice %39 {offsets = [0, 1, 0], sizes = [16, 16, 128], strides = [1, 1, 1]} : vector<16x18x128xbf16> to vector<16x16x128xbf16>
    %41 = vector.shape_cast %40 : vector<16x16x128xbf16> to vector<256x128xbf16>
    %c4 = arith.constant 4 : index
    %c0_50 = arith.constant 0 : index
    %c0_51 = arith.constant 0 : index
    %42 = vector.load %arg2[%c4, %c0_50, %c0_51] : memref<9x128x128xbf16, #tpu.memory_space<vmem>>, vector<1x128x128xbf16>
    %43 = vector.shape_cast %42 : vector<1x128x128xbf16> to vector<128x128xbf16>
    %cst_52 = arith.constant dense<0.000000e+00> : vector<256x128xf32>
    %44 = tpu.matmul %41, %43, %cst_52 {dimension_numbers = #tpu.dot_dimension_numbers<[1], [0], [0], [1], [0, 0, 1, 1], [], []>} : vector<256x128xbf16>, vector<128x128xbf16>, vector<256x128xf32> -> vector<256x128xf32>
    %c0_53 = arith.constant 0 : index
    %c0_54 = arith.constant 0 : index
    %45 = vector.load %arg5[%c0_53, %c0_54] : memref<256x128xf32, #tpu.memory_space<vmem>>, vector<256x128xf32>
    %46 = arith.addf %45, %44 : vector<256x128xf32>
    %c0_55 = arith.constant 0 : index
    %c0_56 = arith.constant 0 : index
    %47 = vector.load %arg5[%c0_55, %c0_56] : memref<256x128xf32, #tpu.memory_space<vmem>>, vector<256x128xf32>
    tpu.vector_store %arg5[%c0_55, %c0_56], %46 {strides = array<i32>} : memref<256x128xf32, #tpu.memory_space<vmem>>, vector<256x128xf32>,
    %c0_57 = arith.constant 0 : index
    %c0_58 = arith.constant 0 : index
    %c1_59 = arith.constant 1 : index
    %c0_60 = arith.constant 0 : index
    %c0_61 = arith.constant 0 : index
    %48 = vector.load %arg1[%c0_57, %c0_58, %c1_59, %c0_60, %c0_61] : memref<1x1x18x18x128xbf16, #tpu.memory_space<vmem>>, vector<1x1x16x18x128xbf16>
    %49 = vector.shape_cast %48 : vector<1x1x16x18x128xbf16> to vector<16x18x128xbf16>
    %50 = vector.extract_strided_slice %49 {offsets = [0, 2, 0], sizes = [16, 16, 128], strides = [1, 1, 1]} : vector<16x18x128xbf16> to vector<16x16x128xbf16>
    %51 = vector.shape_cast %50 : vector<16x16x128xbf16> to vector<256x128xbf16>
    %c5 = arith.constant 5 : index
    %c0_62 = arith.constant 0 : index
    %c0_63 = arith.constant 0 : index
    %52 = vector.load %arg2[%c5, %c0_62, %c0_63] : memref<9x128x128xbf16, #tpu.memory_space<vmem>>, vector<1x128x128xbf16>
    %53 = vector.shape_cast %52 : vector<1x128x128xbf16> to vector<128x128xbf16>
    %cst_64 = arith.constant dense<0.000000e+00> : vector<256x128xf32>
    %54 = tpu.matmul %51, %53, %cst_64 {dimension_numbers = #tpu.dot_dimension_numbers<[1], [0], [0], [1], [0, 0, 1, 1], [], []>} : vector<256x128xbf16>, vector<128x128xbf16>, vector<256x128xf32> -> vector<256x128xf32>
    %c0_65 = arith.constant 0 : index
    %c0_66 = arith.constant 0 : index
    %55 = vector.load %arg5[%c0_65, %c0_66] : memref<256x128xf32, #tpu.memory_space<vmem>>, vector<256x128xf32>
    %56 = arith.addf %55, %54 : vector<256x128xf32>
    %c0_67 = arith.constant 0 : index
    %c0_68 = arith.constant 0 : index
    %57 = vector.load %arg5[%c0_67, %c0_68] : memref<256x128xf32, #tpu.memory_space<vmem>>, vector<256x128xf32>
    tpu.vector_store %arg5[%c0_67, %c0_68], %56 {strides = array<i32>} : memref<256x128xf32, #tpu.memory_space<vmem>>, vector<256x128xf32>,
    %c0_69 = arith.constant 0 : index
    %c0_70 = arith.constant 0 : index
    %c2_71 = arith.constant 2 : index
    %c0_72 = arith.constant 0 : index
    %c0_73 = arith.constant 0 : index
    %58 = vector.load %arg1[%c0_69, %c0_70, %c2_71, %c0_72, %c0_73] : memref<1x1x18x18x128xbf16, #tpu.memory_space<vmem>>, vector<1x1x16x18x128xbf16>
    %59 = vector.shape_cast %58 : vector<1x1x16x18x128xbf16> to vector<16x18x128xbf16>
    %60 = vector.extract_strided_slice %59 {offsets = [0, 0, 0], sizes = [16, 16, 128], strides = [1, 1, 1]} : vector<16x18x128xbf16> to vector<16x16x128xbf16>
    %61 = vector.shape_cast %60 : vector<16x16x128xbf16> to vector<256x128xbf16>
    %c6 = arith.constant 6 : index
    %c0_74 = arith.constant 0 : index
    %c0_75 = arith.constant 0 : index
    %62 = vector.load %arg2[%c6, %c0_74, %c0_75] : memref<9x128x128xbf16, #tpu.memory_space<vmem>>, vector<1x128x128xbf16>
    %63 = vector.shape_cast %62 : vector<1x128x128xbf16> to vector<128x128xbf16>
    %cst_76 = arith.constant dense<0.000000e+00> : vector<256x128xf32>
    %64 = tpu.matmul %61, %63, %cst_76 {dimension_numbers = #tpu.dot_dimension_numbers<[1], [0], [0], [1], [0, 0, 1, 1], [], []>} : vector<256x128xbf16>, vector<128x128xbf16>, vector<256x128xf32> -> vector<256x128xf32>
    %c0_77 = arith.constant 0 : index
    %c0_78 = arith.constant 0 : index
    %65 = vector.load %arg5[%c0_77, %c0_78] : memref<256x128xf32, #tpu.memory_space<vmem>>, vector<256x128xf32>
    %66 = arith.addf %65, %64 : vector<256x128xf32>
    %c0_79 = arith.constant 0 : index
    %c0_80 = arith.constant 0 : index
    %67 = vector.load %arg5[%c0_79, %c0_80] : memref<256x128xf32, #tpu.memory_space<vmem>>, vector<256x128xf32>
    tpu.vector_store %arg5[%c0_79, %c0_80], %66 {strides = array<i32>} : memref<256x128xf32, #tpu.memory_space<vmem>>, vector<256x128xf32>,
    %c0_81 = arith.constant 0 : index
    %c0_82 = arith.constant 0 : index
    %c2_83 = arith.constant 2 : index
    %c0_84 = arith.constant 0 : index
    %c0_85 = arith.constant 0 : index
    %68 = vector.load %arg1[%c0_81, %c0_82, %c2_83, %c0_84, %c0_85] : memref<1x1x18x18x128xbf16, #tpu.memory_space<vmem>>, vector<1x1x16x18x128xbf16>
    %69 = vector.shape_cast %68 : vector<1x1x16x18x128xbf16> to vector<16x18x128xbf16>
    %70 = vector.extract_strided_slice %69 {offsets = [0, 1, 0], sizes = [16, 16, 128], strides = [1, 1, 1]} : vector<16x18x128xbf16> to vector<16x16x128xbf16>
    %71 = vector.shape_cast %70 : vector<16x16x128xbf16> to vector<256x128xbf16>
    %c7 = arith.constant 7 : index
    %c0_86 = arith.constant 0 : index
    %c0_87 = arith.constant 0 : index
    %72 = vector.load %arg2[%c7, %c0_86, %c0_87] : memref<9x128x128xbf16, #tpu.memory_space<vmem>>, vector<1x128x128xbf16>
    %73 = vector.shape_cast %72 : vector<1x128x128xbf16> to vector<128x128xbf16>
    %cst_88 = arith.constant dense<0.000000e+00> : vector<256x128xf32>
    %74 = tpu.matmul %71, %73, %cst_88 {dimension_numbers = #tpu.dot_dimension_numbers<[1], [0], [0], [1], [0, 0, 1, 1], [], []>} : vector<256x128xbf16>, vector<128x128xbf16>, vector<256x128xf32> -> vector<256x128xf32>
    %c0_89 = arith.constant 0 : index
    %c0_90 = arith.constant 0 : index
    %75 = vector.load %arg5[%c0_89, %c0_90] : memref<256x128xf32, #tpu.memory_space<vmem>>, vector<256x128xf32>
    %76 = arith.addf %75, %74 : vector<256x128xf32>
    %c0_91 = arith.constant 0 : index
    %c0_92 = arith.constant 0 : index
    %77 = vector.load %arg5[%c0_91, %c0_92] : memref<256x128xf32, #tpu.memory_space<vmem>>, vector<256x128xf32>
    tpu.vector_store %arg5[%c0_91, %c0_92], %76 {strides = array<i32>} : memref<256x128xf32, #tpu.memory_space<vmem>>, vector<256x128xf32>,
    %c0_93 = arith.constant 0 : index
    %c0_94 = arith.constant 0 : index
    %c2_95 = arith.constant 2 : index
    %c0_96 = arith.constant 0 : index
    %c0_97 = arith.constant 0 : index
    %78 = vector.load %arg1[%c0_93, %c0_94, %c2_95, %c0_96, %c0_97] : memref<1x1x18x18x128xbf16, #tpu.memory_space<vmem>>, vector<1x1x16x18x128xbf16>
    %79 = vector.shape_cast %78 : vector<1x1x16x18x128xbf16> to vector<16x18x128xbf16>
    %80 = vector.extract_strided_slice %79 {offsets = [0, 2, 0], sizes = [16, 16, 128], strides = [1, 1, 1]} : vector<16x18x128xbf16> to vector<16x16x128xbf16>
    %81 = vector.shape_cast %80 : vector<16x16x128xbf16> to vector<256x128xbf16>
    %c8 = arith.constant 8 : index
    %c0_98 = arith.constant 0 : index
    %c0_99 = arith.constant 0 : index
    %82 = vector.load %arg2[%c8, %c0_98, %c0_99] : memref<9x128x128xbf16, #tpu.memory_space<vmem>>, vector<1x128x128xbf16>
    %83 = vector.shape_cast %82 : vector<1x128x128xbf16> to vector<128x128xbf16>
    %cst_100 = arith.constant dense<0.000000e+00> : vector<256x128xf32>
    %84 = tpu.matmul %81, %83, %cst_100 {dimension_numbers = #tpu.dot_dimension_numbers<[1], [0], [0], [1], [0, 0, 1, 1], [], []>} : vector<256x128xbf16>, vector<128x128xbf16>, vector<256x128xf32> -> vector<256x128xf32>
    %c0_101 = arith.constant 0 : index
    %c0_102 = arith.constant 0 : index
    %85 = vector.load %arg5[%c0_101, %c0_102] : memref<256x128xf32, #tpu.memory_space<vmem>>, vector<256x128xf32>
    %86 = arith.addf %85, %84 : vector<256x128xf32>
    %c0_103 = arith.constant 0 : index
    %c0_104 = arith.constant 0 : index
    %87 = vector.load %arg5[%c0_103, %c0_104] : memref<256x128xf32, #tpu.memory_space<vmem>>, vector<256x128xf32>
    tpu.vector_store %arg5[%c0_103, %c0_104], %86 {strides = array<i32>} : memref<256x128xf32, #tpu.memory_space<vmem>>, vector<256x128xf32>,
    %c0_105 = arith.constant 0 : index
    %c0_106 = arith.constant 0 : index
    %88 = vector.load %arg5[%c0_105, %c0_106] : memref<256x128xf32, #tpu.memory_space<vmem>>, vector<256x128xf32>
    %89 = tpu.iota {dimensions = array<i32: 0>} : vector<256x1xi32>
    %c16_i32 = arith.constant 16 : i32
    %c0_i32 = arith.constant 0 : i32
    %90 = arith.cmpi eq, %c16_i32, %c0_i32 : i32
    %c1_i32 = arith.constant 1 : i32
    %91 = arith.select %90, %c1_i32, %c16_i32 : i32
    %92 = vector.broadcast %91 : i32 to vector<256x1xi32>
    %93 = arith.remsi %89, %92 : vector<256x1xi32>
    %c0_i32_107 = arith.constant 0 : i32
    %94 = vector.broadcast %c0_i32_107 : i32 to vector<256x1xi32>
    %95 = arith.cmpi ne, %93, %94 : vector<256x1xi32>
    %c0_i32_108 = arith.constant 0 : i32
    %96 = vector.broadcast %c0_i32_108 : i32 to vector<256x1xi32>
    %97 = arith.cmpi slt, %93, %96 : vector<256x1xi32>
    %c0_i32_109 = arith.constant 0 : i32
    %98 = arith.cmpi slt, %91, %c0_i32_109 : i32
    %99 = vector.broadcast %98 : i1 to vector<256x1xi1>
    %100 = vector.broadcast %99 : vector<256x1xi1> to vector<256x1xi1>
    %101 = arith.xori %97, %100 : vector<256x1xi1>
    %102 = arith.andi %101, %95 : vector<256x1xi1>
    %103 = vector.broadcast %91 : i32 to vector<256x1xi32>
    %104 = arith.addi %93, %103 : vector<256x1xi32>
    %105 = arith.select %102, %104, %93 : vector<256x1xi1>, vector<256x1xi32>
    %c16_i32_110 = arith.constant 16 : i32
    %106 = vector.broadcast %c16_i32_110 : i32 to vector<256x1xi32>
    %107 = arith.cmpi slt, %105, %106 : vector<256x1xi32>
    %cst_111 = arith.constant 0.000000e+00 : f32
    %108 = vector.shape_cast %107 : vector<256x1xi1> to vector<256x1xi1>
    %109 = vector.broadcast %108 : vector<256x1xi1> to vector<256x128xi1>
    %110 = vector.broadcast %cst_111 : f32 to vector<256x128xf32>
    %111 = arith.select %109, %88, %110 : vector<256x128xi1>, vector<256x128xf32>
    %112 = arith.truncf %111 : vector<256x128xf32> to vector<256x128xbf16>
    %c0_112 = arith.constant 0 : index
    %c0_113 = arith.constant 0 : index
    %c0_114 = arith.constant 0 : index
    %113 = vector.load %arg3[%c0_112, %c0_113, %c0_114] : memref<1x256x128xbf16, #tpu.memory_space<vmem>>, vector<1x256x128xbf16>
    %114 = vector.shape_cast %113 : vector<1x256x128xbf16> to vector<256x128xbf16>
    %115 = vector.shape_cast %112 : vector<256x128xbf16> to vector<1x256x128xbf16>
    tpu.vector_store %arg3[%c0_112, %c0_113, %c0_114], %115 {strides = array<i32>} : memref<1x256x128xbf16, #tpu.memory_space<vmem>>, vector<1x256x128xbf16>,
    %cst_115 = arith.constant dense<0.000000e+00> : vector<128xf32>
    %116 = vector.multi_reduction <add>, %111, %cst_115 [0] : vector<256x128xf32> to vector<128xf32>
    %117 = vector.shape_cast %116 : vector<128xf32> to vector<1x128xf32>
    %118 = arith.mulf %111, %111 : vector<256x128xf32>
    %cst_116 = arith.constant dense<0.000000e+00> : vector<128xf32>
    %119 = vector.multi_reduction <add>, %118, %cst_116 [0] : vector<256x128xf32> to vector<128xf32>
    %120 = vector.shape_cast %119 : vector<128xf32> to vector<1x128xf32>
    %121 = tpu.concatenate %117, %120 in 0 : vector<1x128xf32>, vector<1x128xf32> -> vector<2x128xf32>
    %c0_117 = arith.constant 0 : index
    %c0_118 = arith.constant 0 : index
    %c0_119 = arith.constant 0 : index
    %122 = vector.load %arg4[%c0_117, %c0_118, %c0_119] : memref<1x2x128xf32, #tpu.memory_space<vmem>>, vector<1x2x128xf32>
    %123 = vector.shape_cast %122 : vector<1x2x128xf32> to vector<2x128xf32>
    %124 = vector.shape_cast %121 : vector<2x128xf32> to vector<1x2x128xf32>
    tpu.vector_store %arg4[%c0_117, %c0_118, %c0_119], %124 {strides = array<i32>} : memref<1x2x128xf32, #tpu.memory_space<vmem>>, vector<1x2x128xf32>,
    return
  }
  func.func @transform_0(%arg0: i32) -> (i32, i32, i32, i32, i32) {
    %c0_i32 = arith.constant 0 : i32
    %c0_i32_0 = arith.constant 0 : i32
    %c0_i32_1 = arith.constant 0 : i32
    %c0_i32_2 = arith.constant 0 : i32
    %c0_i32_3 = arith.constant 0 : i32
    return %arg0, %c0_i32, %c0_i32_0, %c0_i32_1, %c0_i32_2 : i32, i32, i32, i32, i32
  }
  func.func @transform_1(%arg0: i32) -> (i32, i32, i32) {
    %c0_i32 = arith.constant 0 : i32
    %c0_i32_0 = arith.constant 0 : i32
    %c0_i32_1 = arith.constant 0 : i32
    %c0_i32_2 = arith.constant 0 : i32
    return %c0_i32, %c0_i32_0, %c0_i32_1 : i32, i32, i32
  }
  func.func @transform_2(%arg0: i32) -> (i32, i32, i32) {
    %c0_i32 = arith.constant 0 : i32
    %c0_i32_0 = arith.constant 0 : i32
    %c0_i32_1 = arith.constant 0 : i32
    return %arg0, %c0_i32, %c0_i32_0 : i32, i32, i32
  }
  func.func @transform_3(%arg0: i32) -> (i32, i32, i32) {
    %c0_i32 = arith.constant 0 : i32
    %c0_i32_0 = arith.constant 0 : i32
    %c0_i32_1 = arith.constant 0 : i32
    return %arg0, %c0_i32, %c0_i32_0 : i32, i32, i32
  }
}

module attributes {stable_mosaic.version = 11 : i64} {
  func.func @bn_add_relu_kernel(%arg0: i32, %arg1: memref<1x256x128xbf16, #tpu.memory_space<vmem>>, %arg2: memref<1x128xf32, #tpu.memory_space<vmem>>, %arg3: memref<1x128xf32, #tpu.memory_space<vmem>>, %arg4: memref<1x256x128xbf16, #tpu.memory_space<vmem>>, %arg5: memref<1x256x128xbf16, #tpu.memory_space<vmem>>) attributes {dimension_semantics = [#tpu.dimension_semantics<parallel>], iteration_bounds = array<i64: 2>, scalar_prefetch = 0 : i64, scratch_operands = 0 : i64, tpu.core_type = #tpu.core_type<tc>, window_params = [{transform_indices = @transform_0, window_bounds = array<i64: 1, 256, 128>}, {pipeline_mode = #tpu.pipeline_mode<synchronous>, transform_indices = @transform_1, window_bounds = array<i64: 1, 128>}, {pipeline_mode = #tpu.pipeline_mode<synchronous>, transform_indices = @transform_2, window_bounds = array<i64: 1, 128>}, {transform_indices = @transform_3, window_bounds = array<i64: 1, 256, 128>}, {transform_indices = @transform_4, window_bounds = array<i64: 1, 256, 128>}]} {
    %c0 = arith.constant 0 : index
    %c0_0 = arith.constant 0 : index
    %c0_1 = arith.constant 0 : index
    %0 = vector.load %arg1[%c0, %c0_0, %c0_1] : memref<1x256x128xbf16, #tpu.memory_space<vmem>>, vector<1x256x128xbf16>
    %1 = vector.shape_cast %0 : vector<1x256x128xbf16> to vector<256x128xbf16>
    %2 = arith.extf %1 : vector<256x128xbf16> to vector<256x128xf32>
    %c0_2 = arith.constant 0 : index
    %c0_3 = arith.constant 0 : index
    %3 = vector.load %arg2[%c0_2, %c0_3] : memref<1x128xf32, #tpu.memory_space<vmem>>, vector<1x128xf32>
    %4 = vector.broadcast %3 : vector<1x128xf32> to vector<256x128xf32>
    %5 = arith.mulf %2, %4 : vector<256x128xf32>
    %c0_4 = arith.constant 0 : index
    %c0_5 = arith.constant 0 : index
    %6 = vector.load %arg3[%c0_4, %c0_5] : memref<1x128xf32, #tpu.memory_space<vmem>>, vector<1x128xf32>
    %7 = vector.broadcast %6 : vector<1x128xf32> to vector<256x128xf32>
    %8 = arith.addf %5, %7 : vector<256x128xf32>
    %c0_6 = arith.constant 0 : index
    %c0_7 = arith.constant 0 : index
    %c0_8 = arith.constant 0 : index
    %9 = vector.load %arg4[%c0_6, %c0_7, %c0_8] : memref<1x256x128xbf16, #tpu.memory_space<vmem>>, vector<1x256x128xbf16>
    %10 = vector.shape_cast %9 : vector<1x256x128xbf16> to vector<256x128xbf16>
    %11 = arith.extf %10 : vector<256x128xbf16> to vector<256x128xf32>
    %12 = arith.addf %8, %11 : vector<256x128xf32>
    %cst = arith.constant 0.000000e+00 : f32
    %13 = vector.broadcast %cst : f32 to vector<256x128xf32>
    %14 = arith.maximumf %12, %13 : vector<256x128xf32>
    %15 = arith.truncf %14 : vector<256x128xf32> to vector<256x128xbf16>
    %c0_9 = arith.constant 0 : index
    %c0_10 = arith.constant 0 : index
    %c0_11 = arith.constant 0 : index
    %16 = vector.load %arg5[%c0_9, %c0_10, %c0_11] : memref<1x256x128xbf16, #tpu.memory_space<vmem>>, vector<1x256x128xbf16>
    %17 = vector.shape_cast %16 : vector<1x256x128xbf16> to vector<256x128xbf16>
    %18 = vector.shape_cast %15 : vector<256x128xbf16> to vector<1x256x128xbf16>
    tpu.vector_store %arg5[%c0_9, %c0_10, %c0_11], %18 {strides = array<i32>} : memref<1x256x128xbf16, #tpu.memory_space<vmem>>, vector<1x256x128xbf16>,
    return
  }
  func.func @transform_0(%arg0: i32) -> (i32, i32, i32) {
    %c0_i32 = arith.constant 0 : i32
    %c0_i32_0 = arith.constant 0 : i32
    %c0_i32_1 = arith.constant 0 : i32
    return %arg0, %c0_i32, %c0_i32_0 : i32, i32, i32
  }
  func.func @transform_1(%arg0: i32) -> (i32, i32) {
    %c0_i32 = arith.constant 0 : i32
    %c0_i32_0 = arith.constant 0 : i32
    %c0_i32_1 = arith.constant 0 : i32
    return %c0_i32, %c0_i32_0 : i32, i32
  }
  func.func @transform_2(%arg0: i32) -> (i32, i32) {
    %c0_i32 = arith.constant 0 : i32
    %c0_i32_0 = arith.constant 0 : i32
    %c0_i32_1 = arith.constant 0 : i32
    return %c0_i32, %c0_i32_0 : i32, i32
  }
  func.func @transform_3(%arg0: i32) -> (i32, i32, i32) {
    %c0_i32 = arith.constant 0 : i32
    %c0_i32_0 = arith.constant 0 : i32
    %c0_i32_1 = arith.constant 0 : i32
    return %arg0, %c0_i32, %c0_i32_0 : i32, i32, i32
  }
  func.func @transform_4(%arg0: i32) -> (i32, i32, i32) {
    %c0_i32 = arith.constant 0 : i32
    %c0_i32_0 = arith.constant 0 : i32
    %c0_i32_1 = arith.constant 0 : i32
    return %arg0, %c0_i32, %c0_i32_0 : i32, i32, i32
  }
}

module attributes {stable_mosaic.version = 11 : i64} {
  func.func @bn_relu_conv2_9tap_kernel(%arg0: i32, %arg1: memref<1x256x128xbf16, #tpu.memory_space<vmem>>, %arg2: memref<1x128xf32, #tpu.memory_space<vmem>>, %arg3: memref<1x128xf32, #tpu.memory_space<vmem>>, %arg4: memref<9x128x128xbf16, #tpu.memory_space<vmem>>, %arg5: memref<1x256x128xbf16, #tpu.memory_space<vmem>>, %arg6: memref<1x2x128xf32, #tpu.memory_space<vmem>>, %arg7: memref<256x128xf32, #tpu.memory_space<vmem>>) attributes {dimension_semantics = [#tpu.dimension_semantics<parallel>], iteration_bounds = array<i64: 2>, scalar_prefetch = 0 : i64, scratch_operands = 1 : i64, tpu.core_type = #tpu.core_type<tc>, window_params = [{transform_indices = @transform_0, window_bounds = array<i64: 1, 256, 128>}, {pipeline_mode = #tpu.pipeline_mode<synchronous>, transform_indices = @transform_1, window_bounds = array<i64: 1, 128>}, {pipeline_mode = #tpu.pipeline_mode<synchronous>, transform_indices = @transform_2, window_bounds = array<i64: 1, 128>}, {pipeline_mode = #tpu.pipeline_mode<synchronous>, transform_indices = @transform_3, window_bounds = array<i64: 9, 128, 128>}, {transform_indices = @transform_4, window_bounds = array<i64: 1, 256, 128>}, {transform_indices = @transform_5, window_bounds = array<i64: 1, 2, 128>}]} {
    %0 = tpu.iota {dimensions = array<i32: 0>} : vector<256x1xi32>
    %c16_i32 = arith.constant 16 : i32
    %c0_i32 = arith.constant 0 : i32
    %1 = arith.cmpi eq, %c16_i32, %c0_i32 : i32
    %c1_i32 = arith.constant 1 : i32
    %2 = arith.select %1, %c1_i32, %c16_i32 : i32
    %3 = vector.broadcast %2 : i32 to vector<256x1xi32>
    %4 = arith.remsi %0, %3 : vector<256x1xi32>
    %c0_i32_0 = arith.constant 0 : i32
    %5 = vector.broadcast %c0_i32_0 : i32 to vector<256x1xi32>
    %6 = arith.cmpi ne, %4, %5 : vector<256x1xi32>
    %c0_i32_1 = arith.constant 0 : i32
    %7 = vector.broadcast %c0_i32_1 : i32 to vector<256x1xi32>
    %8 = arith.cmpi slt, %4, %7 : vector<256x1xi32>
    %c0_i32_2 = arith.constant 0 : i32
    %9 = arith.cmpi slt, %2, %c0_i32_2 : i32
    %10 = vector.broadcast %9 : i1 to vector<256x1xi1>
    %11 = vector.broadcast %10 : vector<256x1xi1> to vector<256x1xi1>
    %12 = arith.xori %8, %11 : vector<256x1xi1>
    %13 = arith.andi %12, %6 : vector<256x1xi1>
    %14 = vector.broadcast %2 : i32 to vector<256x1xi32>
    %15 = arith.addi %4, %14 : vector<256x1xi32>
    %16 = arith.select %13, %15, %4 : vector<256x1xi1>, vector<256x1xi32>
    %c0 = arith.constant 0 : index
    %c0_3 = arith.constant 0 : index
    %c0_4 = arith.constant 0 : index
    %17 = vector.load %arg1[%c0, %c0_3, %c0_4] : memref<1x256x128xbf16, #tpu.memory_space<vmem>>, vector<1x256x128xbf16>
    %18 = vector.shape_cast %17 : vector<1x256x128xbf16> to vector<256x128xbf16>
    %19 = arith.extf %18 : vector<256x128xbf16> to vector<256x128xf32>
    %c0_5 = arith.constant 0 : index
    %c0_6 = arith.constant 0 : index
    %20 = vector.load %arg2[%c0_5, %c0_6] : memref<1x128xf32, #tpu.memory_space<vmem>>, vector<1x128xf32>
    %21 = vector.broadcast %20 : vector<1x128xf32> to vector<256x128xf32>
    %22 = arith.mulf %19, %21 : vector<256x128xf32>
    %c0_7 = arith.constant 0 : index
    %c0_8 = arith.constant 0 : index
    %23 = vector.load %arg3[%c0_7, %c0_8] : memref<1x128xf32, #tpu.memory_space<vmem>>, vector<1x128xf32>
    %24 = vector.broadcast %23 : vector<1x128xf32> to vector<256x128xf32>
    %25 = arith.addf %22, %24 : vector<256x128xf32>
    %cst = arith.constant 0.000000e+00 : f32
    %26 = vector.broadcast %cst : f32 to vector<256x128xf32>
    %27 = arith.maximumf %25, %26 : vector<256x128xf32>
    %c16_i32_9 = arith.constant 16 : i32
    %28 = vector.broadcast %c16_i32_9 : i32 to vector<256x1xi32>
    %29 = arith.cmpi slt, %16, %28 : vector<256x1xi32>
    %cst_10 = arith.constant 0.000000e+00 : f32
    %30 = vector.shape_cast %29 : vector<256x1xi1> to vector<256x1xi1>
    %31 = vector.broadcast %30 : vector<256x1xi1> to vector<256x128xi1>
    %32 = vector.broadcast %cst_10 : f32 to vector<256x128xf32>
    %33 = arith.select %31, %27, %32 : vector<256x128xi1>, vector<256x128xf32>
    %34 = arith.truncf %33 : vector<256x128xf32> to vector<256x128xbf16>
    %35 = vector.shape_cast %34 : vector<256x128xbf16> to vector<16x16x128xbf16>
    %cst_11 = arith.constant 0.000000e+00 : bf16
    %36 = vector.broadcast %cst_11 : bf16 to vector<16x1x128xbf16>
    %cst_12 = arith.constant 0.000000e+00 : bf16
    %37 = vector.broadcast %cst_12 : bf16 to vector<1x16x128xbf16>
    %38 = vector.extract_strided_slice %35 {offsets = [0, 0, 0], sizes = [16, 15, 128], strides = [1, 1, 1]} : vector<16x16x128xbf16> to vector<16x15x128xbf16>
    %39 = tpu.concatenate %36, %38 in 1 : vector<16x1x128xbf16>, vector<16x15x128xbf16> -> vector<16x16x128xbf16>
    %40 = vector.extract_strided_slice %35 {offsets = [0, 1, 0], sizes = [16, 15, 128], strides = [1, 1, 1]} : vector<16x16x128xbf16> to vector<16x15x128xbf16>
    %41 = tpu.concatenate %40, %36 in 1 : vector<16x15x128xbf16>, vector<16x1x128xbf16> -> vector<16x16x128xbf16>
    %42 = vector.extract_strided_slice %39 {offsets = [0, 0, 0], sizes = [15, 16, 128], strides = [1, 1, 1]} : vector<16x16x128xbf16> to vector<15x16x128xbf16>
    %43 = tpu.concatenate %37, %42 in 0 : vector<1x16x128xbf16>, vector<15x16x128xbf16> -> vector<16x16x128xbf16>
    %44 = vector.shape_cast %43 : vector<16x16x128xbf16> to vector<256x128xbf16>
    %c0_13 = arith.constant 0 : index
    %c0_14 = arith.constant 0 : index
    %c0_15 = arith.constant 0 : index
    %45 = vector.load %arg4[%c0_13, %c0_14, %c0_15] : memref<9x128x128xbf16, #tpu.memory_space<vmem>>, vector<1x128x128xbf16>
    %46 = vector.shape_cast %45 : vector<1x128x128xbf16> to vector<128x128xbf16>
    %cst_16 = arith.constant dense<0.000000e+00> : vector<256x128xf32>
    %47 = tpu.matmul %44, %46, %cst_16 {dimension_numbers = #tpu.dot_dimension_numbers<[1], [0], [0], [1], [0, 0, 1, 1], [], []>} : vector<256x128xbf16>, vector<128x128xbf16>, vector<256x128xf32> -> vector<256x128xf32>
    %c0_17 = arith.constant 0 : index
    %c0_18 = arith.constant 0 : index
    %48 = vector.load %arg7[%c0_17, %c0_18] : memref<256x128xf32, #tpu.memory_space<vmem>>, vector<256x128xf32>
    tpu.vector_store %arg7[%c0_17, %c0_18], %47 {strides = array<i32>} : memref<256x128xf32, #tpu.memory_space<vmem>>, vector<256x128xf32>,
    %49 = vector.extract_strided_slice %35 {offsets = [0, 0, 0], sizes = [15, 16, 128], strides = [1, 1, 1]} : vector<16x16x128xbf16> to vector<15x16x128xbf16>
    %50 = tpu.concatenate %37, %49 in 0 : vector<1x16x128xbf16>, vector<15x16x128xbf16> -> vector<16x16x128xbf16>
    %51 = vector.shape_cast %50 : vector<16x16x128xbf16> to vector<256x128xbf16>
    %c1 = arith.constant 1 : index
    %c0_19 = arith.constant 0 : index
    %c0_20 = arith.constant 0 : index
    %52 = vector.load %arg4[%c1, %c0_19, %c0_20] : memref<9x128x128xbf16, #tpu.memory_space<vmem>>, vector<1x128x128xbf16>
    %53 = vector.shape_cast %52 : vector<1x128x128xbf16> to vector<128x128xbf16>
    %cst_21 = arith.constant dense<0.000000e+00> : vector<256x128xf32>
    %54 = tpu.matmul %51, %53, %cst_21 {dimension_numbers = #tpu.dot_dimension_numbers<[1], [0], [0], [1], [0, 0, 1, 1], [], []>} : vector<256x128xbf16>, vector<128x128xbf16>, vector<256x128xf32> -> vector<256x128xf32>
    %c0_22 = arith.constant 0 : index
    %c0_23 = arith.constant 0 : index
    %55 = vector.load %arg7[%c0_22, %c0_23] : memref<256x128xf32, #tpu.memory_space<vmem>>, vector<256x128xf32>
    %56 = arith.addf %55, %54 : vector<256x128xf32>
    %c0_24 = arith.constant 0 : index
    %c0_25 = arith.constant 0 : index
    %57 = vector.load %arg7[%c0_24, %c0_25] : memref<256x128xf32, #tpu.memory_space<vmem>>, vector<256x128xf32>
    tpu.vector_store %arg7[%c0_24, %c0_25], %56 {strides = array<i32>} : memref<256x128xf32, #tpu.memory_space<vmem>>, vector<256x128xf32>,
    %58 = vector.extract_strided_slice %41 {offsets = [0, 0, 0], sizes = [15, 16, 128], strides = [1, 1, 1]} : vector<16x16x128xbf16> to vector<15x16x128xbf16>
    %59 = tpu.concatenate %37, %58 in 0 : vector<1x16x128xbf16>, vector<15x16x128xbf16> -> vector<16x16x128xbf16>
    %60 = vector.shape_cast %59 : vector<16x16x128xbf16> to vector<256x128xbf16>
    %c2 = arith.constant 2 : index
    %c0_26 = arith.constant 0 : index
    %c0_27 = arith.constant 0 : index
    %61 = vector.load %arg4[%c2, %c0_26, %c0_27] : memref<9x128x128xbf16, #tpu.memory_space<vmem>>, vector<1x128x128xbf16>
    %62 = vector.shape_cast %61 : vector<1x128x128xbf16> to vector<128x128xbf16>
    %cst_28 = arith.constant dense<0.000000e+00> : vector<256x128xf32>
    %63 = tpu.matmul %60, %62, %cst_28 {dimension_numbers = #tpu.dot_dimension_numbers<[1], [0], [0], [1], [0, 0, 1, 1], [], []>} : vector<256x128xbf16>, vector<128x128xbf16>, vector<256x128xf32> -> vector<256x128xf32>
    %c0_29 = arith.constant 0 : index
    %c0_30 = arith.constant 0 : index
    %64 = vector.load %arg7[%c0_29, %c0_30] : memref<256x128xf32, #tpu.memory_space<vmem>>, vector<256x128xf32>
    %65 = arith.addf %64, %63 : vector<256x128xf32>
    %c0_31 = arith.constant 0 : index
    %c0_32 = arith.constant 0 : index
    %66 = vector.load %arg7[%c0_31, %c0_32] : memref<256x128xf32, #tpu.memory_space<vmem>>, vector<256x128xf32>
    tpu.vector_store %arg7[%c0_31, %c0_32], %65 {strides = array<i32>} : memref<256x128xf32, #tpu.memory_space<vmem>>, vector<256x128xf32>,
    %67 = vector.shape_cast %39 : vector<16x16x128xbf16> to vector<256x128xbf16>
    %c3 = arith.constant 3 : index
    %c0_33 = arith.constant 0 : index
    %c0_34 = arith.constant 0 : index
    %68 = vector.load %arg4[%c3, %c0_33, %c0_34] : memref<9x128x128xbf16, #tpu.memory_space<vmem>>, vector<1x128x128xbf16>
    %69 = vector.shape_cast %68 : vector<1x128x128xbf16> to vector<128x128xbf16>
    %cst_35 = arith.constant dense<0.000000e+00> : vector<256x128xf32>
    %70 = tpu.matmul %67, %69, %cst_35 {dimension_numbers = #tpu.dot_dimension_numbers<[1], [0], [0], [1], [0, 0, 1, 1], [], []>} : vector<256x128xbf16>, vector<128x128xbf16>, vector<256x128xf32> -> vector<256x128xf32>
    %c0_36 = arith.constant 0 : index
    %c0_37 = arith.constant 0 : index
    %71 = vector.load %arg7[%c0_36, %c0_37] : memref<256x128xf32, #tpu.memory_space<vmem>>, vector<256x128xf32>
    %72 = arith.addf %71, %70 : vector<256x128xf32>
    %c0_38 = arith.constant 0 : index
    %c0_39 = arith.constant 0 : index
    %73 = vector.load %arg7[%c0_38, %c0_39] : memref<256x128xf32, #tpu.memory_space<vmem>>, vector<256x128xf32>
    tpu.vector_store %arg7[%c0_38, %c0_39], %72 {strides = array<i32>} : memref<256x128xf32, #tpu.memory_space<vmem>>, vector<256x128xf32>,
    %74 = vector.shape_cast %35 : vector<16x16x128xbf16> to vector<256x128xbf16>
    %c4 = arith.constant 4 : index
    %c0_40 = arith.constant 0 : index
    %c0_41 = arith.constant 0 : index
    %75 = vector.load %arg4[%c4, %c0_40, %c0_41] : memref<9x128x128xbf16, #tpu.memory_space<vmem>>, vector<1x128x128xbf16>
    %76 = vector.shape_cast %75 : vector<1x128x128xbf16> to vector<128x128xbf16>
    %cst_42 = arith.constant dense<0.000000e+00> : vector<256x128xf32>
    %77 = tpu.matmul %74, %76, %cst_42 {dimension_numbers = #tpu.dot_dimension_numbers<[1], [0], [0], [1], [0, 0, 1, 1], [], []>} : vector<256x128xbf16>, vector<128x128xbf16>, vector<256x128xf32> -> vector<256x128xf32>
    %c0_43 = arith.constant 0 : index
    %c0_44 = arith.constant 0 : index
    %78 = vector.load %arg7[%c0_43, %c0_44] : memref<256x128xf32, #tpu.memory_space<vmem>>, vector<256x128xf32>
    %79 = arith.addf %78, %77 : vector<256x128xf32>
    %c0_45 = arith.constant 0 : index
    %c0_46 = arith.constant 0 : index
    %80 = vector.load %arg7[%c0_45, %c0_46] : memref<256x128xf32, #tpu.memory_space<vmem>>, vector<256x128xf32>
    tpu.vector_store %arg7[%c0_45, %c0_46], %79 {strides = array<i32>} : memref<256x128xf32, #tpu.memory_space<vmem>>, vector<256x128xf32>,
    %81 = vector.shape_cast %41 : vector<16x16x128xbf16> to vector<256x128xbf16>
    %c5 = arith.constant 5 : index
    %c0_47 = arith.constant 0 : index
    %c0_48 = arith.constant 0 : index
    %82 = vector.load %arg4[%c5, %c0_47, %c0_48] : memref<9x128x128xbf16, #tpu.memory_space<vmem>>, vector<1x128x128xbf16>
    %83 = vector.shape_cast %82 : vector<1x128x128xbf16> to vector<128x128xbf16>
    %cst_49 = arith.constant dense<0.000000e+00> : vector<256x128xf32>
    %84 = tpu.matmul %81, %83, %cst_49 {dimension_numbers = #tpu.dot_dimension_numbers<[1], [0], [0], [1], [0, 0, 1, 1], [], []>} : vector<256x128xbf16>, vector<128x128xbf16>, vector<256x128xf32> -> vector<256x128xf32>
    %c0_50 = arith.constant 0 : index
    %c0_51 = arith.constant 0 : index
    %85 = vector.load %arg7[%c0_50, %c0_51] : memref<256x128xf32, #tpu.memory_space<vmem>>, vector<256x128xf32>
    %86 = arith.addf %85, %84 : vector<256x128xf32>
    %c0_52 = arith.constant 0 : index
    %c0_53 = arith.constant 0 : index
    %87 = vector.load %arg7[%c0_52, %c0_53] : memref<256x128xf32, #tpu.memory_space<vmem>>, vector<256x128xf32>
    tpu.vector_store %arg7[%c0_52, %c0_53], %86 {strides = array<i32>} : memref<256x128xf32, #tpu.memory_space<vmem>>, vector<256x128xf32>,
    %88 = vector.extract_strided_slice %39 {offsets = [1, 0, 0], sizes = [15, 16, 128], strides = [1, 1, 1]} : vector<16x16x128xbf16> to vector<15x16x128xbf16>
    %89 = tpu.concatenate %88, %37 in 0 : vector<15x16x128xbf16>, vector<1x16x128xbf16> -> vector<16x16x128xbf16>
    %90 = vector.shape_cast %89 : vector<16x16x128xbf16> to vector<256x128xbf16>
    %c6 = arith.constant 6 : index
    %c0_54 = arith.constant 0 : index
    %c0_55 = arith.constant 0 : index
    %91 = vector.load %arg4[%c6, %c0_54, %c0_55] : memref<9x128x128xbf16, #tpu.memory_space<vmem>>, vector<1x128x128xbf16>
    %92 = vector.shape_cast %91 : vector<1x128x128xbf16> to vector<128x128xbf16>
    %cst_56 = arith.constant dense<0.000000e+00> : vector<256x128xf32>
    %93 = tpu.matmul %90, %92, %cst_56 {dimension_numbers = #tpu.dot_dimension_numbers<[1], [0], [0], [1], [0, 0, 1, 1], [], []>} : vector<256x128xbf16>, vector<128x128xbf16>, vector<256x128xf32> -> vector<256x128xf32>
    %c0_57 = arith.constant 0 : index
    %c0_58 = arith.constant 0 : index
    %94 = vector.load %arg7[%c0_57, %c0_58] : memref<256x128xf32, #tpu.memory_space<vmem>>, vector<256x128xf32>
    %95 = arith.addf %94, %93 : vector<256x128xf32>
    %c0_59 = arith.constant 0 : index
    %c0_60 = arith.constant 0 : index
    %96 = vector.load %arg7[%c0_59, %c0_60] : memref<256x128xf32, #tpu.memory_space<vmem>>, vector<256x128xf32>
    tpu.vector_store %arg7[%c0_59, %c0_60], %95 {strides = array<i32>} : memref<256x128xf32, #tpu.memory_space<vmem>>, vector<256x128xf32>,
    %97 = vector.extract_strided_slice %35 {offsets = [1, 0, 0], sizes = [15, 16, 128], strides = [1, 1, 1]} : vector<16x16x128xbf16> to vector<15x16x128xbf16>
    %98 = tpu.concatenate %97, %37 in 0 : vector<15x16x128xbf16>, vector<1x16x128xbf16> -> vector<16x16x128xbf16>
    %99 = vector.shape_cast %98 : vector<16x16x128xbf16> to vector<256x128xbf16>
    %c7 = arith.constant 7 : index
    %c0_61 = arith.constant 0 : index
    %c0_62 = arith.constant 0 : index
    %100 = vector.load %arg4[%c7, %c0_61, %c0_62] : memref<9x128x128xbf16, #tpu.memory_space<vmem>>, vector<1x128x128xbf16>
    %101 = vector.shape_cast %100 : vector<1x128x128xbf16> to vector<128x128xbf16>
    %cst_63 = arith.constant dense<0.000000e+00> : vector<256x128xf32>
    %102 = tpu.matmul %99, %101, %cst_63 {dimension_numbers = #tpu.dot_dimension_numbers<[1], [0], [0], [1], [0, 0, 1, 1], [], []>} : vector<256x128xbf16>, vector<128x128xbf16>, vector<256x128xf32> -> vector<256x128xf32>
    %c0_64 = arith.constant 0 : index
    %c0_65 = arith.constant 0 : index
    %103 = vector.load %arg7[%c0_64, %c0_65] : memref<256x128xf32, #tpu.memory_space<vmem>>, vector<256x128xf32>
    %104 = arith.addf %103, %102 : vector<256x128xf32>
    %c0_66 = arith.constant 0 : index
    %c0_67 = arith.constant 0 : index
    %105 = vector.load %arg7[%c0_66, %c0_67] : memref<256x128xf32, #tpu.memory_space<vmem>>, vector<256x128xf32>
    tpu.vector_store %arg7[%c0_66, %c0_67], %104 {strides = array<i32>} : memref<256x128xf32, #tpu.memory_space<vmem>>, vector<256x128xf32>,
    %106 = vector.extract_strided_slice %41 {offsets = [1, 0, 0], sizes = [15, 16, 128], strides = [1, 1, 1]} : vector<16x16x128xbf16> to vector<15x16x128xbf16>
    %107 = tpu.concatenate %106, %37 in 0 : vector<15x16x128xbf16>, vector<1x16x128xbf16> -> vector<16x16x128xbf16>
    %108 = vector.shape_cast %107 : vector<16x16x128xbf16> to vector<256x128xbf16>
    %c8 = arith.constant 8 : index
    %c0_68 = arith.constant 0 : index
    %c0_69 = arith.constant 0 : index
    %109 = vector.load %arg4[%c8, %c0_68, %c0_69] : memref<9x128x128xbf16, #tpu.memory_space<vmem>>, vector<1x128x128xbf16>
    %110 = vector.shape_cast %109 : vector<1x128x128xbf16> to vector<128x128xbf16>
    %cst_70 = arith.constant dense<0.000000e+00> : vector<256x128xf32>
    %111 = tpu.matmul %108, %110, %cst_70 {dimension_numbers = #tpu.dot_dimension_numbers<[1], [0], [0], [1], [0, 0, 1, 1], [], []>} : vector<256x128xbf16>, vector<128x128xbf16>, vector<256x128xf32> -> vector<256x128xf32>
    %c0_71 = arith.constant 0 : index
    %c0_72 = arith.constant 0 : index
    %112 = vector.load %arg7[%c0_71, %c0_72] : memref<256x128xf32, #tpu.memory_space<vmem>>, vector<256x128xf32>
    %113 = arith.addf %112, %111 : vector<256x128xf32>
    %c0_73 = arith.constant 0 : index
    %c0_74 = arith.constant 0 : index
    %114 = vector.load %arg7[%c0_73, %c0_74] : memref<256x128xf32, #tpu.memory_space<vmem>>, vector<256x128xf32>
    tpu.vector_store %arg7[%c0_73, %c0_74], %113 {strides = array<i32>} : memref<256x128xf32, #tpu.memory_space<vmem>>, vector<256x128xf32>,
    %c16_i32_75 = arith.constant 16 : i32
    %115 = vector.broadcast %c16_i32_75 : i32 to vector<256x1xi32>
    %116 = arith.cmpi slt, %16, %115 : vector<256x1xi32>
    %c0_76 = arith.constant 0 : index
    %c0_77 = arith.constant 0 : index
    %117 = vector.load %arg7[%c0_76, %c0_77] : memref<256x128xf32, #tpu.memory_space<vmem>>, vector<256x128xf32>
    %cst_78 = arith.constant 0.000000e+00 : f32
    %118 = vector.shape_cast %116 : vector<256x1xi1> to vector<256x1xi1>
    %119 = vector.broadcast %118 : vector<256x1xi1> to vector<256x128xi1>
    %120 = vector.broadcast %cst_78 : f32 to vector<256x128xf32>
    %121 = arith.select %119, %117, %120 : vector<256x128xi1>, vector<256x128xf32>
    %122 = arith.truncf %121 : vector<256x128xf32> to vector<256x128xbf16>
    %c0_79 = arith.constant 0 : index
    %c0_80 = arith.constant 0 : index
    %c0_81 = arith.constant 0 : index
    %123 = vector.load %arg5[%c0_79, %c0_80, %c0_81] : memref<1x256x128xbf16, #tpu.memory_space<vmem>>, vector<1x256x128xbf16>
    %124 = vector.shape_cast %123 : vector<1x256x128xbf16> to vector<256x128xbf16>
    %125 = vector.shape_cast %122 : vector<256x128xbf16> to vector<1x256x128xbf16>
    tpu.vector_store %arg5[%c0_79, %c0_80, %c0_81], %125 {strides = array<i32>} : memref<1x256x128xbf16, #tpu.memory_space<vmem>>, vector<1x256x128xbf16>,
    %cst_82 = arith.constant dense<0.000000e+00> : vector<128xf32>
    %126 = vector.multi_reduction <add>, %121, %cst_82 [0] : vector<256x128xf32> to vector<128xf32>
    %127 = vector.shape_cast %126 : vector<128xf32> to vector<1x128xf32>
    %128 = arith.mulf %121, %121 : vector<256x128xf32>
    %cst_83 = arith.constant dense<0.000000e+00> : vector<128xf32>
    %129 = vector.multi_reduction <add>, %128, %cst_83 [0] : vector<256x128xf32> to vector<128xf32>
    %130 = vector.shape_cast %129 : vector<128xf32> to vector<1x128xf32>
    %131 = tpu.concatenate %127, %130 in 0 : vector<1x128xf32>, vector<1x128xf32> -> vector<2x128xf32>
    %c0_84 = arith.constant 0 : index
    %c0_85 = arith.constant 0 : index
    %c0_86 = arith.constant 0 : index
    %132 = vector.load %arg6[%c0_84, %c0_85, %c0_86] : memref<1x2x128xf32, #tpu.memory_space<vmem>>, vector<1x2x128xf32>
    %133 = vector.shape_cast %132 : vector<1x2x128xf32> to vector<2x128xf32>
    %134 = vector.shape_cast %131 : vector<2x128xf32> to vector<1x2x128xf32>
    tpu.vector_store %arg6[%c0_84, %c0_85, %c0_86], %134 {strides = array<i32>} : memref<1x2x128xf32, #tpu.memory_space<vmem>>, vector<1x2x128xf32>,
    return
  }
  func.func @transform_0(%arg0: i32) -> (i32, i32, i32) {
    %c0_i32 = arith.constant 0 : i32
    %c0_i32_0 = arith.constant 0 : i32
    %c0_i32_1 = arith.constant 0 : i32
    return %arg0, %c0_i32, %c0_i32_0 : i32, i32, i32
  }
  func.func @transform_1(%arg0: i32) -> (i32, i32) {
    %c0_i32 = arith.constant 0 : i32
    %c0_i32_0 = arith.constant 0 : i32
    %c0_i32_1 = arith.constant 0 : i32
    return %c0_i32, %c0_i32_0 : i32, i32
  }
  func.func @transform_2(%arg0: i32) -> (i32, i32) {
    %c0_i32 = arith.constant 0 : i32
    %c0_i32_0 = arith.constant 0 : i32
    %c0_i32_1 = arith.constant 0 : i32
    return %c0_i32, %c0_i32_0 : i32, i32
  }
  func.func @transform_3(%arg0: i32) -> (i32, i32, i32) {
    %c0_i32 = arith.constant 0 : i32
    %c0_i32_0 = arith.constant 0 : i32
    %c0_i32_1 = arith.constant 0 : i32
    %c0_i32_2 = arith.constant 0 : i32
    return %c0_i32, %c0_i32_0, %c0_i32_1 : i32, i32, i32
  }
  func.func @transform_4(%arg0: i32) -> (i32, i32, i32) {
    %c0_i32 = arith.constant 0 : i32
    %c0_i32_0 = arith.constant 0 : i32
    %c0_i32_1 = arith.constant 0 : i32
    return %arg0, %c0_i32, %c0_i32_0 : i32, i32, i32
  }
  func.func @transform_5(%arg0: i32) -> (i32, i32, i32) {
    %c0_i32 = arith.constant 0 : i32
    %c0_i32_0 = arith.constant 0 : i32
    %c0_i32_1 = arith.constant 0 : i32
    return %arg0, %c0_i32, %c0_i32_0 : i32, i32, i32
  }
}

</mosaic_0001>

<bundles_post_ra>
// kernel: residual_forward.5
= control target key start
LH: loop header
LB: loop body
LE: loop exit
PB: predicated region body
PF: predicated region fallthrough
CT: control target
= control target key end

     0   :  { %s1091_s15 = smov 0   ;;  %s1244_s0 = inlined_call_operand.vmem [shape: bf16[2,256,128], index: 0, kind: input, shape index: {}]   ;;  %s1245_s1 = inlined_call_operand.vmem [shape: f32[1,128], index: 1, kind: input, shape index: {}]   ;;  %s1246_s2 = inlined_call_operand.vmem [shape: f32[1,128], index: 2, kind: input, shape index: {}]   ;;  %s1247_s3 = inlined_call_operand.vmem [shape: bf16[2,256,128], index: 3, kind: input, shape index: {}]   ;;  %s1248_s4 = inlined_call_operand.vmem [shape: bf16[2,256,128], index: 4, kind: output, shape index: {}]  }
   0x1 LB: > { %s715_s16 = sadd.s32 4294967295, %s1064_s15   ;;  %p719_p0 = scmp.ge.s32.totalorder %s1064_s15, 1  ;;  %s1064_s15 = sphi %s1091_s15, %s14_s15  }
   0x2   : > { %p172_p1 = scmp.lt.s32.totalorder %s1064_s15, 3 }
   0x4   : > { %p173_p2 = pnand %p719_p0, %p172_p1 }
   0x5   : > { %p203_p3 = scmp.lt.s32.totalorder (!%p173_p2), %s715_s16, 1 }
   0x6   : > { %176 = sbr.rel (%p173_p2) target bundleno = 74 (0x4a), region = 36 }
   0xb   : > { %s1250_s16 = smov (!%p203_p3, %s715_s16), 1  ;;  %v1116_v0 = vld [vmem:[%s1245_s1] ss:$0 sm:$0xff] }
   0xc   : > { %s1099_s17 = sshll.u32 %s1250_s16, 7  ;;  %v1127_v11 = vld [vmem:[%s1246_s2] ss:$0 sm:$0xff] }
   0xd   : > { %s1105_s20 = scalar_lea.vmem %s1244_s0, %s1099_s17  ;;  %s1111_s23 = scalar_lea.vmem %s1247_s3, %s1099_s17 }
   0xe   : > { %v798_v1 = vld [vmem:[%s1105_s20] sm:$0xff]   ;;  %v1005_v3 = vld [vmem:[%s1105_s20 + $0x8] sm:$0xff]   ;;  %v1006_v9 = vld [vmem:[%s1105_s20 + $0x10] sm:$0xff]   ;;  %s1150_s30 = scalar_lea.vmem %s1248_s4, %s1099_s17 }
   0xf   : > { %v862_v2 = vld [vmem:[%s1111_s23] sm:$0xff]   ;;  %v799_v4 = vunpack.c.l.bf16 %v798_v1  ;;  %v800_v5 = vunpack.c.h.bf16 %v798_v1  ;;  %v1020_v8 = vld [vmem:[%s1111_s23 + $0x8] sm:$0xff]   ;;  %v1021_v10 = vld [vmem:[%s1111_s23 + $0x10] sm:$0xff]   ;;  %v803_v12 = vunpack.c.l.bf16 %v1005_v3  ;;  %v804_v13 = vunpack.c.h.bf16 %v1005_v3 }
  0x10   : > { %v863_v6 = vunpack.c.l.bf16 %v862_v2  ;;  %v864_v7 = vunpack.c.h.bf16 %v862_v2  ;;  %v867_v14 = vunpack.c.l.bf16 %v1020_v8  ;;  %v868_v15 = vunpack.c.h.bf16 %v1020_v8  ;;  %v1007_v20 = vld [vmem:[%s1105_s20 + $0x18] sm:$0xff]   ;;  %v1008_v46 = vld [vmem:[%s1105_s20 + $0x20] sm:$0xff]   ;;  %v1009_v56 = vld [vmem:[%s1105_s20 + $0x28] sm:$0xff]  }
  0x11   : > { %v289_v16 = vmul.f32 %v799_v4, %v1116_v0  ;;  %v290_v17 = vmul.f32 %v800_v5, %v1116_v0  ;;  %v807_v18 = vunpack.c.l.bf16 %v1006_v9  ;;  %v808_v19 = vunpack.c.h.bf16 %v1006_v9  ;;  %v1022_v41 = vld [vmem:[%s1111_s23 + $0x18] sm:$0xff]   ;;  %v1023_v51 = vld [vmem:[%s1111_s23 + $0x20] sm:$0xff]   ;;  %v1024_v61 = vld [vmem:[%s1111_s23 + $0x28] sm:$0xff]  }
  0x12   : > { %v291_v21 = vmul.f32 %v803_v12, %v1116_v0  ;;  %v292_v22 = vmul.f32 %v804_v13, %v1116_v0  ;;  %v871_v23 = vunpack.c.l.bf16 %v1021_v10  ;;  %v872_v24 = vunpack.c.h.bf16 %v1021_v10  ;;  %v1025_v8 = vld [vmem:[%s1111_s23 + $0x30] sm:$0xff]  }
  0x13   : > { %v328_v25 = vadd.f32 %v1127_v11, %v289_v16  ;;  %v329_v26 = vadd.f32 %v1127_v11, %v290_v17  ;;  %v293_v27 = vmul.f32 %v807_v18, %v1116_v0  ;;  %v294_v28 = vmul.f32 %v808_v19, %v1116_v0 }
  0x14   : > { %v330_v29 = vadd.f32 %v1127_v11, %v291_v21  ;;  %v331_v30 = vadd.f32 %v1127_v11, %v292_v22  ;;  %v811_v31 = vunpack.c.l.bf16 %v1007_v20  ;;  %v812_v32 = vunpack.c.h.bf16 %v1007_v20  ;;  %v1011_v22 = vld [vmem:[%s1105_s20 + $0x38] sm:$0xff]  }
  0x15   : > { %v424_v33 = vadd.f32 %v863_v6, %v328_v25  ;;  %v425_v34 = vadd.f32 %v864_v7, %v329_v26  ;;  %v332_v35 = vadd.f32 %v1127_v11, %v293_v27  ;;  %v333_v36 = vadd.f32 %v1127_v11, %v294_v28  ;;  %v1010_v7 = vld [vmem:[%s1105_s20 + $0x30] sm:$0xff]  }
  0x16   : > { %v426_v37 = vadd.f32 %v867_v14, %v330_v29  ;;  %v427_v38 = vadd.f32 %v868_v15, %v331_v30  ;;  %v295_v39 = vmul.f32 %v811_v31, %v1116_v0  ;;  %v296_v40 = vmul.f32 %v812_v32, %v1116_v0  ;;  %v1026_v31 = vld [vmem:[%s1111_s23 + $0x38] sm:$0xff]  }
  0x17   : > { %v456_v42 = vmax.f32 %v424_v33, 0.0  ;;  %v457_v43 = vmax.f32 %v425_v34, 0.0  ;;  %v428_v44 = vadd.f32 %v871_v23, %v332_v35  ;;  %v429_v45 = vadd.f32 %v872_v24, %v333_v36 }
  0x18   : > { %v458_v47 = vmax.f32 %v426_v37, 0.0  ;;  %v459_v48 = vmax.f32 %v427_v38, 0.0  ;;  %v334_v49 = vadd.f32 %v1127_v11, %v295_v39  ;;  %v335_v50 = vadd.f32 %v1127_v11, %v296_v40  ;;  %v1012_v40 = vld [vmem:[%s1105_s20 + $0x40] sm:$0xff]  }
  0x19   : > { %v928_v52 = vpack.c.bf16 %v457_v43, %v456_v42  ;;  %v460_v53 = vmax.f32 %v428_v44, 0.0  ;;  %v461_v54 = vmax.f32 %v429_v45, 0.0  ;;  %v875_v55 = vunpack.c.l.bf16 %v1022_v41 }
  0x1a   : > { %v933_v57 = vpack.c.bf16 %v459_v48, %v458_v47  ;;  %v876_v58 = vunpack.c.h.bf16 %v1022_v41  ;;  %v815_v59 = vunpack.c.l.bf16 %v1008_v46  ;;  %v816_v60 = vunpack.c.h.bf16 %v1008_v46 }
  0x1b   : > { %929 = vst [vmem:[%s1150_s30] sm:$0xff] %v928_v52   ;;  %v938_v62 = vpack.c.bf16 %v461_v54, %v460_v53  ;;  %v430_v63 = vadd.f32 %v875_v55, %v334_v49  ;;  %v879_v1 = vunpack.c.l.bf16 %v1023_v51  ;;  %v880_v2 = vunpack.c.h.bf16 %v1023_v51  ;;  %v1027_v49 = vld [vmem:[%s1111_s23 + $0x40] sm:$0xff]   ;;  %v1013_v54 = vld [vmem:[%s1105_s20 + $0x48] sm:$0xff]  }
  0x1c   : > { %1035 = vst [vmem:[%s1150_s30 + $0x8] sm:$0xff] %v933_v57   ;;  %v431_v3 = vadd.f32 %v876_v58, %v335_v50  ;;  %v297_v4 = vmul.f32 %v815_v59, %v1116_v0  ;;  %v298_v5 = vmul.f32 %v816_v60, %v1116_v0  ;;  %v819_v6 = vunpack.c.l.bf16 %v1009_v56 }
  0x1d   : > { %1036 = vst [vmem:[%s1150_s30 + $0x10] sm:$0xff] %v938_v62   ;;  %v462_v9 = vmax.f32 %v430_v63, 0.0  ;;  %v820_v10 = vunpack.c.h.bf16 %v1009_v56  ;;  %v883_v12 = vunpack.c.l.bf16 %v1024_v61  ;;  %v884_v13 = vunpack.c.h.bf16 %v1024_v61  ;;  %v1028_v63 = vld [vmem:[%s1111_s23 + $0x48] sm:$0xff]  }
  0x1e   : > { %v463_v14 = vmax.f32 %v431_v3, 0.0  ;;  %v336_v15 = vadd.f32 %v1127_v11, %v297_v4  ;;  %v337_v16 = vadd.f32 %v1127_v11, %v298_v5  ;;  %v299_v17 = vmul.f32 %v819_v6, %v1116_v0  ;;  %v1014_v5 = vld [vmem:[%s1105_s20 + $0x50] sm:$0xff]  }
  0x1f   : > { %v300_v18 = vmul.f32 %v820_v10, %v1116_v0  ;;  %v823_v19 = vunpack.c.l.bf16 %v1010_v7  ;;  %v824_v20 = vunpack.c.h.bf16 %v1010_v7  ;;  %v887_v21 = vunpack.c.l.bf16 %v1025_v8  ;;  %v1029_v10 = vld [vmem:[%s1111_s23 + $0x50] sm:$0xff]  }
  0x20   : > { %v943_v23 = vpack.c.bf16 %v463_v14, %v462_v9  ;;  %v432_v24 = vadd.f32 %v879_v1, %v336_v15  ;;  %v433_v25 = vadd.f32 %v880_v2, %v337_v16  ;;  %v338_v26 = vadd.f32 %v1127_v11, %v299_v17 }
  0x21   : > { %v339_v27 = vadd.f32 %v1127_v11, %v300_v18  ;;  %v301_v28 = vmul.f32 %v823_v19, %v1116_v0  ;;  %v302_v29 = vmul.f32 %v824_v20, %v1116_v0  ;;  %v888_v30 = vunpack.c.h.bf16 %v1025_v8  ;;  %v1015_v20 = vld [vmem:[%s1105_s20 + $0x58] sm:$0xff]  }
  0x22   : > { %1037 = vst [vmem:[%s1150_s30 + $0x18] sm:$0xff] %v943_v23   ;;  %v464_v32 = vmax.f32 %v432_v24, 0.0  ;;  %v465_v33 = vmax.f32 %v433_v25, 0.0  ;;  %v434_v34 = vadd.f32 %v883_v12, %v338_v26  ;;  %v827_v35 = vunpack.c.l.bf16 %v1011_v22 }
  0x23   : > { %v435_v36 = vadd.f32 %v884_v13, %v339_v27  ;;  %v340_v37 = vadd.f32 %v1127_v11, %v301_v28  ;;  %v341_v38 = vadd.f32 %v1127_v11, %v302_v29  ;;  %v828_v39 = vunpack.c.h.bf16 %v1011_v22  ;;  %v1030_v29 = vld [vmem:[%s1111_s23 + $0x58] sm:$0xff]  }
  0x24   : > { %v948_v41 = vpack.c.bf16 %v465_v33, %v464_v32  ;;  %v466_v42 = vmax.f32 %v434_v34, 0.0  ;;  %v303_v43 = vmul.f32 %v827_v35, %v1116_v0  ;;  %v891_v44 = vunpack.c.l.bf16 %v1026_v31 }
  0x25   : > { %v467_v45 = vmax.f32 %v435_v36, 0.0  ;;  %v436_v46 = vadd.f32 %v887_v21, %v340_v37  ;;  %v437_v47 = vadd.f32 %v888_v30, %v341_v38  ;;  %v304_v48 = vmul.f32 %v828_v39, %v1116_v0  ;;  %v1016_v38 = vld [vmem:[%s1105_s20 + $0x60] sm:$0xff]  }
  0x26   : > { %1038 = vst [vmem:[%s1150_s30 + $0x20] sm:$0xff] %v948_v41   ;;  %v342_v50 = vadd.f32 %v1127_v11, %v303_v43  ;;  %v892_v51 = vunpack.c.h.bf16 %v1026_v31  ;;  %v831_v52 = vunpack.c.l.bf16 %v1012_v40  ;;  %v832_v53 = vunpack.c.h.bf16 %v1012_v40  ;;  %v1031_v43 = vld [vmem:[%s1111_s23 + $0x60] sm:$0xff]  }
  0x27   : > { %v953_v55 = vpack.c.bf16 %v467_v45, %v466_v42  ;;  %v468_v56 = vmax.f32 %v436_v46, 0.0  ;;  %v469_v57 = vmax.f32 %v437_v47, 0.0  ;;  %v343_v58 = vadd.f32 %v1127_v11, %v304_v48 }
  0x28   : > { %v438_v59 = vadd.f32 %v891_v44, %v342_v50  ;;  %v305_v60 = vmul.f32 %v831_v52, %v1116_v0  ;;  %v306_v61 = vmul.f32 %v832_v53, %v1116_v0  ;;  %v895_v62 = vunpack.c.l.bf16 %v1027_v49  ;;  %v1017_v52 = vld [vmem:[%s1105_s20 + $0x68] sm:$0xff]  }
  0x29   : > { %1039 = vst [vmem:[%s1150_s30 + $0x28] sm:$0xff] %v953_v55   ;;  %v958_v1 = vpack.c.bf16 %v469_v57, %v468_v56  ;;  %v439_v2 = vadd.f32 %v892_v51, %v343_v58  ;;  %v896_v3 = vunpack.c.h.bf16 %v1027_v49  ;;  %v835_v4 = vunpack.c.l.bf16 %v1013_v54 }
  0x2a   : > { %v470_v6 = vmax.f32 %v438_v59, 0.0  ;;  %v344_v7 = vadd.f32 %v1127_v11, %v305_v60  ;;  %v345_v8 = vadd.f32 %v1127_v11, %v306_v61  ;;  %v836_v9 = vunpack.c.h.bf16 %v1013_v54  ;;  %v1032_v61 = vld [vmem:[%s1111_s23 + $0x68] sm:$0xff]  }
  0x2b   : > { %1040 = vst [vmem:[%s1150_s30 + $0x30] sm:$0xff] %v958_v1   ;;  %v471_v12 = vmax.f32 %v439_v2, 0.0  ;;  %v307_v13 = vmul.f32 %v835_v4, %v1116_v0  ;;  %v899_v14 = vunpack.c.l.bf16 %v1028_v63  ;;  %v900_v15 = vunpack.c.h.bf16 %v1028_v63 }
  0x2c   : > { %v440_v16 = vadd.f32 %v895_v62, %v344_v7  ;;  %v441_v17 = vadd.f32 %v896_v3, %v345_v8  ;;  %v308_v18 = vmul.f32 %v836_v9, %v1116_v0  ;;  %v839_v19 = vunpack.c.l.bf16 %v1014_v5  ;;  %v1018_v3 = vld [vmem:[%s1105_s20 + $0x70] sm:$0xff]  }
  0x2d   : > { %v963_v21 = vpack.c.bf16 %v471_v12, %v470_v6  ;;  %v346_v22 = vadd.f32 %v1127_v11, %v307_v13  ;;  %v840_v23 = vunpack.c.h.bf16 %v1014_v5  ;;  %v903_v24 = vunpack.c.l.bf16 %v1029_v10  ;;  %v1033_v13 = vld [vmem:[%s1111_s23 + $0x70] sm:$0xff]  }
  0x2e   : > { %v472_v25 = vmax.f32 %v440_v16, 0.0  ;;  %v473_v26 = vmax.f32 %v441_v17, 0.0  ;;  %v347_v27 = vadd.f32 %v1127_v11, %v308_v18  ;;  %v309_v28 = vmul.f32 %v839_v19, %v1116_v0 }
  0x2f   : > { %1041 = vst [vmem:[%s1150_s30 + $0x38] sm:$0xff] %v963_v21   ;;  %v442_v30 = vadd.f32 %v899_v14, %v346_v22  ;;  %v310_v31 = vmul.f32 %v840_v23, %v1116_v0  ;;  %v904_v32 = vunpack.c.h.bf16 %v1029_v10  ;;  %v843_v33 = vunpack.c.l.bf16 %v1015_v20  ;;  %v1019_v22 = vld [vmem:[%s1105_s20 + $0x78] sm:$0xff]  }
  0x30   : > { %v968_v34 = vpack.c.bf16 %v473_v26, %v472_v25  ;;  %v443_v35 = vadd.f32 %v900_v15, %v347_v27  ;;  %v348_v36 = vadd.f32 %v1127_v11, %v309_v28  ;;  %v844_v37 = vunpack.c.h.bf16 %v1015_v20  ;;  %v1034_v27 = vld [vmem:[%s1111_s23 + $0x78] sm:$0xff]  }
  0x31   : > { %v474_v39 = vmax.f32 %v442_v30, 0.0  ;;  %v349_v40 = vadd.f32 %v1127_v11, %v310_v31  ;;  %v311_v41 = vmul.f32 %v843_v33, %v1116_v0  ;;  %v907_v42 = vunpack.c.l.bf16 %v1030_v29 }
  0x32   : > { %1042 = vst [vmem:[%s1150_s30 + $0x40] sm:$0xff] %v968_v34   ;;  %v475_v44 = vmax.f32 %v443_v35, 0.0  ;;  %v444_v45 = vadd.f32 %v903_v24, %v348_v36  ;;  %v312_v46 = vmul.f32 %v844_v37, %v1116_v0  ;;  %v908_v47 = vunpack.c.h.bf16 %v1030_v29 }
  0x33   : > { %v445_v48 = vadd.f32 %v904_v32, %v349_v40  ;;  %v350_v49 = vadd.f32 %v1127_v11, %v311_v41  ;;  %v847_v50 = vunpack.c.l.bf16 %v1016_v38  ;;  %v848_v51 = vunpack.c.h.bf16 %v1016_v38 }
  0x34   : > { %v973_v53 = vpack.c.bf16 %v475_v44, %v474_v39  ;;  %v476_v54 = vmax.f32 %v444_v45, 0.0  ;;  %v351_v55 = vadd.f32 %v1127_v11, %v312_v46  ;;  %v911_v56 = vunpack.c.l.bf16 %v1031_v43 }
  0x35   : > { %v477_v57 = vmax.f32 %v445_v48, 0.0  ;;  %v446_v58 = vadd.f32 %v907_v42, %v350_v49  ;;  %v313_v59 = vmul.f32 %v847_v50, %v1116_v0  ;;  %v314_v60 = vmul.f32 %v848_v51, %v1116_v0 }
  0x36   : > { %1043 = vst [vmem:[%s1150_s30 + $0x48] sm:$0xff] %v973_v53   ;;  %v447_v62 = vadd.f32 %v908_v47, %v351_v55  ;;  %v912_v63 = vunpack.c.h.bf16 %v1031_v43  ;;  %v851_v1 = vunpack.c.l.bf16 %v1017_v52  ;;  %v852_v2 = vunpack.c.h.bf16 %v1017_v52 }
  0x37   : > { %v978_v4 = vpack.c.bf16 %v477_v57, %v476_v54  ;;  %v478_v5 = vmax.f32 %v446_v58, 0.0  ;;  %v352_v6 = vadd.f32 %v1127_v11, %v313_v59  ;;  %v353_v7 = vadd.f32 %v1127_v11, %v314_v60 }
  0x38   : > { %v479_v8 = vmax.f32 %v447_v62, 0.0  ;;  %v315_v9 = vmul.f32 %v851_v1, %v1116_v0  ;;  %v316_v10 = vmul.f32 %v852_v2, %v1116_v0  ;;  %v915_v12 = vunpack.c.l.bf16 %v1032_v61 }
  0x39   : > { %1044 = vst [vmem:[%s1150_s30 + $0x50] sm:$0xff] %v978_v4   ;;  %v448_v14 = vadd.f32 %v911_v56, %v352_v6  ;;  %v449_v15 = vadd.f32 %v912_v63, %v353_v7  ;;  %v916_v16 = vunpack.c.h.bf16 %v1032_v61  ;;  %v855_v17 = vunpack.c.l.bf16 %v1018_v3 }
  0x3a   : > { %v983_v18 = vpack.c.bf16 %v479_v8, %v478_v5  ;;  %v354_v19 = vadd.f32 %v1127_v11, %v315_v9  ;;  %v355_v20 = vadd.f32 %v1127_v11, %v316_v10  ;;  %v856_v21 = vunpack.c.h.bf16 %v1018_v3 }
  0x3b   : > { %v480_v23 = vmax.f32 %v448_v14, 0.0  ;;  %v481_v24 = vmax.f32 %v449_v15, 0.0  ;;  %v317_v25 = vmul.f32 %v855_v17, %v1116_v0  ;;  %v919_v26 = vunpack.c.l.bf16 %v1033_v13 }
  0x3c   : > { %1045 = vst [vmem:[%s1150_s30 + $0x58] sm:$0xff] %v983_v18   ;;  %v450_v28 = vadd.f32 %v915_v12, %v354_v19  ;;  %v451_v29 = vadd.f32 %v916_v16, %v355_v20  ;;  %v318_v30 = vmul.f32 %v856_v21, %v1116_v0  ;;  %v920_v31 = vunpack.c.h.bf16 %v1033_v13 }
  0x3d   : > { %v988_v32 = vpack.c.bf16 %v481_v24, %v480_v23  ;;  %v356_v33 = vadd.f32 %v1127_v11, %v317_v25  ;;  %v859_v34 = vunpack.c.l.bf16 %v1019_v22  ;;  %v860_v35 = vunpack.c.h.bf16 %v1019_v22 }
  0x3e   : > { %v482_v36 = vmax.f32 %v450_v28, 0.0  ;;  %v483_v37 = vmax.f32 %v451_v29, 0.0  ;;  %v357_v38 = vadd.f32 %v1127_v11, %v318_v30  ;;  %v923_v39 = vunpack.c.l.bf16 %v1034_v27 }
  0x3f   : > { %1046 = vst [vmem:[%s1150_s30 + $0x60] sm:$0xff] %v988_v32   ;;  %v452_v40 = vadd.f32 %v919_v26, %v356_v33  ;;  %v319_v41 = vmul.f32 %v859_v34, %v1116_v0  ;;  %v320_v42 = vmul.f32 %v860_v35, %v1116_v0  ;;  %v924_v43 = vunpack.c.h.bf16 %v1034_v27 }
  0x40   : > { %v993_v44 = vpack.c.bf16 %v483_v37, %v482_v36  ;;  %v453_v45 = vadd.f32 %v920_v31, %v357_v38 }
  0x41   : > { %v484_v46 = vmax.f32 %v452_v40, 0.0  ;;  %v358_v47 = vadd.f32 %v1127_v11, %v319_v41  ;;  %v359_v48 = vadd.f32 %v1127_v11, %v320_v42 }
  0x42   : > { %1047 = vst [vmem:[%s1150_s30 + $0x68] sm:$0xff] %v993_v44   ;;  %v485_v49 = vmax.f32 %v453_v45, 0.0 }
  0x43   : > { %v454_v50 = vadd.f32 %v923_v39, %v358_v47  ;;  %v455_v51 = vadd.f32 %v924_v43, %v359_v48 }
  0x44   : > { %v998_v52 = vpack.c.bf16 %v485_v49, %v484_v46 }
  0x45   : > { %v486_v53 = vmax.f32 %v454_v50, 0.0  ;;  %v487_v54 = vmax.f32 %v455_v51, 0.0 }
  0x46   : > { %1048 = vst [vmem:[%s1150_s30 + $0x70] sm:$0xff] %v998_v52  }
  0x47   : > { %v1003_v55 = vpack.c.bf16 %v487_v54, %v486_v53 }
  0x49   : > { %1049 = vst [vmem:[%s1150_s30 + $0x78] sm:$0xff] %v1003_v55  }
  0x4a PF: > { %s14_s15 = sadd.s32 1, %s1064_s15  }
  0x4b   : > { %p11_p4 = scmp.ge.s32.totalorder %s14_s15, 4  }
  0x4d   :  { %13 = sbr.rel (!%p11_p4) target bundleno = 1 (0x1), region = 69 }

// kernel: residual_forward.4
= control target key start
LH: loop header
LB: loop body
LE: loop exit
PB: predicated region body
PF: predicated region fallthrough
CT: control target
= control target key end

     0   :  { %s5676_s18 = smov 0   ;;  %s6985_s0 = inlined_call_operand.vmem [shape: bf16[2,256,128], index: 0, kind: input, shape index: {}]   ;;  %s6986_s1 = inlined_call_operand.vmem [shape: f32[1,128], index: 1, kind: input, shape index: {}]   ;;  %s6987_s2 = inlined_call_operand.vmem [shape: f32[1,128], index: 2, kind: input, shape index: {}]   ;;  %s6988_s3 = inlined_call_operand.vmem [shape: bf16[9,128,128], index: 3, kind: input, shape index: {}]   ;;  %s6989_s4 = inlined_call_operand.vmem [shape: bf16[2,256,128], index: 4, kind: output, shape index: {0}]   ;;  %s6990_s5 = inlined_call_operand.vmem [shape: f32[2,2,128], index: 5, kind: output, shape index: {1}]  }
   0x1 LB: > { %s4438_s19 = sadd.s32 4294967295, %s5643_s18   ;;  %p4442_p0 = scmp.ge.s32.totalorder %s5643_s18, 1  ;;  %s5643_s18 = sphi %s5676_s18, %s16_s18  }
   0x2   : > { %p190_p1 = scmp.lt.s32.totalorder %s5643_s18, 3 }
   0x4   : > { %p191_p2 = pnand %p4442_p0, %p190_p1 }
   0x6   : > { %194 = sbr.rel (%p191_p2) target bundleno = 561 (0x231), region = 36 }
   0xb   : > { %v5565_v0 = vld [vmem:[%s6988_s3 + $0x38] sm:$0xff]   ;;  %v5566_v1 = vld [vmem:[%s6988_s3 + $0x30] sm:$0xff]   ;;  %v7000_v2 = vmov 0   ;;  %p222_p3 = scmp.lt.s32.totalorder %s4438_s19, 1  ;;  %v5567_v3 = vld [vmem:[%s6988_s3 + $0x28] sm:$0xff]   ;;  %vm1100_vm0 = vcmask 1040384  }
   0xc   : > { %5124 = vmatprep.mubr.bf16.mxu0 %v7000_v2  ;;  %5108 = vmatprep.subr.bf16.mxu0 %v5565_v0  ;;  %v5568_v4 = vld [vmem:[%s6988_s3 + $0x20] sm:$0xff]   ;;  %v5569_v18 = vld [vmem:[%s6988_s3 + $0x18] sm:$0xff]   ;;  %vm1101_vm1 = vsmask.f32 256  ;;  %v5570_v35 = vld [vmem:[%s6988_s3 + $0x10] sm:$0xff]   ;;  %vm1167_vm4 = vcmask 1047552  }
   0xd   : > { %5540 = vmatprep.subr.bf16.mxu1 %v5565_v0  ;;  %5109 = vmatpush3.bf16.msra.mxu0 %v5565_v0  ;;  %s7094_s19 = smov (!%p222_p3, %s4438_s19), 1  ;;  %v5711_v6 = vld [vmem:[%s6986_s1] ss:$0 sm:$0xff]  ;;  %v5571_v52 = vld [vmem:[%s6988_s3 + $0x8] sm:$0xff]   ;;  %vm5769_vm2 = vmand %vm1100_vm0, %vm1101_vm1  ;;  %vm1168_vm3 = vsmask.f32 7424 }
   0xe   : > { %5548 = vmatpush3.bf16.msra.mxu1 %v5565_v0  ;;  %5110 = vmatprep.subr.bf16.mxu0 %v5566_v1  ;;  %s4684_s26 = sshll.u32 %s7094_s19, 7  ;;  %v5718_v11 = vld [vmem:[%s6987_s2] ss:$0 sm:$0xff]  ;;  %vm6101_vm5 = vmand %vm1167_vm4, %vm1168_vm3  ;;  %v5623_v62 = vld [vmem:[%s6988_s3 + $0x1f0] sm:$0xff]  }
   0xf   : > { %5541 = vmatprep.subr.bf16.mxu1 %v5566_v1  ;;  %s5702_s29 = scalar_lea.vmem %s6985_s0, %s4684_s26  ;;  %s6895_s20 = scalar_lea.vmem %s6989_s4, %s4684_s26 }
  0x10   : > { %v4868_v5 = vld [vmem:[%s5702_s29 + $0x38] sm:$0xff]   ;;  %v4719_v9 = vld [vmem:[%s5702_s29] sm:$0xff]   ;;  %v4862_v28 = vld [vmem:[%s5702_s29 + $0x8] sm:$0xff]   ;;  %s4447_s26 = sshll.u32 %s7094_s19, 1 }
  0x11   : > { %5111 = vmatpush3.bf16.msra.mxu0 %v5566_v1  ;;  %v4748_v7 = vunpack.c.l.bf16 %v4868_v5  ;;  %v4749_v8 = vunpack.c.h.bf16 %v4868_v5  ;;  %v4869_v10 = vld [vmem:[%s5702_s29 + $0x40] sm:$0xff]   ;;  %v4720_v12 = vunpack.c.l.bf16 %v4719_v9  ;;  %v4721_v13 = vunpack.c.h.bf16 %v4719_v9  ;;  %v4870_v29 = vld [vmem:[%s5702_s29 + $0x48] sm:$0xff]   ;;  %v5738_v34 = vld [vmem:[%s5702_s29 + $0x10] sm:$0xff]   ;;  %s235_s23 = scalar_lea.vmem %s6990_s5, %s4447_s26 }
  0x12   : > { %5549 = vmatpush3.bf16.msra.mxu1 %v5566_v1  ;;  %5112 = vmatprep.subr.bf16.mxu0 %v5567_v3  ;;  %v4752_v14 = vunpack.c.l.bf16 %v4869_v10  ;;  %v4753_v15 = vunpack.c.h.bf16 %v4869_v10  ;;  %v4724_v33 = vunpack.c.l.bf16 %v4862_v28  ;;  %v4725_v39 = vunpack.c.h.bf16 %v4862_v28  ;;  %v4871_v57 = vld [vmem:[%s5702_s29 + $0x50] sm:$0xff]   ;;  %v5574_v28 = vld [vmem:[%s6988_s3 + $0xb8] sm:$0xff]  }
  0x13   : > { %5542 = vmatprep.subr.bf16.mxu1 %v5567_v3  ;;  %v739_v16 = vmul.f32 %v4748_v7, %v5711_v6  ;;  %v740_v17 = vmul.f32 %v4749_v8, %v5711_v6  ;;  %v725_v19 = vmul.f32 %v4720_v12, %v5711_v6  ;;  %v726_v20 = vmul.f32 %v4721_v13, %v5711_v6 }
  0x14   : > { %v741_v21 = vmul.f32 %v4752_v14, %v5711_v6  ;;  %v742_v24 = vmul.f32 %v4753_v15, %v5711_v6  ;;  %v727_v42 = vmul.f32 %v4724_v33, %v5711_v6  ;;  %v4756_v43 = vunpack.c.l.bf16 %v4870_v29  ;;  %v4864_v14 = vld [vmem:[%s5702_s29 + $0x18] sm:$0xff]  }
  0x15   : > { %5113 = vmatpush3.bf16.msra.mxu0 %v5567_v3  ;;  %v778_v22 = vadd.f32 %v5718_v11, %v739_v16  ;;  %v779_v23 = vadd.f32 %v5718_v11, %v740_v17  ;;  %v764_v25 = vadd.f32 %v5718_v11, %v725_v19  ;;  %v765_v26 = vadd.f32 %v5718_v11, %v726_v20 }
  0x16   : > { %5550 = vmatpush3.bf16.msra.mxu1 %v5567_v3  ;;  %5114 = vmatprep.subr.bf16.mxu0 %v5568_v4  ;;  %v780_v27 = vadd.f32 %v5718_v11, %v741_v21  ;;  %v781_v32 = vadd.f32 %v5718_v11, %v742_v24  ;;  %v728_v45 = vmul.f32 %v4725_v39, %v5711_v6  ;;  %v4757_v46 = vunpack.c.h.bf16 %v4870_v29  ;;  %v5572_v3 = vld [vmem:[%s6988_s3] sm:$0xff]   ;;  %v5573_v24 = vld [vmem:[%s6988_s3 + $0x78] sm:$0xff]  }
  0x17   : > { %5543 = vmatprep.subr.bf16.mxu1 %v5568_v4  ;;  %v810_v30 = vmax.f32 %v778_v22, 0.0  ;;  %v811_v31 = vmax.f32 %v779_v23, 0.0  ;;  %v796_v36 = vmax.f32 %v764_v25, 0.0  ;;  %v797_v37 = vmax.f32 %v765_v26, 0.0 }
  0x18   : > { %v812_v38 = vmax.f32 %v780_v27, 0.0  ;;  %v813_v41 = vmax.f32 %v781_v32, 0.0  ;;  %v4728_v47 = vunpack.c.l.bf16 %v5738_v34  ;;  %v766_v51 = vadd.f32 %v5718_v11, %v727_v42 }
  0x19   : > { %5115 = vmatpush3.bf16.msra.mxu0 %v5568_v4  ;;  %v5743_v40 = vpack.c.bf16 %v811_v31, %v810_v30  ;;  %v5746_v44 = vpack.c.bf16 %v797_v37, %v796_v36  ;;  %v767_v55 = vadd.f32 %v5718_v11, %v728_v45  ;;  %v743_v56 = vmul.f32 %v4756_v43, %v5711_v6  ;;  %v4872_v37 = vld [vmem:[%s5702_s29 + $0x58] sm:$0xff]  }
  0x1a   : > { %5551 = vmatpush3.bf16.msra.mxu1 %v5568_v4  ;;  %5116 = vmatprep.subr.bf16.mxu0 %v5569_v18  ;;  %v5752_v50 = vpack.c.bf16 %v813_v41, %v812_v38  ;;  %v798_v61 = vmax.f32 %v766_v51, 0.0  ;;  %v744_v1 = vmul.f32 %v4757_v46, %v5711_v6  ;;  %v4729_v8 = vunpack.c.h.bf16 %v5738_v34  ;;  %v5575_v38 = vld [vmem:[%s6988_s3 + $0x70] sm:$0xff]  }
  0x1b   : > { %5544 = vmatprep.subr.bf16.mxu1 %v5569_v18  ;;  %v1022_v48 = vshrl.u32 %v5743_v40, 16  ;;  %v1025_v49 = vshll.u32 %v5743_v40, 16  ;;  %v973_v53 = vshrl.u32 %v5746_v44, 16  ;;  %v976_v54 = vshll.u32 %v5746_v44, 16 }
  0x1c   : > { %v1029_v59 = vshrl.u32 %v5752_v50, 16  ;;  %v1032_v60 = vshll.u32 %v5752_v50, 16  ;;  %v799_v0 = vmax.f32 %v767_v55, 0.0  ;;  %v782_v7 = vadd.f32 %v5718_v11, %v743_v56  ;;  %v5576_v55 = vld [vmem:[%s6988_s3 + $0xb0] sm:$0xff]  }
  0x1d   : > { %5117 = vmatpush3.bf16.msra.mxu0 %v5569_v18  ;;  %v1024_v58 = vrot.slane %v1022_v48, 7  ;;  %v975_v63 = vrot.slane %v973_v53, 7  ;;  %v783_v12 = vadd.f32 %v5718_v11, %v744_v1  ;;  %v4760_v13 = vunpack.c.l.bf16 %v4871_v57 }
  0x1e   : > { %5552 = vmatpush3.bf16.msra.mxu1 %v5569_v18  ;;  %5118 = vmatprep.subr.bf16.mxu0 %v5570_v35  ;;  %v1031_v5 = vrot.slane %v1029_v59, 7  ;;  %v5787_v10 = vpack.c.bf16 %v799_v0, %v798_v61  ;;  %v814_v17 = vmax.f32 %v782_v7, 0.0  ;;  %v729_v18 = vmul.f32 %v4728_v47, %v5711_v6  ;;  %v5578_v7 = vld [vmem:[%s6988_s3 + $0xa8] sm:$0xff]  }
  0x1f   : > { %5545 = vmatprep.subr.bf16.mxu1 %v5570_v35  ;;  %v1027_v4 = vor.u32 %v1025_v49, %v1024_v58  ;;  %v978_v9 = vor.u32 %v976_v54, %v975_v63  ;;  %v815_v22 = vmax.f32 %v783_v12, 0.0  ;;  %v730_v25 = vmul.f32 %v4729_v8, %v5711_v6 }
  0x20   : > { %v1034_v16 = vor.u32 %v1032_v60, %v1031_v5  ;;  %v980_v20 = vshrl.u32 %v5787_v10, 16  ;;  %v983_v21 = vshll.u32 %v5787_v10, 16  ;;  %v768_v26 = vadd.f32 %v5718_v11, %v729_v18  ;;  %v5577_v5 = vld [vmem:[%s6988_s3 + $0x68] sm:$0xff]   ;;  %v4873_v18 = vld [vmem:[%s5702_s29 + $0x60] sm:$0xff]  }
  0x21   : > { %5119 = vmatpush3.bf16.msra.mxu0 %v5570_v35  ;;  %v5793_v15 = vsel %vm5769_vm2, 0, %v1027_v4  ;;  %v5801_v19 = vsel %vm5769_vm2, 0, %v978_v9  ;;  %v4761_v27 = vunpack.c.h.bf16 %v4871_v57  ;;  %v5819_v30 = vpack.c.bf16 %v815_v22, %v814_v17 }
  0x22   : > { %5553 = vmatpush3.bf16.msra.mxu1 %v5570_v35  ;;  %5120 = vmatprep.subr.bf16.mxu0 %v5571_v52  ;;  %v5807_v23 = vsel %vm5769_vm2, 0, %v1034_v16  ;;  %v982_v29 = vrot.slane %v980_v20, 7  ;;  %v745_v31 = vmul.f32 %v4760_v13, %v5711_v6  ;;  %v4732_v32 = vunpack.c.l.bf16 %v4864_v14 }
  0x23   : > { %5546 = vmatprep.subr.bf16.mxu1 %v5571_v52  ;;  %5140 = vmatprep.mubr.bf16.mxu1 %v5793_v15  ;;  %v769_v33 = vadd.f32 %v5718_v11, %v730_v25  ;;  %v800_v34 = vmax.f32 %v768_v26, 0.0  ;;  %v746_v35 = vmul.f32 %v4761_v27, %v5711_v6  ;;  %v4733_v36 = vunpack.c.h.bf16 %v4864_v14 }
  0x24   : > { %v985_v39 = vor.u32 %v983_v21, %v982_v29  ;;  %v1036_v41 = vshrl.u32 %v5819_v30, 16  ;;  %v1039_v42 = vshll.u32 %v5819_v30, 16  ;;  %v784_v43 = vadd.f32 %v5718_v11, %v745_v31 }
  0x25   : > { %5121 = vmatpush3.bf16.msra.mxu0 %v5571_v52  ;;  %v801_v45 = vmax.f32 %v769_v33, 0.0  ;;  %v785_v46 = vadd.f32 %v5718_v11, %v746_v35  ;;  %v731_v47 = vmul.f32 %v4732_v32, %v5711_v6  ;;  %v732_v51 = vmul.f32 %v4733_v36, %v5711_v6 }
  0x26   : > { %5554 = vmatpush3.bf16.msra.mxu1 %v5571_v52  ;;  %5122 = vmatprep.subr.bf16.mxu0 %v5572_v3  ;;  %v4865_v52 = vld [vmem:[%s5702_s29 + $0x20] sm:$0xff]   ;;  %v5842_v56 = vsel %vm5769_vm2, 0, %v985_v39  ;;  %v1038_v57 = vrot.slane %v1036_v41, 7  ;;  %v816_v58 = vmax.f32 %v784_v43, 0.0  ;;  %v4764_v61 = vunpack.c.l.bf16 %v4872_v37 }
  0x27   : > { %5547 = vmatprep.subr.bf16.mxu1 %v5572_v3  ;;  %v5846_v63 = vpack.c.bf16 %v801_v45, %v800_v34  ;;  %v817_v0 = vmax.f32 %v785_v46, 0.0  ;;  %v770_v1 = vadd.f32 %v5718_v11, %v731_v47  ;;  %v4765_v8 = vunpack.c.h.bf16 %v4872_v37  ;;  %v5579_v39 = vld [vmem:[%s6988_s3 + $0x60] sm:$0xff]  }
  0x28   : > { %v1041_v4 = vor.u32 %v1039_v42, %v1038_v57  ;;  %v747_v9 = vmul.f32 %v4764_v61, %v5711_v6  ;;  %v4736_v12 = vunpack.c.l.bf16 %v4865_v52  ;;  %v4737_v31 = vunpack.c.h.bf16 %v4865_v52  ;;  %v4866_v52 = vld [vmem:[%s5702_s29 + $0x28] sm:$0xff]  }
  0x29   : > { %5123 = vmatpush3.bf16.msra.mxu0 %v5572_v3  ;;  %v6994_v13 = vshrl.u32 %v5846_v63, 16  ;;  %v990_v14 = vshll.u32 %v5846_v63, 16  ;;  %v5863_v16 = vpack.c.bf16 %v817_v0, %v816_v58  ;;  %v802_v17 = vmax.f32 %v770_v1, 0.0  ;;  %v5580_v58 = vld [vmem:[%s6988_s3 + $0xa0] sm:$0xff]  }
  0x2a   : > { %5555 = vmatpush3.bf16.msra.mxu1 %v5572_v3  ;;  %5204 = vmatprep.subr.bf16.mxu0 %v5574_v28  ;;  %v771_v3 = vadd.f32 %v5718_v11, %v732_v51  ;;  %v5868_v22 = vsel %vm5769_vm2, 0, %v1041_v4  ;;  %v748_v26 = vmul.f32 %v4765_v8, %v5711_v6  ;;  %v733_v35 = vmul.f32 %v4736_v12, %v5711_v6 }
  0x2b   : > { %5156 = vmatprep.subr.bf16.mxu1 %v5573_v24  ;;  %v989_v27 = vrot.slane %v6994_v13, 7  ;;  %v1046_v29 = vshll.u32 %v5863_v16, 16  ;;  %v734_v43 = vmul.f32 %v4737_v31, %v5711_v6  ;;  %v4768_v45 = vunpack.c.l.bf16 %v4873_v18 }
  0x2c   : > { %5125 = vmatmul.mubr.bf16.vlgmr.msra.gmra.mxu0 %v5801_v19  ;;  %v803_v25 = vmax.f32 %v771_v3, 0.0  ;;  %v787_v33 = vadd.f32 %v5718_v11, %v748_v26  ;;  %v772_v51 = vadd.f32 %v5718_v11, %v733_v35  ;;  %v4769_v0 = vunpack.c.h.bf16 %v4873_v18  ;;  %v5581_v18 = vld [vmem:[%s6988_s3 + $0x58] sm:$0xff]   ;;  %v4874_v26 = vld [vmem:[%s5702_s29 + $0x68] sm:$0xff]  }
  0x2d   : > { %5141 = vmatmul.mubr.bf16.vlgmr.msra.gmra.mxu1 %v5807_v23  ;;  %5205 = vmatpush3.bf16.msra.mxu0 %v5574_v28  ;;  %v1043_v28 = vshrl.u32 %v5863_v16, 16  ;;  %v992_v36 = vor.u32 %v990_v14, %v989_v27  ;;  %v773_v61 = vadd.f32 %v5718_v11, %v734_v43  ;;  %v749_v8 = vmul.f32 %v4768_v45, %v5711_v6 }
  0x2e   : > { %5157 = vmatpush3.bf16.msra.mxu1 %v5573_v24  ;;  %5206 = vmatprep.subr.bf16.mxu0 %v5576_v55  ;;  %v786_v24 = vadd.f32 %v5718_v11, %v747_v9  ;;  %v5878_v32 = vpack.c.bf16 %v803_v25, %v802_v17  ;;  %v819_v47 = vmax.f32 %v787_v33, 0.0  ;;  %v804_v4 = vmax.f32 %v772_v51, 0.0  ;;  %v4867_v51 = vld [vmem:[%s5702_s29 + $0x30] sm:$0xff]  }
  0x2f   : > { %5158 = vmatprep.subr.bf16.mxu1 %v5575_v38  ;;  %5128 = vmatprep.mubr.bf16.mxu0 %v5842_v56  ;;  %v1045_v37 = vrot.slane %v1043_v28, 7  ;;  %v805_v12 = vmax.f32 %v773_v61, 0.0  ;;  %v750_v17 = vmul.f32 %v4769_v0, %v5711_v6  ;;  %v4740_v25 = vunpack.c.l.bf16 %v4866_v52 }
  0x30   : > { %5144 = vmatprep.mubr.bf16.mxu1 %v5868_v22  ;;  %v818_v34 = vmax.f32 %v786_v24, 0.0  ;;  %v6993_v46 = vshrl.u32 %v5878_v32, 16  ;;  %v4741_v35 = vunpack.c.h.bf16 %v4866_v52  ;;  %v5583_v52 = vld [vmem:[%s6988_s3 + $0x50] sm:$0xff]  }
  0x31   : > { %5207 = vmatpush3.bf16.msra.mxu0 %v5576_v55  ;;  %v5896_v55 = vsel %vm5769_vm2, 0, %v992_v36  ;;  %v1048_v57 = vor.u32 %v1046_v29, %v1045_v37  ;;  %v5925_v31 = vpack.c.bf16 %v805_v12, %v804_v4  ;;  %v789_v33 = vadd.f32 %v5718_v11, %v750_v17 }
  0x32   : > { %5159 = vmatpush3.bf16.msra.mxu1 %v5575_v38  ;;  %5208 = vmatprep.subr.bf16.mxu0 %v5578_v7  ;;  %v6995_v38 = vshll.u32 %v5878_v32, 16  ;;  %v996_v1 = vrot.slane %v6993_v46, 7  ;;  %v5907_v3 = vpack.c.bf16 %v819_v47, %v818_v34  ;;  %v5582_v34 = vld [vmem:[%s6988_s3 + $0x98] sm:$0xff]   ;;  %v735_v36 = vmul.f32 %v4740_v25, %v5711_v6  ;;  %v5584_v25 = vld [vmem:[%s6988_s3 + $0x90] sm:$0xff]  }
  0x33   : > { %5160 = vmatprep.subr.bf16.mxu1 %v5577_v5  ;;  %v5912_v9 = vsel %vm5769_vm2, 0, %v1048_v57  ;;  %v4772_v47 = vunpack.c.l.bf16 %v4874_v26  ;;  %v6991_v57 = vshrl.u32 %v5925_v31, 16  ;;  %v6992_v61 = vshll.u32 %v5925_v31, 16 }
  0x34   : > { %5129 = vmatmul.mubr.bf16.gmra.mxu0 %v5896_v55  ;;  %v999_v24 = vor.u32 %v6995_v38, %v996_v1  ;;  %v1050_v27 = vshrl.u32 %v5907_v3, 16  ;;  %v821_v0 = vmax.f32 %v789_v33, 0.0  ;;  %v736_v1 = vmul.f32 %v4741_v35, %v5711_v6 }
  0x35   : > { %5209 = vmatpush3.bf16.msra.mxu0 %v5578_v7  ;;  %5145 = vmatmul.mubr.bf16.gmra.mxu1 %v5912_v9  ;;  %v788_v7 = vadd.f32 %v5718_v11, %v749_v8  ;;  %v751_v8 = vmul.f32 %v4772_v47, %v5711_v6  ;;  %v1003_v12 = vrot.slane %v6991_v57, 7 }
  0x36   : > { %5161 = vmatpush3.bf16.msra.mxu1 %v5577_v5  ;;  %v1053_v5 = vshll.u32 %v5907_v3, 16  ;;  %5210 = vmatprep.subr.bf16.mxu0 %v5580_v58  ;;  %v5934_v37 = vsel %vm5769_vm2, 0, %v999_v24  ;;  %v1052_v43 = vrot.slane %v1050_v27, 7  ;;  %v775_v24 = vadd.f32 %v5718_v11, %v736_v1 }
  0x37   : > { %5162 = vmatprep.subr.bf16.mxu1 %v5579_v39  ;;  %v820_v45 = vmax.f32 %v788_v7, 0.0  ;;  %5132 = vmatprep.mubr.bf16.mxu0 %v5934_v37  ;;  %v4744_v7 = vunpack.c.l.bf16 %v4867_v51 }
  0x38   : > { %v1055_v4 = vor.u32 %v1053_v5, %v1052_v43  ;;  %v4875_v43 = vld [vmem:[%s5702_s29 + $0x70] sm:$0xff]   ;;  %v807_v1 = vmax.f32 %v775_v24, 0.0 }
  0x39   : > { %5211 = vmatpush3.bf16.msra.mxu0 %v5580_v58  ;;  %v4773_v58 = vunpack.c.h.bf16 %v4874_v26  ;;  %v5952_v17 = vpack.c.bf16 %v821_v0, %v820_v45  ;;  %v1006_v45 = vor.u32 %v6992_v61, %v1003_v12  ;;  %v737_v57 = vmul.f32 %v4744_v7, %v5711_v6  ;;  %v5586_v12 = vld [vmem:[%s6988_s3 + $0x88] sm:$0xff]  }
  0x3a   : > { %5163 = vmatpush3.bf16.msra.mxu1 %v5579_v39  ;;  %v774_v39 = vadd.f32 %v5718_v11, %v735_v36  ;;  %5212 = vmatprep.subr.bf16.mxu0 %v5582_v34  ;;  %v5960_v33 = vsel %vm5769_vm2, 0, %v1055_v4  ;;  %v790_v36 = vadd.f32 %v5718_v11, %v751_v8  ;;  %v5585_v4 = vld [vmem:[%s6988_s3 + $0x48] sm:$0xff]   ;;  %v4745_v8 = vunpack.c.h.bf16 %v4867_v51 }
  0x3b   : > { %5164 = vmatprep.subr.bf16.mxu1 %v5581_v18  ;;  %v752_v35 = vmul.f32 %v4773_v58, %v5711_v6  ;;  %5148 = vmatprep.mubr.bf16.mxu1 %v5960_v33  ;;  %v6997_v47 = vshrl.u32 %v5952_v17, 16  ;;  %v1060_v0 = vshll.u32 %v5952_v17, 16  ;;  %v4776_v61 = vunpack.c.l.bf16 %v4875_v43 }
  0x3c   : > { %v806_v26 = vmax.f32 %v774_v39, 0.0  ;;  %v822_v58 = vmax.f32 %v790_v36, 0.0  ;;  %v738_v7 = vmul.f32 %v4745_v8, %v5711_v6  ;;  %v4777_v36 = vunpack.c.h.bf16 %v4875_v43  ;;  %v5588_v43 = vld [vmem:[%s6988_s3 + $0x80] sm:$0xff]  }
  0x3d   : > { %5213 = vmatpush3.bf16.msra.mxu0 %v5582_v34  ;;  %v791_v39 = vadd.f32 %v5718_v11, %v752_v35  ;;  %v1059_v24 = vrot.slane %v6997_v47, 7  ;;  %v776_v35 = vadd.f32 %v5718_v11, %v737_v57  ;;  %v5587_v57 = vld [vmem:[%s6988_s3 + $0x40] sm:$0xff]   ;;  %v6024_v47 = vld [vmem:[%s6988_s3 + $0xf8] sm:$0xff]  }
  0x3e   : > { %5165 = vmatpush3.bf16.msra.mxu1 %v5581_v18  ;;  %v5980_v18 = vsel %vm5769_vm2, 0, %v1006_v45  ;;  %5214 = vmatprep.subr.bf16.mxu0 %v5584_v25  ;;  %v5984_v34 = vpack.c.bf16 %v807_v1, %v806_v26  ;;  %v753_v26 = vmul.f32 %v4776_v61, %v5711_v6  ;;  %v754_v8 = vmul.f32 %v4777_v36, %v5711_v6 }
  0x3f   : > { %5166 = vmatprep.subr.bf16.mxu1 %v5583_v52  ;;  %5133 = vmatmul.mubr.bf16.gmra.mxu0 %v5980_v18  ;;  %v823_v51 = vmax.f32 %v791_v39, 0.0  ;;  %v1062_v46 = vor.u32 %v1060_v0, %v1059_v24  ;;  %v777_v39 = vadd.f32 %v5718_v11, %v738_v7  ;;  %v808_v38 = vmax.f32 %v776_v35, 0.0 }
  0x40   : > { %v6996_v45 = vshrl.u32 %v5984_v34, 16  ;;  %v1011_v13 = vshll.u32 %v5984_v34, 16 }
  0x41   : > { %5215 = vmatpush3.bf16.msra.mxu0 %v5584_v25  ;;  %v5994_v1 = vpack.c.bf16 %v823_v51, %v822_v58  ;;  %v792_v25 = vadd.f32 %v5718_v11, %v753_v26  ;;  %v809_v51 = vmax.f32 %v777_v39, 0.0 }
  0x42   : > { %5167 = vmatpush3.bf16.msra.mxu1 %v5583_v52  ;;  %v6003_v52 = vsel %vm5769_vm2, 0, %v1062_v46  ;;  %v1010_v61 = vrot.slane %v6996_v45, 7  ;;  %5216 = vmatprep.subr.bf16.mxu0 %v5586_v12  ;;  %v793_v46 = vadd.f32 %v5718_v11, %v754_v8 }
  0x43   : > { %5168 = vmatprep.subr.bf16.mxu1 %v5585_v4  ;;  %5149 = vmatmul.mubr.bf16.gmra.mxu1 %v6003_v52  ;;  %v6998_v58 = vshrl.u32 %v5994_v1, 16  ;;  %v1067_v24 = vshll.u32 %v5994_v1, 16  ;;  %v824_v35 = vmax.f32 %v792_v25, 0.0  ;;  %v6019_v26 = vpack.c.bf16 %v809_v51, %v808_v38 }
  0x44   : > { %v1013_v7 = vor.u32 %v1011_v13, %v1010_v61  ;;  %v825_v45 = vmax.f32 %v793_v46, 0.0 }
  0x45   : > { %v1066_v36 = vrot.slane %v6998_v58, 7  ;;  %5217 = vmatpush3.bf16.msra.mxu0 %v5586_v12  ;;  %v1015_v12 = vshrl.u32 %v6019_v26, 16  ;;  %v1018_v8 = vshll.u32 %v6019_v26, 16  ;;  %v1137_v58 = vrot.slane %v1039_v42, 1 }
  0x46   : > { %5169 = vmatpush3.bf16.msra.mxu1 %v5585_v4  ;;  %v6028_v39 = vsel %vm5769_vm2, 0, %v1013_v7  ;;  %5218 = vmatprep.subr.bf16.mxu0 %v5588_v43  ;;  %v5590_v4 = vld [vmem:[%s6988_s3 + $0x138] sm:$0xff]   ;;  %v6038_v61 = vpack.c.bf16 %v825_v45, %v824_v35  ;;  %v1119_v45 = vrot.slane %v976_v54, 1  ;;  %v1139_v54 = vrot.slane %v1046_v29, 1 }
  0x47   : > { %5170 = vmatprep.subr.bf16.mxu1 %v5587_v57  ;;  %5136 = vmatprep.mubr.bf16.mxu0 %v6028_v39  ;;  %v1069_v38 = vor.u32 %v1067_v24, %v1066_v36  ;;  %v1017_v51 = vrot.slane %v1015_v12, 7  ;;  %v1133_v36 = vrot.slane %v1025_v49, 1  ;;  %v4876_v29 = vld [vmem:[%s5702_s29 + $0x78] sm:$0xff]  }
  0x48   : > { %v6999_v46 = vshrl.u32 %v6038_v61, 16  ;;  %v1074_v7 = vshll.u32 %v6038_v61, 16  ;;  %v6087_v42 = vor.u32 %v1139_v54, %v1043_v28 }
  0x49   : > { %v6042_v25 = vsel %vm5769_vm2, 0, %v1069_v38  ;;  %5219 = vmatpush3.bf16.msra.mxu0 %v5588_v43  ;;  %v1121_v43 = vrot.slane %v983_v21, 1  ;;  %v1135_v38 = vrot.slane %v1032_v60, 1  ;;  %v6074_v49 = vor.u32 %v1133_v36, %v1022_v48 }
  0x4a   : > { %5171 = vmatpush3.bf16.msra.mxu1 %v5587_v57  ;;  %5152 = vmatprep.mubr.bf16.mxu1 %v6042_v25  ;;  %v1020_v57 = vor.u32 %v1018_v8, %v1017_v51  ;;  %v1073_v35 = vrot.slane %v6999_v46, 7  ;;  %v6083_v21 = vor.u32 %v1137_v58, %v1036_v41  ;;  %v1120_v48 = vor.u32 %v1119_v45, %v973_v53 }
  0x4b   : > { %5252 = vmatprep.subr.bf16.mxu1 %v6024_v47  ;;  %5300 = vmatprep.subr.bf16.mxu0 %v5590_v4  ;;  %v6079_v60 = vor.u32 %v1135_v38, %v1029_v59  ;;  %v1141_v59 = vrot.slane %v1053_v5, 1  ;;  %v1122_v28 = vor.u32 %v1121_v43, %v980_v20  ;;  %v1143_v58 = vrot.slane %v1060_v0, 1  ;;  %v5592_v0 = vld [vmem:[%s6988_s3 + $0x130] sm:$0xff]  }
  0x4c   : > { %v6068_v51 = vsel %vm5769_vm2, 0, %v1020_v57  ;;  %v1076_v46 = vor.u32 %v1074_v7, %v1073_v35  ;;  %v1123_v53 = vrot.slane %v990_v14, 1  ;;  %v7007_v45 = vshrl.u32 %v5952_v17, 16 }
  0x4d   : > { %5137 = vmatmul.mubr.bf16.gmra.mxu0 %v6068_v51  ;;  %v6114_v5 = vor.u32 %v1141_v59, %v1050_v27  ;;  %v4781_v36 = vunpack.c.h.bf16 %v4876_v29  ;;  %v6122_v20 = vsel %vm6101_vm5, %v1120_v48, 0  ;;  %v6130_v27 = vsel %vm6101_vm5, %v1122_v28, 0  ;;  %v5591_v48 = vld [vmem:[%s6988_s3 + $0xf0] sm:$0xff]  }
  0x4e   : > { %v6092_v57 = vsel %vm5769_vm2, 0, %v1076_v46  ;;  %5220 = vmatprep.mubr.bf16.mxu0 %v7000_v2  ;;  %v4780_v46 = vunpack.c.l.bf16 %v4876_v29  ;;  %v6118_v35 = vor.u32 %v1143_v58, %v7007_v45  ;;  %v7008_v43 = vshll.u32 %v5878_v32, 16  ;;  %v5593_v45 = vld [vmem:[%s6988_s3 + $0xe8] sm:$0xff]  }
  0x4f   : > { %5153 = vmatmul.mubr.bf16.gmra.mxu1 %v6092_v57  ;;  %v756_v54 = vmul.f32 %v4781_v36, %v5711_v6  ;;  %v7009_v29 = vshrl.u32 %v5846_v63, 16  ;;  %v5594_v36 = vld [vmem:[%s6988_s3 + $0x128] sm:$0xff]  }
  0x50   : > { %5172 = vmatprep.mubr.bf16.mxu1 %v7000_v2  ;;  %v755_v14 = vmul.f32 %v4780_v46, %v5711_v6  ;;  %v1125_v38 = vrot.slane %v7008_v43, 1  ;;  %v7010_v6 = vshrl.u32 %v5878_v32, 16 }
  0x51   : > { %v1124_v59 = vor.u32 %v1123_v53, %v7009_v29  ;;  %v795_v46 = vadd.f32 %v5718_v11, %v756_v54  ;;  %v1129_v29 = vrot.slane %v1011_v13, 1  ;;  %v5598_v13 = vld [vmem:[%s6988_s3 + $0x118] sm:$0xff]  }
  0x52   : > { %v794_v58 = vadd.f32 %v5718_v11, %v755_v14  ;;  %v1126_v53 = vor.u32 %v1125_v38, %v7010_v6  ;;  %v5596_v38 = vld [vmem:[%s6988_s3 + $0x120] sm:$0xff]  }
  0x53   : > { %v827_v14 = vmax.f32 %v795_v46, 0.0  ;;  %v6157_v11 = vsel %vm6101_vm5, %v1124_v59, 0  ;;  %v5595_v59 = vld [vmem:[%s6988_s3 + $0xe0] sm:$0xff]   ;;  %v7014_v46 = vshrl.u32 %v5984_v34, 16 }
  0x54   : > { %v826_v28 = vmax.f32 %v794_v58, 0.0 }
  0x55   : > { %5221 = vmatmul.mubr.bf16.vlgmr.msra.gmra.mxu0 %v6122_v20 }
  0x56   : > { %5301 = vmatpush3.bf16.msra.mxu0 %v5590_v4  ;;  %5224 = vmatprep.mubr.bf16.mxu0 %v6130_v27  ;;  %v7011_v4 = vshll.u32 %v5925_v31, 16  ;;  %v6164_v54 = vpack.c.bf16 %v827_v14, %v826_v28  ;;  %v1130_v28 = vor.u32 %v1129_v29, %v7014_v46  ;;  %v5599_v14 = vld [vmem:[%s6988_s3 + $0xd0] sm:$0xff]   ;;  %v5604_v29 = vld [vmem:[%s6988_s3 + $0x100] sm:$0xff]   ;;  %v6250_v46 = vsel %vm6101_vm5, %v6083_v21, 0 }
  0x57   : > { %5173 = vmatmul.mubr.bf16.vlgmr.msra.gmra.mxu1 %v5746_v44  ;;  %5302 = vmatprep.subr.bf16.mxu0 %v5592_v0  ;;  %v6264_v21 = vsel %vm6101_vm5, %v6114_v5, 0  ;;  %v1147_v5 = vrot.slane %v1074_v7, 1  ;;  %v5608_v7 = vld [vmem:[%s6988_s3 + $0x1b0] sm:$0xff]  }
  0x58   : > { %5253 = vmatpush3.bf16.msra.mxu1 %v6024_v47  ;;  %5176 = vmatprep.mubr.bf16.mxu1 %v5787_v10  ;;  %v1127_v43 = vrot.slane %v7011_v4, 1  ;;  %7012 = vst [vmem:[#allocation3_spill] sm:$0xff] %v6164_v54  ;;  %v6168_v47 = vsel %vm6101_vm5, %v1126_v53, 0  ;;  %v1131_v53 = vrot.slane %v1018_v8, 1  ;;  %v5602_v4 = vld [vmem:[%s6988_s3 + $0x108] sm:$0xff]  }
  0x59   : > { %5254 = vmatprep.subr.bf16.mxu1 %v5591_v48 }
  0x5a   : > { %5303 = vmatpush3.bf16.msra.mxu0 %v5592_v0  ;;  %v7013_v0 = vshrl.u32 %v5925_v31, 16  ;;  %v1132_v8 = vor.u32 %v1131_v53, %v1015_v12  ;;  %v6224_v12 = vsel %vm6101_vm5, %v6074_v49, 0  ;;  %v5606_v49 = vld [vmem:[%s6988_s3 + $0x1b8] sm:$0xff]   ;;  %v7016_v53 = vshrl.u32 %v6038_v61, 16 }
  0x5b   : > { %5304 = vmatprep.subr.bf16.mxu0 %v5594_v36 }
  0x5c   : > { %5255 = vmatpush3.bf16.msra.mxu1 %v5591_v48  ;;  %v1128_v58 = vor.u32 %v1127_v43, %v7013_v0  ;;  %v5597_v48 = vld [vmem:[%s6988_s3 + $0xd8] sm:$0xff]   ;;  %v5601_v43 = vld [vmem:[%s6988_s3 + $0xc8] sm:$0xff]  }
  0x5d   : > { %5225 = vmatmul.mubr.bf16.gmra.mxu0 %v6157_v11  ;;  %5256 = vmatprep.subr.bf16.mxu1 %v5593_v45  ;;  %v5605_v0 = vld [vmem:[%s6988_s3 + $0x178] sm:$0xff]  }
  0x5e   : > { %5228 = vmatprep.mubr.bf16.mxu0 %v6168_v47  ;;  %5305 = vmatpush3.bf16.msra.mxu0 %v5594_v36  ;;  %v6191_v6 = vsel %vm6101_vm5, %v1128_v58, 0  ;;  %v6197_v36 = vsel %vm6101_vm5, %v1130_v28, 0  ;;  %v6245_v58 = vsel %vm6101_vm5, %v6079_v60, 0  ;;  %v6259_v60 = vsel %vm6101_vm5, %v6087_v42, 0 }
  0x5f   : > { %5177 = vmatmul.mubr.bf16.gmra.mxu1 %v5846_v63  ;;  %5306 = vmatprep.subr.bf16.mxu0 %v5596_v38  ;;  %v1145_v28 = vrot.slane %v1067_v24, 1  ;;  %v6277_v42 = vsel %vm6101_vm5, %v6118_v35, 0 }
  0x60   : > { %5180 = vmatprep.mubr.bf16.mxu1 %v5878_v32  ;;  %5257 = vmatpush3.bf16.msra.mxu1 %v5593_v45  ;;  %v5600_v45 = vld [vmem:[%s6988_s3 + $0x110] sm:$0xff]  }
  0x61   : > { %5258 = vmatprep.subr.bf16.mxu1 %v5595_v59 }
  0x62   : > { %5307 = vmatpush3.bf16.msra.mxu0 %v5596_v38  ;;  %v6219_v38 = vsel %vm6101_vm5, %v1132_v8, 0  ;;  %v5612_v8 = vld [vmem:[%s6988_s3 + $0x1a0] sm:$0xff]  }
  0x63   : > { %5308 = vmatprep.subr.bf16.mxu0 %v5598_v13 }
  0x64   : > { %5259 = vmatpush3.bf16.msra.mxu1 %v5595_v59  ;;  %v5603_v59 = vld [vmem:[%s6988_s3 + $0xc0] sm:$0xff]  }
  0x65   : > { %5229 = vmatmul.mubr.bf16.gmra.mxu0 %v6191_v6  ;;  %5260 = vmatprep.subr.bf16.mxu1 %v5597_v48 }
  0x66   : > { %5232 = vmatprep.mubr.bf16.mxu0 %v6197_v36  ;;  %5309 = vmatpush3.bf16.msra.mxu0 %v5598_v13  ;;  %v7015_v13 = vshrl.u32 %v5994_v1, 16 }
  0x67   : > { %5181 = vmatmul.mubr.bf16.gmra.mxu1 %v5925_v31  ;;  %5310 = vmatprep.subr.bf16.mxu0 %v5600_v45 }
  0x68   : > { %5184 = vmatprep.mubr.bf16.mxu1 %v5984_v34  ;;  %5261 = vmatpush3.bf16.msra.mxu1 %v5597_v48  ;;  %v1146_v48 = vor.u32 %v1145_v28, %v7015_v13  ;;  %v5617_v28 = vld [vmem:[%s6988_s3 + $0x148] sm:$0xff]   ;;  %v5620_v13 = vld [vmem:[%s6988_s3 + $0x180] sm:$0xff]  }
  0x69   : > { %5262 = vmatprep.subr.bf16.mxu1 %v5599_v14 }
  0x6a   : > { %5311 = vmatpush3.bf16.msra.mxu0 %v5600_v45  ;;  %v6283_v24 = vsel %vm6101_vm5, %v1146_v48, 0  ;;  %v1148_v45 = vor.u32 %v1147_v5, %v7016_v53  ;;  %v5619_v48 = vld [vmem:[%s6988_s3 + $0x140] sm:$0xff]   ;;  %v5622_v5 = vld [vmem:[%s6988_s3 + $0x238] sm:$0xff]  }
  0x6b   : > { %5312 = vmatprep.subr.bf16.mxu0 %v5602_v4  ;;  %v5621_v53 = vld [vmem:[%s6988_s3 + $0x1f8] sm:$0xff]  }
  0x6c   : > { %5263 = vmatpush3.bf16.msra.mxu1 %v5599_v14  ;;  %v6293_v35 = vsel %vm6101_vm5, %v1148_v45, 0  ;;  %v5607_v14 = vld [vmem:[%s6988_s3 + $0x170] sm:$0xff]   ;;  %v1078_v45 = vshrl.u32 %v6164_v54, 16 }
  0x6d   : > { %5233 = vmatmul.mubr.bf16.gmra.mxu0 %v6219_v38  ;;  %5264 = vmatprep.subr.bf16.mxu1 %v5601_v43 }
  0x6e   : > { %5236 = vmatprep.mubr.bf16.mxu0 %v6224_v12  ;;  %5313 = vmatpush3.bf16.msra.mxu0 %v5602_v4  ;;  %v5611_v4 = vld [vmem:[%s6988_s3 + $0x160] sm:$0xff]  }
  0x6f   : > { %5185 = vmatmul.mubr.bf16.gmra.mxu1 %v6019_v26  ;;  %5314 = vmatprep.subr.bf16.mxu0 %v5604_v29 }
  0x70   : > { %5188 = vmatprep.mubr.bf16.mxu1 %v5743_v40  ;;  %5265 = vmatpush3.bf16.msra.mxu1 %v5601_v43  ;;  %v5614_v43 = vld [vmem:[%s6988_s3 + $0x198] sm:$0xff]  }
  0x71   : > { %5266 = vmatprep.subr.bf16.mxu1 %v5603_v59 }
  0x72   : > { %5315 = vmatpush3.bf16.msra.mxu0 %v5604_v29  ;;  %v5613_v29 = vld [vmem:[%s6988_s3 + $0x158] sm:$0xff]  }
  0x73   : > { %5396 = vmatprep.subr.bf16.mxu0 %v5606_v49 }
  0x74   : > { %5267 = vmatpush3.bf16.msra.mxu1 %v5603_v59  ;;  %v5616_v59 = vld [vmem:[%s6988_s3 + $0x190] sm:$0xff]  }
  0x75   : > { %5237 = vmatmul.mubr.bf16.gmra.mxu0 %v6245_v58  ;;  %5348 = vmatprep.subr.bf16.mxu1 %v5605_v0 }
  0x76   : > { %5240 = vmatprep.mubr.bf16.mxu0 %v6250_v46 }
  0x77   : > { %5189 = vmatmul.mubr.bf16.gmra.mxu1 %v5752_v50 }
  0x78   : > { %5192 = vmatprep.mubr.bf16.mxu1 %v5819_v30 }
  0x7d   : > { %5241 = vmatmul.mubr.bf16.gmra.mxu0 %v6259_v60 }
  0x7e   : > { %5244 = vmatprep.mubr.bf16.mxu0 %v6264_v21 }
  0x7f   : > { %5193 = vmatmul.mubr.bf16.gmra.mxu1 %v5863_v16 }
  0x80   : > { %5196 = vmatprep.mubr.bf16.mxu1 %v5907_v3 }
  0x85   : > { %5245 = vmatmul.mubr.bf16.gmra.mxu0 %v6277_v42 }
  0x86   : > { %5248 = vmatprep.mubr.bf16.mxu0 %v6283_v24 }
  0x87   : > { %5197 = vmatmul.mubr.bf16.gmra.mxu1 %v5952_v17 }
  0x88   : > { %5200 = vmatprep.mubr.bf16.mxu1 %v5994_v1 }
  0x8d   : > { %5249 = vmatmul.mubr.bf16.gmra.mxu0 %v6293_v35 }
  0x8e   : > { %5316 = vmatprep.mubr.bf16.mxu0 %v5746_v44  ;;  %v5610_v44 = vld [vmem:[%s6988_s3 + $0x1a8] sm:$0xff]  }
  0x8f   : > { %5201 = vmatmul.mubr.bf16.gmra.mxu1 %v6038_v61 }
  0x90   : > { %5268 = vmatprep.mubr.bf16.mxu1 %v5801_v19  ;;  %v5609_v19 = vld [vmem:[%s6988_s3 + $0x168] sm:$0xff]  }
  0x95   : > { %5317 = vmatmul.mubr.bf16.vlgmr.msra.gmra.mxu0 %v5787_v10 }
  0x96   : > { %5397 = vmatpush3.bf16.msra.mxu0 %v5606_v49  ;;  %5320 = vmatprep.mubr.bf16.mxu0 %v5846_v63  ;;  %v5615_v49 = vld [vmem:[%s6988_s3 + $0x150] sm:$0xff]  }
  0x97   : > { %5269 = vmatmul.mubr.bf16.vlgmr.msra.gmra.mxu1 %v5842_v56  ;;  %5398 = vmatprep.subr.bf16.mxu0 %v5608_v7 }
  0x98   : > { %5349 = vmatpush3.bf16.msra.mxu1 %v5605_v0  ;;  %5272 = vmatprep.mubr.bf16.mxu1 %v5896_v55  ;;  %v5618_v0 = vld [vmem:[%s6988_s3 + $0x188] sm:$0xff]  }
  0x99   : > { %5350 = vmatprep.subr.bf16.mxu1 %v5607_v14 }
  0x9a   : > { %5399 = vmatpush3.bf16.msra.mxu0 %v5608_v7  ;;  %v1080_v7 = vrot.slane %v1078_v45, 7 }
  0x9b   : > { %5400 = vmatprep.subr.bf16.mxu0 %v5610_v44 }
  0x9c   : > { %5351 = vmatpush3.bf16.msra.mxu1 %v5607_v14  ;;  %v1081_v14 = vshll.u32 %v6164_v54, 16 }
  0x9d   : > { %5321 = vmatmul.mubr.bf16.gmra.mxu0 %v5878_v32  ;;  %5352 = vmatprep.subr.bf16.mxu1 %v5609_v19 }
  0x9e   : > { %5324 = vmatprep.mubr.bf16.mxu0 %v5925_v31  ;;  %5401 = vmatpush3.bf16.msra.mxu0 %v5610_v44  ;;  %v1083_v44 = vor.u32 %v1081_v14, %v1080_v7 }
  0x9f   : > { %5273 = vmatmul.mubr.bf16.gmra.mxu1 %v5934_v37  ;;  %5402 = vmatprep.subr.bf16.mxu0 %v5612_v8 }
  0xa0   : > { %5276 = vmatprep.mubr.bf16.mxu1 %v5980_v18  ;;  %5353 = vmatpush3.bf16.msra.mxu1 %v5609_v19  ;;  %v6383_v19 = vsel %vm5769_vm2, 0, %v1083_v44 }
  0xa1   : > { %5354 = vmatprep.subr.bf16.mxu1 %v5611_v4 }
  0xa2   : > { %5403 = vmatpush3.bf16.msra.mxu0 %v5612_v8  ;;  %v5624_v8 = vld [vmem:[%s6988_s3 + $0x230] sm:$0xff]  }
  0xa3   : > { %5404 = vmatprep.subr.bf16.mxu0 %v5614_v43 }
  0xa4   : > { %5355 = vmatpush3.bf16.msra.mxu1 %v5611_v4  ;;  %v5630_v4 = vld [vmem:[%s6988_s3 + $0x218] sm:$0xff]  }
  0xa5   : > { %5325 = vmatmul.mubr.bf16.gmra.mxu0 %v5984_v34  ;;  %5356 = vmatprep.subr.bf16.mxu1 %v5613_v29 }
  0xa6   : > { %5328 = vmatprep.mubr.bf16.mxu0 %v6019_v26  ;;  %5405 = vmatpush3.bf16.msra.mxu0 %v5614_v43  ;;  %v5631_v43 = vld [vmem:[%s6988_s3 + $0x1d0] sm:$0xff]  }
  0xa7   : > { %5277 = vmatmul.mubr.bf16.gmra.mxu1 %v6028_v39  ;;  %5406 = vmatprep.subr.bf16.mxu0 %v5616_v59 }
  0xa8   : > { %5280 = vmatprep.mubr.bf16.mxu1 %v6068_v51  ;;  %5357 = vmatpush3.bf16.msra.mxu1 %v5613_v29  ;;  %v5634_v29 = vld [vmem:[%s6988_s3 + $0x208] sm:$0xff]  }
  0xa9   : > { %5358 = vmatprep.subr.bf16.mxu1 %v5615_v49 }
  0xaa   : > { %5407 = vmatpush3.bf16.msra.mxu0 %v5616_v59 }
  0xab   : > { %5408 = vmatprep.subr.bf16.mxu0 %v5618_v0 }
  0xac   : > { %5359 = vmatpush3.bf16.msra.mxu1 %v5615_v49 }
  0xad   : > { %5329 = vmatmul.mubr.bf16.gmra.mxu0 %v5743_v40  ;;  %5360 = vmatprep.subr.bf16.mxu1 %v5617_v28 }
  0xae   : > { %5332 = vmatprep.mubr.bf16.mxu0 %v5752_v50  ;;  %5409 = vmatpush3.bf16.msra.mxu0 %v5618_v0 }
  0xaf   : > { %5281 = vmatmul.mubr.bf16.gmra.mxu1 %v5793_v15  ;;  %5410 = vmatprep.subr.bf16.mxu0 %v5620_v13 }
  0xb0   : > { %5284 = vmatprep.mubr.bf16.mxu1 %v5807_v23  ;;  %5361 = vmatpush3.bf16.msra.mxu1 %v5617_v28 }
  0xb1   : > { %5362 = vmatprep.subr.bf16.mxu1 %v5619_v48 }
  0xb2   : > { %5411 = vmatpush3.bf16.msra.mxu0 %v5620_v13  ;;  %v5635_v13 = vld [vmem:[%s6988_s3 + $0x1c0] sm:$0xff]  }
  0xb3   : > { %5492 = vmatprep.subr.bf16.mxu0 %v5622_v5 }
  0xb4   : > { %5363 = vmatpush3.bf16.msra.mxu1 %v5619_v48 }
  0xb5   : > { %5333 = vmatmul.mubr.bf16.gmra.mxu0 %v5819_v30  ;;  %5444 = vmatprep.subr.bf16.mxu1 %v5621_v53 }
  0xb6   : > { %5336 = vmatprep.mubr.bf16.mxu0 %v5863_v16 }
  0xb7   : > { %5285 = vmatmul.mubr.bf16.gmra.mxu1 %v5868_v22 }
  0xb8   : > { %5288 = vmatprep.mubr.bf16.mxu1 %v5912_v9 }
  0xbd   : > { %5337 = vmatmul.mubr.bf16.gmra.mxu0 %v5907_v3 }
  0xbe   : > { %5340 = vmatprep.mubr.bf16.mxu0 %v5952_v17 }
  0xbf   : > { %5289 = vmatmul.mubr.bf16.gmra.mxu1 %v5960_v33 }
  0xc0   : > { %5292 = vmatprep.mubr.bf16.mxu1 %v6003_v52 }
  0xc5   : > { %5341 = vmatmul.mubr.bf16.gmra.mxu0 %v5994_v1 }
  0xc6   : > { %5344 = vmatprep.mubr.bf16.mxu0 %v6038_v61 }
  0xc7   : > { %5293 = vmatmul.mubr.bf16.gmra.mxu1 %v6042_v25 }
  0xc8   : > { %5296 = vmatprep.mubr.bf16.mxu1 %v6092_v57 }
  0xcd   : > { %5345 = vmatmul.mubr.bf16.gmra.mxu0 %v6164_v54 }
  0xce   : > { %5412 = vmatprep.mubr.bf16.mxu0 %v5842_v56  ;;  %v5626_v56 = vld [vmem:[%s6988_s3 + $0x228] sm:$0xff]  }
  0xcf   : > { %5297 = vmatmul.mubr.bf16.gmra.mxu1 %v6383_v19 }
  0xd0   : > { %5364 = vmatprep.mubr.bf16.mxu1 %v6122_v20  ;;  %v5627_v20 = vld [vmem:[%s6988_s3 + $0x1e0] sm:$0xff]  }
  0xd5   : > { %5413 = vmatmul.mubr.bf16.vlgmr.msra.gmra.mxu0 %v5896_v55  ;;  %v5625_v55 = vld [vmem:[%s6988_s3 + $0x1e8] sm:$0xff]  }
  0xd6   : > { %5493 = vmatpush3.bf16.msra.mxu0 %v5622_v5  ;;  %5416 = vmatprep.mubr.bf16.mxu0 %v5934_v37  ;;  %v5628_v37 = vld [vmem:[%s6988_s3 + $0x220] sm:$0xff]  }
  0xd7   : > { %5365 = vmatmul.mubr.bf16.vlgmr.msra.gmra.mxu1 %v6130_v27  ;;  %5494 = vmatprep.subr.bf16.mxu0 %v5624_v8 }
  0xd8   : > { %5445 = vmatpush3.bf16.msra.mxu1 %v5621_v53  ;;  %5368 = vmatprep.mubr.bf16.mxu1 %v6157_v11 }
  0xd9   : > { %5446 = vmatprep.subr.bf16.mxu1 %v5623_v62 }
  0xda   : > { %5495 = vmatpush3.bf16.msra.mxu0 %v5624_v8 }
  0xdb   : > { %5496 = vmatprep.subr.bf16.mxu0 %v5626_v56 }
  0xdc   : > { %5447 = vmatpush3.bf16.msra.mxu1 %v5623_v62 }
  0xdd   : > { %5417 = vmatmul.mubr.bf16.gmra.mxu0 %v5980_v18  ;;  %5448 = vmatprep.subr.bf16.mxu1 %v5625_v55  ;;  %v5629_v18 = vld [vmem:[%s6988_s3 + $0x1d8] sm:$0xff]  }
  0xde   : > { %5420 = vmatprep.mubr.bf16.mxu0 %v6028_v39  ;;  %5497 = vmatpush3.bf16.msra.mxu0 %v5626_v56  ;;  %v5632_v39 = vld [vmem:[%s6988_s3 + $0x210] sm:$0xff]  }
  0xdf   : > { %5369 = vmatmul.mubr.bf16.gmra.mxu1 %v6168_v47  ;;  %5498 = vmatprep.subr.bf16.mxu0 %v5628_v37 }
  0xe0   : > { %5372 = vmatprep.mubr.bf16.mxu1 %v6191_v6  ;;  %5449 = vmatpush3.bf16.msra.mxu1 %v5625_v55 }
  0xe1   : > { %5450 = vmatprep.subr.bf16.mxu1 %v5627_v20 }
  0xe2   : > { %5499 = vmatpush3.bf16.msra.mxu0 %v5628_v37 }
  0xe3   : > { %5500 = vmatprep.subr.bf16.mxu0 %v5630_v4 }
  0xe4   : > { %5451 = vmatpush3.bf16.msra.mxu1 %v5627_v20 }
  0xe5   : > { %5421 = vmatmul.mubr.bf16.gmra.mxu0 %v6068_v51  ;;  %5452 = vmatprep.subr.bf16.mxu1 %v5629_v18  ;;  %v5633_v51 = vld [vmem:[%s6988_s3 + $0x1c8] sm:$0xff]  }
  0xe6   : > { %5424 = vmatprep.mubr.bf16.mxu0 %v5793_v15  ;;  %5501 = vmatpush3.bf16.msra.mxu0 %v5630_v4  ;;  %v5636_v15 = vld [vmem:[%s6988_s3 + $0x200] sm:$0xff]  }
  0xe7   : > { %5373 = vmatmul.mubr.bf16.gmra.mxu1 %v6197_v36  ;;  %5502 = vmatprep.subr.bf16.mxu0 %v5632_v39 }
  0xe8   : > { %5376 = vmatprep.mubr.bf16.mxu1 %v6219_v38  ;;  %5453 = vmatpush3.bf16.msra.mxu1 %v5629_v18  ;;  %v1149_v18 = vrot.slane %v1081_v14, 1 }
  0xe9   : > { %5454 = vmatprep.subr.bf16.mxu1 %v5631_v43 }
  0xea   : > { %5503 = vmatpush3.bf16.msra.mxu0 %v5632_v39  ;;  %v1150_v39 = vor.u32 %v1149_v18, %v1078_v45 }
  0xeb   : > { %5504 = vmatprep.subr.bf16.mxu0 %v5634_v29 }
  0xec   : > { %v6437_v59 = vpop.f32.mrf.mxu0  ;;  %5455 = vmatpush3.bf16.msra.mxu1 %v5631_v43 }
  0xed   : > { %v6439_v49 = vpop.f32.mrf.mxu1  ;;  %5425 = vmatmul.mubr.bf16.gmra.mxu0 %v5807_v23  ;;  %5456 = vmatprep.subr.bf16.mxu1 %v5633_v51 }
  0xee   : > { %v6444_v0 = vpop.f32.mrf.mxu0  ;;  %5428 = vmatprep.mubr.bf16.mxu0 %v5868_v22  ;;  %5505 = vmatpush3.bf16.msra.mxu0 %v5634_v29 }
  0xef   : > { %v6446_v28 = vpop.f32.mrf.mxu1  ;;  %5377 = vmatmul.mubr.bf16.gmra.mxu1 %v6224_v12  ;;  %5506 = vmatprep.subr.bf16.mxu0 %v5636_v15 }
  0xf0   : > { %v6453_v48 = vpop.f32.mrf.mxu0  ;;  %5380 = vmatprep.mubr.bf16.mxu1 %v6245_v58  ;;  %5457 = vmatpush3.bf16.msra.mxu1 %v5633_v51 }
  0xf1   : > { %v6455_v5 = vpop.f32.mrf.mxu1  ;;  %5458 = vmatprep.subr.bf16.mxu1 %v5635_v13 }
  0xf2   : > { %v6459_v53 = vpop.f32.mrf.mxu0  ;;  %5507 = vmatpush3.bf16.msra.mxu0 %v5636_v15 }
  0xf3   : > { %v6461_v23 = vpop.f32.mrf.mxu1 }
  0xf4   : > { %v6463_v7 = vpop.f32.mrf.mxu0  ;;  %5459 = vmatpush3.bf16.msra.mxu1 %v5635_v13 }
  0xf5   : > { %v6465_v22 = vpop.f32.mrf.mxu1  ;;  %5429 = vmatmul.mubr.bf16.gmra.mxu0 %v5912_v9 }
  0xf6   : > { %v6467_v44 = vpop.f32.mrf.mxu0  ;;  %5432 = vmatprep.mubr.bf16.mxu0 %v5960_v33 }
  0xf7   : > { %v6471_v8 = vpop.f32.mrf.mxu1  ;;  %5381 = vmatmul.mubr.bf16.gmra.mxu1 %v6250_v46 }
  0xf8   : > { %v6473_v62 = vpop.f32.mrf.mxu0  ;;  %5384 = vmatprep.mubr.bf16.mxu1 %v6259_v60 }
  0xf9   : > { %v6477_v56 = vpop.f32.mrf.mxu1 }
  0xfa   : > { %v6479_v55 = vpop.f32.mrf.mxu0 }
  0xfb   : > { %v6482_v37 = vpop.f32.mrf.mxu1 }
  0xfd   : > { %5433 = vmatmul.mubr.bf16.gmra.mxu0 %v6003_v52 }
  0xfe   : > { %5436 = vmatprep.mubr.bf16.mxu0 %v6042_v25 }
  0xff   : > { %v6485_v9 = vpop.f32.mrf.mxu0  ;;  %5385 = vmatmul.mubr.bf16.gmra.mxu1 %v6264_v21 }
 0x100   : > { %5388 = vmatprep.mubr.bf16.mxu1 %v6277_v42 }
 0x101   : > { %v6489_v33 = vpop.f32.mrf.mxu0 }
 0x103   : > { %v6491_v20 = vpop.f32.mrf.mxu1  ;;  %v6498_v52 = vpop.f32.mrf.mxu0 }
 0x105   : > { %v6493_v4 = vpop.f32.mrf.mxu1  ;;  %5437 = vmatmul.mubr.bf16.gmra.mxu0 %v6092_v57  ;;  %v6507_v43 = vpop.f32.mrf.mxu0  ;;  %v6513_v57 = vsel %vm6101_vm5, %v1150_v39, 0 }
 0x106   : > { %7017 = vst [vmem:[#allocation4_spill] sm:$0xff] %v6493_v4  ;;  %5440 = vmatprep.mubr.bf16.mxu0 %v6383_v19 }
 0x107   : > { %5389 = vmatmul.mubr.bf16.gmra.mxu1 %v6283_v24  ;;  %v6502_v25 = vpop.f32.mrf.mxu1 }
 0x108   : > { %7018 = vst [vmem:[#allocation5_spill] sm:$0xff] %v6502_v25  ;;  %5392 = vmatprep.mubr.bf16.mxu1 %v6293_v35 }
 0x109   : > { %v6509_v29 = vpop.f32.mrf.mxu1 }
 0x10a   : > { %7019 = vst [vmem:[#allocation6_spill] sm:$0xff] %v6509_v29 }
 0x10d   : > { %v6515_v14 = vpop.f32.mrf.mxu0  ;;  %5441 = vmatmul.mubr.bf16.gmra.mxu0 %v7000_v2 }
 0x10e   : > { %5508 = vmatprep.mubr.bf16.mxu0 %v6130_v27 }
 0x10f   : > { %v6519_v19 = vpop.f32.mrf.mxu1  ;;  %5393 = vmatmul.mubr.bf16.gmra.mxu1 %v6513_v57  ;;  %v6522_v51 = vpop.f32.mrf.mxu0 }
 0x110   : > { %7020 = vst [vmem:[#allocation7_spill] sm:$0xff] %v6519_v19  ;;  %5460 = vmatprep.mubr.bf16.mxu1 %v5787_v10 }
 0x111   : > { %v6525_v45 = vpop.f32.mrf.mxu1  ;;  %v6527_v15 = vpop.f32.mrf.mxu0 }
 0x112   : > { %7021 = vst [vmem:[#allocation8_spill] sm:$0xff] %v6525_v45 }
 0x113   : > { %v6529_v41 = vpop.f32.mrf.mxu1  ;;  %v6531_v13 = vpop.f32.mrf.mxu0 }
 0x114   : > { %7022 = vst [vmem:[#allocation9_spill] sm:$0xff] %v6529_v41 }
 0x115   : > { %v6533_v18 = vpop.f32.mrf.mxu1  ;;  %v5222_v39 = vpop.f32.mrf.mxu0  ;;  %5509 = vmatmul.mubr.bf16.vlgmr.msra.gmra.mxu0 %v6157_v11 }
 0x116   : > { %7023 = vst [vmem:[#allocation10_spill] sm:$0xff] %v6533_v18  ;;  %5512 = vmatprep.mubr.bf16.mxu0 %v6168_v47 }
 0x117   : > { %v5174_v27 = vpop.f32.mrf.mxu1  ;;  %5461 = vmatmul.mubr.bf16.vlgmr.msra.gmra.mxu1 %v5846_v63  ;;  %v1864_v2 = vpop.f32.mrf.mxu0 }
 0x118   : > { %v1703_v10 = vadd.f32 %v5174_v27, %v6437_v59  ;;  %5464 = vmatprep.mubr.bf16.mxu1 %v5878_v32 }
 0x119   : > { %v1542_v45 = vpop.f32.mrf.mxu1  ;;  %v5223_v19 = vpop.f32.mrf.mxu0 }
 0x11a   : > { %v6540_v41 = vadd.f32 %v5222_v39, %v1703_v10  ;;  %v1701_v29 = vadd.f32 %v1542_v45, %v6444_v0 }
 0x11b   : > { %v5175_v18 = vpop.f32.mrf.mxu1  ;;  %v1867_v25 = vpop.f32.mrf.mxu0 }
 0x11c   : > { %v6543_v4 = vadd.f32 %v1864_v2, %v1701_v29  ;;  %v1704_v11 = vadd.f32 %v5175_v18, %v6453_v48 }
 0x11d   : > { %v1545_v47 = vpop.f32.mrf.mxu1  ;;  %v5226_v54 = vpop.f32.mrf.mxu0  ;;  %5513 = vmatmul.mubr.bf16.gmra.mxu0 %v6191_v6 }
 0x11e   : > { %v6547_v63 = vadd.f32 %v5223_v19, %v1704_v11  ;;  %v1702_v32 = vadd.f32 %v1545_v47, %v6459_v53  ;;  %5516 = vmatprep.mubr.bf16.mxu0 %v6197_v36 }
 0x11f   : > { %v5178_v59 = vpop.f32.mrf.mxu1  ;;  %5465 = vmatmul.mubr.bf16.gmra.mxu1 %v5925_v31  ;;  %v1880_v0 = vpop.f32.mrf.mxu0 }
 0x120   : > { %v6552_v45 = vadd.f32 %v1867_v25, %v1702_v32  ;;  %v1707_v2 = vadd.f32 %v5178_v59, %v6463_v7  ;;  %5468 = vmatprep.mubr.bf16.mxu1 %v5984_v34 }
 0x121   : > { %v1558_v48 = vpop.f32.mrf.mxu1  ;;  %v5227_v29 = vpop.f32.mrf.mxu0 }
 0x122   : > { %v6556_v18 = vadd.f32 %v5226_v54, %v1707_v2  ;;  %v1705_v6 = vadd.f32 %v1558_v48, %v6467_v44 }
 0x123   : > { %v5179_v19 = vpop.f32.mrf.mxu1  ;;  %v1883_v53 = vpop.f32.mrf.mxu0 }
 0x124   : > { %v6559_v39 = vadd.f32 %v1880_v0, %v1705_v6  ;;  %v1708_v36 = vadd.f32 %v5179_v19, %v6473_v62 }
 0x125   : > { %v1561_v31 = vpop.f32.mrf.mxu1  ;;  %v5230_v27 = vpop.f32.mrf.mxu0  ;;  %5517 = vmatmul.mubr.bf16.gmra.mxu0 %v6219_v38 }
 0x126   : > { %v6563_v25 = vadd.f32 %v5227_v29, %v1708_v36  ;;  %v1706_v34 = vadd.f32 %v1561_v31, %v6479_v55  ;;  %5520 = vmatprep.mubr.bf16.mxu0 %v6224_v12 }
 0x127   : > { %v5182_v54 = vpop.f32.mrf.mxu1  ;;  %5469 = vmatmul.mubr.bf16.gmra.mxu1 %v6019_v26  ;;  %v1896_v7 = vpop.f32.mrf.mxu0 }
 0x128   : > { %v6568_v44 = vadd.f32 %v1883_v53, %v1706_v34  ;;  %v1711_v10 = vadd.f32 %v5182_v54, %v6485_v9  ;;  %5472 = vmatprep.mubr.bf16.mxu1 %v5743_v40 }
 0x129   : > { %v1574_v62 = vpop.f32.mrf.mxu1  ;;  %v5231_v11 = vpop.f32.mrf.mxu0 }
 0x12a   : > { %v6572_v47 = vadd.f32 %v5230_v27, %v1711_v10  ;;  %v1709_v38 = vadd.f32 %v1574_v62, %v6489_v33 }
 0x12b   : > { %v5183_v32 = vpop.f32.mrf.mxu1  ;;  %v1899_v55 = vpop.f32.mrf.mxu0 }
 0x12c   : > { %v6575_v59 = vadd.f32 %v1896_v7, %v1709_v38  ;;  %v1712_v12 = vadd.f32 %v5183_v32, %v6498_v52 }
 0x12d   : > { %v1577_v26 = vpop.f32.mrf.mxu1  ;;  %v5234_v0 = vpop.f32.mrf.mxu0  ;;  %5521 = vmatmul.mubr.bf16.gmra.mxu0 %v6245_v58 }
 0x12e   : > { %v6579_v2 = vadd.f32 %v5231_v11, %v1712_v12  ;;  %v1710_v40 = vadd.f32 %v1577_v26, %v6507_v43  ;;  %5524 = vmatprep.mubr.bf16.mxu0 %v6250_v46 }
 0x12f   : > { %v5186_v9 = vpop.f32.mrf.mxu1  ;;  %5473 = vmatmul.mubr.bf16.gmra.mxu1 %v5752_v50  ;;  %v1912_v33 = vpop.f32.mrf.mxu0 }
 0x130   : > { %v6584_v48 = vadd.f32 %v1899_v55, %v1710_v40  ;;  %v1715_v29 = vadd.f32 %v5186_v9, %v6515_v14  ;;  %5476 = vmatprep.mubr.bf16.mxu1 %v5819_v30 }
 0x131   : > { %v1590_v52 = vpop.f32.mrf.mxu1  ;;  %v5235_v6 = vpop.f32.mrf.mxu0 }
 0x132   : > { %v6588_v19 = vadd.f32 %v5234_v0, %v1715_v29  ;;  %v1713_v58 = vadd.f32 %v1590_v52, %v6522_v51 }
 0x133   : > { %v5187_v53 = vpop.f32.mrf.mxu1  ;;  %v1915_v43 = vpop.f32.mrf.mxu0 }
 0x134   : > { %v6591_v36 = vadd.f32 %v1912_v33, %v1713_v58  ;;  %v1716_v46 = vadd.f32 %v5187_v53, %v6527_v15  ;;  %v7024_v58 = vld [vmem:[#allocation3_spill] sm:$0xff] }
 0x135   : > { %v1593_v50 = vpop.f32.mrf.mxu1  ;;  %v5238_v31 = vpop.f32.mrf.mxu0  ;;  %5525 = vmatmul.mubr.bf16.gmra.mxu0 %v6259_v60 }
 0x136   : > { %v6595_v27 = vadd.f32 %v5235_v6, %v1716_v46  ;;  %v1714_v30 = vadd.f32 %v1593_v50, %v6531_v13  ;;  %5528 = vmatprep.mubr.bf16.mxu0 %v6264_v21 }
 0x137   : > { %v5190_v14 = vpop.f32.mrf.mxu1  ;;  %5477 = vmatmul.mubr.bf16.gmra.mxu1 %v5863_v16  ;;  %v1928_v51 = vpop.f32.mrf.mxu0 }
 0x138   : > { %v6600_v34 = vadd.f32 %v1915_v43, %v1714_v30  ;;  %v1719_v54 = vadd.f32 %v5190_v14, %v6439_v49  ;;  %5480 = vmatprep.mubr.bf16.mxu1 %v5907_v3 }
 0x139   : > { %v1606_v15 = vpop.f32.mrf.mxu1  ;;  %v5239_v7 = vpop.f32.mrf.mxu0 }
 0x13a   : > { %v6604_v10 = vadd.f32 %v5238_v31, %v1719_v54  ;;  %v1717_v60 = vadd.f32 %v1606_v15, %v6446_v28 }
 0x13b   : > { %v5191_v62 = vpop.f32.mrf.mxu1  ;;  %v1931_v13 = vpop.f32.mrf.mxu0 }
 0x13c   : > { %v6607_v11 = vadd.f32 %v1928_v51, %v1717_v60  ;;  %v1720_v21 = vadd.f32 %v5191_v62, %v6455_v5  ;;  %v7027_v51 = vmov 0  }
 0x13d   : > { %v1609_v16 = vpop.f32.mrf.mxu1  ;;  %v5242_v38 = vpop.f32.mrf.mxu0  ;;  %5529 = vmatmul.mubr.bf16.gmra.mxu0 %v6277_v42 }
 0x13e   : > { %v6611_v32 = vadd.f32 %v5239_v7, %v1720_v21  ;;  %v1718_v3 = vadd.f32 %v1609_v16, %v6461_v23  ;;  %5532 = vmatprep.mubr.bf16.mxu0 %v6283_v24 }
 0x13f   : > { %v5194_v49 = vpop.f32.mrf.mxu1  ;;  %5481 = vmatmul.mubr.bf16.gmra.mxu1 %v5952_v17  ;;  %v1944_v28 = vpop.f32.mrf.mxu0 }
 0x140   : > { %v6616_v55 = vadd.f32 %v1931_v13, %v1718_v3  ;;  %v1723_v12 = vadd.f32 %v5194_v49, %v6465_v22  ;;  %5484 = vmatprep.mubr.bf16.mxu1 %v5994_v1  ;;  %v7029_v13 = vld [vmem:[#allocation7_spill] sm:$0xff]  ;;  %v7030_v49 = vld [vmem:[#allocation8_spill] sm:$0xff] }
 0x141   : > { %v1622_v5 = vpop.f32.mrf.mxu1  ;;  %v5243_v26 = vpop.f32.mrf.mxu0 }
 0x142   : > { %v6620_v0 = vadd.f32 %v5242_v38, %v1723_v12  ;;  %v1721_v42 = vadd.f32 %v1622_v5, %v6471_v8 }
 0x143   : > { %v5195_v40 = vpop.f32.mrf.mxu1  ;;  %v1947_v23 = vpop.f32.mrf.mxu0 }
 0x144   : > { %v6623_v9 = vadd.f32 %v1944_v28, %v1721_v42  ;;  %v1724_v24 = vadd.f32 %v5195_v40, %v6477_v56  ;;  %v7031_v42 = vld [vmem:[#allocation9_spill] sm:$0xff] }
 0x145   : > { %v1625_v17 = vpop.f32.mrf.mxu1  ;;  %v5246_v33 = vpop.f32.mrf.mxu0  ;;  %5533 = vmatmul.mubr.bf16.gmra.mxu0 %v6293_v35  ;;  %v7025_v35 = vld [vmem:[#allocation4_spill] sm:$0xff] }
 0x146   : > { %v6627_v29 = vadd.f32 %v5243_v26, %v1724_v24  ;;  %v1722_v1 = vadd.f32 %v1625_v17, %v6482_v37  ;;  %5536 = vmatprep.mubr.bf16.mxu0 %v6513_v57  ;;  %v7026_v57 = vld [vmem:[#allocation5_spill] sm:$0xff] }
 0x147   : > { %v5198_v22 = vpop.f32.mrf.mxu1  ;;  %5485 = vmatmul.mubr.bf16.gmra.mxu1 %v6038_v61  ;;  %v1960_v8 = vpop.f32.mrf.mxu0 }
 0x148   : > { %v6632_v52 = vadd.f32 %v1947_v23, %v1722_v1  ;;  %v1727_v6 = vadd.f32 %v5198_v22, %v6491_v20  ;;  %5488 = vmatprep.mubr.bf16.mxu1 %v7024_v58  ;;  %v7028_v20 = vld [vmem:[#allocation6_spill] sm:$0xff] }
 0x149   : > { %v1638_v56 = vpop.f32.mrf.mxu1  ;;  %v5247_v53 = vpop.f32.mrf.mxu0 }
 0x14a   : > { %v6636_v43 = vadd.f32 %v5246_v33, %v1727_v6  ;;  %v1725_v46 = vadd.f32 %v1638_v56, %v7025_v35  ;;  %v7032_v33 = vld [vmem:[#allocation10_spill] sm:$0xff] }
 0x14b   : > { %v5199_v50 = vpop.f32.mrf.mxu1  ;;  %v1963_v37 = vpop.f32.mrf.mxu0 }
 0x14c   : > { %v6639_v31 = vadd.f32 %v1960_v8, %v1725_v46  ;;  %v1728_v30 = vadd.f32 %v5199_v50, %v7026_v57 }
 0x14d   : > { %v1641_v61 = vpop.f32.mrf.mxu1  ;;  %v5250_v14 = vpop.f32.mrf.mxu0  ;;  %5537 = vmatmul.mubr.bf16.gmra.mxu0 %v7027_v51 }
 0x14e   : > { %v6643_v54 = vadd.f32 %v5247_v53, %v1728_v30  ;;  %v1726_v15 = vadd.f32 %v1641_v61, %v7028_v20 }
 0x14f   : > { %v5202_v7 = vpop.f32.mrf.mxu1  ;;  %5489 = vmatmul.mubr.bf16.gmra.mxu1 %v7027_v51  ;;  %v1976_v60 = vpop.f32.mrf.mxu0 }
 0x150   : > { %v6647_v62 = vadd.f32 %v1963_v37, %v1726_v15  ;;  %v1731_v21 = vadd.f32 %v5202_v7, %v7029_v13 }
 0x151   : > { %v1654_v16 = vpop.f32.mrf.mxu1  ;;  %v5251_v38 = vpop.f32.mrf.mxu0 }
 0x152   : > { %v6650_v3 = vadd.f32 %v5250_v14, %v1731_v21  ;;  %v1729_v28 = vadd.f32 %v1654_v16, %v7030_v49 }
 0x153   : > { %v5203_v12 = vpop.f32.mrf.mxu1  ;;  %v1979_v5 = vpop.f32.mrf.mxu0 }
 0x154   : > { %v6653_v26 = vadd.f32 %v1976_v60, %v1729_v28  ;;  %v1732_v40 = vadd.f32 %v5203_v12, %v7031_v42 }
 0x155   : > { %v1657_v23 = vpop.f32.mrf.mxu1  ;;  %v5318_v24 = vpop.f32.mrf.mxu0 }
 0x156   : > { %v6656_v17 = vadd.f32 %v5251_v38, %v1732_v40  ;;  %v1730_v1 = vadd.f32 %v1657_v23, %v7032_v33 }
 0x157   : > { %v5270_v22 = vpop.f32.mrf.mxu1  ;;  %v2508_v8 = vpop.f32.mrf.mxu0 }
 0x158   : > { %v6659_v6 = vadd.f32 %v1979_v5, %v1730_v1  ;;  %v2347_v58 = vadd.f32 %v5270_v22, %v6540_v41 }
 0x159   : > { %v2186_v56 = vpop.f32.mrf.mxu1  ;;  %v5319_v53 = vpop.f32.mrf.mxu0 }
 0x15a   : > { %v6662_v35 = vadd.f32 %v5318_v24, %v2347_v58  ;;  %v2345_v46 = vadd.f32 %v2186_v56, %v6543_v4 }
 0x15b   : > { %v5271_v50 = vpop.f32.mrf.mxu1  ;;  %v2511_v37 = vpop.f32.mrf.mxu0 }
 0x15c   : > { %v6665_v57 = vadd.f32 %v2508_v8, %v2345_v46  ;;  %v2348_v30 = vadd.f32 %v5271_v50, %v6547_v63 }
 0x15d   : > { %v2189_v61 = vpop.f32.mrf.mxu1  ;;  %v5322_v14 = vpop.f32.mrf.mxu0 }
 0x15e   : > { %v6668_v51 = vadd.f32 %v5319_v53, %v2348_v30  ;;  %v2346_v20 = vadd.f32 %v2189_v61, %v6552_v45 }
 0x15f   : > { %v5274_v15 = vpop.f32.mrf.mxu1  ;;  %v2524_v41 = vpop.f32.mrf.mxu0 }
 0x160   : > { %v6671_v7 = vadd.f32 %v2511_v37, %v2346_v20  ;;  %v2351_v60 = vadd.f32 %v5274_v15, %v6556_v18 }
 0x161   : > { %v2202_v13 = vpop.f32.mrf.mxu1  ;;  %v5323_v4 = vpop.f32.mrf.mxu0 }
 0x162   : > { %v6674_v21 = vadd.f32 %v5322_v14, %v2351_v60  ;;  %v2349_v16 = vadd.f32 %v2202_v13, %v6559_v39 }
 0x163   : > { %v5275_v38 = vpop.f32.mrf.mxu1  ;;  %v2527_v63 = vpop.f32.mrf.mxu0 }
 0x164   : > { %v6677_v49 = vadd.f32 %v2524_v41, %v2349_v16  ;;  %v2352_v28 = vadd.f32 %v5275_v38, %v6563_v25 }
 0x165   : > { %v2205_v12 = vpop.f32.mrf.mxu1  ;;  %v5326_v45 = vpop.f32.mrf.mxu0 }
 0x166   : > { %v6680_v5 = vadd.f32 %v5323_v4, %v2352_v28  ;;  %v2350_v42 = vadd.f32 %v2205_v12, %v6568_v44 }
 0x167   : > { %v5278_v40 = vpop.f32.mrf.mxu1  ;;  %v2540_v18 = vpop.f32.mrf.mxu0 }
 0x168   : > { %v6683_v23 = vadd.f32 %v2527_v63, %v2350_v42  ;;  %v2355_v24 = vadd.f32 %v5278_v40, %v6572_v47 }
 0x169   : > { %v2218_v33 = vpop.f32.mrf.mxu1  ;;  %v5327_v39 = vpop.f32.mrf.mxu0 }
 0x16a   : > { %v6686_v1 = vadd.f32 %v5326_v45, %v2355_v24  ;;  %v2353_v22 = vadd.f32 %v2218_v33, %v6575_v59 }
 0x16b   : > { %v5279_v8 = vpop.f32.mrf.mxu1  ;;  %v2543_v25 = vpop.f32.mrf.mxu0 }
 0x16c   : > { %v6689_v58 = vadd.f32 %v2540_v18, %v2353_v22  ;;  %v2356_v56 = vadd.f32 %v5279_v8, %v6579_v2 }
 0x16d   : > { %v2221_v53 = vpop.f32.mrf.mxu1  ;;  %v5330_v44 = vpop.f32.mrf.mxu0 }
 0x16e   : > { %v6692_v46 = vadd.f32 %v5327_v39, %v2356_v56  ;;  %v2354_v50 = vadd.f32 %v2221_v53, %v6584_v48 }
 0x16f   : > { %v5282_v37 = vpop.f32.mrf.mxu1  ;;  %v2556_v47 = vpop.f32.mrf.mxu0 }
 0x170   : > { %v6695_v30 = vadd.f32 %v2543_v25, %v2354_v50  ;;  %v2359_v61 = vadd.f32 %v5282_v37, %v6588_v19 }
 0x171   : > { %v2234_v14 = vpop.f32.mrf.mxu1  ;;  %v5331_v59 = vpop.f32.mrf.mxu0 }
 0x172   : > { %v6698_v20 = vadd.f32 %v5330_v44, %v2359_v61  ;;  %v2357_v15 = vadd.f32 %v2234_v14, %v6591_v36 }
 0x173   : > { %v5283_v41 = vpop.f32.mrf.mxu1  ;;  %v2559_v2 = vpop.f32.mrf.mxu0 }
 0x174   : > { %v6701_v60 = vadd.f32 %v2556_v47, %v2357_v15  ;;  %v2360_v13 = vadd.f32 %v5283_v41, %v6595_v27 }
 0x175   : > { %v2237_v4 = vpop.f32.mrf.mxu1  ;;  %v5334_v48 = vpop.f32.mrf.mxu0 }
 0x176   : > { %v6704_v16 = vadd.f32 %v5331_v59, %v2360_v13  ;;  %v2358_v38 = vadd.f32 %v2237_v4, %v6600_v34 }
 0x177   : > { %v5286_v63 = vpop.f32.mrf.mxu1  ;;  %v2572_v19 = vpop.f32.mrf.mxu0 }
 0x178   : > { %v6707_v28 = vadd.f32 %v2559_v2, %v2358_v38  ;;  %v2363_v12 = vadd.f32 %v5286_v63, %v6604_v10 }
 0x179   : > { %v2250_v45 = vpop.f32.mrf.mxu1  ;;  %v5335_v36 = vpop.f32.mrf.mxu0 }
 0x17a   : > { %v6710_v42 = vadd.f32 %v5334_v48, %v2363_v12  ;;  %v2361_v40 = vadd.f32 %v2250_v45, %v6607_v11 }
 0x17b   : > { %v5287_v18 = vpop.f32.mrf.mxu1  ;;  %v2575_v27 = vpop.f32.mrf.mxu0 }
 0x17c   : > { %v6713_v24 = vadd.f32 %v2572_v19, %v2361_v40  ;;  %v2364_v33 = vadd.f32 %v5287_v18, %v6611_v32 }
 0x17d   : > { %v2253_v39 = vpop.f32.mrf.mxu1  ;;  %v5338_v34 = vpop.f32.mrf.mxu0 }
 0x17e   : > { %v6716_v22 = vadd.f32 %v5335_v36, %v2364_v33  ;;  %v2362_v8 = vadd.f32 %v2253_v39, %v6616_v55 }
 0x17f   : > { %v5290_v25 = vpop.f32.mrf.mxu1  ;;  %v2588_v10 = vpop.f32.mrf.mxu0 }
 0x180   : > { %v6719_v56 = vadd.f32 %v2575_v27, %v2362_v8  ;;  %v2367_v53 = vadd.f32 %v5290_v25, %v6620_v0 }
 0x181   : > { %v2266_v44 = vpop.f32.mrf.mxu1  ;;  %v5339_v11 = vpop.f32.mrf.mxu0 }
 0x182   : > { %v6722_v50 = vadd.f32 %v5338_v34, %v2367_v53  ;;  %v2365_v37 = vadd.f32 %v2266_v44, %v6623_v9 }
 0x183   : > { %v5291_v47 = vpop.f32.mrf.mxu1  ;;  %v2591_v32 = vpop.f32.mrf.mxu0 }
 0x184   : > { %v6725_v61 = vadd.f32 %v2588_v10, %v2365_v37  ;;  %v2368_v14 = vadd.f32 %v5291_v47, %v6627_v29 }
 0x185   : > { %v2269_v59 = vpop.f32.mrf.mxu1  ;;  %v5342_v55 = vpop.f32.mrf.mxu0 }
 0x186   : > { %7033 = vst [vmem:[#allocation3_spill] sm:$0xff] %v6725_v61  ;;  %v6728_v15 = vadd.f32 %v5339_v11, %v2368_v14  ;;  %v2366_v41 = vadd.f32 %v2269_v59, %v6632_v52 }
 0x187   : > { %v5294_v2 = vpop.f32.mrf.mxu1  ;;  %v2604_v0 = vpop.f32.mrf.mxu0 }
 0x188   : > { %7034 = vst [vmem:[#allocation4_spill] sm:$0xff] %v6728_v15  ;;  %v6731_v13 = vadd.f32 %v2591_v32, %v2366_v41  ;;  %v2371_v4 = vadd.f32 %v5294_v2, %v6636_v43 }
 0x189   : > { %v2282_v48 = vpop.f32.mrf.mxu1  ;;  %v5343_v9 = vpop.f32.mrf.mxu0 }
 0x18a   : > { %7035 = vst [vmem:[#allocation5_spill] sm:$0xff] %v6731_v13  ;;  %v6734_v38 = vadd.f32 %v5342_v55, %v2371_v4  ;;  %v2369_v63 = vadd.f32 %v2282_v48, %v6639_v31 }
 0x18b   : > { %v5295_v19 = vpop.f32.mrf.mxu1  ;;  %v2607_v29 = vpop.f32.mrf.mxu0 }
 0x18c   : > { %v6737_v12 = vadd.f32 %v2604_v0, %v2369_v63  ;;  %v2372_v45 = vadd.f32 %v5295_v19, %v6643_v54 }
 0x18d   : > { %v2285_v36 = vpop.f32.mrf.mxu1  ;;  %v5346_v52 = vpop.f32.mrf.mxu0 }
 0x18e   : > { %7036 = vst [vmem:[#allocation6_spill] sm:$0xff] %v6737_v12  ;;  %v6740_v40 = vadd.f32 %v5343_v9, %v2372_v45  ;;  %v2370_v18 = vadd.f32 %v2285_v36, %v6647_v62 }
 0x18f   : > { %v5298_v27 = vpop.f32.mrf.mxu1  ;;  %v2620_v43 = vpop.f32.mrf.mxu0 }
 0x190   : > { %7037 = vst [vmem:[#allocation7_spill] sm:$0xff] %v6740_v40  ;;  %v6743_v33 = vadd.f32 %v2607_v29, %v2370_v18  ;;  %v2375_v39 = vadd.f32 %v5298_v27, %v6650_v3 }
 0x191   : > { %v2298_v34 = vpop.f32.mrf.mxu1  ;;  %v5347_v31 = vpop.f32.mrf.mxu0 }
 0x192   : > { %7038 = vst [vmem:[#allocation8_spill] sm:$0xff] %v6743_v33  ;;  %v6746_v8 = vadd.f32 %v5346_v52, %v2375_v39  ;;  %v2373_v25 = vadd.f32 %v2298_v34, %v6653_v26 }
 0x193   : > { %v5299_v10 = vpop.f32.mrf.mxu1  ;;  %v2623_v54 = vpop.f32.mrf.mxu0 }
 0x194   : > { %v6749_v53 = vadd.f32 %v2620_v43, %v2373_v25  ;;  %v2376_v44 = vadd.f32 %v5299_v10, %v6656_v17 }
 0x195   : > { %v2301_v11 = vpop.f32.mrf.mxu1  ;;  %v5414_v62 = vpop.f32.mrf.mxu0 }
 0x196   : > { %7039 = vst [vmem:[#allocation9_spill] sm:$0xff] %v6749_v53  ;;  %v6752_v37 = vadd.f32 %v5347_v31, %v2376_v44  ;;  %v2374_v47 = vadd.f32 %v2301_v11, %v6659_v6 }
 0x197   : > { %v5366_v32 = vpop.f32.mrf.mxu1  ;;  %v3152_v3 = vpop.f32.mrf.mxu0 }
 0x198   : > { %7040 = vst [vmem:[#allocation10_spill] sm:$0xff] %v6752_v37  ;;  %v6755_v14 = vadd.f32 %v2623_v54, %v2374_v47  ;;  %v2991_v59 = vadd.f32 %v5366_v32, %v6662_v35 }
 0x199   : > { %v2830_v55 = vpop.f32.mrf.mxu1  ;;  %v6758_v26 = vpop.f32.mrf.mxu0 }
 0x19a   : > { %7041 = vst [vmem:[#allocation11_spill] sm:$0xff] %v6755_v14  ;;  %v6760_v41 = vadd.f32 %v5414_v62, %v2991_v59  ;;  %v2989_v2 = vadd.f32 %v2830_v55, %v6665_v57 }
 0x19b   : > { %v6763_v17 = vpop.f32.mrf.mxu1  ;;  %v6765_v0 = vpop.f32.mrf.mxu0 }
 0x19c   : > { %v6767_v4 = vadd.f32 %v3152_v3, %v2989_v2 }
 0x19d   : > { %v6769_v6 = vpop.f32.mrf.mxu1  ;;  %v5418_v48 = vpop.f32.mrf.mxu0 }
 0x19f   : > { %v5370_v9 = vpop.f32.mrf.mxu1  ;;  %v6771_v63 = vpop.f32.mrf.mxu0 }
 0x1a0   : > { %v2995_v35 = vadd.f32 %v5370_v9, %v6674_v21 }
 0x1a1   : > { %v6774_v19 = vpop.f32.mrf.mxu1  ;;  %v6776_v29 = vpop.f32.mrf.mxu0 }
 0x1a2   : > { %v6778_v45 = vadd.f32 %v5418_v48, %v2995_v35 }
 0x1a3   : > { %v6780_v57 = vpop.f32.mrf.mxu1  ;;  %v6782_v36 = vpop.f32.mrf.mxu0 }
 0x1a5   : > { %v6784_v52 = vpop.f32.mrf.mxu1  ;;  %v5422_v18 = vpop.f32.mrf.mxu0 }
 0x1a7   : > { %v5374_v27 = vpop.f32.mrf.mxu1  ;;  %v6786_v43 = vpop.f32.mrf.mxu0 }
 0x1a8   : > { %v2999_v39 = vadd.f32 %v5374_v27, %v6686_v1 }
 0x1a9   : > { %v6789_v34 = vpop.f32.mrf.mxu1  ;;  %v6791_v21 = vpop.f32.mrf.mxu0 }
 0x1aa   : > { %v6793_v31 = vadd.f32 %v5422_v18, %v2999_v39 }
 0x1ab   : > { %v6795_v25 = vpop.f32.mrf.mxu1  ;;  %v6797_v10 = vpop.f32.mrf.mxu0 }
 0x1ad   : > { %v6799_v54 = vpop.f32.mrf.mxu1  ;;  %v5426_v44 = vpop.f32.mrf.mxu0 }
 0x1af   : > { %v5378_v11 = vpop.f32.mrf.mxu1  ;;  %v6801_v62 = vpop.f32.mrf.mxu0 }
 0x1b0   : > { %v3003_v47 = vadd.f32 %v5378_v11, %v6698_v20 }
 0x1b1   : > { %v6804_v32 = vpop.f32.mrf.mxu1  ;;  %v6806_v1 = vpop.f32.mrf.mxu0 }
 0x1b2   : > { %v6808_v3 = vadd.f32 %v5426_v44, %v3003_v47 }
 0x1b3   : > { %v6810_v59 = vpop.f32.mrf.mxu1  ;;  %v6812_v55 = vpop.f32.mrf.mxu0 }
 0x1b5   : > { %v6814_v2 = vpop.f32.mrf.mxu1  ;;  %v5430_v48 = vpop.f32.mrf.mxu0 }
 0x1b7   : > { %v5382_v9 = vpop.f32.mrf.mxu1  ;;  %v6816_v35 = vpop.f32.mrf.mxu0 }
 0x1b8   : > { %v3007_v18 = vadd.f32 %v5382_v9, %v6710_v42 }
 0x1b9   : > { %v6819_v27 = vpop.f32.mrf.mxu1  ;;  %v6821_v20 = vpop.f32.mrf.mxu0 }
 0x1ba   : > { %v6823_v39 = vadd.f32 %v5430_v48, %v3007_v18 }
 0x1bb   : > { %v6825_v44 = vpop.f32.mrf.mxu1  ;;  %v6827_v11 = vpop.f32.mrf.mxu0 }
 0x1bc   : > { %7042 = vst [vmem:[#allocation12_spill] sm:$0xff] %v6827_v11 }
 0x1bd   : > { %v6829_v47 = vpop.f32.mrf.mxu1  ;;  %v5434_v14 = vpop.f32.mrf.mxu0 }
 0x1bf   : > { %v5386_v37 = vpop.f32.mrf.mxu1  ;;  %v6831_v53 = vpop.f32.mrf.mxu0 }
 0x1c0   : > { %7043 = vst [vmem:[#allocation13_spill] sm:$0xff] %v6831_v53  ;;  %v3011_v33 = vadd.f32 %v5386_v37, %v6722_v50 }
 0x1c1   : > { %v6834_v40 = vpop.f32.mrf.mxu1  ;;  %v6836_v42 = vpop.f32.mrf.mxu0 }
 0x1c2   : > { %7044 = vst [vmem:[#allocation14_spill] sm:$0xff] %v6836_v42  ;;  %v6838_v9 = vadd.f32 %v5434_v14, %v3011_v33 }
 0x1c3   : > { %v6840_v48 = vpop.f32.mrf.mxu1  ;;  %v6842_v18 = vpop.f32.mrf.mxu0 }
 0x1c4   : > { %7045 = vst [vmem:[#allocation15_spill] sm:$0xff] %v6838_v9  ;;  %7046 = vst [vmem:[#allocation16_spill] sm:$0xff] %v6840_v48 }
 0x1c5   : > { %7047 = vst [vmem:[#allocation17_spill] sm:$0xff] %v6842_v18  ;;  %v6844_v12 = vpop.f32.mrf.mxu1  ;;  %v5438_v13 = vpop.f32.mrf.mxu0 }
 0x1c6   : > { %7048 = vst [vmem:[#allocation18_spill] sm:$0xff] %v6844_v12 }
 0x1c7   : > { %v5390_v15 = vpop.f32.mrf.mxu1  ;;  %v6846_v61 = vpop.f32.mrf.mxu0 }
 0x1c8   : > { %7049 = vst [vmem:[#allocation19_spill] sm:$0xff] %v6846_v61  ;;  %v3015_v53 = vadd.f32 %v5390_v15, %v6734_v38 }
 0x1c9   : > { %v6849_v11 = vpop.f32.mrf.mxu1  ;;  %v6851_v50 = vpop.f32.mrf.mxu0 }
 0x1ca   : > { %7050 = vst [vmem:[#allocation20_spill] sm:$0xff] %v6849_v11  ;;  %7051 = vst [vmem:[#allocation21_spill] sm:$0xff] %v6851_v50  ;;  %v6853_v37 = vadd.f32 %v5438_v13, %v3015_v53  ;;  %v2992_v50 = vadd.f32 %v6763_v17, %v6668_v51  ;;  %v2993_v51 = vadd.f32 %v6774_v19, %v6677_v49 }
 0x1cb   : > { %v6855_v33 = vpop.f32.mrf.mxu1  ;;  %v6857_v14 = vpop.f32.mrf.mxu0 }
 0x1cc   : > { %7052 = vst [vmem:[#allocation22_spill] sm:$0xff] %v6853_v37  ;;  %7053 = vst [vmem:[#allocation23_spill] sm:$0xff] %v6855_v33  ;;  %v3315_v19 = vadd.f32 %v6771_v63, %v2993_v51 }
 0x1cd   : > { %7054 = vst [vmem:[#allocation24_spill] sm:$0xff] %v6857_v14  ;;  %v6859_v9 = vpop.f32.mrf.mxu1  ;;  %v5442_v18 = vpop.f32.mrf.mxu0 }
 0x1ce   : > { %7055 = vst [vmem:[#allocation25_spill] sm:$0xff] %v6859_v9 }
 0x1cf   : > { %v5394_v42 = vpop.f32.mrf.mxu1  ;;  %v6861_v12 = vpop.f32.mrf.mxu0 }
 0x1d0   : > { %7056 = vst [vmem:[#allocation26_spill] sm:$0xff] %v6861_v12  ;;  %v3019_v61 = vadd.f32 %v5394_v42, %v6746_v8  ;;  %v2990_v8 = vadd.f32 %v6769_v6, %v6671_v7  ;;  %v2996_v7 = vadd.f32 %v6780_v57, %v6680_v5 }
 0x1d1   : > { %v6864_v48 = vpop.f32.mrf.mxu1  ;;  %v6866_v15 = vpop.f32.mrf.mxu0 }
 0x1d2   : > { %7057 = vst [vmem:[#allocation27_spill] sm:$0xff] %v6864_v48  ;;  %7058 = vst [vmem:[#allocation28_spill] sm:$0xff] %v6866_v15  ;;  %v6868_v38 = vadd.f32 %v5442_v18, %v3019_v61  ;;  %v3314_v61 = vadd.f32 %v6758_v26, %v2992_v50 }
 0x1d3   : > { %v6870_v13 = vpop.f32.mrf.mxu1  ;;  %v6872_v53 = vpop.f32.mrf.mxu0 }
 0x1d4   : > { %7059 = vst [vmem:[#allocation29_spill] sm:$0xff] %v6868_v38  ;;  %7060 = vst [vmem:[#allocation30_spill] sm:$0xff] %v6870_v13 }
 0x1d5   : > { %7061 = vst [vmem:[#allocation31_spill] sm:$0xff] %v6872_v53  ;;  %v6874_v37 = vpop.f32.mrf.mxu1  ;;  %v5510_v14 = vpop.f32.mrf.mxu0 }
 0x1d6   : > { %7062 = vst [vmem:[#allocation32_spill] sm:$0xff] %v6874_v37  ;;  %v3312_v37 = vadd.f32 %v6765_v0, %v2990_v8 }
 0x1d7   : > { %v5462_v9 = vpop.f32.mrf.mxu1  ;;  %v3796_v12 = vpop.f32.mrf.mxu0 }
 0x1d8   : > { %v3635_v18 = vadd.f32 %v5462_v9, %v6760_v41  ;;  %v2994_v41 = vadd.f32 %v6784_v52, %v6683_v23 }
 0x1d9   : > { %v3474_v42 = vpop.f32.mrf.mxu1  ;;  %v5511_v48 = vpop.f32.mrf.mxu0 }
 0x1da   : > { %v3633_v53 = vadd.f32 %v3474_v42, %v6767_v4  ;;  %v3957_v33 = vadd.f32 %v5510_v14, %v3635_v18  ;;  %v3000_v42 = vadd.f32 %v6795_v25, %v6692_v46 }
 0x1db   : > { %v5463_v38 = vpop.f32.mrf.mxu1  ;;  %v3799_v15 = vpop.f32.mrf.mxu0 }
 0x1dc   : > { %v3636_v13 = vadd.f32 %v5463_v38, %v3314_v61  ;;  %v3955_v26 = vadd.f32 %v3796_v12, %v3633_v53  ;;  %v3318_v12 = vadd.f32 %v6776_v29, %v2996_v7  ;;  %v3316_v38 = vadd.f32 %v6782_v36, %v2994_v41 }
 0x1dd   : > { %v3477_v17 = vpop.f32.mrf.mxu1  ;;  %v5514_v6 = vpop.f32.mrf.mxu0  ;;  %v4282_v53 = vmul.f32 %v3957_v33, %v3957_v33 }
 0x1de   : > { %v3958_v50 = vadd.f32 %v5511_v48, %v3636_v13  ;;  %v3634_v11 = vadd.f32 %v3477_v17, %v3312_v37  ;;  %v4280_v52 = vmul.f32 %v3955_v26, %v3955_v26  ;;  %v2997_v13 = vadd.f32 %v6789_v34, %v6689_v58 }
 0x1df   : > { %v5466_v49 = vpop.f32.mrf.mxu1  ;;  %v3812_v0 = vpop.f32.mrf.mxu0 }
 0x1e0   : > { %v4790_v4 = vpack.c.bf16 %v3958_v50, %v3957_v33  ;;  %v3956_v5 = vadd.f32 %v3799_v15, %v3634_v11  ;;  %v3639_v57 = vadd.f32 %v5466_v49, %v6778_v45  ;;  %v4283_v61 = vmul.f32 %v3958_v50, %v3958_v50 }
 0x1e1   : > { %v3490_v9 = vpop.f32.mrf.mxu1  ;;  %v5515_v23 = vpop.f32.mrf.mxu0  ;;  %v3319_v41 = vadd.f32 %v6786_v43, %v2997_v13 }
 0x1e2   : > { %4877 = vst [vmem:[%s6895_s20 + $0x8] sm:$0xff] %v4790_v4   ;;  %v4785_v48 = vpack.c.bf16 %v3956_v5, %v3955_v26  ;;  %v4243_v37 = vadd.f32 %v3956_v5, %v3955_v26  ;;  %v4281_v14 = vmul.f32 %v3956_v5, %v3956_v5  ;;  %v3637_v11 = vadd.f32 %v3490_v9, %v3315_v19 }
 0x1e3   : > { %v5467_v15 = vpop.f32.mrf.mxu1  ;;  %v3815_v63 = vpop.f32.mrf.mxu0  ;;  %v3961_v18 = vadd.f32 %v5514_v6, %v3639_v57 }
 0x1e4   : > { %4786 = vst [vmem:[%s6895_s20] sm:$0xff] %v4785_v48   ;;  %v4244_v29 = vadd.f32 %v4243_v37, %v3957_v33  ;;  %v4312_v8 = vadd.f32 %v4281_v14, %v4280_v52  ;;  %v3640_v45 = vadd.f32 %v5467_v15, %v3318_v12  ;;  %v3959_v51 = vadd.f32 %v3812_v0, %v3637_v11 }
 0x1e5   : > { %v3493_v7 = vpop.f32.mrf.mxu1  ;;  %v5518_v17 = vpop.f32.mrf.mxu0  ;;  %v2998_v33 = vadd.f32 %v6799_v54, %v6695_v30  ;;  %v3001_v14 = vadd.f32 %v6804_v32, %v6701_v60 }
 0x1e6   : > { %v4313_v36 = vadd.f32 %v4312_v8, %v4282_v53  ;;  %v4245_v26 = vadd.f32 %v4244_v29, %v3958_v50  ;;  %v3962_v58 = vadd.f32 %v5515_v23, %v3640_v45  ;;  %v3638_v34 = vadd.f32 %v3493_v7, %v3316_v38 }
 0x1e7   : > { %v5470_v49 = vpop.f32.mrf.mxu1  ;;  %v3828_v4 = vpop.f32.mrf.mxu0  ;;  %v4284_v19 = vmul.f32 %v3959_v51, %v3959_v51  ;;  %v3322_v50 = vadd.f32 %v6791_v21, %v3000_v42  ;;  %v3320_v37 = vadd.f32 %v6797_v10, %v2998_v33  ;;  %v3004_v38 = vadd.f32 %v6810_v59, %v6704_v16 }
 0x1e8   : > { %v4246_v5 = vadd.f32 %v4245_v26, %v3959_v51  ;;  %v4314_v46 = vadd.f32 %v4313_v36, %v4283_v61  ;;  %v4800_v25 = vpack.c.bf16 %v3962_v58, %v3961_v18  ;;  %v3960_v6 = vadd.f32 %v3815_v63, %v3638_v34 }
 0x1e9   : > { %v3506_v0 = vpop.f32.mrf.mxu1  ;;  %v5519_v12 = vpop.f32.mrf.mxu0  ;;  %v3643_v9 = vadd.f32 %v5470_v49, %v6793_v31  ;;  %v4286_v21 = vmul.f32 %v3961_v18, %v3961_v18  ;;  %v4287_v42 = vmul.f32 %v3962_v58, %v3962_v58  ;;  %v3323_v32 = vadd.f32 %v6801_v62, %v3001_v14 }
 0x1ea   : > { %v4315_v57 = vadd.f32 %v4314_v46, %v4284_v19  ;;  %4879 = vst [vmem:[%s6895_s20 + $0x18] sm:$0xff] %v4800_v25   ;;  %v3641_v43 = vadd.f32 %v3506_v0, %v3319_v41  ;;  %v4795_v23 = vpack.c.bf16 %v3960_v6, %v3959_v51  ;;  %v4247_v52 = vadd.f32 %v4246_v5, %v3960_v6 }
 0x1eb   : > { %v4285_v30 = vmul.f32 %v3960_v6, %v3960_v6  ;;  %v5471_v54 = vpop.f32.mrf.mxu1  ;;  %v3831_v48 = vpop.f32.mrf.mxu0  ;;  %v3965_v29 = vadd.f32 %v5518_v17, %v3643_v9  ;;  %v3002_v16 = vadd.f32 %v6814_v2, %v6707_v28  ;;  %v3326_v7 = vadd.f32 %v6806_v1, %v3004_v38 }
 0x1ec   : > { %v3644_v13 = vadd.f32 %v5471_v54, %v3322_v50  ;;  %4878 = vst [vmem:[%s6895_s20 + $0x10] sm:$0xff] %v4795_v23   ;;  %v4248_v11 = vadd.f32 %v4247_v52, %v3961_v18  ;;  %v3963_v31 = vadd.f32 %v3828_v4, %v3641_v43  ;;  %v3005_v1 = vadd.f32 %v6819_v27, %v6713_v24 }
 0x1ed   : > { %v4316_v15 = vadd.f32 %v4315_v57, %v4285_v30  ;;  %v3509_v63 = vpop.f32.mrf.mxu1  ;;  %v5522_v53 = vpop.f32.mrf.mxu0  ;;  %v3324_v2 = vadd.f32 %v6812_v55, %v3002_v16  ;;  %v3008_v46 = vadd.f32 %v6825_v44, %v6716_v22  ;;  %v4290_v6 = vmul.f32 %v3965_v29, %v3965_v29 }
 0x1ee   : > { %v3966_v8 = vadd.f32 %v5519_v12, %v3644_v13  ;;  %v3642_v45 = vadd.f32 %v3509_v63, %v3320_v37  ;;  %v4249_v61 = vadd.f32 %v4248_v11, %v3962_v58  ;;  %v4288_v26 = vmul.f32 %v3963_v31, %v3963_v31 }
 0x1ef   : > { %v4317_v10 = vadd.f32 %v4316_v15, %v4286_v21  ;;  %v5474_v51 = vpop.f32.mrf.mxu1  ;;  %v3844_v60 = vpop.f32.mrf.mxu0  ;;  %v3327_v27 = vadd.f32 %v6816_v35, %v3005_v1  ;;  %v3006_v22 = vadd.f32 %v6829_v47, %v6719_v56  ;;  %v3330_v37 = vadd.f32 %v6821_v20, %v3008_v46  ;;  %v7063_v47 = vld [vmem:[#allocation12_spill] sm:$0xff]  ;;  %v7070_v1 = vld [vmem:[#allocation14_spill] sm:$0xff] }
 0x1f0   : > { %v4810_v59 = vpack.c.bf16 %v3966_v8, %v3965_v29  ;;  %v3964_v18 = vadd.f32 %v3831_v48, %v3642_v45  ;;  %v4250_v36 = vadd.f32 %v4249_v61, %v3963_v31  ;;  %v3647_v49 = vadd.f32 %v5474_v51, %v6808_v3  ;;  %v7066_v61 = vld [vmem:[#allocation16_spill] sm:$0xff] }
 0x1f1   : > { %v4318_v17 = vadd.f32 %v4317_v10, %v4287_v42  ;;  %v3522_v34 = vpop.f32.mrf.mxu1  ;;  %v5523_v41 = vpop.f32.mrf.mxu0  ;;  %v4291_v52 = vmul.f32 %v3966_v8, %v3966_v8  ;;  %v3328_v45 = vadd.f32 %v7063_v47, %v3006_v22  ;;  %v7064_v42 = vld [vmem:[#allocation3_spill] sm:$0xff]  ;;  %v7065_v10 = vld [vmem:[#allocation4_spill] sm:$0xff]  ;;  %v7073_v22 = vld [vmem:[#allocation6_spill] sm:$0xff] }
 0x1f2   : > { %4881 = vst [vmem:[%s6895_s20 + $0x28] sm:$0xff] %v4810_v59   ;;  %v4805_v33 = vpack.c.bf16 %v3964_v18, %v3963_v31  ;;  %v4289_v58 = vmul.f32 %v3964_v18, %v3964_v18  ;;  %v3645_v4 = vadd.f32 %v3522_v34, %v3323_v32  ;;  %v4251_v5 = vadd.f32 %v4250_v36, %v3964_v18 }
 0x1f3   : > { %v4319_v62 = vadd.f32 %v4318_v17, %v4288_v26  ;;  %v5475_v19 = vpop.f32.mrf.mxu1  ;;  %v3847_v28 = vpop.f32.mrf.mxu0  ;;  %v3969_v9 = vadd.f32 %v5522_v53, %v3647_v49  ;;  %v3009_v20 = vadd.f32 %v6834_v40, %v7064_v42  ;;  %v3012_v51 = vadd.f32 %v7066_v61, %v7065_v10  ;;  %v7067_v49 = vld [vmem:[#allocation13_spill] sm:$0xff]  ;;  %v7077_v10 = vld [vmem:[#allocation19_spill] sm:$0xff] }
 0x1f4   : > { %4880 = vst [vmem:[%s6895_s20 + $0x20] sm:$0xff] %v4805_v33   ;;  %v3648_v25 = vadd.f32 %v5475_v19, %v3326_v7  ;;  %v4252_v0 = vadd.f32 %v4251_v5, %v3965_v29  ;;  %v3967_v50 = vadd.f32 %v3844_v60, %v3645_v4  ;;  %v7069_v5 = vld [vmem:[#allocation18_spill] sm:$0xff] }
 0x1f5   : > { %v4320_v12 = vadd.f32 %v4319_v62, %v4289_v58  ;;  %v3525_v3 = vpop.f32.mrf.mxu1  ;;  %v5526_v57 = vpop.f32.mrf.mxu0  ;;  %v4294_v32 = vmul.f32 %v3969_v9, %v3969_v9  ;;  %v3331_v4 = vadd.f32 %v7067_v49, %v3009_v20  ;;  %v7068_v62 = vld [vmem:[#allocation5_spill] sm:$0xff]  ;;  %v3334_v46 = vadd.f32 %v7070_v1, %v3012_v51  ;;  %v7078_v51 = vld [vmem:[#allocation8_spill] sm:$0xff] }
 0x1f6   : > { %v3970_v43 = vadd.f32 %v5523_v41, %v3648_v25  ;;  %v3646_v23 = vadd.f32 %v3525_v3, %v3324_v2  ;;  %v4253_v30 = vadd.f32 %v4252_v0, %v3966_v8  ;;  %v4292_v38 = vmul.f32 %v3967_v50, %v3967_v50  ;;  %v7083_v1 = vld [vmem:[#allocation9_spill] sm:$0xff] }
 0x1f7   : > { %v4321_v55 = vadd.f32 %v4320_v12, %v4290_v6  ;;  %v5478_v54 = vpop.f32.mrf.mxu1  ;;  %v3860_v24 = vpop.f32.mrf.mxu0  ;;  %v3010_v19 = vadd.f32 %v7069_v5, %v7068_v62 }
 0x1f8   : > { %v4820_v44 = vpack.c.bf16 %v3970_v43, %v3969_v9  ;;  %v3968_v48 = vadd.f32 %v3847_v28, %v3646_v23  ;;  %v4254_v14 = vadd.f32 %v4253_v30, %v3967_v50  ;;  %v3651_v63 = vadd.f32 %v5478_v54, %v6823_v39 }
 0x1f9   : > { %v4322_v13 = vadd.f32 %v4321_v55, %v4291_v52  ;;  %v3538_v21 = vpop.f32.mrf.mxu1  ;;  %v5527_v11 = vpop.f32.mrf.mxu0  ;;  %v4295_v34 = vmul.f32 %v3970_v43, %v3970_v43 }
 0x1fa   : > { %4883 = vst [vmem:[%s6895_s20 + $0x38] sm:$0xff] %v4820_v44   ;;  %v4815_v15 = vpack.c.bf16 %v3968_v48, %v3967_v50  ;;  %v4293_v31 = vmul.f32 %v3968_v48, %v3968_v48  ;;  %v3649_v53 = vadd.f32 %v3538_v21, %v3327_v27  ;;  %v4255_v29 = vadd.f32 %v4254_v14, %v3968_v48  ;;  %v7074_v44 = vld [vmem:[#allocation20_spill] sm:$0xff]  ;;  %v7076_v14 = vld [vmem:[#allocation23_spill] sm:$0xff] }
 0x1fb   : > { %v4323_v35 = vadd.f32 %v4322_v13, %v4292_v38  ;;  %v5479_v8 = vpop.f32.mrf.mxu1  ;;  %v3863_v56 = vpop.f32.mrf.mxu0  ;;  %v3973_v36 = vadd.f32 %v5526_v57, %v3651_v63  ;;  %v3013_v48 = vadd.f32 %v7074_v44, %v7073_v22 }
 0x1fc   : > { %4882 = vst [vmem:[%s6895_s20 + $0x30] sm:$0xff] %v4815_v15   ;;  %v3652_v60 = vadd.f32 %v5479_v8, %v3330_v37  ;;  %v4256_v16 = vadd.f32 %v4255_v29, %v3969_v9  ;;  %v3971_v18 = vadd.f32 %v3860_v24, %v3649_v53  ;;  %v7071_v9 = vld [vmem:[#allocation15_spill] sm:$0xff]  ;;  %v7072_v24 = vld [vmem:[#allocation17_spill] sm:$0xff] }
 0x1fd   : > { %v4324_v59 = vadd.f32 %v4323_v35, %v4293_v31  ;;  %v3541_v39 = vpop.f32.mrf.mxu1  ;;  %v5530_v7 = vpop.f32.mrf.mxu0  ;;  %v3332_v27 = vadd.f32 %v7072_v24, %v3010_v19  ;;  %v7075_v37 = vld [vmem:[#allocation7_spill] sm:$0xff]  ;;  %v4298_v21 = vmul.f32 %v3973_v36, %v3973_v36  ;;  %v3335_v61 = vadd.f32 %v7077_v10, %v3013_v48 }
 0x1fe   : > { %v3974_v26 = vadd.f32 %v5527_v11, %v3652_v60  ;;  %v3650_v17 = vadd.f32 %v3541_v39, %v3328_v45  ;;  %v4257_v33 = vadd.f32 %v4256_v16, %v3970_v43  ;;  %v4296_v6 = vmul.f32 %v3971_v18, %v3971_v18  ;;  %v7079_v60 = vld [vmem:[#allocation25_spill] sm:$0xff] }
 0x1ff   : > { %v4325_v41 = vadd.f32 %v4324_v59, %v4294_v32  ;;  %v5482_v58 = vpop.f32.mrf.mxu1  ;;  %v3876_v40 = vpop.f32.mrf.mxu0  ;;  %v3016_v38 = vadd.f32 %v7076_v14, %v7075_v37  ;;  %v3014_v32 = vadd.f32 %v7079_v60, %v7078_v51  ;;  %v7087_v37 = vld [vmem:[#allocation26_spill] sm:$0xff] }
 0x200   : > { %v4830_v28 = vpack.c.bf16 %v3974_v26, %v3973_v36  ;;  %v3972_v2 = vadd.f32 %v3863_v56, %v3650_v17  ;;  %v4258_v25 = vadd.f32 %v4257_v33, %v3971_v18  ;;  %v3655_v43 = vadd.f32 %v5482_v58, %v7071_v9  ;;  %v7081_v58 = vld [vmem:[#allocation22_spill] sm:$0xff] }
 0x201   : > { %v4326_v0 = vadd.f32 %v4325_v41, %v4295_v34  ;;  %v3554_v12 = vpop.f32.mrf.mxu1  ;;  %v5531_v50 = vpop.f32.mrf.mxu0  ;;  %v4299_v56 = vmul.f32 %v3974_v26, %v3974_v26 }
 0x202   : > { %4885 = vst [vmem:[%s6895_s20 + $0x48] sm:$0xff] %v4830_v28   ;;  %v4825_v3 = vpack.c.bf16 %v3972_v2, %v3971_v18  ;;  %v4297_v57 = vmul.f32 %v3972_v2, %v3972_v2  ;;  %v3653_v23 = vadd.f32 %v3554_v12, %v3331_v4  ;;  %v4259_v55 = vadd.f32 %v4258_v25, %v3972_v2  ;;  %v7080_v18 = vld [vmem:[#allocation21_spill] sm:$0xff]  ;;  %v7082_v28 = vld [vmem:[#allocation24_spill] sm:$0xff] }
 0x203   : > { %v4327_v52 = vadd.f32 %v4326_v0, %v4296_v6  ;;  %v5483_v30 = vpop.f32.mrf.mxu1  ;;  %v3879_v54 = vpop.f32.mrf.mxu0  ;;  %v3977_v35 = vadd.f32 %v5530_v7, %v3655_v43  ;;  %v3338_v39 = vadd.f32 %v7080_v18, %v3016_v38  ;;  %v3336_v2 = vadd.f32 %v7082_v28, %v3014_v32  ;;  %v7085_v6 = vld [vmem:[#allocation10_spill] sm:$0xff]  ;;  %v7088_v38 = vld [vmem:[#allocation11_spill] sm:$0xff] }
 0x204   : > { %4884 = vst [vmem:[%s6895_s20 + $0x40] sm:$0xff] %v4825_v3   ;;  %v3656_v13 = vadd.f32 %v5483_v30, %v3334_v46  ;;  %v4260_v11 = vadd.f32 %v4259_v55, %v3973_v36  ;;  %v3975_v31 = vadd.f32 %v3876_v40, %v3653_v23  ;;  %v7084_v46 = vld [vmem:[#allocation27_spill] sm:$0xff]  ;;  %v7086_v0 = vld [vmem:[#allocation30_spill] sm:$0xff] }
 0x205   : > { %v4328_v15 = vadd.f32 %v4327_v52, %v4297_v57  ;;  %v3557_v63 = vpop.f32.mrf.mxu1  ;;  %v5534_v53 = vpop.f32.mrf.mxu0  ;;  %v3017_v25 = vadd.f32 %v7084_v46, %v7083_v1  ;;  %v3020_v12 = vadd.f32 %v7086_v0, %v7085_v6  ;;  %v4302_v3 = vmul.f32 %v3977_v35, %v3977_v35  ;;  %v7092_v32 = vld [vmem:[#allocation31_spill] sm:$0xff] }
 0x206   : > { %v3978_v29 = vadd.f32 %v5531_v50, %v3656_v13  ;;  %v3654_v8 = vadd.f32 %v3557_v63, %v3332_v27  ;;  %v4261_v45 = vadd.f32 %v4260_v11, %v3974_v26  ;;  %v4300_v17 = vmul.f32 %v3975_v31, %v3975_v31  ;;  %v7089_v13 = vld [vmem:[#allocation32_spill] sm:$0xff] }
 0x207   : > { %v4329_v47 = vadd.f32 %v4328_v15, %v4298_v21  ;;  %v5486_v42 = vpop.f32.mrf.mxu1  ;;  %v3892_v20 = vpop.f32.mrf.mxu0  ;;  %v3339_v14 = vadd.f32 %v7087_v37, %v3017_v25  ;;  %v3018_v21 = vadd.f32 %v7089_v13, %v7088_v38 }
 0x208   : > { %v4840_v16 = vpack.c.bf16 %v3978_v29, %v3977_v35  ;;  %v3976_v59 = vadd.f32 %v3879_v54, %v3654_v8  ;;  %v4262_v36 = vadd.f32 %v4261_v45, %v3975_v31  ;;  %v3659_v40 = vadd.f32 %v5486_v42, %v7081_v58 }
 0x209   : > { %v4330_v7 = vadd.f32 %v4329_v47, %v4299_v56  ;;  %v3570_v34 = vpop.f32.mrf.mxu1  ;;  %v5535_v41 = vpop.f32.mrf.mxu0  ;;  %v4303_v24 = vmul.f32 %v3978_v29, %v3978_v29 }
 0x20a   : > { %4887 = vst [vmem:[%s6895_s20 + $0x58] sm:$0xff] %v4840_v16   ;;  %v4835_v33 = vpack.c.bf16 %v3976_v59, %v3975_v31  ;;  %v4301_v26 = vmul.f32 %v3976_v59, %v3976_v59  ;;  %v3657_v49 = vadd.f32 %v3570_v34, %v3335_v61  ;;  %v4263_v62 = vadd.f32 %v4262_v36, %v3976_v59  ;;  %v7090_v31 = vld [vmem:[#allocation28_spill] sm:$0xff] }
 0x20b   : > { %v4331_v4 = vadd.f32 %v4330_v7, %v4300_v17  ;;  %v5487_v5 = vpop.f32.mrf.mxu1  ;;  %v3895_v19 = vpop.f32.mrf.mxu0  ;;  %v3981_v55 = vadd.f32 %v5534_v53, %v3659_v40  ;;  %v3342_v63 = vadd.f32 %v7090_v31, %v3020_v12  ;;  %v3340_v16 = vadd.f32 %v7092_v32, %v3018_v21 }
 0x20c   : > { %4886 = vst [vmem:[%s6895_s20 + $0x50] sm:$0xff] %v4835_v33   ;;  %v3660_v50 = vadd.f32 %v5487_v5, %v3338_v39  ;;  %v4264_v57 = vadd.f32 %v4263_v62, %v3977_v35  ;;  %v3979_v43 = vadd.f32 %v3892_v20, %v3657_v49 }
 0x20d   : > { %v4332_v9 = vadd.f32 %v4331_v4, %v4301_v26  ;;  %v3573_v23 = vpop.f32.mrf.mxu1  ;;  %v5538_v52 = vpop.f32.mrf.mxu0  ;;  %v4306_v18 = vmul.f32 %v3981_v55, %v3981_v55 }
 0x20e   : > { %v3982_v30 = vadd.f32 %v5535_v41, %v3660_v50  ;;  %v3658_v54 = vadd.f32 %v3573_v23, %v3336_v2  ;;  %v4265_v22 = vadd.f32 %v4264_v57, %v3978_v29  ;;  %v4304_v53 = vmul.f32 %v3979_v43, %v3979_v43  ;;  %v7091_v29 = vld [vmem:[#allocation29_spill] sm:$0xff] }
 0x20f   : > { %v4333_v27 = vadd.f32 %v4332_v9, %v4302_v3  ;;  %v5490_v44 = vpop.f32.mrf.mxu1  ;;  %v3908_v48 = vpop.f32.mrf.mxu0 }
 0x210   : > { %v4850_v11 = vpack.c.bf16 %v3982_v30, %v3981_v55  ;;  %v3980_v15 = vadd.f32 %v3895_v19, %v3658_v54  ;;  %v4266_v35 = vadd.f32 %v4265_v22, %v3979_v43  ;;  %v3663_v42 = vadd.f32 %v5490_v44, %v7091_v29 }
 0x211   : > { %v4334_v8 = vadd.f32 %v4333_v27, %v4303_v24  ;;  %v3586_v56 = vpop.f32.mrf.mxu1  ;;  %v5539_v60 = vpop.f32.mrf.mxu0  ;;  %v4307_v26 = vmul.f32 %v3982_v30, %v3982_v30 }
 0x212   : > { %4889 = vst [vmem:[%s6895_s20 + $0x68] sm:$0xff] %v4850_v11   ;;  %v4845_v47 = vpack.c.bf16 %v3980_v15, %v3979_v43  ;;  %v4305_v45 = vmul.f32 %v3980_v15, %v3980_v15  ;;  %v3661_v20 = vadd.f32 %v3586_v56, %v3339_v14  ;;  %v4267_v61 = vadd.f32 %v4266_v35, %v3980_v15 }
 0x213   : > { %v4335_v10 = vadd.f32 %v4334_v8, %v4304_v53  ;;  %v5491_v51 = vpop.f32.mrf.mxu1  ;;  %v3985_v34 = vadd.f32 %v5538_v52, %v3663_v42  ;;  %v3911_v49 = vpop.f32.mrf.mxu0 }
 0x214   : > { %4888 = vst [vmem:[%s6895_s20 + $0x60] sm:$0xff] %v4845_v47   ;;  %v3664_v59 = vadd.f32 %v5491_v51, %v3342_v63  ;;  %v4268_v39 = vadd.f32 %v4267_v61, %v3981_v55  ;;  %v3983_v17 = vadd.f32 %v3908_v48, %v3661_v20 }
 0x215   : > { %v4336_v36 = vadd.f32 %v4335_v10, %v4305_v45  ;;  %v3589_v7 = vpop.f32.mrf.mxu1  ;;  %v4310_v6 = vmul.f32 %v3985_v34, %v3985_v34 }
 0x216   : > { %v3986_v41 = vadd.f32 %v5539_v60, %v3664_v59  ;;  %v3662_v33 = vadd.f32 %v3589_v7, %v3340_v16  ;;  %v4269_v40 = vadd.f32 %v4268_v39, %v3982_v30  ;;  %v4308_v19 = vmul.f32 %v3983_v17, %v3983_v17 }
 0x217   : > { %v4337_v58 = vadd.f32 %v4336_v36, %v4306_v18 }
 0x218   : > { %v4860_v4 = vpack.c.bf16 %v3986_v41, %v3985_v34  ;;  %v3984_v62 = vadd.f32 %v3911_v49, %v3662_v33  ;;  %v4270_v5 = vadd.f32 %v4269_v40, %v3983_v17  ;;  %v4311_v50 = vmul.f32 %v3986_v41, %v3986_v41 }
 0x219   : > { %v4338_v28 = vadd.f32 %v4337_v58, %v4307_v26 }
 0x21a   : > { %4891 = vst [vmem:[%s6895_s20 + $0x78] sm:$0xff] %v4860_v4   ;;  %v4855_v2 = vpack.c.bf16 %v3984_v62, %v3983_v17  ;;  %v4309_v1 = vmul.f32 %v3984_v62, %v3984_v62  ;;  %v4271_v25 = vadd.f32 %v4270_v5, %v3984_v62 }
 0x21b   : > { %v4339_v46 = vadd.f32 %v4338_v28, %v4308_v19 }
 0x21c   : > { %4890 = vst [vmem:[%s6895_s20 + $0x70] sm:$0xff] %v4855_v2   ;;  %v4272_v0 = vadd.f32 %v4271_v25, %v3985_v34 }
 0x21d   : > { %v4340_v12 = vadd.f32 %v4339_v46, %v4309_v1 }
 0x21e   : > { %v4273_v3 = vadd.f32 %v4272_v0, %v3986_v41 }
 0x21f   : > { %v4341_v57 = vadd.f32 %v4340_v12, %v4310_v6 }
 0x220   : > { %v4274_v9 = vrot.slane %v4273_v3, 4 }
 0x221   : > { %v4342_v43 = vadd.f32 %v4341_v57, %v4311_v50 }
 0x222   : > { %v4275_v23 = vadd.f32 %v4274_v9, %v4273_v3 }
 0x223   : > { %v4343_v52 = vrot.slane %v4342_v43, 4 }
 0x224   : > { %v4276_v55 = vrot.slane %v4275_v23, 2 }
 0x225   : > { %v4344_v30 = vadd.f32 %v4343_v52, %v4342_v43 }
 0x226   : > { %v4277_v54 = vadd.f32 %v4276_v55, %v4275_v23 }
 0x227   : > { %v4345_v24 = vrot.slane %v4344_v30, 2 }
 0x228   : > { %v4278_v27 = vrot.slane %v4277_v54, 1 }
 0x229   : > { %v4346_v22 = vadd.f32 %v4345_v24, %v4344_v30 }
 0x22a   : > { %v4279_v48 = vadd.f32 %v4278_v27, %v4277_v54 }
 0x22b   : > { %v4347_v44 = vrot.slane %v4346_v22, 1 }
 0x22d   : > { %v4348_v37 = vadd.f32 %v4347_v44, %v4346_v22 }
 0x22f   : > { %v4350_v14 = vsel %vm1100_vm0, %v4279_v48, %v4348_v37 }
 0x230   : > { %4351 = vst [vmem:[%s235_s23] sm:$0x3] %v4350_v14 }
 0x231 PF: > { %s16_s18 = sadd.s32 1, %s5643_s18  }
 0x232   : > { %p13_p4 = scmp.ge.s32.totalorder %s16_s18, 4  }
 0x234   :  { %15 = sbr.rel (!%p13_p4) target bundleno = 1 (0x1), region = 86 }

// kernel: residual_forward.3
= control target key start
LH: loop header
LB: loop body
LE: loop exit
PB: predicated region body
PF: predicated region fallthrough
CT: control target
= control target key end

     0   :  { %s8284_s12 = smov 0   ;;  %s10050_s0 = inlined_call_operand.vmem [shape: bf16[2,1,18,18,128], index: 0, kind: input, shape index: {}]   ;;  %s10051_s1 = inlined_call_operand.vmem [shape: bf16[9,128,128], index: 1, kind: input, shape index: {}]   ;;  %s10052_s2 = inlined_call_operand.vmem [shape: bf16[2,256,128], index: 2, kind: output, shape index: {0}]   ;;  %s10053_s3 = inlined_call_operand.vmem [shape: f32[2,2,128], index: 3, kind: output, shape index: {1}]  }
   0x1 LB: > { %s6644_s13 = sadd.s32 4294967295, %s8262_s12   ;;  %p6648_p0 = scmp.ge.s32.totalorder %s8262_s12, 1  ;;  %s8262_s12 = sphi %s8284_s12, %s14_s12  }
   0x2   : > { %p140_p1 = scmp.lt.s32.totalorder %s8262_s12, 3 }
   0x4   : > { %p141_p2 = pnand %p6648_p0, %p140_p1 }
   0x6   : > { %144 = sbr.rel (%p141_p2) target bundleno = 609 (0x261), region = 28 }
   0xb   : > { %v8136_v0 = vld [vmem:[%s10051_s1 + $0x38] sm:$0xff]   ;;  %p168_p3 = scmp.lt.s32.totalorder %s6644_s13, 1  ;;  %v8137_v1 = vld [vmem:[%s10051_s1 + $0x30] sm:$0xff]   ;;  %v8138_v2 = vld [vmem:[%s10051_s1 + $0x28] sm:$0xff]   ;;  %vm1485_vm0 = vcmask 1042432   ;;  %vm1486_vm1 = vcmask 1046532  }
   0xc   : > { %7679 = vmatprep.subr.bf16.mxu0 %v8136_v0  ;;  %8111 = vmatprep.subr.bf16.mxu1 %v8136_v0  ;;  %v8139_v3 = vld [vmem:[%s10051_s1 + $0x20] sm:$0xff]   ;;  %v8140_v6 = vld [vmem:[%s10051_s1 + $0x18] sm:$0xff]   ;;  %v8141_v7 = vld [vmem:[%s10051_s1 + $0x10] sm:$0xff]   ;;  %vm616_vm2 = vsmask.f32 3328  ;;  %vm6555_vm6 = vcmask 1040384  }
   0xd   : > { %s10134_s13 = smov (!%p168_p3, %s6644_s13), 1  ;;  %7680 = vmatpush3.bf16.msra.mxu0 %v8136_v0  ;;  %8119 = vmatpush3.bf16.msra.mxu1 %v8136_v0  ;;  %v8142_v8 = vld [vmem:[%s10051_s1 + $0x8] sm:$0xff]   ;;  %v8143_v9 = vld [vmem:[%s10051_s1] sm:$0xff]   ;;  %v8148_v10 = vld [vmem:[%s10051_s1 + $0x78] sm:$0xff]   ;;  %vm617_vm3 = vsmask.f32 7440 }
   0xe   : > { %7681 = vmatprep.subr.bf16.mxu0 %v8137_v1  ;;  %8112 = vmatprep.subr.bf16.mxu1 %v8137_v1  ;;  %s8127_s20 = smul.u32 216, %s10134_s13  ;;  %v8149_v12 = vld [vmem:[%s10051_s1 + $0xb8] sm:$0xff]   ;;  %v8150_v14 = vld [vmem:[%s10051_s1 + $0x70] sm:$0xff]   ;;  %v8156_v18 = vld [vmem:[%s10051_s1 + $0x68] sm:$0xff]  }
   0xf   : > { %v8151_v15 = vld [vmem:[%s10051_s1 + $0xb0] sm:$0xff]   ;;  %v8157_v20 = vld [vmem:[%s10051_s1 + $0xa8] sm:$0xff]   ;;  %v8158_v22 = vld [vmem:[%s10051_s1 + $0x60] sm:$0xff]  }
  0x10   : > { %s8307_s23 = scalar_lea.vmem %s10050_s0, %s8127_s20  ;;  %v8159_v23 = vld [vmem:[%s10051_s1 + $0xa0] sm:$0xff]   ;;  %v8364_v31 = vld [vmem:[%s10051_s1 + $0x58] sm:$0xff]   ;;  %vm8378_vm4 = vmor %vm1485_vm0, %vm1486_vm1  ;;  %s6652_s20 = sshll.u32 %s10134_s13, 1 }
  0x11   : > { %7682 = vmatpush3.bf16.msra.mxu0 %v8137_v1  ;;  %8120 = vmatpush3.bf16.msra.mxu1 %v8137_v1  ;;  %v8144_v4 = vld [vmem:[%s8307_s23] sm:$0xff]   ;;  %v8146_v11 = vld [vmem:[%s8307_s23 + $0xc] sm:$0xff]   ;;  %v8152_v16 = vld [vmem:[%s8307_s23 + $0x18] sm:$0xff]   ;;  %s181_s24 = scalar_lea.vmem %s10053_s3, %s6652_s20 }
  0x12   : > { %7683 = vmatprep.subr.bf16.mxu0 %v8138_v2  ;;  %8113 = vmatprep.subr.bf16.mxu1 %v8138_v2  ;;  %v8145_v5 = vld [vmem:[%s8307_s23 + $0x60] sm:$0xff]   ;;  %v8147_v13 = vld [vmem:[%s8307_s23 + $0x6c] sm:$0xff]   ;;  %v8153_v17 = vld [vmem:[%s8307_s23 + $0x78] sm:$0xff]  }
  0x13   : > { %7695 = vmatprep.mubr.bf16.mxu0 %v8144_v4  ;;  %7711 = vmatprep.mubr.bf16.mxu1 %v8145_v5  ;;  %v8154_v19 = vld [vmem:[%s8307_s23 + $0x24] sm:$0xff]   ;;  %v8160_v24 = vld [vmem:[%s8307_s23 + $0x30] sm:$0xff]   ;;  %v568_v26 = vld [vmem:[%s8307_s23] sm:$0xf] }
  0x14   : > { %v8155_v21 = vld [vmem:[%s8307_s23 + $0x84] sm:$0xff]   ;;  %v8161_v25 = vld [vmem:[%s8307_s23 + $0x90] sm:$0xff]   ;;  %v620_v29 = vshrl.u32 %v568_v26, 16  ;;  %v623_v30 = vshll.u32 %v568_v26, 16  ;;  %v8369_v32 = vld [vmem:[%s10051_s1 + $0x98] sm:$0xff]  }
  0x15   : > { %7684 = vmatpush3.bf16.msra.mxu0 %v8138_v2  ;;  %8121 = vmatpush3.bf16.msra.mxu1 %v8138_v2  ;;  %v569_v27 = vld [vmem:[%s8307_s23 + $0x4] sm:$0xf]  ;;  %v570_v28 = vld [vmem:[%s8307_s23 + $0x8] sm:$0x1]  ;;  %v1389_v36 = vld [vmem:[%s8307_s23] sm:$0xf] }
  0x16   : > { %7685 = vmatprep.subr.bf16.mxu0 %v8139_v3  ;;  %8114 = vmatprep.subr.bf16.mxu1 %v8139_v3  ;;  %v629_v33 = vshll.u32 %v569_v27, 16  ;;  %v633_v34 = vshrl.u32 %v569_v27, 16  ;;  %v639_v35 = vshll.u32 %v570_v28, 16  ;;  %v622_v37 = vrot.slane %v620_v29, 4  ;;  %v1390_v39 = vld [vmem:[%s8307_s23 + $0x4] sm:$0xf]  ;;  %vm8397_vm5 = vmor %vm616_vm2, %vm617_vm3 }
  0x17   : > { %v625_v38 = vrot.slane %v623_v30, 5  ;;  %v1391_v40 = vld [vmem:[%s8307_s23 + $0x8] sm:$0x1]  ;;  %v8162_v41 = vld [vmem:[%s8307_s23 + $0x3c] sm:$0xff]   ;;  %v6717_v47 = vrot.slane %v1389_v36, 9  ;;  %v1490_v50 = vrot.slane %v1390_v39, 5 }
  0x18   : > { %v8163_v42 = vld [vmem:[%s8307_s23 + $0x9c] sm:$0xff]   ;;  %v631_v43 = vrot.slane %v629_v33, 5  ;;  %v635_v44 = vrot.slane %v633_v34, 4  ;;  %v641_v45 = vrot.slane %v639_v35, 5  ;;  %v571_v48 = vld [vmem:[%s8307_s23 + $0xc] sm:$0xf] }
  0x19   : > { %7686 = vmatpush3.bf16.msra.mxu0 %v8139_v3  ;;  %8122 = vmatpush3.bf16.msra.mxu1 %v8139_v3  ;;  %v626_v49 = vor.u32 %v625_v38, %v622_v37  ;;  %v1493_v51 = vrot.slane %v1391_v40, 5  ;;  %v572_v52 = vld [vmem:[%s8307_s23 + $0x10] sm:$0xf]  ;;  %v573_v53 = vld [vmem:[%s8307_s23 + $0x14] sm:$0x1]  ;;  %v644_v58 = vshrl.u32 %v571_v48, 16  ;;  %v8406_v1 = vsel %vm8378_vm4, %v6717_v47, %v1490_v50 }
  0x1a   : > { %7687 = vmatprep.subr.bf16.mxu0 %v8140_v6  ;;  %8115 = vmatprep.subr.bf16.mxu1 %v8140_v6  ;;  %v8388_v54 = vld [vmem:[%s10051_s1 + $0x50] sm:$0xff]   ;;  %v636_v57 = vor.u32 %v635_v44, %v631_v43  ;;  %v647_v59 = vshll.u32 %v571_v48, 16  ;;  %v653_v60 = vshll.u32 %v572_v52, 16  ;;  %v1392_v61 = vld [vmem:[%s8307_s23 + $0xc] sm:$0xf]  ;;  %v1492_v2 = vrot.slane %v1490_v50, 4 }
  0x1b   : > { %v8393_v55 = vld [vmem:[%s10051_s1 + $0x90] sm:$0xff]   ;;  %v8168_v62 = vld [vmem:[%s8307_s23 + $0x48] sm:$0xff]   ;;  %v627_v0 = vrot.slane %v626_v49, 4  ;;  %v657_v3 = vshrl.u32 %v572_v52, 16  ;;  %v576_v29 = vld [vmem:[%s8307_s23 + $0x20] sm:$0x1] }
  0x1c   : > { %v8169_v63 = vld [vmem:[%s8307_s23 + $0xa8] sm:$0xff]   ;;  %v1393_v4 = vld [vmem:[%s8307_s23 + $0x10] sm:$0xf]  ;;  %v637_v5 = vrot.slane %v636_v57, 4  ;;  %v8170_v26 = vld [vmem:[%s8307_s23 + $0x54] sm:$0xff]   ;;  %v687_v48 = vshll.u32 %v576_v29, 16 }
  0x1d   : > { %7688 = vmatpush3.bf16.msra.mxu0 %v8140_v6  ;;  %8123 = vmatpush3.bf16.msra.mxu1 %v8140_v6  ;;  %v646_v6 = vrot.slane %v644_v58, 4  ;;  %v1395_v37 = vld [vmem:[%s8307_s23 + $0x18] sm:$0xf]  ;;  %v8174_v38 = vld [vmem:[%s10051_s1 + $0x40] sm:$0xff]   ;;  %v578_v57 = vld [vmem:[%s8307_s23 + $0x28] sm:$0xf] }
  0x1e   : > { %7689 = vmatprep.subr.bf16.mxu0 %v8141_v7  ;;  %8116 = vmatprep.subr.bf16.mxu1 %v8141_v7  ;;  %v1397_v49 = vld [vmem:[%s8307_s23 + $0x20] sm:$0x1]  ;;  %v577_v50 = vld [vmem:[%s8307_s23 + $0x24] sm:$0xf]  ;;  %v579_v58 = vld [vmem:[%s8307_s23 + $0x2c] sm:$0x1] }
  0x1f   : > { %v580_v29 = vld [vmem:[%s8307_s23 + $0x30] sm:$0xf] }
  0x21   : > { %7690 = vmatpush3.bf16.msra.mxu0 %v8141_v7  ;;  %8124 = vmatpush3.bf16.msra.mxu1 %v8141_v7  ;;  %v649_v7 = vrot.slane %v647_v59, 5  ;;  %v689_v59 = vrot.slane %v687_v48, 5 }
  0x22   : > { %7691 = vmatprep.subr.bf16.mxu0 %v8142_v8  ;;  %8117 = vmatprep.subr.bf16.mxu1 %v8142_v8 }
  0x25   : > { %7692 = vmatpush3.bf16.msra.mxu0 %v8142_v8  ;;  %8125 = vmatpush3.bf16.msra.mxu1 %v8142_v8  ;;  %v655_v8 = vrot.slane %v653_v60, 5  ;;  %v6719_v60 = vrot.slane %v1395_v37, 9 }
  0x26   : > { %7693 = vmatprep.subr.bf16.mxu0 %v8143_v9  ;;  %8118 = vmatprep.subr.bf16.mxu1 %v8143_v9 }
  0x29   : > { %7694 = vmatpush3.bf16.msra.mxu0 %v8143_v9  ;;  %8126 = vmatpush3.bf16.msra.mxu1 %v8143_v9  ;;  %v1394_v9 = vld [vmem:[%s8307_s23 + $0x14] sm:$0x1] }
  0x2a   : > { %7727 = vmatprep.subr.bf16.mxu1 %v8148_v10  ;;  %7775 = vmatprep.subr.bf16.mxu0 %v8149_v12  ;;  %v1500_v28 = vrot.slane %v1394_v9, 5  ;;  %v701_v9 = vshll.u32 %v578_v57, 16 }
  0x2c   : > { %7696 = vmatmul.mubr.bf16.vlgmr.msra.gmra.mxu0 %v8146_v11  ;;  %7712 = vmatmul.mubr.bf16.vlgmr.msra.gmra.mxu1 %v8147_v13  ;;  %v8416_v11 = vsel %vm8378_vm4, %v1492_v2, %v1493_v51  ;;  %v663_v13 = vshll.u32 %v573_v53, 16  ;;  %v8175_v51 = vld [vmem:[%s10051_s1 + $0x80] sm:$0xff]  }
  0x2d   : > { %7728 = vmatpush3.bf16.msra.mxu1 %v8148_v10  ;;  %7776 = vmatpush3.bf16.msra.mxu0 %v8149_v12  ;;  %v632_v10 = vsel %vm8397_vm5, %v627_v0, %v631_v43  ;;  %v659_v12 = vrot.slane %v657_v3, 4  ;;  %v1396_v43 = vld [vmem:[%s8307_s23 + $0x1c] sm:$0xf]  ;;  %v692_v3 = vshrl.u32 %v577_v50, 16 }
  0x2e   : > { %7729 = vmatprep.subr.bf16.mxu1 %v8150_v14  ;;  %7777 = vmatprep.subr.bf16.mxu0 %v8151_v15 }
  0x2f   : > { %7699 = vmatprep.mubr.bf16.mxu0 %v8152_v16  ;;  %7715 = vmatprep.mubr.bf16.mxu1 %v8153_v17  ;;  %v642_v16 = vsel %vm8397_vm5, %v637_v5, %v641_v45  ;;  %v6749_v17 = vcombine.low %v8406_v1, %v8416_v11  ;;  %v1399_v5 = vld [vmem:[%s8307_s23 + $0x28] sm:$0xf] }
  0x31   : > { %7730 = vmatpush3.bf16.msra.mxu1 %v8150_v14  ;;  %7778 = vmatpush3.bf16.msra.mxu0 %v8151_v15  ;;  %v8421_v14 = vld [vmem:[%s10051_s1 + $0x48] sm:$0xff]  }
  0x32   : > { %7731 = vmatprep.subr.bf16.mxu1 %v8156_v18  ;;  %7779 = vmatprep.subr.bf16.mxu0 %v8157_v20  ;;  %v8426_v15 = vld [vmem:[%s10051_s1 + $0x88] sm:$0xff]  }
  0x34   : > { %7700 = vmatmul.mubr.bf16.gmra.mxu0 %v8154_v19  ;;  %7716 = vmatmul.mubr.bf16.gmra.mxu1 %v8155_v21  ;;  %v6718_v19 = vrot.slane %v1392_v61, 9  ;;  %v660_v21 = vor.u32 %v659_v12, %v655_v8  ;;  %v1504_v61 = vrot.slane %v1396_v43, 5  ;;  %v1400_v12 = vld [vmem:[%s8307_s23 + $0x2c] sm:$0x1] }
  0x35   : > { %7732 = vmatpush3.bf16.msra.mxu1 %v8156_v18  ;;  %7780 = vmatpush3.bf16.msra.mxu0 %v8157_v20  ;;  %v650_v18 = vor.u32 %v649_v7, %v646_v6  ;;  %v8434_v20 = vcombine.low %v632_v10, %v642_v16  ;;  %v8176_v6 = vld [vmem:[%s10051_s1 + $0xf8] sm:$0xff]   ;;  %v705_v10 = vshrl.u32 %v578_v57, 16  ;;  %v694_v16 = vrot.slane %v692_v3, 4 }
  0x36   : > { %7733 = vmatprep.subr.bf16.mxu1 %v8158_v22  ;;  %7781 = vmatprep.subr.bf16.mxu0 %v8159_v23  ;;  %v661_v33 = vrot.slane %v660_v21, 4  ;;  %v1505_v7 = vsel %vm8378_vm4, %v6719_v60, %v1504_v61  ;;  %v703_v21 = vrot.slane %v701_v9, 5  ;;  %v584_v60 = vld [vmem:[%s8307_s23 + $0x40] sm:$0xf] }
  0x37   : > { %7703 = vmatprep.mubr.bf16.mxu0 %v8160_v24  ;;  %7719 = vmatprep.mubr.bf16.mxu1 %v8161_v25  ;;  %v574_v24 = vld [vmem:[%s8307_s23 + $0x18] sm:$0xf]  ;;  %v575_v25 = vld [vmem:[%s8307_s23 + $0x1c] sm:$0xf]  ;;  %v651_v27 = vrot.slane %v650_v18, 4 }
  0x38   : > { %v668_v30 = vshrl.u32 %v574_v24, 16  ;;  %v677_v36 = vshll.u32 %v575_v25, 16  ;;  %v1405_v9 = vld [vmem:[%s8307_s23 + $0x40] sm:$0xf] }
  0x39   : > { %7734 = vmatpush3.bf16.msra.mxu1 %v8158_v22  ;;  %7782 = vmatpush3.bf16.msra.mxu0 %v8159_v23  ;;  %v665_v22 = vrot.slane %v663_v13, 5  ;;  %v1497_v23 = vrot.slane %v1393_v4, 5  ;;  %v656_v39 = vsel %vm8397_vm5, %v651_v27, %v655_v8  ;;  %v695_v4 = vshll.u32 %v577_v50, 16  ;;  %v8177_v13 = vld [vmem:[%s10051_s1 + $0x138] sm:$0xff]   ;;  %v8180_v50 = vld [vmem:[%s10051_s1 + $0xe8] sm:$0xff]  }
  0x3a   : > { %7735 = vmatprep.subr.bf16.mxu1 %v8364_v31  ;;  %7783 = vmatprep.subr.bf16.mxu0 %v8369_v32  ;;  %v670_v40 = vrot.slane %v668_v30, 4  ;;  %v679_v47 = vrot.slane %v677_v36, 5  ;;  %v1506_v8 = vrot.slane %v1504_v61, 4  ;;  %v581_v30 = vld [vmem:[%s8307_s23 + $0x34] sm:$0xf]  ;;  %v719_v36 = vshll.u32 %v580_v29, 16 }
  0x3b   : > { %v8445_v34 = vsel %vm8378_vm4, %v6718_v19, %v1497_v23  ;;  %v1499_v35 = vrot.slane %v1497_v23, 4  ;;  %v666_v44 = vsel %vm8397_vm5, %v661_v33, %v665_v22  ;;  %v697_v18 = vrot.slane %v695_v4, 5  ;;  %v582_v33 = vld [vmem:[%s8307_s23 + $0x38] sm:$0x1]  ;;  %v585_v61 = vld [vmem:[%s8307_s23 + $0x44] sm:$0x1] }
  0x3c   : > { %7704 = vmatmul.mubr.bf16.gmra.mxu0 %v8162_v41  ;;  %7720 = vmatmul.mubr.bf16.gmra.mxu1 %v8163_v42  ;;  %v681_v42 = vshrl.u32 %v575_v25, 16  ;;  %v8469_v52 = vcombine.low %v656_v39, %v666_v44  ;;  %v707_v22 = vrot.slane %v705_v10, 4  ;;  %v711_v23 = vshll.u32 %v579_v58, 16  ;;  %v1404_v4 = vld [vmem:[%s8307_s23 + $0x3c] sm:$0xf] }
  0x3d   : > { %7736 = vmatpush3.bf16.msra.mxu1 %v8364_v31  ;;  %7784 = vmatpush3.bf16.msra.mxu0 %v8369_v32  ;;  %v671_v31 = vshll.u32 %v574_v24, 16  ;;  %v8171_v32 = vld [vmem:[%s8307_s23 + $0xb4] sm:$0xff]   ;;  %v8460_v45 = vsel %vm8378_vm4, %v1499_v35, %v1500_v28  ;;  %v716_v35 = vshrl.u32 %v580_v29, 16  ;;  %v729_v48 = vshrl.u32 %v581_v30, 16 }
  0x3e   : > { %7737 = vmatprep.subr.bf16.mxu1 %v8388_v54  ;;  %7785 = vmatprep.subr.bf16.mxu0 %v8393_v55  ;;  %v6750_v53 = vcombine.low %v8445_v34, %v8460_v45  ;;  %v708_v1 = vor.u32 %v707_v22, %v703_v21  ;;  %v713_v11 = vrot.slane %v711_v23, 5  ;;  %v8178_v28 = vld [vmem:[%s10051_s1 + $0xf0] sm:$0xff]   ;;  %v8182_v22 = vld [vmem:[%s10051_s1 + $0xe0] sm:$0xff]   ;;  %v8556_v29 = vld [vmem:[%s10051_s1 + $0x118] sm:$0xff]  }
  0x3f   : > { %7707 = vmatprep.mubr.bf16.mxu0 %v8168_v62  ;;  %7723 = vmatprep.mubr.bf16.mxu1 %v8169_v63  ;;  %v673_v41 = vrot.slane %v671_v31, 5  ;;  %v1507_v62 = vrot.slane %v1397_v49, 5  ;;  %v1398_v63 = vld [vmem:[%s8307_s23 + $0x24] sm:$0xf]  ;;  %v718_v44 = vrot.slane %v716_v35, 4 }
  0x40   : > { %v6720_v27 = vrot.slane %v1398_v63, 9  ;;  %v709_v37 = vrot.slane %v708_v1, 4  ;;  %v1402_v49 = vld [vmem:[%s8307_s23 + $0x34] sm:$0xf]  ;;  %v586_v35 = vld [vmem:[%s8307_s23 + $0x48] sm:$0xf] }
  0x41   : > { %7738 = vmatpush3.bf16.msra.mxu1 %v8388_v54  ;;  %7786 = vmatpush3.bf16.msra.mxu0 %v8393_v55  ;;  %v674_v54 = vor.u32 %v673_v41, %v670_v40  ;;  %v683_v55 = vrot.slane %v681_v42, 4  ;;  %v1508_v19 = vsel %vm8378_vm4, %v1506_v8, %v1507_v62  ;;  %v8179_v40 = vld [vmem:[%s10051_s1 + $0x130] sm:$0xff]   ;;  %v725_v41 = vshll.u32 %v581_v30, 16  ;;  %v8181_v62 = vld [vmem:[%s10051_s1 + $0x128] sm:$0xff]  }
  0x42   : > { %7739 = vmatprep.subr.bf16.mxu1 %v8421_v14  ;;  %7787 = vmatprep.subr.bf16.mxu0 %v8426_v15  ;;  %v6751_v25 = vcombine.low %v1505_v7, %v1508_v19  ;;  %v1401_v42 = vld [vmem:[%s8307_s23 + $0x30] sm:$0xf] }
  0x43   : > { %v675_v0 = vrot.slane %v674_v54, 4  ;;  %v684_v2 = vor.u32 %v683_v55, %v679_v47  ;;  %v727_v45 = vrot.slane %v725_v41, 5  ;;  %v583_v54 = vld [vmem:[%s8307_s23 + $0x3c] sm:$0xf]  ;;  %v767_v41 = vshll.u32 %v586_v35, 16 }
  0x44   : > { %7708 = vmatmul.mubr.bf16.gmra.mxu0 %v8170_v26  ;;  %7724 = vmatmul.mubr.bf16.gmra.mxu1 %v8171_v32  ;;  %v698_v26 = vor.u32 %v697_v18, %v694_v16  ;;  %v1514_v32 = vrot.slane %v1400_v12, 5  ;;  %v740_v7 = vshrl.u32 %v583_v54, 16  ;;  %v743_v8 = vshll.u32 %v583_v54, 16 }
  0x45   : > { %7740 = vmatpush3.bf16.msra.mxu1 %v8421_v14  ;;  %7788 = vmatpush3.bf16.msra.mxu0 %v8426_v15  ;;  %v680_v14 = vsel %vm8397_vm5, %v675_v0, %v679_v47  ;;  %v685_v15 = vrot.slane %v684_v2, 4  ;;  %v721_v47 = vrot.slane %v719_v36, 5  ;;  %v6721_v0 = vrot.slane %v1401_v42, 9  ;;  %v587_v36 = vld [vmem:[%s8307_s23 + $0x4c] sm:$0xf] }
  0x46   : > { %7741 = vmatprep.subr.bf16.mxu1 %v8174_v38  ;;  %7789 = vmatprep.subr.bf16.mxu0 %v8175_v51  ;;  %v699_v31 = vrot.slane %v698_v26, 4  ;;  %v1518_v2 = vrot.slane %v1402_v49, 5  ;;  %v742_v19 = vrot.slane %v740_v7, 4  ;;  %v759_v26 = vshll.u32 %v585_v61, 16 }
  0x47   : > { %7743 = vmatprep.mubr.bf16.mxu1 %v8434_v20  ;;  %7791 = vmatprep.mubr.bf16.mxu0 %v6749_v17  ;;  %v690_v24 = vsel %vm8397_vm5, %v685_v15, %v689_v59  ;;  %v1511_v17 = vrot.slane %v1399_v5, 5  ;;  %v722_v58 = vor.u32 %v721_v47, %v718_v44  ;;  %v731_v59 = vrot.slane %v729_v48, 4  ;;  %v1406_v15 = vld [vmem:[%s8307_s23 + $0x44] sm:$0x1]  ;;  %v1407_v48 = vld [vmem:[%s8307_s23 + $0x48] sm:$0xf] }
  0x48   : > { %v6695_v20 = vcombine.low %v680_v14, %v690_v24  ;;  %v704_v43 = vsel %vm8397_vm5, %v699_v31, %v703_v21  ;;  %v1519_v10 = vsel %vm8378_vm4, %v6721_v0, %v1518_v2  ;;  %v1520_v12 = vrot.slane %v1518_v2, 4  ;;  %v590_v0 = vld [vmem:[%s8307_s23 + $0x58] sm:$0xf]  ;;  %v591_v2 = vld [vmem:[%s8307_s23 + $0x5c] sm:$0x1] }
  0x49   : > { %7742 = vmatpush3.bf16.msra.mxu1 %v8174_v38  ;;  %7790 = vmatpush3.bf16.msra.mxu0 %v8175_v51  ;;  %v1512_v38 = vsel %vm8378_vm4, %v6720_v27, %v1511_v17  ;;  %v1513_v39 = vrot.slane %v1511_v17, 4  ;;  %v714_v51 = vsel %vm8397_vm5, %v709_v37, %v713_v11  ;;  %v723_v5 = vrot.slane %v722_v58, 4  ;;  %v8183_v27 = vld [vmem:[%s10051_s1 + $0x120] sm:$0xff]   ;;  %v1409_v58 = vld [vmem:[%s8307_s23 + $0x50] sm:$0x1] }
  0x4a   : > { %7823 = vmatprep.subr.bf16.mxu1 %v8176_v6  ;;  %7871 = vmatprep.subr.bf16.mxu0 %v8177_v13  ;;  %v6696_v55 = vcombine.low %v704_v43, %v714_v51  ;;  %v753_v14 = vshrl.u32 %v584_v60, 16  ;;  %v745_v21 = vrot.slane %v743_v8, 5  ;;  %v6722_v17 = vrot.slane %v1404_v4, 9  ;;  %v1410_v8 = vld [vmem:[%s8307_s23 + $0x54] sm:$0xf] }
  0x4b   : > { %v1515_v34 = vsel %vm8378_vm4, %v1513_v39, %v1514_v32  ;;  %v728_v16 = vsel %vm8397_vm5, %v723_v5, %v727_v45  ;;  %v761_v32 = vrot.slane %v759_v26, 5  ;;  %v588_v39 = vld [vmem:[%s8307_s23 + $0x50] sm:$0x1]  ;;  %v773_v47 = vshll.u32 %v587_v36, 16  ;;  %v8188_v26 = vld [vmem:[%s10051_s1 + $0xc8] sm:$0xff]  }
  0x4c   : > { %7744 = vmatmul.mubr.bf16.vlgmr.msra.gmra.mxu1 %v8469_v52  ;;  %7792 = vmatmul.mubr.bf16.vlgmr.msra.gmra.mxu0 %v6750_v53  ;;  %v735_v52 = vshll.u32 %v582_v33, 16  ;;  %v1403_v53 = vld [vmem:[%s8307_s23 + $0x38] sm:$0x1]  ;;  %v6752_v57 = vcombine.low %v1512_v38, %v1515_v34  ;;  %v746_v11 = vor.u32 %v745_v21, %v742_v19  ;;  %v1525_v33 = vrot.slane %v1405_v9, 5  ;;  %v1412_v21 = vld [vmem:[%s8307_s23 + $0x5c] sm:$0x1] }
  0x4d   : > { %7824 = vmatpush3.bf16.msra.mxu1 %v8176_v6  ;;  %7872 = vmatpush3.bf16.msra.mxu0 %v8177_v13  ;;  %v1521_v3 = vrot.slane %v1403_v53, 5  ;;  %v732_v6 = vor.u32 %v731_v59, %v727_v45  ;;  %v749_v13 = vshll.u32 %v584_v60, 16  ;;  %v1528_v38 = vrot.slane %v1406_v15, 5  ;;  %v1408_v45 = vld [vmem:[%s8307_s23 + $0x4c] sm:$0xf] }
  0x4e   : > { %7747 = vmatprep.mubr.bf16.mxu1 %v6695_v20  ;;  %7795 = vmatprep.mubr.bf16.mxu0 %v6751_v25  ;;  %v737_v63 = vrot.slane %v735_v52, 5  ;;  %v755_v25 = vrot.slane %v753_v14, 4  ;;  %v747_v37 = vrot.slane %v746_v11, 4  ;;  %v1526_v43 = vsel %vm8378_vm4, %v6722_v17, %v1525_v33  ;;  %v8186_v52 = vld [vmem:[%s10051_s1 + $0xd0] sm:$0xff]   ;;  %v1411_v14 = vld [vmem:[%s8307_s23 + $0x58] sm:$0xf] }
  0x4f   : > { %7825 = vmatprep.subr.bf16.mxu1 %v8178_v28  ;;  %7873 = vmatprep.subr.bf16.mxu0 %v8179_v40  ;;  %v733_v18 = vrot.slane %v732_v6, 4  ;;  %v1522_v23 = vsel %vm8378_vm4, %v1520_v12, %v1521_v3  ;;  %v751_v24 = vrot.slane %v749_v13, 5  ;;  %v1527_v44 = vrot.slane %v1525_v33, 4  ;;  %v589_v59 = vld [vmem:[%s8307_s23 + $0x54] sm:$0xf]  ;;  %v8189_v17 = vld [vmem:[%s10051_s1 + $0x108] sm:$0xff]  }
  0x50   : > { %v6753_v1 = vcombine.low %v1519_v10, %v1522_v23  ;;  %v769_v51 = vrot.slane %v767_v41, 5  ;;  %v777_v34 = vshrl.u32 %v587_v36, 16  ;;  %v8187_v3 = vld [vmem:[%s10051_s1 + $0x110] sm:$0xff]   ;;  %v6723_v5 = vrot.slane %v1407_v48, 9  ;;  %v8610_v33 = vld [vmem:[%s10051_s1 + $0x100] sm:$0xff]  }
  0x51   : > { %7826 = vmatpush3.bf16.msra.mxu1 %v8178_v28  ;;  %7874 = vmatpush3.bf16.msra.mxu0 %v8179_v40  ;;  %v738_v20 = vsel %vm8397_vm5, %v733_v18, %v737_v63  ;;  %v8551_v28 = vld [vmem:[%s10051_s1 + $0xd8] sm:$0xff]   ;;  %v756_v31 = vor.u32 %v755_v25, %v751_v24  ;;  %v764_v40 = vshrl.u32 %v586_v35, 16  ;;  %v752_v49 = vsel %vm8397_vm5, %v747_v37, %v751_v24 }
  0x52   : > { %7827 = vmatprep.subr.bf16.mxu1 %v8180_v50  ;;  %7875 = vmatprep.subr.bf16.mxu0 %v8181_v62  ;;  %v6697_v30 = vcombine.low %v728_v16, %v738_v20  ;;  %v1529_v54 = vsel %vm8378_vm4, %v1527_v44, %v1528_v38  ;;  %v779_v63 = vrot.slane %v777_v34, 4  ;;  %v1532_v6 = vrot.slane %v1408_v45, 5  ;;  %v1413_v34 = vld [vmem:[%s8307_s23 + $0x60] sm:$0xf] }
  0x53   : > { %v757_v42 = vrot.slane %v756_v31, 4  ;;  %v6754_v61 = vcombine.low %v1526_v43, %v1529_v54  ;;  %v1535_v7 = vrot.slane %v1409_v58, 5  ;;  %v788_v12 = vshrl.u32 %v589_v59, 16  ;;  %v594_v43 = vld [vmem:[%s8307_s23 + $0x68] sm:$0x1] }
  0x54   : > { %7748 = vmatmul.mubr.bf16.gmra.mxu1 %v6696_v55  ;;  %7796 = vmatmul.mubr.bf16.gmra.mxu0 %v6752_v57  ;;  %v775_v55 = vrot.slane %v773_v47, 5  ;;  %v783_v57 = vshll.u32 %v588_v39, 16  ;;  %v791_v13 = vshll.u32 %v589_v59, 16  ;;  %v1533_v15 = vsel %vm8378_vm4, %v6723_v5, %v1532_v6  ;;  %v592_v39 = vld [vmem:[%s8307_s23 + $0x60] sm:$0xf] }
  0x55   : > { %7828 = vmatpush3.bf16.msra.mxu1 %v8180_v50  ;;  %7876 = vmatpush3.bf16.msra.mxu0 %v8181_v62  ;;  %v766_v50 = vrot.slane %v764_v40, 4  ;;  %v762_v53 = vsel %vm8397_vm5, %v757_v42, %v761_v32  ;;  %v1534_v16 = vrot.slane %v1532_v6, 4  ;;  %v797_v18 = vshll.u32 %v590_v0, 16  ;;  %v8605_v32 = vld [vmem:[%s10051_s1 + $0xc0] sm:$0xff]   ;;  %v596_v5 = vld [vmem:[%s8307_s23 + $0x70] sm:$0xf] }
  0x56   : > { %7799 = vmatprep.mubr.bf16.mxu0 %v6753_v1  ;;  %7829 = vmatprep.subr.bf16.mxu1 %v8182_v22  ;;  %v6698_v60 = vcombine.low %v752_v49, %v762_v53  ;;  %v785_v4 = vrot.slane %v783_v57, 5  ;;  %v780_v10 = vor.u32 %v779_v63, %v775_v55  ;;  %v801_v19 = vshrl.u32 %v590_v0, 16  ;;  %v593_v40 = vld [vmem:[%s8307_s23 + $0x64] sm:$0xf]  ;;  %v8624_v57 = vld [vmem:[%s10051_s1 + $0x178] sm:$0xff]  }
  0x57   : > { %7751 = vmatprep.mubr.bf16.mxu1 %v6697_v30  ;;  %7877 = vmatprep.subr.bf16.mxu0 %v8183_v27  ;;  %v770_v62 = vor.u32 %v769_v51, %v766_v50  ;;  %v790_v24 = vrot.slane %v788_v12, 4  ;;  %v793_v25 = vrot.slane %v791_v13, 5  ;;  %v799_v20 = vrot.slane %v797_v18, 5  ;;  %v595_v63 = vld [vmem:[%s8307_s23 + $0x6c] sm:$0xf] }
  0x58   : > { %v781_v23 = vrot.slane %v780_v10, 4  ;;  %v803_v1 = vrot.slane %v801_v19, 4  ;;  %v807_v11 = vshll.u32 %v591_v2, 16  ;;  %v6724_v31 = vrot.slane %v1410_v8, 9  ;;  %v597_v6 = vld [vmem:[%s8307_s23 + $0x74] sm:$0x1] }
  0x59   : > { %7830 = vmatpush3.bf16.msra.mxu1 %v8182_v22  ;;  %7878 = vmatpush3.bf16.msra.mxu0 %v8183_v27  ;;  %v771_v9 = vrot.slane %v770_v62, 4  ;;  %v1536_v27 = vsel %vm8378_vm4, %v1534_v16, %v1535_v7  ;;  %v794_v30 = vor.u32 %v793_v25, %v790_v24  ;;  %v1539_v38 = vrot.slane %v1411_v14, 5  ;;  %v1415_v62 = vld [vmem:[%s8307_s23 + $0x68] sm:$0x1]  ;;  %v8639_v7 = vld [vmem:[%s10051_s1 + $0x1b8] sm:$0xff]  }
  0x5a   : > { %7831 = vmatprep.subr.bf16.mxu1 %v8551_v28  ;;  %7879 = vmatprep.subr.bf16.mxu0 %v8556_v29  ;;  %v804_v36 = vor.u32 %v803_v1, %v799_v20  ;;  %v809_v37 = vrot.slane %v807_v11, 5  ;;  %v1542_v42 = vrot.slane %v1412_v21, 5  ;;  %v812_v44 = vshrl.u32 %v592_v39, 16  ;;  %v1416_v13 = vld [vmem:[%s8307_s23 + $0x6c] sm:$0xf] }
  0x5b   : > { %v776_v22 = vsel %vm8397_vm5, %v771_v9, %v775_v55  ;;  %v795_v41 = vrot.slane %v794_v30, 4  ;;  %v815_v47 = vshll.u32 %v592_v39, 16  ;;  %v1540_v49 = vsel %vm8378_vm4, %v6724_v31, %v1539_v38  ;;  %v1414_v55 = vld [vmem:[%s8307_s23 + $0x64] sm:$0xf]  ;;  %v1417_v19 = vld [vmem:[%s8307_s23 + $0x70] sm:$0xf] }
  0x5c   : > { %7752 = vmatmul.mubr.bf16.gmra.mxu1 %v6698_v60  ;;  %7800 = vmatmul.mubr.bf16.gmra.mxu0 %v6754_v61  ;;  %v805_v48 = vrot.slane %v804_v36, 4  ;;  %v1541_v50 = vrot.slane %v1539_v38, 4  ;;  %v821_v51 = vshll.u32 %v593_v40, 16  ;;  %v825_v54 = vshrl.u32 %v593_v40, 16  ;;  %v1418_v25 = vld [vmem:[%s8307_s23 + $0x74] sm:$0x1] }
  0x5d   : > { %7832 = vmatpush3.bf16.msra.mxu1 %v8551_v28  ;;  %7880 = vmatpush3.bf16.msra.mxu0 %v8556_v29  ;;  %v786_v28 = vsel %vm8397_vm5, %v781_v23, %v785_v4  ;;  %v6755_v29 = vcombine.low %v1533_v15, %v1536_v27  ;;  %v800_v45 = vsel %vm8397_vm5, %v795_v41, %v799_v20  ;;  %v817_v53 = vrot.slane %v815_v47, 5  ;;  %v598_v39 = vld [vmem:[%s8307_s23 + $0x78] sm:$0xf]  ;;  %v599_v40 = vld [vmem:[%s8307_s23 + $0x7c] sm:$0xf] }
  0x5e   : > { %7833 = vmatprep.subr.bf16.mxu1 %v8186_v52  ;;  %7881 = vmatprep.subr.bf16.mxu0 %v8187_v3  ;;  %v6699_v35 = vcombine.low %v776_v22, %v786_v28  ;;  %v810_v58 = vsel %vm8397_vm5, %v805_v48, %v809_v37  ;;  %v1543_v59 = vsel %vm8378_vm4, %v1541_v50, %v1542_v42  ;;  %v823_v60 = vrot.slane %v821_v51, 5 }
  0x5f   : > { %7803 = vmatprep.mubr.bf16.mxu0 %v6755_v29  ;;  %v831_v61 = vshll.u32 %v594_v43, 16  ;;  %v6700_v0 = vcombine.low %v800_v45, %v810_v58  ;;  %v6756_v2 = vcombine.low %v1540_v49, %v1543_v59  ;;  %v827_v4 = vrot.slane %v825_v54, 4  ;;  %v600_v43 = vld [vmem:[%s8307_s23 + $0x80] sm:$0x1] }
  0x60   : > { %7755 = vmatprep.mubr.bf16.mxu1 %v6699_v35  ;;  %v6725_v9 = vrot.slane %v1413_v34, 9  ;;  %v1546_v10 = vrot.slane %v1414_v55, 5  ;;  %v1549_v12 = vrot.slane %v1415_v62, 5  ;;  %v836_v16 = vshrl.u32 %v595_v63, 16  ;;  %v1419_v34 = vld [vmem:[%s8307_s23 + $0x78] sm:$0xf] }
  0x61   : > { %7834 = vmatpush3.bf16.msra.mxu1 %v8186_v52  ;;  %7882 = vmatpush3.bf16.msra.mxu0 %v8187_v3  ;;  %v814_v52 = vrot.slane %v812_v44, 4  ;;  %v833_v8 = vrot.slane %v831_v61, 5  ;;  %v828_v15 = vor.u32 %v827_v4, %v823_v60  ;;  %v839_v18 = vshll.u32 %v595_v63, 16  ;;  %v1420_v55 = vld [vmem:[%s8307_s23 + $0x7c] sm:$0xf] }
  0x62   : > { %7835 = vmatprep.subr.bf16.mxu1 %v8188_v26  ;;  %7883 = vmatprep.subr.bf16.mxu0 %v8189_v17  ;;  %v1547_v21 = vsel %vm8378_vm4, %v6725_v9, %v1546_v10  ;;  %v1548_v22 = vrot.slane %v1546_v10, 4  ;;  %v845_v23 = vshll.u32 %v596_v5, 16  ;;  %v849_v24 = vshrl.u32 %v596_v5, 16  ;;  %v1421_v62 = vld [vmem:[%s8307_s23 + $0x80] sm:$0x1] }
  0x63   : > { %v818_v3 = vor.u32 %v817_v53, %v814_v52  ;;  %v829_v27 = vrot.slane %v828_v15, 4  ;;  %v838_v20 = vrot.slane %v836_v16, 4  ;;  %v841_v1 = vrot.slane %v839_v18, 5  ;;  %v601_v63 = vld [vmem:[%s8307_s23 + $0x84] sm:$0xf] }
  0x64   : > { %7756 = vmatmul.mubr.bf16.gmra.mxu1 %v6700_v0  ;;  %7804 = vmatmul.mubr.bf16.gmra.mxu0 %v6756_v2  ;;  %v1550_v11 = vsel %vm8378_vm4, %v1548_v22, %v1549_v12  ;;  %v851_v28 = vrot.slane %v849_v24, 4  ;;  %v855_v29 = vshll.u32 %v597_v6, 16  ;;  %v1553_v38 = vrot.slane %v1417_v19, 5  ;;  %v602_v5 = vld [vmem:[%s8307_s23 + $0x88] sm:$0xf] }
  0x65   : > { %7836 = vmatpush3.bf16.msra.mxu1 %v8188_v26  ;;  %7884 = vmatpush3.bf16.msra.mxu0 %v8189_v17  ;;  %v819_v14 = vrot.slane %v818_v3, 4  ;;  %v847_v17 = vrot.slane %v845_v23, 5  ;;  %v834_v30 = vsel %vm8397_vm5, %v829_v27, %v833_v8  ;;  %v6757_v31 = vcombine.low %v1547_v21, %v1550_v11  ;;  %v603_v6 = vld [vmem:[%s8307_s23 + $0x8c] sm:$0x1]  ;;  %v1423_v19 = vld [vmem:[%s8307_s23 + $0x88] sm:$0xf] }
  0x66   : > { %7837 = vmatprep.subr.bf16.mxu1 %v8605_v32  ;;  %7885 = vmatprep.subr.bf16.mxu0 %v8610_v33  ;;  %v857_v37 = vrot.slane %v855_v29, 5  ;;  %v1556_v42 = vrot.slane %v1418_v25, 5  ;;  %v860_v44 = vshrl.u32 %v598_v39, 16  ;;  %v863_v47 = vshll.u32 %v598_v39, 16  ;;  %v1424_v25 = vld [vmem:[%s8307_s23 + $0x8c] sm:$0x1] }
  0x67   : > { %v824_v26 = vsel %vm8397_vm5, %v819_v14, %v823_v60  ;;  %v852_v36 = vor.u32 %v851_v28, %v847_v17  ;;  %7807 = vmatprep.mubr.bf16.mxu0 %v6757_v31  ;;  %v1555_v50 = vrot.slane %v1553_v38, 4  ;;  %v869_v51 = vshll.u32 %v599_v40, 16  ;;  %v604_v39 = vld [vmem:[%s8307_s23 + $0x90] sm:$0xf] }
  0x68   : > { %v6701_v35 = vcombine.low %v824_v26, %v834_v30  ;;  %v862_v52 = vrot.slane %v860_v44, 4  ;;  %v865_v53 = vrot.slane %v863_v47, 5  ;;  %v873_v54 = vshrl.u32 %v599_v40, 16  ;;  %v605_v40 = vld [vmem:[%s8307_s23 + $0x94] sm:$0xf] }
  0x69   : > { %7838 = vmatpush3.bf16.msra.mxu1 %v8605_v32  ;;  %7886 = vmatpush3.bf16.msra.mxu0 %v8610_v33  ;;  %v842_v32 = vor.u32 %v841_v1, %v838_v20  ;;  %v6726_v33 = vrot.slane %v1416_v13, 9  ;;  %v853_v48 = vrot.slane %v852_v36, 4  ;;  %v1557_v59 = vsel %vm8378_vm4, %v1555_v50, %v1556_v42  ;;  %v1422_v13 = vld [vmem:[%s8307_s23 + $0x84] sm:$0xf] }
  0x6a   : > { %7919 = vmatprep.subr.bf16.mxu1 %v8624_v57  ;;  %7967 = vmatprep.subr.bf16.mxu0 %v8639_v7  ;;  %v871_v60 = vrot.slane %v869_v51, 5  ;;  %v879_v61 = vshll.u32 %v600_v43, 16  ;;  %v866_v3 = vor.u32 %v865_v53, %v862_v52  ;;  %v875_v4 = vrot.slane %v873_v54, 4  ;;  %v606_v43 = vld [vmem:[%s8307_s23 + $0x98] sm:$0x1] }
  0x6b   : > { %v843_v41 = vrot.slane %v842_v32, 4  ;;  %7759 = vmatprep.mubr.bf16.mxu1 %v6701_v35  ;;  %v1554_v49 = vsel %vm8378_vm4, %v6726_v33, %v1553_v38  ;;  %v858_v58 = vsel %vm8397_vm5, %v853_v48, %v857_v37  ;;  %v6727_v9 = vrot.slane %v1419_v34, 9  ;;  %v1425_v34 = vld [vmem:[%s8307_s23 + $0x90] sm:$0xf] }
  0x6c   : > { %v6758_v2 = vcombine.low %v1554_v49, %v1557_v59  ;;  %v881_v8 = vrot.slane %v879_v61, 5  ;;  %v1560_v10 = vrot.slane %v1420_v55, 5  ;;  %v1563_v12 = vrot.slane %v1421_v62, 5  ;;  %v1426_v55 = vld [vmem:[%s8307_s23 + $0x94] sm:$0xf] }
  0x6d   : > { %v848_v45 = vsel %vm8397_vm5, %v843_v41, %v847_v17  ;;  %v867_v14 = vrot.slane %v866_v3, 4  ;;  %v876_v15 = vor.u32 %v875_v4, %v871_v60  ;;  %v884_v16 = vshrl.u32 %v601_v63, 16  ;;  %v1427_v62 = vld [vmem:[%s8307_s23 + $0x98] sm:$0x1] }
  0x6e   : > { %v6702_v0 = vcombine.low %v848_v45, %v858_v58  ;;  %7808 = vmatmul.mubr.bf16.gmra.mxu0 %v6758_v2  ;;  %v887_v18 = vshll.u32 %v601_v63, 16  ;;  %v1561_v21 = vsel %vm8378_vm4, %v6727_v9, %v1560_v10  ;;  %v1562_v22 = vrot.slane %v1560_v10, 4  ;;  %v607_v63 = vld [vmem:[%s8307_s23 + $0x9c] sm:$0xf] }
  0x6f   : > { %v893_v23 = vshll.u32 %v602_v5, 16  ;;  %v897_v24 = vshrl.u32 %v602_v5, 16  ;;  %v872_v26 = vsel %vm8397_vm5, %v867_v14, %v871_v60  ;;  %v877_v27 = vrot.slane %v876_v15, 4  ;;  %v608_v5 = vld [vmem:[%s8307_s23 + $0xa0] sm:$0xf] }
  0x70   : > { %7760 = vmatmul.mubr.bf16.gmra.mxu1 %v6702_v0  ;;  %v886_v20 = vrot.slane %v884_v16, 4  ;;  %v889_v1 = vrot.slane %v887_v18, 5  ;;  %v1564_v11 = vsel %vm8378_vm4, %v1562_v22, %v1563_v12  ;;  %v903_v29 = vshll.u32 %v603_v6, 16  ;;  %v609_v6 = vld [vmem:[%s8307_s23 + $0xa4] sm:$0x1] }
  0x71   : > { %v895_v17 = vrot.slane %v893_v23, 5  ;;  %v899_v28 = vrot.slane %v897_v24, 4  ;;  %v882_v30 = vsel %vm8397_vm5, %v877_v27, %v881_v8  ;;  %v6759_v31 = vcombine.low %v1561_v21, %v1564_v11 }
  0x72   : > { %v890_v32 = vor.u32 %v889_v1, %v886_v20  ;;  %v6728_v33 = vrot.slane %v1422_v13, 9  ;;  %v6703_v35 = vcombine.low %v872_v26, %v882_v30  ;;  %v905_v37 = vrot.slane %v903_v29, 5  ;;  %v1428_v13 = vld [vmem:[%s8307_s23 + $0x9c] sm:$0xf] }
  0x73   : > { %v900_v36 = vor.u32 %v899_v28, %v895_v17  ;;  %v1567_v38 = vrot.slane %v1423_v19, 5  ;;  %7811 = vmatprep.mubr.bf16.mxu0 %v6759_v31  ;;  %v1570_v42 = vrot.slane %v1424_v25, 5  ;;  %v908_v44 = vshrl.u32 %v604_v39, 16  ;;  %v1429_v19 = vld [vmem:[%s8307_s23 + $0xa0] sm:$0xf] }
  0x74   : > { %v891_v41 = vrot.slane %v890_v32, 4  ;;  %v911_v47 = vshll.u32 %v604_v39, 16  ;;  %7763 = vmatprep.mubr.bf16.mxu1 %v6703_v35  ;;  %v917_v51 = vshll.u32 %v605_v40, 16  ;;  %v921_v54 = vshrl.u32 %v605_v40, 16  ;;  %v1430_v25 = vld [vmem:[%s8307_s23 + $0xa4] sm:$0x1] }
  0x75   : > { %v901_v48 = vrot.slane %v900_v36, 4  ;;  %v1568_v49 = vsel %vm8378_vm4, %v6728_v33, %v1567_v38  ;;  %v1569_v50 = vrot.slane %v1567_v38, 4  ;;  %v910_v52 = vrot.slane %v908_v44, 4  ;;  %v610_v39 = vld [vmem:[%s8307_s23 + $0xa8] sm:$0xf] }
  0x76   : > { %v896_v45 = vsel %vm8397_vm5, %v891_v41, %v895_v17  ;;  %v913_v53 = vrot.slane %v911_v47, 5  ;;  %v919_v60 = vrot.slane %v917_v51, 5  ;;  %v927_v61 = vshll.u32 %v606_v43, 16  ;;  %v611_v40 = vld [vmem:[%s8307_s23 + $0xac] sm:$0xf] }
  0x77   : > { %v906_v58 = vsel %vm8397_vm5, %v901_v48, %v905_v37  ;;  %v1571_v59 = vsel %vm8378_vm4, %v1569_v50, %v1570_v42  ;;  %v923_v4 = vrot.slane %v921_v54, 4  ;;  %v6729_v9 = vrot.slane %v1425_v34, 9  ;;  %v612_v43 = vld [vmem:[%s8307_s23 + $0xb0] sm:$0x1]  ;;  %v1431_v34 = vld [vmem:[%s8307_s23 + $0xa8] sm:$0xf] }
  0x78   : > { %v6704_v0 = vcombine.low %v896_v45, %v906_v58  ;;  %v6760_v2 = vcombine.low %v1568_v49, %v1571_v59  ;;  %v914_v3 = vor.u32 %v913_v53, %v910_v52  ;;  %v929_v8 = vrot.slane %v927_v61, 5 }
  0x79   : > { %v1574_v10 = vrot.slane %v1426_v55, 5  ;;  %v1577_v12 = vrot.slane %v1427_v62, 5  ;;  %v924_v15 = vor.u32 %v923_v4, %v919_v60  ;;  %v932_v16 = vshrl.u32 %v607_v63, 16  ;;  %v1432_v55 = vld [vmem:[%s8307_s23 + $0xac] sm:$0xf] }
  0x7a   : > { %7764 = vmatmul.mubr.bf16.gmra.mxu1 %v6704_v0  ;;  %7812 = vmatmul.mubr.bf16.gmra.mxu0 %v6760_v2  ;;  %v915_v14 = vrot.slane %v914_v3, 4  ;;  %v935_v18 = vshll.u32 %v607_v63, 16  ;;  %v941_v23 = vshll.u32 %v608_v5, 16  ;;  %v945_v24 = vshrl.u32 %v608_v5, 16  ;;  %v1433_v62 = vld [vmem:[%s8307_s23 + $0xb0] sm:$0x1] }
  0x7b   : > { %v1575_v21 = vsel %vm8378_vm4, %v6729_v9, %v1574_v10  ;;  %v1576_v22 = vrot.slane %v1574_v10, 4  ;;  %v925_v27 = vrot.slane %v924_v15, 4  ;;  %v934_v20 = vrot.slane %v932_v16, 4  ;;  %v613_v63 = vld [vmem:[%s8307_s23 + $0xb4] sm:$0xf] }
  0x7c   : > { %v920_v26 = vsel %vm8397_vm5, %v915_v14, %v919_v60  ;;  %v937_v1 = vrot.slane %v935_v18, 5  ;;  %v943_v17 = vrot.slane %v941_v23, 5  ;;  %v947_v28 = vrot.slane %v945_v24, 4  ;;  %v614_v5 = vld [vmem:[%s8307_s23 + $0xb8] sm:$0xf] }
  0x7d   : > { %v1578_v11 = vsel %vm8378_vm4, %v1576_v22, %v1577_v12  ;;  %v951_v29 = vshll.u32 %v609_v6, 16  ;;  %v930_v30 = vsel %vm8397_vm5, %v925_v27, %v929_v8  ;;  %v6730_v33 = vrot.slane %v1428_v13, 9  ;;  %v615_v6 = vld [vmem:[%s8307_s23 + $0xbc] sm:$0x1]  ;;  %v1434_v13 = vld [vmem:[%s8307_s23 + $0xb4] sm:$0xf] }
  0x7e   : > { %v6761_v31 = vcombine.low %v1575_v21, %v1578_v11  ;;  %v938_v32 = vor.u32 %v937_v1, %v934_v20  ;;  %v6705_v35 = vcombine.low %v920_v26, %v930_v30  ;;  %v948_v36 = vor.u32 %v947_v28, %v943_v17 }
  0x7f   : > { %v953_v37 = vrot.slane %v951_v29, 5  ;;  %v1581_v38 = vrot.slane %v1429_v19, 5  ;;  %v1584_v42 = vrot.slane %v1430_v25, 5  ;;  %v956_v44 = vshrl.u32 %v610_v39, 16  ;;  %v1435_v19 = vld [vmem:[%s8307_s23 + $0xb8] sm:$0xf] }
  0x80   : > { %7815 = vmatprep.mubr.bf16.mxu0 %v6761_v31  ;;  %v939_v41 = vrot.slane %v938_v32, 4  ;;  %v959_v47 = vshll.u32 %v610_v39, 16  ;;  %7767 = vmatprep.mubr.bf16.mxu1 %v6705_v35  ;;  %v949_v48 = vrot.slane %v948_v36, 4  ;;  %v965_v51 = vshll.u32 %v611_v40, 16  ;;  %v1436_v25 = vld [vmem:[%s8307_s23 + $0xbc] sm:$0x1] }
  0x81   : > { %v1582_v49 = vsel %vm8378_vm4, %v6730_v33, %v1581_v38  ;;  %v1583_v50 = vrot.slane %v1581_v38, 4  ;;  %v958_v52 = vrot.slane %v956_v44, 4  ;;  %v969_v54 = vshrl.u32 %v611_v40, 16 }
  0x82   : > { %v944_v45 = vsel %vm8397_vm5, %v939_v41, %v943_v17  ;;  %v961_v53 = vrot.slane %v959_v47, 5  ;;  %v954_v58 = vsel %vm8397_vm5, %v949_v48, %v953_v37  ;;  %v967_v60 = vrot.slane %v965_v51, 5  ;;  %v6845_v41 = vld [vmem:[%s8307_s23 + $0xc] sm:$0xf]  ;;  %v6847_v48 = vld [vmem:[%s8307_s23 + $0x14] sm:$0x1] }
  0x83   : > { %v1585_v59 = vsel %vm8378_vm4, %v1583_v50, %v1584_v42  ;;  %v975_v61 = vshll.u32 %v612_v43, 16  ;;  %v6706_v0 = vcombine.low %v944_v45, %v954_v58  ;;  %v971_v4 = vrot.slane %v969_v54, 4  ;;  %v6846_v42 = vld [vmem:[%s8307_s23 + $0x10] sm:$0xf] }
  0x84   : > { %v6762_v2 = vcombine.low %v1582_v49, %v1585_v59  ;;  %v962_v3 = vor.u32 %v961_v53, %v958_v52  ;;  %v6731_v9 = vrot.slane %v1431_v34, 9  ;;  %v1588_v10 = vrot.slane %v1432_v55, 5  ;;  %v8192_v51 = vld [vmem:[%s8307_s23 + $0xc] sm:$0xff]   ;;  %v6848_v59 = vld [vmem:[%s8307_s23 + $0x18] sm:$0xf] }
  0x85   : > { %v977_v8 = vrot.slane %v975_v61, 5  ;;  %v1591_v12 = vrot.slane %v1433_v62, 5  ;;  %7768 = vmatmul.mubr.bf16.gmra.mxu1 %v6706_v0  ;;  %v972_v15 = vor.u32 %v971_v4, %v967_v60  ;;  %v980_v16 = vshrl.u32 %v613_v63, 16  ;;  %v6849_v0 = vld [vmem:[%s8307_s23 + $0x1c] sm:$0xf] }
  0x86   : > { %7816 = vmatmul.mubr.bf16.gmra.mxu0 %v6762_v2  ;;  %v963_v14 = vrot.slane %v962_v3, 4  ;;  %v983_v18 = vshll.u32 %v613_v63, 16  ;;  %v1589_v21 = vsel %vm8378_vm4, %v6731_v9, %v1588_v10  ;;  %v1590_v22 = vrot.slane %v1588_v10, 4  ;;  %v6850_v2 = vld [vmem:[%s8307_s23 + $0x20] sm:$0x1] }
  0x87   : > { %v989_v23 = vshll.u32 %v614_v5, 16  ;;  %v993_v24 = vshrl.u32 %v614_v5, 16  ;;  %v973_v27 = vrot.slane %v972_v15, 4  ;;  %v982_v20 = vrot.slane %v980_v16, 4 }
  0x88   : > { %v968_v26 = vsel %vm8397_vm5, %v963_v14, %v967_v60  ;;  %v985_v1 = vrot.slane %v983_v18, 5  ;;  %v1592_v11 = vsel %vm8378_vm4, %v1590_v22, %v1591_v12  ;;  %v999_v29 = vshll.u32 %v615_v6, 16  ;;  %v8193_v18 = vld [vmem:[%s8307_s23 + $0x18] sm:$0xff]  }
  0x89   : > { %v991_v17 = vrot.slane %v989_v23, 5  ;;  %v995_v28 = vrot.slane %v993_v24, 4  ;;  %v978_v30 = vsel %vm8397_vm5, %v973_v27, %v977_v8  ;;  %v6763_v31 = vcombine.low %v1589_v21, %v1592_v11 }
  0x8a   : > { %v986_v32 = vor.u32 %v985_v1, %v982_v20  ;;  %v6732_v33 = vrot.slane %v1434_v13, 9  ;;  %v6707_v35 = vcombine.low %v968_v26, %v978_v30  ;;  %v1001_v37 = vrot.slane %v999_v29, 5  ;;  %v6852_v20 = vld [vmem:[%s8307_s23 + $0x28] sm:$0xf]  ;;  %v6853_v1 = vld [vmem:[%s8307_s23 + $0x2c] sm:$0x1] }
  0x8b   : > { %v996_v36 = vor.u32 %v995_v28, %v991_v17  ;;  %v1595_v38 = vrot.slane %v1435_v19, 5  ;;  %7819 = vmatprep.mubr.bf16.mxu0 %v6763_v31  ;;  %v1598_v40 = vrot.slane %v1436_v25, 5  ;;  %v2486_v49 = vshrl.u32 %v6845_v41, 16  ;;  %v6851_v25 = vld [vmem:[%s8307_s23 + $0x24] sm:$0xf] }
  0x8c   : > { %v987_v39 = vrot.slane %v986_v32, 4  ;;  %7771 = vmatprep.mubr.bf16.mxu1 %v6707_v35  ;;  %v2489_v34 = vshll.u32 %v6845_v41, 16  ;;  %v2495_v45 = vshll.u32 %v6846_v42, 16  ;;  %v2499_v52 = vshrl.u32 %v6846_v42, 16  ;;  %v8196_v30 = vld [vmem:[%s8307_s23 + $0x24] sm:$0xff]  }
  0x8d   : > { %v997_v43 = vrot.slane %v996_v36, 4  ;;  %v1596_v44 = vsel %vm8378_vm4, %v6732_v33, %v1595_v38  ;;  %v1597_v47 = vrot.slane %v1595_v38, 4  ;;  %v2488_v55 = vrot.slane %v2486_v49, 4  ;;  %v8198_v38 = vld [vmem:[%s10051_s1 + $0x170] sm:$0xff]  }
  0x8e   : > { %v992_v50 = vsel %vm8397_vm5, %v987_v39, %v991_v17  ;;  %v2505_v58 = vshll.u32 %v6847_v48, 16  ;;  %v2491_v62 = vrot.slane %v2489_v34, 5  ;;  %v2497_v63 = vrot.slane %v2495_v45, 5  ;;  %v6855_v49 = vld [vmem:[%s8307_s23 + $0x34] sm:$0xf]  ;;  %v8202_v45 = vld [vmem:[%s10051_s1 + $0x168] sm:$0xff]  }
  0x8f   : > { %v1002_v53 = vsel %vm8397_vm5, %v997_v43, %v1001_v37  ;;  %v1599_v54 = vsel %vm8378_vm4, %v1597_v47, %v1598_v40  ;;  %v2501_v3 = vrot.slane %v2499_v52, 4  ;;  %v2510_v5 = vshrl.u32 %v6848_v59, 16  ;;  %v6854_v43 = vld [vmem:[%s8307_s23 + $0x30] sm:$0xf] }
  0x90   : > { %v6708_v60 = vcombine.low %v992_v50, %v1002_v53  ;;  %v6764_v61 = vcombine.low %v1596_v44, %v1599_v54  ;;  %v2507_v4 = vrot.slane %v2505_v58, 5  ;;  %v2513_v6 = vshll.u32 %v6848_v59, 16  ;;  %v8199_v44 = vld [vmem:[%s10051_s1 + $0x1b0] sm:$0xff]   ;;  %v6856_v50 = vld [vmem:[%s8307_s23 + $0x38] sm:$0x1] }
  0x91   : > { %v2492_v8 = vor.u32 %v2491_v62, %v2488_v55  ;;  %v2519_v9 = vshll.u32 %v6849_v0, 16  ;;  %v2523_v10 = vshrl.u32 %v6849_v0, 16  ;;  %v2529_v12 = vshll.u32 %v6850_v2, 16  ;;  %v8197_v59 = vld [vmem:[%s8307_s23 + $0x30] sm:$0xff]  }
  0x92   : > { %7772 = vmatmul.mubr.bf16.gmra.mxu1 %v6708_v60  ;;  %7820 = vmatmul.mubr.bf16.gmra.mxu0 %v6764_v61  ;;  %v2502_v13 = vor.u32 %v2501_v3, %v2497_v63  ;;  %v2512_v14 = vrot.slane %v2510_v5, 4  ;;  %v2515_v15 = vrot.slane %v2513_v6, 5  ;;  %v2534_v11 = vshrl.u32 %v6851_v25, 16  ;;  %v8200_v3 = vld [vmem:[%s8307_s23 + $0x3c] sm:$0xff]   ;;  %v8203_v6 = vld [vmem:[%s10051_s1 + $0x1a8] sm:$0xff]  }
  0x93   : > { %7839 = vmatprep.mubr.bf16.mxu1 %v8192_v51  ;;  %v2493_v16 = vrot.slane %v2492_v8, 4  ;;  %v2521_v19 = vrot.slane %v2519_v9, 5  ;;  %v2525_v21 = vrot.slane %v2523_v10, 4  ;;  %v2531_v24 = vrot.slane %v2529_v12, 5  ;;  %v6857_v10 = vld [vmem:[%s8307_s23 + $0x3c] sm:$0xf] }
  0x94   : > { %v2503_v22 = vrot.slane %v2502_v13, 4  ;;  %v2516_v23 = vor.u32 %v2515_v15, %v2512_v14  ;;  %v2537_v17 = vshll.u32 %v6851_v25, 16  ;;  %v2543_v31 = vshll.u32 %v6852_v20, 16  ;;  %v6858_v12 = vld [vmem:[%s8307_s23 + $0x40] sm:$0xf] }
  0x95   : > { %v2498_v26 = vsel %vm8397_vm5, %v2493_v16, %v2497_v63  ;;  %v2526_v27 = vor.u32 %v2525_v21, %v2521_v19  ;;  %v2547_v32 = vshrl.u32 %v6852_v20, 16  ;;  %v2536_v36 = vrot.slane %v2534_v11, 4  ;;  %v6859_v16 = vld [vmem:[%s8307_s23 + $0x44] sm:$0x1]  ;;  %v6861_v20 = vld [vmem:[%s8307_s23 + $0x4c] sm:$0xf] }
  0x96   : > { %v2508_v28 = vsel %vm8397_vm5, %v2503_v22, %v2507_v4  ;;  %v2517_v29 = vrot.slane %v2516_v23, 4  ;;  %v2539_v37 = vrot.slane %v2537_v17, 5  ;;  %v2545_v40 = vrot.slane %v2543_v31, 5  ;;  %v8201_v31 = vld [vmem:[%s8307_s23 + $0x48] sm:$0xff]  }
  0x97   : > { %v6909_v33 = vcombine.low %v2498_v26, %v2508_v28  ;;  %v2527_v35 = vrot.slane %v2526_v27, 4  ;;  %v2549_v41 = vrot.slane %v2547_v32, 4  ;;  %v2553_v42 = vshll.u32 %v6853_v1, 16  ;;  %v6860_v27 = vld [vmem:[%s8307_s23 + $0x48] sm:$0xf] }
  0x98   : > { %v2522_v39 = vsel %vm8397_vm5, %v2517_v29, %v2521_v19  ;;  %v2540_v48 = vor.u32 %v2539_v37, %v2536_v36  ;;  %v2558_v51 = vshrl.u32 %v6854_v43, 16  ;;  %v2561_v34 = vshll.u32 %v6854_v43, 16  ;;  %v6862_v29 = vld [vmem:[%s8307_s23 + $0x50] sm:$0x1]  ;;  %v8207_v36 = vld [vmem:[%s10051_s1 + $0x1a0] sm:$0xff]  }
  0x99   : > { %7887 = vmatprep.mubr.bf16.mxu0 %v6909_v33  ;;  %v2532_v47 = vsel %vm8397_vm5, %v2527_v35, %v2531_v24  ;;  %v2550_v53 = vor.u32 %v2549_v41, %v2545_v40  ;;  %v2555_v54 = vrot.slane %v2553_v42, 5  ;;  %v2567_v55 = vshll.u32 %v6855_v49, 16  ;;  %v8210_v41 = vld [vmem:[%s10051_s1 + $0x158] sm:$0xff]  }
  0x9a   : > { %7840 = vmatmul.mubr.bf16.vlgmr.msra.gmra.mxu1 %v8193_v18  ;;  %v6910_v52 = vcombine.low %v2522_v39, %v2532_v47  ;;  %v2541_v58 = vrot.slane %v2540_v48, 4  ;;  %v2560_v60 = vrot.slane %v2558_v51, 4  ;;  %v2563_v61 = vrot.slane %v2561_v34, 5  ;;  %v8204_v51 = vld [vmem:[%s8307_s23 + $0x54] sm:$0xff]  }
  0x9b   : > { %7920 = vmatpush3.bf16.msra.mxu1 %v8624_v57  ;;  %7843 = vmatprep.mubr.bf16.mxu1 %v8196_v30  ;;  %v2571_v62 = vshrl.u32 %v6855_v49, 16  ;;  %v2551_v63 = vrot.slane %v2550_v53, 4  ;;  %v2569_v0 = vrot.slane %v2567_v55, 5  ;;  %v2577_v2 = vshll.u32 %v6856_v50, 16 }
  0x9c   : > { %7921 = vmatprep.subr.bf16.mxu1 %v8198_v38  ;;  %7888 = vmatmul.mubr.bf16.vlgmr.msra.gmra.mxu0 %v6910_v52  ;;  %v2546_v57 = vsel %vm8397_vm5, %v2541_v58, %v2545_v40  ;;  %v2564_v4 = vor.u32 %v2563_v61, %v2560_v60  ;;  %v2582_v18 = vshrl.u32 %v6857_v10, 16  ;;  %v2585_v19 = vshll.u32 %v6857_v10, 16  ;;  %v6863_v52 = vld [vmem:[%s8307_s23 + $0x54] sm:$0xf]  ;;  %v6864_v58 = vld [vmem:[%s8307_s23 + $0x58] sm:$0xf] }
  0x9d   : > { %7968 = vmatpush3.bf16.msra.mxu0 %v8639_v7  ;;  %v2573_v5 = vrot.slane %v2571_v62, 4  ;;  %v2556_v8 = vsel %vm8397_vm5, %v2551_v63, %v2555_v54  ;;  %v2579_v9 = vrot.slane %v2577_v2, 5  ;;  %v8206_v7 = vld [vmem:[%s10051_s1 + $0x160] sm:$0xff]   ;;  %v2591_v21 = vshll.u32 %v6858_v12, 16  ;;  %v8211_v61 = vld [vmem:[%s10051_s1 + $0x198] sm:$0xff]  }
  0x9e   : > { %7969 = vmatprep.subr.bf16.mxu0 %v8199_v44  ;;  %v6911_v13 = vcombine.low %v2546_v57, %v2556_v8  ;;  %v2565_v14 = vrot.slane %v2564_v4, 4  ;;  %v2595_v22 = vshrl.u32 %v6858_v12, 16  ;;  %v2601_v23 = vshll.u32 %v6859_v16, 16  ;;  %v8205_v12 = vld [vmem:[%s8307_s23 + $0x60] sm:$0xff]  }
  0x9f   : > { %7922 = vmatpush3.bf16.msra.mxu1 %v8198_v38  ;;  %v2574_v15 = vor.u32 %v2573_v5, %v2569_v0  ;;  %v2584_v26 = vrot.slane %v2582_v18, 4  ;;  %v2587_v1 = vrot.slane %v2585_v19, 5  ;;  %v2593_v11 = vrot.slane %v2591_v21, 5  ;;  %v6868_v18 = vld [vmem:[%s8307_s23 + $0x68] sm:$0x1]  ;;  %v8208_v21 = vld [vmem:[%s8307_s23 + $0x6c] sm:$0xff]  }
  0xa0   : > { %7923 = vmatprep.subr.bf16.mxu1 %v8202_v45  ;;  %7891 = vmatprep.mubr.bf16.mxu0 %v6911_v13  ;;  %v2570_v24 = vsel %vm8397_vm5, %v2565_v14, %v2569_v0  ;;  %v2597_v17 = vrot.slane %v2595_v22, 4  ;;  %v2603_v28 = vrot.slane %v2601_v23, 5  ;;  %v2606_v32 = vshrl.u32 %v6860_v27, 16  ;;  %v6867_v13 = vld [vmem:[%s8307_s23 + $0x64] sm:$0xf]  ;;  %v8215_v22 = vld [vmem:[%s10051_s1 + $0x190] sm:$0xff]  }
  0xa1   : > { %v2575_v25 = vrot.slane %v2574_v15, 4  ;;  %7970 = vmatpush3.bf16.msra.mxu0 %v8199_v44  ;;  %v2609_v33 = vshll.u32 %v6860_v27, 16  ;;  %v2615_v35 = vshll.u32 %v6861_v20, 16  ;;  %v2588_v38 = vor.u32 %v2587_v1, %v2584_v26 }
  0xa2   : > { %7844 = vmatmul.mubr.bf16.gmra.mxu1 %v8197_v59  ;;  %7971 = vmatprep.subr.bf16.mxu0 %v8203_v6  ;;  %v2598_v39 = vor.u32 %v2597_v17, %v2593_v11  ;;  %v2619_v40 = vshrl.u32 %v6861_v20, 16  ;;  %v2608_v42 = vrot.slane %v2606_v32, 4  ;;  %v2625_v47 = vshll.u32 %v6862_v29, 16  ;;  %v6865_v59 = vld [vmem:[%s8307_s23 + $0x5c] sm:$0x1]  ;;  %v8218_v17 = vld [vmem:[%s10051_s1 + $0x148] sm:$0xff]  }
  0xa3   : > { %7847 = vmatprep.mubr.bf16.mxu1 %v8200_v3  ;;  %v2580_v30 = vsel %vm8397_vm5, %v2575_v25, %v2579_v9  ;;  %7924 = vmatpush3.bf16.msra.mxu1 %v8202_v45  ;;  %v2611_v43 = vrot.slane %v2609_v33, 5  ;;  %v2617_v44 = vrot.slane %v2615_v35, 5  ;;  %v2589_v48 = vrot.slane %v2588_v38, 4  ;;  %v8214_v3 = vld [vmem:[%s10051_s1 + $0x150] sm:$0xff]  }
  0xa4   : > { %v6912_v37 = vcombine.low %v2570_v24, %v2580_v30  ;;  %7925 = vmatprep.subr.bf16.mxu1 %v8206_v7  ;;  %v2599_v49 = vrot.slane %v2598_v39, 4  ;;  %v2621_v50 = vrot.slane %v2619_v40, 4  ;;  %v2627_v45 = vrot.slane %v2625_v47, 5  ;;  %v6869_v39 = vld [vmem:[%s8307_s23 + $0x6c] sm:$0xf] }
  0xa5   : > { %v2612_v34 = vor.u32 %v2611_v43, %v2608_v42  ;;  %7972 = vmatpush3.bf16.msra.mxu0 %v8203_v6  ;;  %v2594_v53 = vsel %vm8397_vm5, %v2589_v48, %v2593_v11  ;;  %v2630_v60 = vshrl.u32 %v6863_v52, 16  ;;  %v2633_v0 = vshll.u32 %v6863_v52, 16  ;;  %v6870_v40 = vld [vmem:[%s8307_s23 + $0x70] sm:$0xf]  ;;  %v6871_v43 = vld [vmem:[%s8307_s23 + $0x74] sm:$0x1] }
  0xa6   : > { %7892 = vmatmul.mubr.bf16.gmra.mxu0 %v6912_v37  ;;  %v2604_v54 = vsel %vm8397_vm5, %v2599_v49, %v2603_v28  ;;  %v2622_v55 = vor.u32 %v2621_v50, %v2617_v44  ;;  %7973 = vmatprep.subr.bf16.mxu0 %v8207_v36  ;;  %v2639_v2 = vshll.u32 %v6864_v58, 16  ;;  %v2643_v5 = vshrl.u32 %v6864_v58, 16  ;;  %v8212_v58 = vld [vmem:[%s8307_s23 + $0x84] sm:$0xff]  }
  0xa7   : > { %7926 = vmatpush3.bf16.msra.mxu1 %v8206_v7  ;;  %v6913_v62 = vcombine.low %v2594_v53, %v2604_v54  ;;  %v2613_v63 = vrot.slane %v2612_v34, 4  ;;  %v2632_v4 = vrot.slane %v2630_v60, 4  ;;  %v2649_v6 = vshll.u32 %v6865_v59, 16  ;;  %v6866_v7 = vld [vmem:[%s8307_s23 + $0x60] sm:$0xf]  ;;  %v8209_v34 = vld [vmem:[%s8307_s23 + $0x78] sm:$0xff]  }
  0xa8   : > { %7927 = vmatprep.subr.bf16.mxu1 %v8210_v41  ;;  %v2623_v57 = vrot.slane %v2622_v55, 4  ;;  %v2635_v9 = vrot.slane %v2633_v0, 5  ;;  %v2641_v10 = vrot.slane %v2639_v2, 5  ;;  %v2645_v15 = vrot.slane %v2643_v5, 4  ;;  %v6872_v55 = vld [vmem:[%s8307_s23 + $0x78] sm:$0xf] }
  0xa9   : > { %7895 = vmatprep.mubr.bf16.mxu0 %v6913_v62  ;;  %v2618_v8 = vsel %vm8397_vm5, %v2613_v63, %v2617_v44  ;;  %7974 = vmatpush3.bf16.msra.mxu0 %v8207_v36  ;;  %v2651_v16 = vrot.slane %v2649_v6, 5  ;;  %v2654_v19 = vshrl.u32 %v6866_v7, 16  ;;  %v2657_v25 = vshll.u32 %v6866_v7, 16  ;;  %v8222_v36 = vld [vmem:[%s10051_s1 + $0x140] sm:$0xff]   ;;  %v6873_v63 = vld [vmem:[%s8307_s23 + $0x7c] sm:$0xf] }
  0xaa   : > { %7848 = vmatmul.mubr.bf16.gmra.mxu1 %v8201_v31  ;;  %v2628_v14 = vsel %vm8397_vm5, %v2623_v57, %v2627_v45  ;;  %7975 = vmatprep.subr.bf16.mxu0 %v8211_v61  ;;  %v2636_v24 = vor.u32 %v2635_v9, %v2632_v4  ;;  %v2663_v26 = vshll.u32 %v6867_v13, 16  ;;  %v2646_v27 = vor.u32 %v2645_v15, %v2641_v10  ;;  %v8219_v31 = vld [vmem:[%s10051_s1 + $0x188] sm:$0xff]   ;;  %v8223_v59 = vld [vmem:[%s10051_s1 + $0x180] sm:$0xff]   ;;  %v8866_v2 = vld [vmem:[%s10051_s1 + $0x1f8] sm:$0xff]  }
  0xab   : > { %7851 = vmatprep.mubr.bf16.mxu1 %v8204_v51  ;;  %7928 = vmatpush3.bf16.msra.mxu1 %v8210_v41  ;;  %v6914_v23 = vcombine.low %v2618_v8, %v2628_v14  ;;  %v2656_v20 = vrot.slane %v2654_v19, 4  ;;  %v2667_v1 = vshrl.u32 %v6867_v13, 16  ;;  %v2673_v11 = vshll.u32 %v6868_v18, 16  ;;  %v6874_v0 = vld [vmem:[%s8307_s23 + $0x80] sm:$0x1]  ;;  %v8873_v19 = vld [vmem:[%s10051_s1 + $0x238] sm:$0xff]  }
  0xac   : > { %7929 = vmatprep.subr.bf16.mxu1 %v8214_v3  ;;  %v2637_v28 = vrot.slane %v2636_v24, 4  ;;  %v2659_v29 = vrot.slane %v2657_v25, 5  ;;  %v2665_v30 = vrot.slane %v2663_v26, 5  ;;  %v2647_v32 = vrot.slane %v2646_v27, 4  ;;  %v6875_v24 = vld [vmem:[%s8307_s23 + $0x84] sm:$0xf] }
  0xad   : > { %v2669_v33 = vrot.slane %v2667_v1, 4  ;;  %v2675_v35 = vrot.slane %v2673_v11, 5  ;;  %7976 = vmatpush3.bf16.msra.mxu0 %v8211_v61  ;;  %v2678_v44 = vshrl.u32 %v6869_v39, 16  ;;  %v2681_v47 = vshll.u32 %v6869_v39, 16  ;;  %v6876_v25 = vld [vmem:[%s8307_s23 + $0x88] sm:$0xf] }
  0xae   : > { %7896 = vmatmul.mubr.bf16.gmra.mxu0 %v6914_v23  ;;  %v2642_v37 = vsel %vm8397_vm5, %v2637_v28, %v2641_v10  ;;  %v2660_v38 = vor.u32 %v2659_v29, %v2656_v20  ;;  %7977 = vmatprep.subr.bf16.mxu0 %v8215_v22  ;;  %v2652_v41 = vsel %vm8397_vm5, %v2647_v32, %v2651_v16  ;;  %v2687_v50 = vshll.u32 %v6870_v40, 16  ;;  %v6877_v20 = vld [vmem:[%s8307_s23 + $0x8c] sm:$0x1]  ;;  %v6878_v32 = vld [vmem:[%s8307_s23 + $0x90] sm:$0xf] }
  0xaf   : > { %7930 = vmatpush3.bf16.msra.mxu1 %v8214_v3  ;;  %v2670_v42 = vor.u32 %v2669_v33, %v2665_v30  ;;  %v6915_v48 = vcombine.low %v2642_v37, %v2652_v41  ;;  %v2691_v51 = vshrl.u32 %v6870_v40, 16  ;;  %v2680_v52 = vrot.slane %v2678_v44, 4  ;;  %v8216_v33 = vld [vmem:[%s8307_s23 + $0x9c] sm:$0xff]   ;;  %v6879_v39 = vld [vmem:[%s8307_s23 + $0x94] sm:$0xf] }
  0xb0   : > { %7931 = vmatprep.subr.bf16.mxu1 %v8218_v17  ;;  %v2661_v49 = vrot.slane %v2660_v38, 4  ;;  %v2683_v53 = vrot.slane %v2681_v47, 5  ;;  %v2697_v54 = vshll.u32 %v6871_v43, 16  ;;  %v2689_v61 = vrot.slane %v2687_v50, 5  ;;  %v6880_v43 = vld [vmem:[%s8307_s23 + $0x98] sm:$0x1] }
  0xb1   : > { %v2671_v45 = vrot.slane %v2670_v42, 4  ;;  %7978 = vmatpush3.bf16.msra.mxu0 %v8215_v22  ;;  %7899 = vmatprep.mubr.bf16.mxu0 %v6915_v48  ;;  %v2693_v62 = vrot.slane %v2691_v51, 4  ;;  %v2702_v5 = vshrl.u32 %v6872_v55, 16  ;;  %v2705_v9 = vshll.u32 %v6872_v55, 16 }
  0xb2   : > { %7852 = vmatmul.mubr.bf16.gmra.mxu1 %v8205_v12  ;;  %v2666_v60 = vsel %vm8397_vm5, %v2661_v49, %v2665_v30  ;;  %7979 = vmatprep.subr.bf16.mxu0 %v8219_v31  ;;  %v2684_v57 = vor.u32 %v2683_v53, %v2680_v52  ;;  %v2699_v4 = vrot.slane %v2697_v54, 5  ;;  %v2711_v10 = vshll.u32 %v6873_v63, 16 }
  0xb3   : > { %7855 = vmatprep.mubr.bf16.mxu1 %v8208_v21  ;;  %7932 = vmatpush3.bf16.msra.mxu1 %v8218_v17  ;;  %v2676_v3 = vsel %vm8397_vm5, %v2671_v45, %v2675_v35  ;;  %v2694_v8 = vor.u32 %v2693_v62, %v2689_v61  ;;  %v2704_v7 = vrot.slane %v2702_v5, 4  ;;  %v2715_v13 = vshrl.u32 %v6873_v63, 16  ;;  %v8213_v17 = vld [vmem:[%s8307_s23 + $0x90] sm:$0xff]  }
  0xb4   : > { %7933 = vmatprep.subr.bf16.mxu1 %v8222_v36  ;;  %v6916_v6 = vcombine.low %v2666_v60, %v2676_v3  ;;  %v2685_v12 = vrot.slane %v2684_v57, 4  ;;  %v2721_v14 = vshll.u32 %v6874_v0, 16  ;;  %v2707_v16 = vrot.slane %v2705_v9, 5  ;;  %v6881_v3 = vld [vmem:[%s8307_s23 + $0x9c] sm:$0xf] }
  0xb5   : > { %7980 = vmatpush3.bf16.msra.mxu0 %v8219_v31  ;;  %v2695_v15 = vrot.slane %v2694_v8, 4  ;;  %v2713_v18 = vrot.slane %v2711_v10, 5  ;;  %v2717_v22 = vrot.slane %v2715_v13, 4  ;;  %v2726_v1 = vshrl.u32 %v6875_v24, 16  ;;  %v6882_v57 = vld [vmem:[%s8307_s23 + $0xa0] sm:$0xf] }
  0xb6   : > { %7900 = vmatmul.mubr.bf16.gmra.mxu0 %v6916_v6  ;;  %v2690_v21 = vsel %vm8397_vm5, %v2685_v12, %v2689_v61  ;;  %v2723_v23 = vrot.slane %v2721_v14, 5  ;;  %7981 = vmatprep.subr.bf16.mxu0 %v8223_v59  ;;  %v2708_v27 = vor.u32 %v2707_v16, %v2704_v7  ;;  %v2729_v11 = vshll.u32 %v6875_v24, 16  ;;  %v6883_v8 = vld [vmem:[%s8307_s23 + $0xa4] sm:$0x1]  ;;  %v8220_v12 = vld [vmem:[%s8307_s23 + $0xb4] sm:$0xff]  }
  0xb7   : > { %7934 = vmatpush3.bf16.msra.mxu1 %v8222_v36  ;;  %v2700_v26 = vsel %vm8397_vm5, %v2695_v15, %v2699_v4  ;;  %v2718_v29 = vor.u32 %v2717_v22, %v2713_v18  ;;  %v2735_v30 = vshll.u32 %v6876_v25, 16  ;;  %v2739_v31 = vshrl.u32 %v6876_v25, 16  ;;  %v8217_v4 = vld [vmem:[%s8307_s23 + $0xa8] sm:$0xff]  }
  0xb8   : > { %8015 = vmatprep.subr.bf16.mxu1 %v8866_v2  ;;  %v6917_v28 = vcombine.low %v2690_v21, %v2700_v26  ;;  %v2709_v35 = vrot.slane %v2708_v27, 4  ;;  %v2728_v36 = vrot.slane %v2726_v1, 4  ;;  %v2731_v37 = vrot.slane %v2729_v11, 5  ;;  %v6885_v27 = vld [vmem:[%s8307_s23 + $0xac] sm:$0xf] }
  0xb9   : > { %7982 = vmatpush3.bf16.msra.mxu0 %v8223_v59  ;;  %v2745_v38 = vshll.u32 %v6877_v20, 16  ;;  %v2719_v40 = vrot.slane %v2718_v29, 4  ;;  %v2737_v41 = vrot.slane %v2735_v30, 5  ;;  %v2741_v42 = vrot.slane %v2739_v31, 4  ;;  %v6886_v20 = vld [vmem:[%s8307_s23 + $0xb0] sm:$0x1] }
  0xba   : > { %7856 = vmatmul.mubr.bf16.gmra.mxu1 %v8209_v34  ;;  %8063 = vmatprep.subr.bf16.mxu0 %v8873_v19  ;;  %v2750_v44 = vshrl.u32 %v6878_v32, 16  ;;  %v2714_v47 = vsel %vm8397_vm5, %v2709_v35, %v2713_v18  ;;  %v2732_v48 = vor.u32 %v2731_v37, %v2728_v36  ;;  %v2753_v50 = vshll.u32 %v6878_v32, 16 }
  0xbb   : > { %7859 = vmatprep.mubr.bf16.mxu1 %v8212_v58  ;;  %7903 = vmatprep.mubr.bf16.mxu0 %v6917_v28  ;;  %v2747_v49 = vrot.slane %v2745_v38, 5  ;;  %v2724_v51 = vsel %vm8397_vm5, %v2719_v40, %v2723_v23  ;;  %v2742_v34 = vor.u32 %v2741_v42, %v2737_v41  ;;  %v2759_v52 = vshll.u32 %v6879_v39, 16  ;;  %v6884_v23 = vld [vmem:[%s8307_s23 + $0xa8] sm:$0xf] }
  0xbc   : > { %v2752_v45 = vrot.slane %v2750_v44, 4  ;;  %v6918_v53 = vcombine.low %v2714_v47, %v2724_v51  ;;  %v2733_v54 = vrot.slane %v2732_v48, 4  ;;  %v2755_v55 = vrot.slane %v2753_v50, 5  ;;  %v6887_v44 = vld [vmem:[%s8307_s23 + $0xb4] sm:$0xf]  ;;  %v8221_v47 = vld [vmem:[%s8307_s23 + $0xc0] sm:$0xff]  }
  0xbd   : > { %v2763_v58 = vshrl.u32 %v6879_v39, 16  ;;  %v2743_v59 = vrot.slane %v2742_v34, 4  ;;  %v2761_v60 = vrot.slane %v2759_v52, 5  ;;  %v2769_v61 = vshll.u32 %v6880_v43, 16  ;;  %v6888_v51 = vld [vmem:[%s8307_s23 + $0xb8] sm:$0xf] }
  0xbe   : > { %7904 = vmatmul.mubr.bf16.gmra.mxu0 %v6918_v53  ;;  %v2738_v62 = vsel %vm8397_vm5, %v2733_v54, %v2737_v41  ;;  %v2756_v63 = vor.u32 %v2755_v55, %v2752_v45  ;;  %v2774_v9 = vshrl.u32 %v6881_v3, 16  ;;  %v2777_v10 = vshll.u32 %v6881_v3, 16  ;;  %v6889_v34 = vld [vmem:[%s8307_s23 + $0xbc] sm:$0x1] }
  0xbf   : > { %v2765_v0 = vrot.slane %v2763_v58, 4  ;;  %v2748_v5 = vsel %vm8397_vm5, %v2743_v59, %v2747_v49  ;;  %v2771_v6 = vrot.slane %v2769_v61, 5  ;;  %v2783_v15 = vshll.u32 %v6882_v57, 16 }
  0xc0   : > { %v6919_v7 = vcombine.low %v2738_v62, %v2748_v5  ;;  %v2757_v13 = vrot.slane %v2756_v63, 4  ;;  %v2776_v16 = vrot.slane %v2774_v9, 4  ;;  %v2779_v18 = vrot.slane %v2777_v10, 5 }
  0xc1   : > { %v2766_v14 = vor.u32 %v2765_v0, %v2761_v60  ;;  %v2787_v21 = vshrl.u32 %v6882_v57, 16  ;;  %v2793_v22 = vshll.u32 %v6883_v8, 16  ;;  %v2785_v26 = vrot.slane %v2783_v15, 5  ;;  %v6890_v57 = vld [vmem:[%s8307_s23 + $0xc0] sm:$0xf] }
  0xc2   : > { %7860 = vmatmul.mubr.bf16.gmra.mxu1 %v8213_v17  ;;  %7907 = vmatprep.mubr.bf16.mxu0 %v6919_v7  ;;  %v2762_v24 = vsel %vm8397_vm5, %v2757_v13, %v2761_v60  ;;  %v2780_v1 = vor.u32 %v2779_v18, %v2776_v16  ;;  %v2798_v28 = vshrl.u32 %v6884_v23, 16  ;;  %v2801_v30 = vshll.u32 %v6884_v23, 16  ;;  %v6892_v8 = vld [vmem:[%s8307_s23 + $0xc8] sm:$0x1] }
  0xc3   : > { %7863 = vmatprep.mubr.bf16.mxu1 %v8216_v33  ;;  %v2767_v25 = vrot.slane %v2766_v14, 4  ;;  %v2789_v11 = vrot.slane %v2787_v21, 4  ;;  %v2795_v17 = vrot.slane %v2793_v22, 5  ;;  %v2807_v31 = vshll.u32 %v6885_v27, 16 }
  0xc4   : > { %v2811_v32 = vshrl.u32 %v6885_v27, 16  ;;  %v2781_v35 = vrot.slane %v2780_v1, 4  ;;  %v2800_v37 = vrot.slane %v2798_v28, 4  ;;  %v2803_v38 = vrot.slane %v2801_v30, 5  ;;  %v6934_v1 = vld [vmem:[%s8307_s23 + $0x10] sm:$0xf] }
  0xc5   : > { %v2772_v29 = vsel %vm8397_vm5, %v2767_v25, %v2771_v6  ;;  %v2790_v36 = vor.u32 %v2789_v11, %v2785_v26  ;;  %v2809_v39 = vrot.slane %v2807_v31, 5  ;;  %v2817_v41 = vshll.u32 %v6886_v20, 16  ;;  %v6891_v6 = vld [vmem:[%s8307_s23 + $0xc4] sm:$0xf]  ;;  %v6933_v20 = vld [vmem:[%s8307_s23 + $0xc] sm:$0xf] }
  0xc6   : > { %v6920_v33 = vcombine.low %v2762_v24, %v2772_v29  ;;  %v2813_v40 = vrot.slane %v2811_v32, 4  ;;  %v2786_v42 = vsel %vm8397_vm5, %v2781_v35, %v2785_v26  ;;  %v2804_v48 = vor.u32 %v2803_v38, %v2800_v37  ;;  %v6935_v29 = vld [vmem:[%s8307_s23 + $0x14] sm:$0x1]  ;;  %v6937_v38 = vld [vmem:[%s8307_s23 + $0x1c] sm:$0xf] }
  0xc7   : > { %v2791_v43 = vrot.slane %v2790_v36, 4  ;;  %v2819_v50 = vrot.slane %v2817_v41, 5  ;;  %v2822_v45 = vshrl.u32 %v6887_v44, 16  ;;  %v2825_v53 = vshll.u32 %v6887_v44, 16  ;;  %v6936_v36 = vld [vmem:[%s8307_s23 + $0x18] sm:$0xf] }
  0xc8   : > { %7908 = vmatmul.mubr.bf16.gmra.mxu0 %v6920_v33  ;;  %v2814_v49 = vor.u32 %v2813_v40, %v2809_v39  ;;  %v2831_v54 = vshll.u32 %v6888_v51, 16  ;;  %v2835_v55 = vshrl.u32 %v6888_v51, 16  ;;  %v2805_v59 = vrot.slane %v2804_v48, 4 }
  0xc9   : > { %v2796_v52 = vsel %vm8397_vm5, %v2791_v43, %v2795_v17  ;;  %v2824_v61 = vrot.slane %v2822_v45, 4  ;;  %v2827_v62 = vrot.slane %v2825_v53, 5  ;;  %v2841_v3 = vshll.u32 %v6889_v34, 16  ;;  %v6939_v34 = vld [vmem:[%s8307_s23 + $0x24] sm:$0xf] }
  0xca   : > { %7864 = vmatmul.mubr.bf16.gmra.mxu1 %v8217_v4  ;;  %v6921_v58 = vcombine.low %v2786_v42, %v2796_v52  ;;  %v2815_v60 = vrot.slane %v2814_v49, 4  ;;  %v2833_v63 = vrot.slane %v2831_v54, 5  ;;  %v2837_v0 = vrot.slane %v2835_v55, 4  ;;  %v6940_v55 = vld [vmem:[%s8307_s23 + $0x28] sm:$0xf] }
  0xcb   : > { %7867 = vmatprep.mubr.bf16.mxu1 %v8220_v12  ;;  %v2810_v4 = vsel %vm8397_vm5, %v2805_v59, %v2809_v39  ;;  %v2846_v9 = vshrl.u32 %v6890_v57, 16  ;;  %v2849_v10 = vshll.u32 %v6890_v57, 16  ;;  %v2828_v7 = vor.u32 %v2827_v62, %v2824_v61  ;;  %v6938_v39 = vld [vmem:[%s8307_s23 + $0x20] sm:$0x1]  ;;  %v8230_v62 = vld [vmem:[%s10051_s1 + $0x1f0] sm:$0xff]  }
  0xcc   : > { %7911 = vmatprep.mubr.bf16.mxu0 %v6921_v58  ;;  %v2820_v5 = vsel %vm8397_vm5, %v2815_v60, %v2819_v50  ;;  %v2838_v13 = vor.u32 %v2837_v0, %v2833_v63  ;;  %v2843_v14 = vrot.slane %v2841_v3, 5  ;;  %v2855_v18 = vshll.u32 %v6891_v6, 16  ;;  %v6941_v58 = vld [vmem:[%s8307_s23 + $0x2c] sm:$0x1]  ;;  %v6942_v0 = vld [vmem:[%s8307_s23 + $0x30] sm:$0xf] }
  0xcd   : > { %v6922_v12 = vcombine.low %v2810_v4, %v2820_v5  ;;  %v2848_v15 = vrot.slane %v2846_v9, 4  ;;  %v2851_v16 = vrot.slane %v2849_v10, 5  ;;  %v2859_v21 = vshrl.u32 %v6891_v6, 16  ;;  %v6943_v3 = vld [vmem:[%s8307_s23 + $0x34] sm:$0xf]  ;;  %v8225_v9 = vld [vmem:[%s8307_s23 + $0x24] sm:$0xff]  }
  0xce   : > { %v2829_v22 = vrot.slane %v2828_v7, 4  ;;  %v2839_v23 = vrot.slane %v2838_v13, 4  ;;  %v2865_v24 = vshll.u32 %v6892_v8, 16  ;;  %v2857_v26 = vrot.slane %v2855_v18, 5  ;;  %v6944_v6 = vld [vmem:[%s8307_s23 + $0x38] sm:$0x1] }
  0xcf   : > { %v2852_v25 = vor.u32 %v2851_v16, %v2848_v15  ;;  %v2861_v27 = vrot.slane %v2859_v21, 4  ;;  %v6981_v30 = vrot.slane %v6933_v20, 9  ;;  %v3353_v35 = vrot.slane %v6934_v1, 5  ;;  %v8228_v13 = vld [vmem:[%s8307_s23 + $0x30] sm:$0xff]   ;;  %v6945_v21 = vld [vmem:[%s8307_s23 + $0x3c] sm:$0xf] }
  0xd0   : > { %7912 = vmatmul.mubr.bf16.gmra.mxu0 %v6922_v12  ;;  %v2834_v11 = vsel %vm8397_vm5, %v2829_v22, %v2833_v63  ;;  %v2844_v17 = vsel %vm8397_vm5, %v2839_v23, %v2843_v14  ;;  %v2867_v28 = vrot.slane %v2865_v24, 5  ;;  %v3356_v37 = vrot.slane %v6935_v29, 5  ;;  %v8231_v18 = vld [vmem:[%s10051_s1 + $0x230] sm:$0xff]   ;;  %v6946_v22 = vld [vmem:[%s8307_s23 + $0x40] sm:$0xf]  ;;  %v8234_v20 = vld [vmem:[%s10051_s1 + $0x1e8] sm:$0xff]  }
  0xd1   : > { %v6923_v31 = vcombine.low %v2834_v11, %v2844_v17  ;;  %v2853_v32 = vrot.slane %v2852_v25, 4  ;;  %v2862_v33 = vor.u32 %v2861_v27, %v2857_v26  ;;  %v6982_v40 = vrot.slane %v6936_v36, 9  ;;  %v6947_v23 = vld [vmem:[%s8307_s23 + $0x44] sm:$0x1]  ;;  %v6948_v27 = vld [vmem:[%s8307_s23 + $0x48] sm:$0xf] }
  0xd2   : > { %7868 = vmatmul.mubr.bf16.gmra.mxu1 %v8221_v47  ;;  %v3354_v43 = vsel %vm8378_vm4, %v6981_v30, %v3353_v35  ;;  %v3355_v44 = vrot.slane %v3353_v35, 4  ;;  %v8224_v47 = vld [vmem:[%s8307_s23 + $0x18] sm:$0xff]   ;;  %v3360_v48 = vrot.slane %v6937_v38, 5  ;;  %v3363_v49 = vrot.slane %v6938_v39, 5  ;;  %v6950_v29 = vld [vmem:[%s8307_s23 + $0x50] sm:$0x1] }
  0xd3   : > { %7915 = vmatprep.mubr.bf16.mxu0 %v6923_v31  ;;  %v2858_v41 = vsel %vm8397_vm5, %v2853_v32, %v2857_v26  ;;  %v2863_v42 = vrot.slane %v2862_v33, 4  ;;  %v6983_v59 = vrot.slane %v6939_v34, 9  ;;  %v3367_v60 = vrot.slane %v6940_v55, 5  ;;  %v8238_v31 = vld [vmem:[%s10051_s1 + $0x1e0] sm:$0xff]  }
  0xd4   : > { %v3357_v51 = vsel %vm8378_vm4, %v3355_v44, %v3356_v37  ;;  %v3361_v53 = vsel %vm8378_vm4, %v6982_v40, %v3360_v48  ;;  %v3362_v54 = vrot.slane %v3360_v48, 4  ;;  %v3370_v61 = vrot.slane %v6941_v58, 5  ;;  %v8229_v40 = vld [vmem:[%s8307_s23 + $0x3c] sm:$0xff]   ;;  %v6951_v44 = vld [vmem:[%s8307_s23 + $0x54] sm:$0xf] }
  0xd5   : > { %v2868_v50 = vsel %vm8397_vm5, %v2863_v42, %v2867_v28  ;;  %v7013_v52 = vcombine.low %v3354_v43, %v3357_v51  ;;  %v3368_v4 = vsel %vm8378_vm4, %v6983_v59, %v3367_v60  ;;  %v3369_v5 = vrot.slane %v3367_v60, 4  ;;  %v6949_v28 = vld [vmem:[%s8307_s23 + $0x4c] sm:$0xf]  ;;  %v6953_v48 = vld [vmem:[%s8307_s23 + $0x5c] sm:$0x1] }
  0xd6   : > { %v6924_v45 = vcombine.low %v2858_v41, %v2868_v50  ;;  %v3364_v63 = vsel %vm8378_vm4, %v3362_v54, %v3363_v49  ;;  %v6984_v8 = vrot.slane %v6942_v0, 9  ;;  %v3374_v10 = vrot.slane %v6943_v3, 5  ;;  %v8235_v43 = vld [vmem:[%s10051_s1 + $0x228] sm:$0xff]   ;;  %v6954_v54 = vld [vmem:[%s8307_s23 + $0x60] sm:$0xf]  ;;  %v8242_v3 = vld [vmem:[%s10051_s1 + $0x1d8] sm:$0xff]  }
  0xd7   : > { %7935 = vmatprep.mubr.bf16.mxu1 %v7013_v52  ;;  %v7014_v57 = vcombine.low %v3361_v53, %v3364_v63  ;;  %v3377_v12 = vrot.slane %v6944_v6, 5  ;;  %v3371_v7 = vsel %vm8378_vm4, %v3369_v5, %v3370_v61  ;;  %v6985_v24 = vrot.slane %v6945_v21, 9  ;;  %v6955_v55 = vld [vmem:[%s8307_s23 + $0x64] sm:$0xf]  ;;  %v6956_v58 = vld [vmem:[%s8307_s23 + $0x68] sm:$0x1] }
  0xd8   : > { %7916 = vmatmul.mubr.bf16.gmra.mxu0 %v6924_v45  ;;  %v7015_v14 = vcombine.low %v3368_v4, %v3371_v7  ;;  %v3375_v15 = vsel %vm8378_vm4, %v6984_v8, %v3374_v10  ;;  %v3376_v16 = vrot.slane %v3374_v10, 4  ;;  %v3381_v25 = vrot.slane %v6946_v22, 5  ;;  %v8239_v0 = vld [vmem:[%s10051_s1 + $0x220] sm:$0xff]   ;;  %v8246_v8 = vld [vmem:[%s10051_s1 + $0x1d0] sm:$0xff]   ;;  %v8243_v7 = vld [vmem:[%s10051_s1 + $0x218] sm:$0xff]  }
  0xd9   : > { %7983 = vmatprep.mubr.bf16.mxu0 %v8224_v47  ;;  %v3384_v26 = vrot.slane %v6947_v23, 5  ;;  %v6986_v30 = vrot.slane %v6948_v27, 9  ;;  %v3388_v35 = vrot.slane %v6949_v28, 5  ;;  %v3391_v36 = vrot.slane %v6950_v29, 5  ;;  %v6952_v47 = vld [vmem:[%s8307_s23 + $0x58] sm:$0xf] }
  0xda   : > { %7936 = vmatmul.mubr.bf16.vlgmr.msra.gmra.mxu1 %v7014_v57  ;;  %v3382_v11 = vsel %vm8378_vm4, %v6985_v24, %v3381_v25  ;;  %v3383_v17 = vrot.slane %v3381_v25, 4  ;;  %v6987_v49 = vrot.slane %v6951_v44, 9  ;;  %v3395_v52 = vrot.slane %v6952_v47, 5  ;;  %v8233_v21 = vld [vmem:[%s8307_s23 + $0x54] sm:$0xff]   ;;  %v8236_v25 = vld [vmem:[%s8307_s23 + $0x60] sm:$0xff]  }
  0xdb   : > { %8016 = vmatpush3.bf16.msra.mxu1 %v8866_v2  ;;  %7939 = vmatprep.mubr.bf16.mxu1 %v7015_v14  ;;  %v3378_v2 = vsel %vm8378_vm4, %v3376_v16, %v3377_v12  ;;  %v3390_v42 = vrot.slane %v3388_v35, 4  ;;  %v3389_v34 = vsel %vm8378_vm4, %v6986_v30, %v3388_v35  ;;  %v3398_v53 = vrot.slane %v6953_v48, 5  ;;  %v6957_v14 = vld [vmem:[%s8307_s23 + $0x6c] sm:$0xf]  ;;  %v6959_v22 = vld [vmem:[%s8307_s23 + $0x74] sm:$0x1] }
  0xdc   : > { %8017 = vmatprep.subr.bf16.mxu1 %v8230_v62  ;;  %v7016_v1 = vcombine.low %v3375_v15, %v3378_v2  ;;  %v3385_v37 = vsel %vm8378_vm4, %v3383_v17, %v3384_v26  ;;  %v3396_v61 = vsel %vm8378_vm4, %v6987_v49, %v3395_v52  ;;  %v3402_v63 = vrot.slane %v6955_v55, 5  ;;  %v6958_v15 = vld [vmem:[%s8307_s23 + $0x70] sm:$0xf]  ;;  %v6960_v26 = vld [vmem:[%s8307_s23 + $0x78] sm:$0xf]  ;;  %v8254_v49 = vld [vmem:[%s10051_s1 + $0x1c0] sm:$0xff]  }
  0xdd   : > { %v7017_v41 = vcombine.low %v3382_v11, %v3385_v37  ;;  %v3392_v45 = vsel %vm8378_vm4, %v3390_v42, %v3391_v36  ;;  %v6988_v4 = vrot.slane %v6954_v54, 9  ;;  %v3405_v12 = vrot.slane %v6956_v58, 5  ;;  %v6961_v28 = vld [vmem:[%s8307_s23 + $0x7c] sm:$0xf]  ;;  %v6962_v29 = vld [vmem:[%s8307_s23 + $0x80] sm:$0x1] }
  0xde   : > { %v7018_v57 = vcombine.low %v3389_v34, %v3392_v45  ;;  %v3404_v10 = vrot.slane %v3402_v63, 4  ;;  %v6989_v23 = vrot.slane %v6957_v14, 9  ;;  %v3409_v24 = vrot.slane %v6958_v15, 5  ;;  %v8247_v30 = vld [vmem:[%s10051_s1 + $0x210] sm:$0xff]   ;;  %v8251_v55 = vld [vmem:[%s10051_s1 + $0x208] sm:$0xff]   ;;  %v8255_v15 = vld [vmem:[%s10051_s1 + $0x200] sm:$0xff]  }
  0xdf   : > { %8018 = vmatpush3.bf16.msra.mxu1 %v8230_v62  ;;  %v3397_v62 = vrot.slane %v3395_v52, 4  ;;  %v3412_v2 = vrot.slane %v6959_v22, 5  ;;  %v3416_v35 = vrot.slane %v6961_v28, 5  ;;  %v3419_v44 = vrot.slane %v6962_v29, 5  ;;  %v6964_v52 = vld [vmem:[%s8307_s23 + $0x88] sm:$0xf] }
  0xe0   : > { %7984 = vmatmul.mubr.bf16.vlgmr.msra.gmra.mxu0 %v8225_v9  ;;  %8019 = vmatprep.subr.bf16.mxu1 %v8234_v20  ;;  %v3406_v11 = vsel %vm8378_vm4, %v3404_v10, %v3405_v12  ;;  %v3411_v17 = vrot.slane %v3409_v24, 4  ;;  %v3423_v58 = vrot.slane %v6964_v52, 5  ;;  %v6971_v28 = vld [vmem:[%s8307_s23 + $0xa4] sm:$0x1] }
  0xe1   : > { %8064 = vmatpush3.bf16.msra.mxu0 %v8873_v19  ;;  %7987 = vmatprep.mubr.bf16.mxu0 %v8228_v13  ;;  %v8232_v19 = vld [vmem:[%s8307_s23 + $0x48] sm:$0xff]   ;;  %v3399_v9 = vsel %vm8378_vm4, %v3397_v62, %v3398_v53  ;;  %v3418_v45 = vrot.slane %v3416_v35, 4 }
  0xe2   : > { %8065 = vmatprep.subr.bf16.mxu0 %v8231_v18  ;;  %7940 = vmatmul.mubr.bf16.gmra.mxu1 %v7016_v1  ;;  %v7019_v13 = vcombine.low %v3396_v61, %v3399_v9  ;;  %v3403_v1 = vsel %vm8378_vm4, %v6988_v4, %v3402_v63  ;;  %v6965_v53 = vld [vmem:[%s8307_s23 + $0x8c] sm:$0x1]  ;;  %v3425_v9 = vrot.slane %v3423_v58, 4 }
  0xe3   : > { %7943 = vmatprep.mubr.bf16.mxu1 %v7017_v41  ;;  %8020 = vmatpush3.bf16.msra.mxu1 %v8234_v20  ;;  %v3413_v41 = vsel %vm8378_vm4, %v3411_v17, %v3412_v2  ;;  %v7020_v42 = vcombine.low %v3403_v1, %v3406_v11  ;;  %v3426_v61 = vrot.slane %v6965_v53, 5  ;;  %v8237_v4 = vld [vmem:[%s8307_s23 + $0x6c] sm:$0xff]   ;;  %v3420_v14 = vsel %vm8378_vm4, %v3418_v45, %v3419_v44  ;;  %v6970_v1 = vld [vmem:[%s8307_s23 + $0xa0] sm:$0xf] }
  0xe4   : > { %8021 = vmatprep.subr.bf16.mxu1 %v8238_v31  ;;  %v3437_v29 = vrot.slane %v6970_v1, 5  ;;  %v6973_v44 = vld [vmem:[%s8307_s23 + $0xac] sm:$0xf] }
  0xe5   : > { %8066 = vmatpush3.bf16.msra.mxu0 %v8231_v18  ;;  %v3427_v22 = vsel %vm8378_vm4, %v3425_v9, %v3426_v61  ;;  %v3444_v53 = vrot.slane %v6973_v44, 5  ;;  %v8244_v9 = vld [vmem:[%s8307_s23 + $0x90] sm:$0xff]  }
  0xe6   : > { %8067 = vmatprep.subr.bf16.mxu0 %v8235_v43 }
  0xe7   : > { %8022 = vmatpush3.bf16.msra.mxu1 %v8238_v31  ;;  %v3410_v31 = vsel %vm8378_vm4, %v6989_v23, %v3409_v24 }
  0xe8   : > { %7988 = vmatmul.mubr.bf16.gmra.mxu0 %v8229_v40  ;;  %8023 = vmatprep.subr.bf16.mxu1 %v8242_v3  ;;  %v8250_v40 = vld [vmem:[%s10051_s1 + $0x1c8] sm:$0xff]   ;;  %v7021_v34 = vcombine.low %v3410_v31, %v3413_v41  ;;  %v3440_v41 = vrot.slane %v6971_v28, 5  ;;  %v6978_v28 = vld [vmem:[%s8307_s23 + $0xc0] sm:$0xf] }
  0xe9   : > { %7991 = vmatprep.mubr.bf16.mxu0 %v8232_v19  ;;  %8068 = vmatpush3.bf16.msra.mxu0 %v8235_v43  ;;  %v6990_v43 = vrot.slane %v6960_v26, 9  ;;  %v6963_v19 = vld [vmem:[%s8307_s23 + $0x84] sm:$0xf]  ;;  %v6969_v26 = vld [vmem:[%s8307_s23 + $0x9c] sm:$0xf] }
  0xea   : > { %8069 = vmatprep.subr.bf16.mxu0 %v8239_v0  ;;  %7944 = vmatmul.mubr.bf16.gmra.mxu1 %v7018_v57  ;;  %v6991_v54 = vrot.slane %v6963_v19, 9  ;;  %v6968_v57 = vld [vmem:[%s8307_s23 + $0x98] sm:$0x1]  ;;  %v6974_v19 = vld [vmem:[%s8307_s23 + $0xb0] sm:$0x1] }
  0xeb   : > { %7947 = vmatprep.mubr.bf16.mxu1 %v7019_v13  ;;  %8024 = vmatpush3.bf16.msra.mxu1 %v8242_v3  ;;  %v6967_v3 = vld [vmem:[%s8307_s23 + $0x94] sm:$0xf]  ;;  %v3417_v13 = vsel %vm8378_vm4, %v6990_v43, %v3416_v35  ;;  %v3433_v24 = vrot.slane %v6968_v57, 5  ;;  %v3439_v43 = vrot.slane %v3437_v29, 4 }
  0xec   : > { %v8984_v32 = vpop.f32.mrf.mxu0  ;;  %v8986_v33 = vpop.f32.mrf.mxu1  ;;  %8025 = vmatprep.subr.bf16.mxu1 %v8246_v8  ;;  %v3430_v10 = vrot.slane %v6967_v3, 5  ;;  %v7022_v11 = vcombine.low %v3417_v13, %v3420_v14  ;;  %v6977_v13 = vld [vmem:[%s8307_s23 + $0xbc] sm:$0x1] }
  0xed   : > { %8070 = vmatpush3.bf16.msra.mxu0 %v8239_v0  ;;  %v6966_v0 = vld [vmem:[%s8307_s23 + $0x90] sm:$0xf]  ;;  %v3441_v57 = vsel %vm8378_vm4, %v3439_v43, %v3440_v41  ;;  %v6996_v43 = vrot.slane %v6978_v28, 9 }
  0xee   : > { %v8991_v38 = vpop.f32.mrf.mxu0  ;;  %v8993_v39 = vpop.f32.mrf.mxu1  ;;  %8071 = vmatprep.subr.bf16.mxu0 %v8243_v7  ;;  %v6992_v23 = vrot.slane %v6966_v0, 9  ;;  %v3432_v17 = vrot.slane %v3430_v10, 4 }
  0xef   : > { %8026 = vmatpush3.bf16.msra.mxu1 %v8246_v8  ;;  %v8240_v8 = vld [vmem:[%s8307_s23 + $0x78] sm:$0xff]  }
  0xf0   : > { %v9003_v50 = vpop.f32.mrf.mxu0  ;;  %v9005_v51 = vpop.f32.mrf.mxu1  ;;  %7992 = vmatmul.mubr.bf16.gmra.mxu0 %v8233_v21  ;;  %8027 = vmatprep.subr.bf16.mxu1 %v8250_v40  ;;  %v3424_v21 = vsel %vm8378_vm4, %v6991_v54, %v3423_v58  ;;  %v3447_v54 = vrot.slane %v6974_v19, 5  ;;  %v3434_v0 = vsel %vm8378_vm4, %v3432_v17, %v3433_v24  ;;  %v3454_v24 = vrot.slane %v6977_v13, 5 }
  0xf1   : > { %7995 = vmatprep.mubr.bf16.mxu0 %v8236_v25  ;;  %8072 = vmatpush3.bf16.msra.mxu0 %v8243_v7 }
  0xf2   : > { %v9014_v59 = vpop.f32.mrf.mxu0  ;;  %v9016_v60 = vpop.f32.mrf.mxu1  ;;  %8073 = vmatprep.subr.bf16.mxu0 %v8247_v30  ;;  %7948 = vmatmul.mubr.bf16.gmra.mxu1 %v7020_v42  ;;  %v6972_v42 = vld [vmem:[%s8307_s23 + $0xa8] sm:$0xf] }
  0xf3   : > { %7951 = vmatprep.mubr.bf16.mxu1 %v7021_v34  ;;  %8028 = vmatpush3.bf16.msra.mxu1 %v8250_v40  ;;  %v6993_v40 = vrot.slane %v6969_v26, 9  ;;  %v6994_v34 = vrot.slane %v6972_v42, 9 }
  0xf4   : > { %v9026_v5 = vpop.f32.mrf.mxu0  ;;  %v9028_v6 = vpop.f32.mrf.mxu1  ;;  %8029 = vmatprep.subr.bf16.mxu1 %v8254_v49 }
  0xf5   : > { %8074 = vmatpush3.bf16.msra.mxu0 %v8247_v30  ;;  %v7023_v30 = vcombine.low %v3424_v21, %v3427_v22  ;;  %v3438_v3 = vsel %vm8378_vm4, %v6993_v40, %v3437_v29  ;;  %v6979_v29 = vld [vmem:[%s8307_s23 + $0xc4] sm:$0xf] }
  0xf6   : > { %v9040_v16 = vpop.f32.mrf.mxu0  ;;  %v9042_v18 = vpop.f32.mrf.mxu1  ;;  %8075 = vmatprep.subr.bf16.mxu0 %v8251_v55  ;;  %v7025_v1 = vcombine.low %v3438_v3, %v3441_v57  ;;  %v3458_v44 = vrot.slane %v6979_v29, 5 }
  0xf7   : > { %8030 = vmatpush3.bf16.msra.mxu1 %v8254_v49  ;;  %v3431_v49 = vsel %vm8378_vm4, %v6992_v23, %v3430_v10  ;;  %v6976_v10 = vld [vmem:[%s8307_s23 + $0xb8] sm:$0xf] }
  0xf8   : > { %v9048_v27 = vpop.f32.mrf.mxu0  ;;  %v9050_v20 = vpop.f32.mrf.mxu1  ;;  %7996 = vmatmul.mubr.bf16.gmra.mxu0 %v8237_v4  ;;  %v3446_v4 = vrot.slane %v3444_v53, 4  ;;  %v3451_v23 = vrot.slane %v6976_v10, 5  ;;  %v7024_v26 = vcombine.low %v3431_v49, %v3434_v0  ;;  %v8245_v49 = vld [vmem:[%s8307_s23 + $0x9c] sm:$0xff]   ;;  %v9171_v0 = vsel %vm8378_vm4, %v6996_v43, %v3458_v44 }
  0xf9   : > { %10058 = vst [vmem:[#allocation3_spill] sm:$0xff] %v9050_v20  ;;  %7999 = vmatprep.mubr.bf16.mxu0 %v8240_v8  ;;  %8076 = vmatpush3.bf16.msra.mxu0 %v8251_v55  ;;  %v8241_v55 = vld [vmem:[%s8307_s23 + $0x84] sm:$0xff]   ;;  %v6975_v8 = vld [vmem:[%s8307_s23 + $0xb4] sm:$0xf]  ;;  %v3460_v3 = vrot.slane %v3458_v44, 4 }
  0xfa   : > { %v9063_v36 = vpop.f32.mrf.mxu0  ;;  %v9065_v37 = vpop.f32.mrf.mxu1  ;;  %8077 = vmatprep.subr.bf16.mxu0 %v8255_v15  ;;  %7952 = vmatmul.mubr.bf16.gmra.mxu1 %v7022_v11  ;;  %v6995_v14 = vrot.slane %v6975_v8, 9  ;;  %v9150_v11 = vsel %vm8378_vm4, %v6994_v34, %v3444_v53  ;;  %v9154_v17 = vsel %vm8378_vm4, %v3446_v4, %v3447_v54  ;;  %v3453_v42 = vrot.slane %v3451_v23, 4  ;;  %v7109_v8 = vld [vmem:[%s8307_s23 + $0x18] sm:$0xf] }
  0xfb   : > { %10059 = vst [vmem:[#allocation4_spill] sm:$0xff] %v9065_v37  ;;  %7955 = vmatprep.mubr.bf16.mxu1 %v7023_v30  ;;  %v7119_v37 = vld [vmem:[%s8307_s23 + $0x40] sm:$0xf] }
  0xfc   : > { %v9073_v47 = vpop.f32.mrf.mxu0  ;;  %v9075_v48 = vpop.f32.mrf.mxu1  ;;  %v9161_v41 = vsel %vm8378_vm4, %v6995_v14, %v3451_v23  ;;  %v8248_v23 = vld [vmem:[%s8307_s23 + $0xa8] sm:$0xff]  }
  0xfd   : > { %10060 = vst [vmem:[#allocation5_spill] sm:$0xff] %v9075_v48  ;;  %8078 = vmatpush3.bf16.msra.mxu0 %v8255_v15  ;;  %v6980_v15 = vld [vmem:[%s8307_s23 + $0xc8] sm:$0x1] }
  0xfe   : > { %v9085_v62 = vpop.f32.mrf.mxu0  ;;  %v9087_v63 = vpop.f32.mrf.mxu1  ;;  %v3461_v19 = vrot.slane %v6980_v15, 5 }
  0xff   : > { %10061 = vst [vmem:[#allocation6_spill] sm:$0xff] %v9087_v63 }
 0x100   : > { %v9094_v12 = vpop.f32.mrf.mxu0  ;;  %v9096_v7 = vpop.f32.mrf.mxu1  ;;  %8000 = vmatmul.mubr.bf16.gmra.mxu0 %v8241_v55  ;;  %v9167_v55 = vsel %vm8378_vm4, %v3453_v42, %v3454_v24  ;;  %v7111_v24 = vld [vmem:[%s8307_s23 + $0x20] sm:$0x1] }
 0x101   : > { %10062 = vst [vmem:[#allocation7_spill] sm:$0xff] %v9096_v7  ;;  %8003 = vmatprep.mubr.bf16.mxu0 %v8244_v9  ;;  %v7027_v4 = vcombine.low %v9161_v41, %v9167_v55  ;;  %v7110_v9 = vld [vmem:[%s8307_s23 + $0x1c] sm:$0xf]  ;;  %v4368_v15 = vshll.u32 %v7111_v24, 16  ;;  %v7112_v24 = vld [vmem:[%s8307_s23 + $0x24] sm:$0xf] }
 0x102   : > { %v9109_v25 = vpop.f32.mrf.mxu0  ;;  %v9111_v2 = vpop.f32.mrf.mxu1  ;;  %7956 = vmatmul.mubr.bf16.gmra.mxu1 %v7024_v26  ;;  %v4349_v26 = vshrl.u32 %v7109_v8, 16  ;;  %v4362_v29 = vshrl.u32 %v7110_v9, 16 }
 0x103   : > { %10063 = vst [vmem:[#allocation8_spill] sm:$0xff] %v9111_v2  ;;  %7959 = vmatprep.mubr.bf16.mxu1 %v7025_v1  ;;  %v7115_v2 = vld [vmem:[%s8307_s23 + $0x30] sm:$0xf] }
 0x104   : > { %v9116_v31 = vpop.f32.mrf.mxu0  ;;  %v9118_v35 = vpop.f32.mrf.mxu1  ;;  %v4351_v43 = vrot.slane %v4349_v26, 4  ;;  %v4364_v55 = vrot.slane %v4362_v29, 4  ;;  %v4373_v26 = vshrl.u32 %v7112_v24, 16 }
 0x105   : > { %10064 = vst [vmem:[#allocation9_spill] sm:$0xff] %v9118_v35 }
 0x106   : > { %v9123_v45 = vpop.f32.mrf.mxu0  ;;  %v9125_v52 = vpop.f32.mrf.mxu1 }
 0x107   : > { %10065 = vst [vmem:[#allocation10_spill] sm:$0xff] %v9125_v52 }
 0x108   : > { %v9129_v58 = vpop.f32.mrf.mxu0  ;;  %v9131_v61 = vpop.f32.mrf.mxu1  ;;  %8004 = vmatmul.mubr.bf16.gmra.mxu0 %v8245_v49 }
 0x109   : > { %10066 = vst [vmem:[#allocation11_spill] sm:$0xff] %v9131_v61  ;;  %8007 = vmatprep.mubr.bf16.mxu0 %v8248_v23 }
 0x10a   : > { %v9144_v21 = vpop.f32.mrf.mxu0  ;;  %v9146_v22 = vpop.f32.mrf.mxu1 }
 0x10b   : > { %10067 = vst [vmem:[#allocation12_spill] sm:$0xff] %v9146_v22  ;;  %v4375_v22 = vrot.slane %v4373_v26, 4 }
 0x10c   : > { %v7745_v30 = vpop.f32.mrf.mxu1  ;;  %v7793_v40 = vpop.f32.mrf.mxu0 }
 0x10d   : > { %v1327_v34 = vadd.f32 %v7745_v30, %v8984_v32  ;;  %v7026_v32 = vcombine.low %v9150_v11, %v9154_v17  ;;  %v4352_v11 = vshll.u32 %v7109_v8, 16  ;;  %v4358_v17 = vshll.u32 %v7110_v9, 16  ;;  %v7197_v30 = vld [vmem:[%s8307_s23 + $0x18] sm:$0xf] }
 0x10e   : > { %v1166_v53 = vpop.f32.mrf.mxu1  ;;  %v1763_v54 = vpop.f32.mrf.mxu0 }
 0x10f   : > { %v1325_v57 = vadd.f32 %v1166_v53, %v8991_v38  ;;  %v9180_v10 = vadd.f32 %v7793_v40, %v1327_v34  ;;  %v9187_v38 = vsel %vm8378_vm4, %v3460_v3, %v3461_v19  ;;  %v7198_v40 = vld [vmem:[%s8307_s23 + $0x1c] sm:$0xf]  ;;  %v4354_v44 = vrot.slane %v4352_v11, 5  ;;  %v7199_v34 = vld [vmem:[%s8307_s23 + $0x20] sm:$0x1]  ;;  %7960 = vmatmul.mubr.bf16.gmra.mxu1 %v7026_v32 }
 0x110   : > { %v7746_v13 = vpop.f32.mrf.mxu1  ;;  %v9182_v14 = vpop.f32.mrf.mxu0  ;;  %v4360_v19 = vrot.slane %v4358_v17, 5  ;;  %v7245_v53 = vrot.slane %v7197_v30, 9  ;;  %v4370_v3 = vrot.slane %v4368_v15, 5  ;;  %v5216_v8 = vrot.slane %v7198_v40, 5  ;;  %7963 = vmatprep.mubr.bf16.mxu1 %v7027_v4 }
 0x111   : > { %10068 = vst [vmem:[#allocation13_spill] sm:$0xff] %v9180_v10  ;;  %v9194_v41 = vadd.f32 %v1763_v54, %v1325_v57  ;;  %v5219_v9 = vrot.slane %v7199_v34, 5  ;;  %v4355_v57 = vor.u32 %v4354_v44, %v4351_v43  ;;  %v7114_v10 = vld [vmem:[%s8307_s23 + $0x2c] sm:$0x1]  ;;  %v4376_v11 = vshll.u32 %v7112_v24, 16 }
 0x112   : > { %v9196_v1 = vpop.f32.mrf.mxu1  ;;  %v9198_v42 = vpop.f32.mrf.mxu0  ;;  %v1328_v17 = vadd.f32 %v7746_v13, %v9003_v50  ;;  %v4365_v29 = vor.u32 %v4364_v55, %v4360_v19  ;;  %v9211_v15 = vsel %vm8378_vm4, %v7245_v53, %v5216_v8  ;;  %v5218_v30 = vrot.slane %v5216_v8, 4  ;;  %v7200_v34 = vld [vmem:[%s8307_s23 + $0x24] sm:$0xf]  ;;  %v7201_v50 = vld [vmem:[%s8307_s23 + $0x28] sm:$0xf] }
 0x113   : > { %10069 = vst [vmem:[#allocation14_spill] sm:$0xff] %v9194_v41  ;;  %v7113_v41 = vld [vmem:[%s8307_s23 + $0x28] sm:$0xf]  ;;  %v4356_v44 = vrot.slane %v4355_v57, 4  ;;  %v4378_v24 = vrot.slane %v4376_v11, 5  ;;  %v4392_v55 = vshll.u32 %v7114_v10, 16 }
 0x114   : > { %v9202_v28 = vpop.f32.mrf.mxu1  ;;  %v9204_v54 = vpop.f32.mrf.mxu0  ;;  %v4382_v40 = vshll.u32 %v7113_v41, 16  ;;  %v4386_v61 = vshrl.u32 %v7113_v41, 16  ;;  %v4366_v13 = vrot.slane %v4365_v29, 4  ;;  %v9221_v23 = vsel %vm8378_vm4, %v5218_v30, %v5219_v9  ;;  %v7202_v8 = vld [vmem:[%s8307_s23 + $0x2c] sm:$0x1]  ;;  %v8249_v57 = vld [vmem:[%s8307_s23 + $0xb4] sm:$0xff]  }
 0x115   : > { %v4361_v41 = vsel %vm8397_vm5, %v4356_v44, %v4360_v19  ;;  %v4379_v26 = vor.u32 %v4378_v24, %v4375_v22  ;;  %v8252_v11 = vld [vmem:[%s8307_s23 + $0xc0] sm:$0xff]   ;;  %v4394_v29 = vrot.slane %v4392_v55, 5  ;;  %v7246_v30 = vrot.slane %v7200_v34, 9  ;;  %v7116_v22 = vld [vmem:[%s8307_s23 + $0x34] sm:$0xf]  ;;  %8008 = vmatmul.mubr.bf16.gmra.mxu0 %v8249_v57 }
 0x116   : > { %v9214_v49 = vpop.f32.mrf.mxu1  ;;  %v9216_v43 = vpop.f32.mrf.mxu0  ;;  %v4384_v53 = vrot.slane %v4382_v40, 5  ;;  %v4388_v9 = vrot.slane %v4386_v61, 4  ;;  %v4371_v10 = vsel %vm8397_vm5, %v4366_v13, %v4370_v3  ;;  %v5223_v40 = vrot.slane %v7201_v50, 5  ;;  %v7117_v50 = vld [vmem:[%s8307_s23 + $0x38] sm:$0x1]  ;;  %8011 = vmatprep.mubr.bf16.mxu0 %v8252_v11 }
 0x117   : > { %v7173_v19 = vcombine.low %v4361_v41, %v4371_v10  ;;  %v4380_v44 = vrot.slane %v4379_v26, 4  ;;  %v5226_v32 = vrot.slane %v7202_v8, 5  ;;  %v9247_v24 = vadd.f32 %v9182_v14, %v1328_v17  ;;  %v7203_v14 = vld [vmem:[%s8307_s23 + $0x30] sm:$0xf]  ;;  %v7205_v57 = vld [vmem:[%s8307_s23 + $0x38] sm:$0x1] }
 0x118   : > { %v9224_v52 = vpop.f32.mrf.mxu1  ;;  %v9226_v35 = vpop.f32.mrf.mxu0  ;;  %v4389_v63 = vor.u32 %v4388_v9, %v4384_v53  ;;  %v9244_v61 = vsel %vm8378_vm4, %v7246_v30, %v5223_v40  ;;  %v5225_v3 = vrot.slane %v5223_v40, 4  ;;  %v1326_v34 = vadd.f32 %v9196_v1, %v9014_v59  ;;  %v7204_v30 = vld [vmem:[%s8307_s23 + $0x34] sm:$0xf] }
 0x119   : > { %10070 = vst [vmem:[#allocation15_spill] sm:$0xff] %v9247_v24  ;;  %v4385_v8 = vsel %vm8397_vm5, %v4380_v44, %v4384_v53  ;;  %v4397_v26 = vshrl.u32 %v7115_v2, 16  ;;  %v4400_v9 = vshll.u32 %v7115_v2, 16  ;;  %v4406_v1 = vshll.u32 %v7116_v22, 16 }
 0x11a   : > { %v9237_v7 = vpop.f32.mrf.mxu1  ;;  %v9239_v4 = vpop.f32.mrf.mxu0  ;;  %v4390_v41 = vrot.slane %v4389_v63, 4  ;;  %v9261_v17 = vsel %vm8378_vm4, %v5225_v3, %v5226_v32  ;;  %v9264_v59 = vadd.f32 %v9198_v42, %v1326_v34  ;;  %v4410_v10 = vshrl.u32 %v7116_v22, 16  ;;  %v7118_v42 = vld [vmem:[%s8307_s23 + $0x3c] sm:$0xf] }
 0x11b   : > { %v4399_v32 = vrot.slane %v4397_v26, 4  ;;  %v4402_v11 = vrot.slane %v4400_v9, 5  ;;  %v10072_v44 = vcombine.low %v9171_v0, %v9187_v38  ;;  %v4408_v3 = vrot.slane %v4406_v1, 5 }
 0x11c   : > { %v9252_v13 = vpop.f32.mrf.mxu1  ;;  %v9254_v55 = vpop.f32.mrf.mxu0  ;;  %10071 = vst [vmem:[#allocation16_spill] sm:$0xff] %v9264_v59  ;;  %v4395_v2 = vsel %vm8397_vm5, %v4390_v41, %v4394_v29  ;;  %v4412_v34 = vrot.slane %v4410_v10, 4  ;;  %v4416_v59 = vshll.u32 %v7117_v50, 16  ;;  %v8253_v29 = vld [vmem:[%s8307_s23 + $0xcc] sm:$0xff]   ;;  %v7247_v26 = vrot.slane %v7203_v14, 9 }
 0x11d   : > { %7964 = vmatmul.mubr.bf16.gmra.mxu1 %v10072_v44  ;;  %v7174_v22 = vcombine.low %v4385_v8, %v4395_v2  ;;  %v4403_v41 = vor.u32 %v4402_v11, %v4399_v32  ;;  %v5230_v53 = vrot.slane %v7204_v30, 5  ;;  %v5233_v9 = vrot.slane %v7205_v57, 5  ;;  %v7206_v32 = vld [vmem:[%s8307_s23 + $0x3c] sm:$0xf]  ;;  %8012 = vmatmul.mubr.bf16.gmra.mxu0 %v8253_v29  ;;  %v7207_v44 = vld [vmem:[%s8307_s23 + $0x40] sm:$0xf] }
 0x11e   : > { %v9268_v40 = vpop.f32.mrf.mxu1  ;;  %v9270_v63 = vpop.f32.mrf.mxu0  ;;  %8031 = vmatprep.mubr.bf16.mxu1 %v7173_v19  ;;  %v4413_v20 = vor.u32 %v4412_v34, %v4408_v3  ;;  %v4418_v0 = vrot.slane %v4416_v59, 5  ;;  %v1331_v38 = vadd.f32 %v9202_v28, %v9026_v5  ;;  %v4421_v8 = vshrl.u32 %v7118_v42, 16  ;;  %v7120_v19 = vld [vmem:[%s8307_s23 + $0x44] sm:$0x1] }
 0x11f   : > { %v4404_v50 = vrot.slane %v4403_v41, 4  ;;  %v9290_v1 = vsel %vm8378_vm4, %v7247_v26, %v5230_v53  ;;  %v5232_v10 = vrot.slane %v5230_v53, 4  ;;  %v4424_v14 = vshll.u32 %v7118_v42, 16 }
 0x120   : > { %v9280_v24 = vpop.f32.mrf.mxu1  ;;  %v9282_v48 = vpop.f32.mrf.mxu0  ;;  %v4414_v30 = vrot.slane %v4413_v20, 4  ;;  %v9294_v57 = vadd.f32 %v9204_v54, %v1331_v38  ;;  %v4423_v2 = vrot.slane %v4421_v8, 4  ;;  %v4430_v59 = vshll.u32 %v7119_v37, 16  ;;  %v7208_v54 = vld [vmem:[%s8307_s23 + $0x44] sm:$0x1] }
 0x121   : > { %v4409_v28 = vsel %vm8397_vm5, %v4404_v50, %v4408_v3  ;;  %v5234_v53 = vsel %vm8378_vm4, %v5232_v10, %v5233_v9  ;;  %v4426_v42 = vrot.slane %v4424_v14, 5  ;;  %v4434_v20 = vshrl.u32 %v7119_v37, 16  ;;  %v7121_v10 = vld [vmem:[%s8307_s23 + $0x48] sm:$0xf] }
 0x122   : > { %10073 = vst [vmem:[#allocation17_spill] sm:$0xff] %v9294_v57  ;;  %v9297_v11 = vpop.f32.mrf.mxu1  ;;  %v9299_v5 = vpop.f32.mrf.mxu0  ;;  %v10074_v34 = vcombine.low %v9211_v15, %v9221_v23  ;;  %v4419_v41 = vsel %vm8397_vm5, %v4414_v30, %v4418_v0  ;;  %v7279_v29 = vcombine.low %v9290_v1, %v5234_v53  ;;  %v4432_v26 = vrot.slane %v4430_v59, 5 }
 0x123   : > { %v4440_v38 = vshll.u32 %v7120_v19, 16  ;;  %v7175_v8 = vcombine.low %v4409_v28, %v4419_v41  ;;  %v4427_v3 = vor.u32 %v4426_v42, %v4423_v2  ;;  %v4436_v50 = vrot.slane %v4434_v20, 4  ;;  %v7122_v2 = vld [vmem:[%s8307_s23 + $0x4c] sm:$0xf]  ;;  %v7209_v20 = vld [vmem:[%s8307_s23 + $0x48] sm:$0xf] }
 0x124   : > { %8079 = vmatprep.mubr.bf16.mxu0 %v10074_v34  ;;  %v7248_v9 = vrot.slane %v7206_v32, 9  ;;  %v5237_v14 = vrot.slane %v7207_v44, 5  ;;  %v5240_v57 = vrot.slane %v7208_v54, 5  ;;  %v1329_v15 = vadd.f32 %v9214_v49, %v9040_v16  ;;  %v9316_v23 = vpop.f32.mrf.mxu1  ;;  %v9318_v0 = vpop.f32.mrf.mxu0  ;;  %v7123_v32 = vld [vmem:[%s8307_s23 + $0x50] sm:$0x1] }
 0x125   : > { %8032 = vmatmul.mubr.bf16.vlgmr.msra.gmra.mxu1 %v7174_v22  ;;  %v4442_v37 = vrot.slane %v4440_v38, 5  ;;  %v4428_v1 = vrot.slane %v4427_v3, 4  ;;  %v4437_v19 = vor.u32 %v4436_v50, %v4432_v26  ;;  %v1332_v30 = vadd.f32 %v9224_v52, %v9048_v27  ;;  %v7211_v38 = vld [vmem:[%s8307_s23 + $0x50] sm:$0x1] }
 0x126   : > { %8035 = vmatprep.mubr.bf16.mxu1 %v7175_v8  ;;  %v1330_v22 = vadd.f32 %v9237_v7, %v9063_v36  ;;  %v9327_v59 = vsel %vm8378_vm4, %v7248_v9, %v5237_v14  ;;  %v5239_v16 = vrot.slane %v5237_v14, 4  ;;  %v9330_v49 = vadd.f32 %v9216_v43, %v1329_v15  ;;  %v9333_v53 = vpop.f32.mrf.mxu1  ;;  %v9335_v42 = vpop.f32.mrf.mxu0  ;;  %v7210_v43 = vld [vmem:[%s8307_s23 + $0x4c] sm:$0xf]  ;;  %v7124_v9 = vld [vmem:[%s8307_s23 + $0x54] sm:$0xf] }
 0x127   : > { %v4445_v28 = vshrl.u32 %v7121_v10, 16  ;;  %v4433_v27 = vsel %vm8397_vm5, %v4428_v1, %v4432_v26  ;;  %v4438_v36 = vrot.slane %v4437_v19, 4  ;;  %v9340_v7 = vadd.f32 %v9226_v35, %v1332_v30  ;;  %v7125_v19 = vld [vmem:[%s8307_s23 + $0x58] sm:$0xf] }
 0x128   : > { %v9343_v52 = vadd.f32 %v9239_v4, %v1330_v22  ;;  %v5241_v44 = vsel %vm8378_vm4, %v5239_v16, %v5240_v57  ;;  %v4448_v34 = vshll.u32 %v7121_v10, 16  ;;  %v4454_v41 = vshll.u32 %v7122_v2, 16  ;;  %v9350_v8 = vpop.f32.mrf.mxu1  ;;  %v9352_v26 = vpop.f32.mrf.mxu0 }
 0x129   : > { %v4447_v54 = vrot.slane %v4445_v28, 4  ;;  %v10075_v35 = vcombine.low %v9244_v61, %v9261_v17  ;;  %v4443_v4 = vsel %vm8397_vm5, %v4438_v36, %v4442_v37  ;;  %v7280_v3 = vcombine.low %v9327_v59, %v5241_v44  ;;  %v7212_v44 = vld [vmem:[%s8307_s23 + $0x54] sm:$0xf] }
 0x12a   : > { %v4458_v50 = vshrl.u32 %v7122_v2, 16  ;;  %v4464_v57 = vshll.u32 %v7123_v32, 16  ;;  %v7176_v10 = vcombine.low %v4433_v27, %v4443_v4  ;;  %v4450_v14 = vrot.slane %v4448_v34, 5  ;;  %v9366_v32 = vpop.f32.mrf.mxu0 }
 0x12b   : > { %8080 = vmatmul.mubr.bf16.vlgmr.msra.gmra.mxu0 %v10075_v35  ;;  %v4456_v15 = vrot.slane %v4454_v41, 5  ;;  %v7249_v1 = vrot.slane %v7209_v20, 9  ;;  %v5244_v61 = vrot.slane %v7210_v43, 5  ;;  %v5247_v17 = vrot.slane %v7211_v38, 5  ;;  %v7126_v20 = vld [vmem:[%s8307_s23 + $0x5c] sm:$0x1] }
 0x12c   : > { %8083 = vmatprep.mubr.bf16.mxu0 %v7279_v29  ;;  %v4460_v30 = vrot.slane %v4458_v50, 4  ;;  %v4466_v22 = vrot.slane %v4464_v57, 5  ;;  %v4451_v16 = vor.u32 %v4450_v14, %v4447_v54  ;;  %v1335_v37 = vadd.f32 %v9252_v13, %v9073_v47  ;;  %v9364_v29 = vpop.f32.mrf.mxu1  ;;  %v7213_v41 = vld [vmem:[%s8307_s23 + $0x58] sm:$0xf]  ;;  %v7214_v57 = vld [vmem:[%s8307_s23 + $0x5c] sm:$0x1] }
 0x12d   : > { %8036 = vmatmul.mubr.bf16.gmra.mxu1 %v7176_v10  ;;  %v4469_v2 = vshrl.u32 %v7124_v9, 16  ;;  %v4472_v59 = vshll.u32 %v7124_v9, 16  ;;  %v5245_v27 = vsel %vm8378_vm4, %v7249_v1, %v5244_v61  ;;  %v5246_v36 = vrot.slane %v5244_v61, 4 }
 0x12e   : > { %v4461_v28 = vor.u32 %v4460_v30, %v4456_v15  ;;  %v4478_v43 = vshll.u32 %v7125_v19, 16  ;;  %v4452_v54 = vrot.slane %v4451_v16, 4  ;;  %v9373_v34 = vadd.f32 %v9254_v55, %v1335_v37  ;;  %v9383_v55 = vpop.f32.mrf.mxu0 }
 0x12f   : > { %v4471_v47 = vrot.slane %v4469_v2, 4  ;;  %v4474_v13 = vrot.slane %v4472_v59, 5  ;;  %v5248_v35 = vsel %vm8378_vm4, %v5246_v36, %v5247_v17  ;;  %v4482_v50 = vshrl.u32 %v7125_v19, 16  ;;  %v7127_v2 = vld [vmem:[%s8307_s23 + $0x60] sm:$0xf] }
 0x130   : > { %v4462_v38 = vrot.slane %v4461_v28, 4  ;;  %v4480_v4 = vrot.slane %v4478_v43, 5  ;;  %v4457_v9 = vsel %vm8397_vm5, %v4452_v54, %v4456_v15  ;;  %v7281_v10 = vcombine.low %v5245_v27, %v5248_v35  ;;  %v9381_v30 = vpop.f32.mrf.mxu1  ;;  %v9390_v36 = vpop.f32.mrf.mxu0 }
 0x131   : > { %v4475_v14 = vor.u32 %v4474_v13, %v4471_v47  ;;  %v4488_v1 = vshll.u32 %v7126_v20, 16  ;;  %v4484_v16 = vrot.slane %v4482_v50, 4  ;;  %v7250_v37 = vrot.slane %v7212_v44, 9  ;;  %v7128_v13 = vld [vmem:[%s8307_s23 + $0x64] sm:$0xf] }
 0x132   : > { %v4467_v61 = vsel %vm8397_vm5, %v4462_v38, %v4466_v22  ;;  %v5251_v17 = vrot.slane %v7213_v41, 5  ;;  %v5254_v28 = vrot.slane %v7214_v57, 5  ;;  %v9388_v27 = vpop.f32.mrf.mxu1  ;;  %v1333_v43 = vadd.f32 %v9268_v40, %v9085_v62  ;;  %v7129_v41 = vld [vmem:[%s8307_s23 + $0x68] sm:$0x1]  ;;  %v9406_v50 = vpop.f32.mrf.mxu0 }
 0x133   : > { %8084 = vmatmul.mubr.bf16.gmra.mxu0 %v7280_v3  ;;  %v7177_v19 = vcombine.low %v4457_v9, %v4467_v61  ;;  %v4476_v15 = vrot.slane %v4475_v14, 4  ;;  %v4490_v59 = vrot.slane %v4488_v1, 5  ;;  %v4485_v20 = vor.u32 %v4484_v16, %v4480_v4  ;;  %v7217_v14 = vld [vmem:[%s8307_s23 + $0x68] sm:$0x1] }
 0x134   : > { %8087 = vmatprep.mubr.bf16.mxu0 %v7281_v10  ;;  %v5252_v3 = vsel %vm8378_vm4, %v7250_v37, %v5251_v17  ;;  %v5253_v22 = vrot.slane %v5251_v17, 4  ;;  %v1336_v54 = vadd.f32 %v9280_v24, %v9094_v12  ;;  %v1334_v47 = vadd.f32 %v9297_v11, %v9109_v25  ;;  %v9404_v35 = vpop.f32.mrf.mxu1  ;;  %v7215_v12 = vld [vmem:[%s8307_s23 + $0x60] sm:$0xf]  ;;  %v7216_v24 = vld [vmem:[%s8307_s23 + $0x64] sm:$0xf] }
 0x135   : > { %8039 = vmatprep.mubr.bf16.mxu1 %v7177_v19  ;;  %v4481_v44 = vsel %vm8397_vm5, %v4476_v15, %v4480_v4  ;;  %v4493_v38 = vshrl.u32 %v7127_v2, 16  ;;  %v4486_v57 = vrot.slane %v4485_v20, 4  ;;  %v9411_v40 = vadd.f32 %v9270_v63, %v1333_v43  ;;  %v7130_v15 = vld [vmem:[%s8307_s23 + $0x6c] sm:$0xf] }
 0x136   : > { %v5255_v62 = vsel %vm8378_vm4, %v5253_v22, %v5254_v28  ;;  %v4496_v4 = vshll.u32 %v7127_v2, 16  ;;  %v9416_v11 = vadd.f32 %v9282_v48, %v1336_v54  ;;  %v9419_v9 = vadd.f32 %v9299_v5, %v1334_v47  ;;  %v9425_v48 = vpop.f32.mrf.mxu1  ;;  %v9427_v28 = vpop.f32.mrf.mxu0  ;;  %v7131_v22 = vld [vmem:[%s8307_s23 + $0x70] sm:$0xf] }
 0x137   : > { %v7282_v25 = vcombine.low %v5252_v3, %v5255_v62  ;;  %v4495_v10 = vrot.slane %v4493_v38, 4  ;;  %v4491_v1 = vsel %vm8397_vm5, %v4486_v57, %v4490_v59  ;;  %v4502_v63 = vshll.u32 %v7128_v13, 16 }
 0x138   : > { %10076 = vst [vmem:[#allocation18_spill] sm:$0xff] %v9419_v9  ;;  %v4498_v61 = vrot.slane %v4496_v4, 5  ;;  %v4506_v16 = vshrl.u32 %v7128_v13, 16  ;;  %v7178_v37 = vcombine.low %v4481_v44, %v4491_v1  ;;  %v4512_v17 = vshll.u32 %v7129_v41, 16  ;;  %v7132_v13 = vld [vmem:[%s8307_s23 + $0x74] sm:$0x1] }
 0x139   : > { %v7251_v2 = vrot.slane %v7215_v12, 9  ;;  %v5258_v19 = vrot.slane %v7216_v24, 5  ;;  %v4504_v20 = vrot.slane %v4502_v63, 5  ;;  %v5261_v59 = vrot.slane %v7217_v14, 5  ;;  %v7218_v4 = vld [vmem:[%s8307_s23 + $0x6c] sm:$0xf] }
 0x13a   : > { %v4499_v5 = vor.u32 %v4498_v61, %v4495_v10  ;;  %v4508_v3 = vrot.slane %v4506_v16, 4  ;;  %8040 = vmatmul.mubr.bf16.gmra.mxu1 %v7178_v37  ;;  %v4514_v43 = vrot.slane %v4512_v17, 5  ;;  %v1339_v47 = vadd.f32 %v9316_v23, %v9116_v31  ;;  %v7219_v14 = vld [vmem:[%s8307_s23 + $0x70] sm:$0xf]  ;;  %v7220_v1 = vld [vmem:[%s8307_s23 + $0x74] sm:$0x1]  ;;  %v9443_v61 = vpop.f32.mrf.mxu1  ;;  %v9445_v63 = vpop.f32.mrf.mxu0 }
 0x13b   : > { %8088 = vmatmul.mubr.bf16.gmra.mxu0 %v7282_v25  ;;  %v5259_v44 = vsel %vm8378_vm4, %v7251_v2, %v5258_v19  ;;  %v5260_v54 = vrot.slane %v5258_v19, 4  ;;  %v4517_v57 = vshrl.u32 %v7130_v15, 16  ;;  %v4520_v62 = vshll.u32 %v7130_v15, 16 }
 0x13c   : > { %v4500_v41 = vrot.slane %v4499_v5, 4  ;;  %v4509_v38 = vor.u32 %v4508_v3, %v4504_v20  ;;  %v9439_v24 = vadd.f32 %v9318_v0, %v1339_v47  ;;  %v4526_v25 = vshll.u32 %v7131_v22, 16  ;;  %v9449_v15 = vpop.f32.mrf.mxu1  ;;  %v9451_v5 = vpop.f32.mrf.mxu0 }
 0x13d   : > { %v5262_v12 = vsel %vm8378_vm4, %v5260_v54, %v5261_v59  ;;  %v4530_v10 = vshrl.u32 %v7131_v22, 16  ;;  %v4519_v37 = vrot.slane %v4517_v57, 4  ;;  %v4522_v17 = vrot.slane %v4520_v62, 5 }
 0x13e   : > { %10077 = vst [vmem:[#allocation19_spill] sm:$0xff] %v9439_v24  ;;  %v4505_v31 = vsel %vm8397_vm5, %v4500_v41, %v4504_v20  ;;  %v4510_v23 = vrot.slane %v4509_v38, 4  ;;  %v7283_v16 = vcombine.low %v5259_v44, %v5262_v12  ;;  %v4528_v2 = vrot.slane %v4526_v25, 5  ;;  %v7133_v20 = vld [vmem:[%s8307_s23 + $0x78] sm:$0xf]  ;;  %v9456_v57 = vpop.f32.mrf.mxu1 }
 0x13f   : > { %v4532_v19 = vrot.slane %v4530_v10, 4  ;;  %v4536_v0 = vshll.u32 %v7132_v13, 16  ;;  %v7252_v59 = vrot.slane %v7218_v4, 9  ;;  %v5265_v22 = vrot.slane %v7219_v14, 5  ;;  %v9458_v13 = vpop.f32.mrf.mxu0  ;;  %v7134_v25 = vld [vmem:[%s8307_s23 + $0x7c] sm:$0xf] }
 0x140   : > { %v4515_v3 = vsel %vm8397_vm5, %v4510_v23, %v4514_v43  ;;  %8091 = vmatprep.mubr.bf16.mxu0 %v7283_v16  ;;  %v5268_v54 = vrot.slane %v7220_v1, 5  ;;  %v4523_v47 = vor.u32 %v4522_v17, %v4519_v37  ;;  %v1337_v4 = vadd.f32 %v9333_v53, %v9123_v45  ;;  %v7221_v53 = vld [vmem:[%s8307_s23 + $0x78] sm:$0xf] }
 0x141   : > { %v7179_v44 = vcombine.low %v4505_v31, %v4515_v3  ;;  %v4533_v41 = vor.u32 %v4532_v19, %v4528_v2  ;;  %v4538_v38 = vrot.slane %v4536_v0, 5  ;;  %v5266_v62 = vsel %vm8378_vm4, %v7252_v59, %v5265_v22  ;;  %v7135_v31 = vld [vmem:[%s8307_s23 + $0x80] sm:$0x1]  ;;  %v9490_v3 = vpop.f32.mrf.mxu0 }
 0x142   : > { %v5267_v43 = vrot.slane %v5265_v22, 4  ;;  %v1340_v12 = vadd.f32 %v9350_v8, %v9129_v58  ;;  %v4524_v10 = vrot.slane %v4523_v47, 4  ;;  %v1338_v1 = vadd.f32 %v9364_v29, %v9144_v21  ;;  %v7222_v8 = vld [vmem:[%s8307_s23 + $0x7c] sm:$0xf]  ;;  %v7223_v0 = vld [vmem:[%s8307_s23 + $0x80] sm:$0x1] }
 0x143   : > { %8043 = vmatprep.mubr.bf16.mxu1 %v7179_v44  ;;  %v4534_v14 = vrot.slane %v4533_v41, 4  ;;  %v4541_v23 = vshrl.u32 %v7133_v20, 16  ;;  %v9473_v37 = vadd.f32 %v9335_v42, %v1337_v4  ;;  %v4544_v58 = vshll.u32 %v7133_v20, 16  ;;  %v9488_v42 = vpop.f32.mrf.mxu1  ;;  %v7136_v41 = vld [vmem:[%s8307_s23 + $0x84] sm:$0xf] }
 0x144   : > { %v5269_v16 = vsel %vm8378_vm4, %v5267_v43, %v5268_v54  ;;  %v9476_v45 = vadd.f32 %v9352_v26, %v1340_v12  ;;  %v4529_v17 = vsel %vm8397_vm5, %v4524_v10, %v4528_v2  ;;  %v9485_v19 = vadd.f32 %v9366_v32, %v1338_v1  ;;  %v7137_v4 = vld [vmem:[%s8307_s23 + $0x88] sm:$0xf]  ;;  %v7138_v1 = vld [vmem:[%s8307_s23 + $0x8c] sm:$0x1] }
 0x145   : > { %10078 = vst [vmem:[#allocation20_spill] sm:$0xff] %v9473_v37  ;;  %v4539_v21 = vsel %vm8397_vm5, %v4534_v14, %v4538_v38  ;;  %v7284_v29 = vcombine.low %v5266_v62, %v5269_v16  ;;  %v4543_v59 = vrot.slane %v4541_v23, 4  ;;  %v4546_v22 = vrot.slane %v4544_v58, 5 }
 0x146   : > { %10079 = vst [vmem:[#allocation21_spill] sm:$0xff] %v9476_v45  ;;  %10080 = vst [vmem:[#allocation22_spill] sm:$0xff] %v9485_v19  ;;  %v7180_v26 = vcombine.low %v4529_v17, %v4539_v21  ;;  %v4550_v54 = vshll.u32 %v7134_v25, 16  ;;  %v4554_v2 = vshrl.u32 %v7134_v25, 16  ;;  %v4560_v20 = vshll.u32 %v7135_v31, 16  ;;  %v9499_v31 = vpop.f32.mrf.mxu1  ;;  %v9501_v23 = vpop.f32.mrf.mxu0 }
 0x147   : > { %8092 = vmatmul.mubr.bf16.gmra.mxu0 %v7284_v29  ;;  %v7253_v44 = vrot.slane %v7221_v53, 9  ;;  %v5272_v47 = vrot.slane %v7222_v8, 5  ;;  %v4547_v32 = vor.u32 %v4546_v22, %v4543_v59  ;;  %v5275_v62 = vrot.slane %v7223_v0, 5  ;;  %v7225_v0 = vld [vmem:[%s8307_s23 + $0x88] sm:$0xf] }
 0x148   : > { %8044 = vmatmul.mubr.bf16.gmra.mxu1 %v7180_v26  ;;  %v4552_v38 = vrot.slane %v4550_v54, 5  ;;  %v1343_v43 = vadd.f32 %v9381_v30, %v8986_v33  ;;  %v4556_v12 = vrot.slane %v4554_v2, 4  ;;  %v4562_v10 = vrot.slane %v4560_v20, 5  ;;  %v7224_v30 = vld [vmem:[%s8307_s23 + $0x84] sm:$0xf]  ;;  %v9511_v59 = vpop.f32.mrf.mxu1  ;;  %v9513_v22 = vpop.f32.mrf.mxu0 }
 0x149   : > { %v5273_v25 = vsel %vm8378_vm4, %v7253_v44, %v5272_v47  ;;  %v5274_v14 = vrot.slane %v5272_v47, 4  ;;  %v4548_v16 = vrot.slane %v4547_v32, 4  ;;  %v4565_v53 = vshrl.u32 %v7136_v41, 16  ;;  %v7226_v26 = vld [vmem:[%s8307_s23 + $0x8c] sm:$0x1] }
 0x14a   : > { %v9504_v58 = vadd.f32 %v9383_v55, %v1343_v43  ;;  %v4568_v33 = vshll.u32 %v7136_v41, 16  ;;  %v4557_v8 = vor.u32 %v4556_v12, %v4552_v38  ;;  %v4574_v21 = vshll.u32 %v7137_v4, 16  ;;  %v9519_v43 = vpop.f32.mrf.mxu0 }
 0x14b   : > { %v5276_v17 = vsel %vm8378_vm4, %v5274_v14, %v5275_v62  ;;  %v4578_v29 = vshrl.u32 %v7137_v4, 16  ;;  %v4553_v54 = vsel %vm8397_vm5, %v4548_v16, %v4552_v38  ;;  %v4567_v2 = vrot.slane %v4565_v53, 4  ;;  %v9517_v62 = vpop.f32.mrf.mxu1 }
 0x14c   : > { %10081 = vst [vmem:[#allocation23_spill] sm:$0xff] %v9504_v58  ;;  %v7285_v55 = vcombine.low %v5273_v25, %v5276_v17  ;;  %v4570_v20 = vrot.slane %v4568_v33, 5  ;;  %v4558_v44 = vrot.slane %v4557_v8, 4  ;;  %v4576_v47 = vrot.slane %v4574_v21, 5 }
 0x14d   : > { %v4580_v41 = vrot.slane %v4578_v29, 4  ;;  %v4584_v32 = vshll.u32 %v7138_v1, 16  ;;  %v7254_v12 = vrot.slane %v7224_v30, 9  ;;  %v5279_v14 = vrot.slane %v7225_v0, 5  ;;  %v7139_v1 = vld [vmem:[%s8307_s23 + $0x90] sm:$0xf] }
 0x14e   : > { %8095 = vmatprep.mubr.bf16.mxu0 %v7285_v55  ;;  %v4571_v4 = vor.u32 %v4570_v20, %v4567_v2  ;;  %v5282_v58 = vrot.slane %v7226_v26, 5  ;;  %v4563_v38 = vsel %vm8397_vm5, %v4558_v44, %v4562_v10  ;;  %v1341_v53 = vadd.f32 %v9388_v27, %v8993_v39  ;;  %v7140_v39 = vld [vmem:[%s8307_s23 + $0x94] sm:$0xf]  ;;  %v7141_v27 = vld [vmem:[%s8307_s23 + $0x98] sm:$0x1]  ;;  %v9537_v26 = vpop.f32.mrf.mxu1 }
 0x14f   : > { %v4581_v25 = vor.u32 %v4580_v41, %v4576_v47  ;;  %v4586_v16 = vrot.slane %v4584_v32, 5  ;;  %v7181_v33 = vcombine.low %v4553_v54, %v4563_v38  ;;  %v5280_v17 = vsel %vm8378_vm4, %v7254_v12, %v5279_v14  ;;  %v9539_v54 = vpop.f32.mrf.mxu0  ;;  %v7229_v32 = vld [vmem:[%s8307_s23 + $0x98] sm:$0x1] }
 0x150   : > { %v4572_v8 = vrot.slane %v4571_v4, 4  ;;  %v5281_v30 = vrot.slane %v5279_v14, 4  ;;  %v9529_v29 = vadd.f32 %v9390_v36, %v1341_v53  ;;  %v1344_v10 = vadd.f32 %v9404_v35, %v9005_v51  ;;  %v7227_v51 = vld [vmem:[%s8307_s23 + $0x90] sm:$0xf]  ;;  %v7228_v35 = vld [vmem:[%s8307_s23 + $0x94] sm:$0xf] }
 0x151   : > { %v4582_v21 = vrot.slane %v4581_v25, 4  ;;  %v1342_v0 = vadd.f32 %v9425_v48, %v9016_v60  ;;  %8047 = vmatprep.mubr.bf16.mxu1 %v7181_v33  ;;  %v4589_v2 = vshrl.u32 %v7139_v1, 16  ;;  %v4592_v20 = vshll.u32 %v7139_v1, 16 }
 0x152   : > { %10082 = vst [vmem:[#allocation24_spill] sm:$0xff] %v9529_v29  ;;  %v4577_v55 = vsel %vm8397_vm5, %v4572_v8, %v4576_v47  ;;  %v5283_v36 = vsel %vm8378_vm4, %v5281_v30, %v5282_v58  ;;  %v9550_v44 = vadd.f32 %v9406_v50, %v1344_v10  ;;  %v4598_v12 = vshll.u32 %v7140_v39, 16  ;;  %v9557_v1 = vpop.f32.mrf.mxu1  ;;  %v9559_v50 = vpop.f32.mrf.mxu0  ;;  %v7143_v30 = vld [vmem:[%s8307_s23 + $0xa0] sm:$0xf] }
 0x153   : > { %v4587_v60 = vsel %vm8397_vm5, %v4582_v21, %v4586_v16  ;;  %v7286_v48 = vcombine.low %v5280_v17, %v5283_v36  ;;  %v9553_v41 = vadd.f32 %v9427_v28, %v1342_v0  ;;  %v4591_v4 = vrot.slane %v4589_v2, 4  ;;  %v7142_v16 = vld [vmem:[%s8307_s23 + $0x9c] sm:$0xf] }
 0x154   : > { %10083 = vst [vmem:[#allocation25_spill] sm:$0xff] %v9550_v44  ;;  %v7182_v47 = vcombine.low %v4577_v55, %v4587_v60  ;;  %v4594_v58 = vrot.slane %v4592_v20, 5  ;;  %v4602_v14 = vshrl.u32 %v7140_v39, 16  ;;  %v4608_v38 = vshll.u32 %v7141_v27, 16  ;;  %v7144_v27 = vld [vmem:[%s8307_s23 + $0xa4] sm:$0x1]  ;;  %v9567_v55 = vpop.f32.mrf.mxu1  ;;  %v9569_v36 = vpop.f32.mrf.mxu0 }
 0x155   : > { %10084 = vst [vmem:[#allocation26_spill] sm:$0xff] %v9553_v41  ;;  %8096 = vmatmul.mubr.bf16.gmra.mxu0 %v7286_v48  ;;  %v7255_v25 = vrot.slane %v7227_v51, 9  ;;  %v5286_v53 = vrot.slane %v7228_v35, 5  ;;  %v4600_v33 = vrot.slane %v4598_v12, 5  ;;  %v5289_v8 = vrot.slane %v7229_v32, 5 }
 0x156   : > { %8048 = vmatmul.mubr.bf16.gmra.mxu1 %v7182_v47  ;;  %v4595_v28 = vor.u32 %v4594_v58, %v4591_v4  ;;  %v1347_v17 = vadd.f32 %v9443_v61, %v9028_v6  ;;  %v4604_v21 = vrot.slane %v4602_v14, 4  ;;  %v4610_v10 = vrot.slane %v4608_v38, 5  ;;  %v7230_v61 = vld [vmem:[%s8307_s23 + $0x9c] sm:$0xf]  ;;  %v7231_v47 = vld [vmem:[%s8307_s23 + $0xa0] sm:$0xf]  ;;  %v9579_v58 = vpop.f32.mrf.mxu1  ;;  %v9581_v12 = vpop.f32.mrf.mxu0 }
 0x157   : > { %v5287_v0 = vsel %vm8378_vm4, %v7255_v25, %v5286_v53  ;;  %v5288_v39 = vrot.slane %v5286_v53, 4  ;;  %v4613_v51 = vshrl.u32 %v7142_v16, 16  ;;  %v4616_v6 = vshll.u32 %v7142_v16, 16  ;;  %v7232_v4 = vld [vmem:[%s8307_s23 + $0xa4] sm:$0x1] }
 0x158   : > { %v4596_v2 = vrot.slane %v4595_v28, 4  ;;  %v9572_v20 = vadd.f32 %v9445_v63, %v1347_v17  ;;  %v4605_v35 = vor.u32 %v4604_v21, %v4600_v33  ;;  %v4622_v48 = vshll.u32 %v7143_v30, 16  ;;  %v9587_v41 = vpop.f32.mrf.mxu0 }
 0x159   : > { %v5290_v60 = vsel %vm8378_vm4, %v5288_v39, %v5289_v8  ;;  %v4626_v32 = vshrl.u32 %v7143_v30, 16  ;;  %v4615_v38 = vrot.slane %v4613_v51, 4  ;;  %v4618_v25 = vrot.slane %v4616_v6, 5  ;;  %v9585_v8 = vpop.f32.mrf.mxu1 }
 0x15a   : > { %10085 = vst [vmem:[#allocation27_spill] sm:$0xff] %v9572_v20  ;;  %v4601_v14 = vsel %vm8397_vm5, %v4596_v2, %v4600_v33  ;;  %v7287_v63 = vcombine.low %v5287_v0, %v5290_v60  ;;  %v4606_v53 = vrot.slane %v4605_v35, 4  ;;  %v4624_v16 = vrot.slane %v4622_v48, 5 }
 0x15b   : > { %v4628_v28 = vrot.slane %v4626_v32, 4  ;;  %v4632_v17 = vshll.u32 %v7144_v27, 16  ;;  %v4619_v30 = vor.u32 %v4618_v25, %v4615_v38  ;;  %v7256_v21 = vrot.slane %v7230_v61, 9  ;;  %v7145_v27 = vld [vmem:[%s8307_s23 + $0xa8] sm:$0xf]  ;;  %v9594_v6 = vpop.f32.mrf.mxu1 }
 0x15c   : > { %8099 = vmatprep.mubr.bf16.mxu0 %v7287_v63  ;;  %v5293_v39 = vrot.slane %v7231_v47, 5  ;;  %v5296_v20 = vrot.slane %v7232_v4, 5  ;;  %v4611_v33 = vsel %vm8397_vm5, %v4606_v53, %v4610_v10  ;;  %v1345_v51 = vadd.f32 %v9449_v15, %v9042_v18  ;;  %v10087_v10 = vld [vmem:[#allocation3_spill] sm:$0xff]  ;;  %v10088_v63 = vld [vmem:[#allocation4_spill] sm:$0xff] }
 0x15d   : > { %v4629_v0 = vor.u32 %v4628_v28, %v4624_v16  ;;  %v4634_v2 = vrot.slane %v4632_v17, 5  ;;  %v7183_v35 = vcombine.low %v4601_v14, %v4611_v33  ;;  %v4620_v61 = vrot.slane %v4619_v30, 4  ;;  %v7146_v15 = vld [vmem:[%s8307_s23 + $0xac] sm:$0xf]  ;;  %v7147_v14 = vld [vmem:[%s8307_s23 + $0xb0] sm:$0x1]  ;;  %v9607_v38 = vpop.f32.mrf.mxu1 }
 0x15e   : > { %v5294_v60 = vsel %vm8378_vm4, %v7256_v21, %v5293_v39  ;;  %v5295_v48 = vrot.slane %v5293_v39, 4  ;;  %v9599_v47 = vadd.f32 %v9451_v5, %v1345_v51  ;;  %v1348_v4 = vadd.f32 %v9456_v57, %v10087_v10  ;;  %v7233_v17 = vld [vmem:[%s8307_s23 + $0xa8] sm:$0xf]  ;;  %v7234_v30 = vld [vmem:[%s8307_s23 + $0xac] sm:$0xf]  ;;  %v9615_v57 = vpop.f32.mrf.mxu0 }
 0x15f   : > { %v4630_v32 = vrot.slane %v4629_v0, 4  ;;  %v1346_v18 = vadd.f32 %v9488_v42, %v10088_v63  ;;  %8051 = vmatprep.mubr.bf16.mxu1 %v7183_v35  ;;  %v4625_v25 = vsel %vm8397_vm5, %v4620_v61, %v4624_v16  ;;  %v4637_v5 = vshrl.u32 %v7145_v27, 16  ;;  %v7235_v16 = vld [vmem:[%s8307_s23 + $0xb0] sm:$0x1]  ;;  %v9626_v0 = vpop.f32.mrf.mxu1 }
 0x160   : > { %10086 = vst [vmem:[#allocation28_spill] sm:$0xff] %v9599_v47  ;;  %v5297_v53 = vsel %vm8378_vm4, %v5295_v48, %v5296_v20  ;;  %v4640_v28 = vshll.u32 %v7145_v27, 16  ;;  %v9620_v39 = vadd.f32 %v9458_v13, %v1348_v4  ;;  %v4646_v35 = vshll.u32 %v7146_v15, 16  ;;  %v9628_v61 = vpop.f32.mrf.mxu0 }
 0x161   : > { %v4635_v42 = vsel %vm8397_vm5, %v4630_v32, %v4634_v2  ;;  %v7288_v21 = vcombine.low %v5294_v60, %v5297_v53  ;;  %v9623_v33 = vadd.f32 %v9490_v3, %v1346_v18  ;;  %v4639_v51 = vrot.slane %v4637_v5, 4  ;;  %v7148_v32 = vld [vmem:[%s8307_s23 + $0xb4] sm:$0xf]  ;;  %v9631_v10 = vpop.f32.mrf.mxu1  ;;  %v7149_v53 = vld [vmem:[%s8307_s23 + $0xb8] sm:$0xf] }
 0x162   : > { %10089 = vst [vmem:[#allocation3_spill] sm:$0xff] %v9620_v39  ;;  %v7184_v20 = vcombine.low %v4625_v25, %v4635_v42  ;;  %v4642_v27 = vrot.slane %v4640_v28, 5  ;;  %v4650_v2 = vshrl.u32 %v7146_v15, 16  ;;  %v4656_v48 = vshll.u32 %v7147_v14, 16  ;;  %v10091_v18 = vld [vmem:[#allocation5_spill] sm:$0xff]  ;;  %v9636_v5 = vpop.f32.mrf.mxu0 }
 0x163   : > { %10090 = vst [vmem:[#allocation4_spill] sm:$0xff] %v9623_v33  ;;  %8100 = vmatmul.mubr.bf16.gmra.mxu0 %v7288_v21  ;;  %v7257_v60 = vrot.slane %v7233_v17, 9  ;;  %v5300_v13 = vrot.slane %v7234_v30, 5  ;;  %v4648_v4 = vrot.slane %v4646_v35, 5  ;;  %v5303_v63 = vrot.slane %v7235_v16, 5  ;;  %v9641_v42 = vpop.f32.mrf.mxu1 }
 0x164   : > { %8052 = vmatmul.mubr.bf16.gmra.mxu1 %v7184_v20  ;;  %v4643_v3 = vor.u32 %v4642_v27, %v4639_v51  ;;  %v1351_v25 = vadd.f32 %v9499_v31, %v10091_v18  ;;  %v4652_v28 = vrot.slane %v4650_v2, 4  ;;  %v4658_v15 = vrot.slane %v4656_v48, 5  ;;  %v7150_v30 = vld [vmem:[%s8307_s23 + $0xbc] sm:$0x1]  ;;  %v7236_v51 = vld [vmem:[%s8307_s23 + $0xb4] sm:$0xf]  ;;  %v9647_v27 = vpop.f32.mrf.mxu0 }
 0x165   : > { %v5301_v14 = vsel %vm8378_vm4, %v7257_v60, %v5300_v13  ;;  %v5302_v17 = vrot.slane %v5300_v13, 4  ;;  %v4661_v20 = vshrl.u32 %v7148_v32, 16  ;;  %v4664_v31 = vshll.u32 %v7148_v32, 16  ;;  %v7237_v60 = vld [vmem:[%s8307_s23 + $0xb8] sm:$0xf]  ;;  %v9653_v33 = vpop.f32.mrf.mxu1 }
 0x166   : > { %v4644_v21 = vrot.slane %v4643_v3, 4  ;;  %v9644_v16 = vadd.f32 %v9501_v23, %v1351_v25  ;;  %v4653_v35 = vor.u32 %v4652_v28, %v4648_v4  ;;  %v4670_v48 = vshll.u32 %v7149_v53, 16  ;;  %v7238_v13 = vld [vmem:[%s8307_s23 + $0xbc] sm:$0x1]  ;;  %v9659_v19 = vpop.f32.mrf.mxu0 }
 0x167   : > { %v5304_v2 = vsel %vm8378_vm4, %v5302_v17, %v5303_v63  ;;  %v4674_v18 = vshrl.u32 %v7149_v53, 16  ;;  %v4663_v25 = vrot.slane %v4661_v20, 4  ;;  %v4680_v28 = vshll.u32 %v7150_v30, 16  ;;  %v9657_v44 = vpop.f32.mrf.mxu1  ;;  %v10093_v20 = vld [vmem:[#allocation6_spill] sm:$0xff]  ;;  %v7151_v30 = vld [vmem:[%s8307_s23 + $0xc0] sm:$0xf] }
 0x168   : > { %10092 = vst [vmem:[#allocation5_spill] sm:$0xff] %v9644_v16  ;;  %v4649_v3 = vsel %vm8397_vm5, %v4644_v21, %v4648_v4  ;;  %v7289_v23 = vcombine.low %v5301_v14, %v5304_v2  ;;  %v4666_v16 = vrot.slane %v4664_v31, 5  ;;  %v4654_v32 = vrot.slane %v4653_v35, 4 }
 0x169   : > { %v4672_v39 = vrot.slane %v4670_v48, 5  ;;  %v4676_v47 = vrot.slane %v4674_v18, 4  ;;  %v7258_v53 = vrot.slane %v7236_v51, 9  ;;  %v5307_v17 = vrot.slane %v7237_v60, 5  ;;  %v9666_v35 = vpop.f32.mrf.mxu1  ;;  %v9670_v18 = vpop.f32.mrf.mxu0  ;;  %v10095_v60 = vld [vmem:[#allocation7_spill] sm:$0xff] }
 0x16a   : > { %8103 = vmatprep.mubr.bf16.mxu0 %v7289_v23  ;;  %v4667_v63 = vor.u32 %v4666_v16, %v4663_v25  ;;  %v5310_v29 = vrot.slane %v7238_v13, 5  ;;  %v4659_v4 = vsel %vm8397_vm5, %v4654_v32, %v4658_v15  ;;  %v4682_v21 = vrot.slane %v4680_v28, 5  ;;  %v10096_v13 = vld [vmem:[#allocation8_spill] sm:$0xff] }
 0x16b   : > { %v4677_v14 = vor.u32 %v4676_v47, %v4672_v39  ;;  %v1349_v31 = vadd.f32 %v9511_v59, %v10093_v20  ;;  %v7185_v2 = vcombine.low %v4649_v3, %v4659_v4  ;;  %v5308_v51 = vsel %vm8378_vm4, %v7258_v53, %v5307_v17  ;;  %v7152_v3 = vld [vmem:[%s8307_s23 + $0xc4] sm:$0xf]  ;;  %v7153_v25 = vld [vmem:[%s8307_s23 + $0xc8] sm:$0x1]  ;;  %v9681_v32 = vpop.f32.mrf.mxu1 }
 0x16c   : > { %v4668_v16 = vrot.slane %v4667_v63, 4  ;;  %v5309_v48 = vrot.slane %v5307_v17, 4  ;;  %v1352_v59 = vadd.f32 %v9517_v62, %v10095_v60  ;;  %v1350_v23 = vadd.f32 %v9537_v26, %v10096_v13  ;;  %v7239_v17 = vld [vmem:[%s8307_s23 + $0xc0] sm:$0xf]  ;;  %v7240_v4 = vld [vmem:[%s8307_s23 + $0xc4] sm:$0xf]  ;;  %v9689_v62 = vpop.f32.mrf.mxu0 }
 0x16d   : > { %v4678_v15 = vrot.slane %v4677_v14, 4  ;;  %v9673_v47 = vadd.f32 %v9513_v22, %v1349_v31  ;;  %8055 = vmatprep.mubr.bf16.mxu1 %v7185_v2  ;;  %v4685_v22 = vshrl.u32 %v7151_v30, 16  ;;  %v4688_v53 = vshll.u32 %v7151_v30, 16  ;;  %v9700_v2 = vpop.f32.mrf.mxu1 }
 0x16e   : > { %v4673_v28 = vsel %vm8397_vm5, %v4668_v16, %v4672_v39  ;;  %v5311_v63 = vsel %vm8378_vm4, %v5309_v48, %v5310_v29  ;;  %v9694_v20 = vadd.f32 %v9519_v43, %v1352_v59  ;;  %v9697_v31 = vadd.f32 %v9539_v54, %v1350_v23  ;;  %v7241_v39 = vld [vmem:[%s8307_s23 + $0xc8] sm:$0x1]  ;;  %v9702_v60 = vpop.f32.mrf.mxu0  ;;  %v7154_v59 = vld [vmem:[%s8307_s23 + $0xcc] sm:$0xf] }
 0x16f   : > { %10094 = vst [vmem:[#allocation6_spill] sm:$0xff] %v9673_v47  ;;  %v4683_v26 = vsel %vm8397_vm5, %v4678_v15, %v4682_v21  ;;  %v7290_v14 = vcombine.low %v5308_v51, %v5311_v63  ;;  %v4687_v30 = vrot.slane %v4685_v22, 4  ;;  %v4690_v16 = vrot.slane %v4688_v53, 5  ;;  %v9705_v13 = vpop.f32.mrf.mxu1  ;;  %v10100_v63 = vld [vmem:[#allocation9_spill] sm:$0xff] }
 0x170   : > { %10097 = vst [vmem:[#allocation7_spill] sm:$0xff] %v9694_v20  ;;  %10098 = vst [vmem:[#allocation8_spill] sm:$0xff] %v9697_v31  ;;  %v7186_v29 = vcombine.low %v4673_v28, %v4683_v26  ;;  %v4694_v48 = vshll.u32 %v7152_v3, 16  ;;  %v4698_v21 = vshrl.u32 %v7152_v3, 16  ;;  %v4704_v51 = vshll.u32 %v7153_v25, 16 }
 0x171   : > { %8104 = vmatmul.mubr.bf16.gmra.mxu0 %v7290_v14  ;;  %v7259_v15 = vrot.slane %v7239_v17, 9  ;;  %v5314_v43 = vrot.slane %v7240_v4, 5  ;;  %10099 = vst [vmem:[#allocation29_spill] sm:$0xff] %v9705_v13  ;;  %v4691_v54 = vor.u32 %v4690_v16, %v4687_v30  ;;  %v5317_v28 = vrot.slane %v7241_v39, 5  ;;  %v7155_v53 = vld [vmem:[%s8307_s23 + $0xd0] sm:$0xf]  ;;  %v9713_v4 = vpop.f32.mrf.mxu0 }
 0x172   : > { %8056 = vmatmul.mubr.bf16.gmra.mxu1 %v7186_v29  ;;  %v4696_v23 = vrot.slane %v4694_v48, 5  ;;  %v1355_v22 = vadd.f32 %v9557_v1, %v10100_v63  ;;  %v4700_v26 = vrot.slane %v4698_v21, 4  ;;  %v4706_v14 = vrot.slane %v4704_v51, 5  ;;  %v7156_v17 = vld [vmem:[%s8307_s23 + $0xd4] sm:$0x1]  ;;  %v9715_v29 = vpop.f32.mrf.mxu1 }
 0x173   : > { %v5315_v3 = vsel %vm8378_vm4, %v7259_v15, %v5314_v43  ;;  %v5316_v25 = vrot.slane %v5314_v43, 4  ;;  %10101 = vst [vmem:[#allocation9_spill] sm:$0xff] %v9715_v29  ;;  %v4692_v30 = vrot.slane %v4691_v54, 4  ;;  %v4709_v16 = vshrl.u32 %v7154_v59, 16  ;;  %v7242_v48 = vld [vmem:[%s8307_s23 + $0xcc] sm:$0xf]  ;;  %v9725_v20 = vpop.f32.mrf.mxu0 }
 0x174   : > { %v9718_v39 = vadd.f32 %v9559_v50, %v1355_v22  ;;  %v4712_v1 = vshll.u32 %v7154_v59, 16  ;;  %v4701_v21 = vor.u32 %v4700_v26, %v4696_v23  ;;  %v4718_v63 = vshll.u32 %v7155_v53, 16  ;;  %v7243_v15 = vld [vmem:[%s8307_s23 + $0xd0] sm:$0xf]  ;;  %v7244_v43 = vld [vmem:[%s8307_s23 + $0xd4] sm:$0x1]  ;;  %v9727_v47 = vpop.f32.mrf.mxu1 }
 0x175   : > { %v5318_v51 = vsel %vm8378_vm4, %v5316_v25, %v5317_v28  ;;  %v4722_v31 = vshrl.u32 %v7155_v53, 16  ;;  %10103 = vst [vmem:[#allocation31_spill] sm:$0xff] %v9727_v47  ;;  %v4697_v54 = vsel %vm8397_vm5, %v4692_v30, %v4696_v23  ;;  %v4711_v22 = vrot.slane %v4709_v16, 4  ;;  %v9731_v24 = vpop.f32.mrf.mxu0  ;;  %s7335_s23 = sshll.u32 %s10134_s13, 7 }
 0x176   : > { %10102 = vst [vmem:[#allocation30_spill] sm:$0xff] %v9718_v39  ;;  %v7291_v50 = vcombine.low %v5315_v3, %v5318_v51  ;;  %v4714_v39 = vrot.slane %v4712_v1, 5  ;;  %v4702_v59 = vrot.slane %v4701_v21, 4  ;;  %v4720_v45 = vrot.slane %v4718_v63, 5  ;;  %v2262_v28 = vpop.f32.mrf.mxu1  ;;  %v10104_v3 = vld [vmem:[#allocation10_spill] sm:$0xff]  ;;  %v10105_v63 = vld [vmem:[#allocation11_spill] sm:$0xff]  ;;  %s9995_s19 = scalar_lea.vmem %s10052_s2, %s7335_s23 }
 0x177   : > { %v4724_v26 = vrot.slane %v4722_v31, 4  ;;  %v4728_v37 = vshll.u32 %v7156_v17, 16  ;;  %v7260_v25 = vrot.slane %v7242_v48, 9  ;;  %v5321_v29 = vrot.slane %v7243_v15, 5  ;;  %v3067_v16 = vpop.f32.mrf.mxu0  ;;  %v10106_v15 = vld [vmem:[#allocation12_spill] sm:$0xff] }
 0x178   : > { %8107 = vmatprep.mubr.bf16.mxu0 %v7291_v50  ;;  %v4715_v53 = vor.u32 %v4714_v39, %v4711_v22  ;;  %v5324_v9 = vrot.slane %v7244_v43, 5  ;;  %v4707_v47 = vsel %vm8397_vm5, %v4702_v59, %v4706_v14  ;;  %v1353_v30 = vadd.f32 %v9567_v55, %v10104_v3  ;;  %v7854_v1 = vpop.f32.mrf.mxu1 }
 0x179   : > { %v4725_v13 = vor.u32 %v4724_v26, %v4720_v45  ;;  %v4730_v23 = vrot.slane %v4728_v37, 5  ;;  %v7187_v31 = vcombine.low %v4697_v54, %v4707_v47  ;;  %v5322_v21 = vsel %vm8378_vm4, %v7260_v25, %v5321_v29  ;;  %v10107_v54 = vld [vmem:[#allocation13_spill] sm:$0xff]  ;;  %v10110_v26 = vld [vmem:[#allocation16_spill] sm:$0xff] }
 0x17a   : > { %v4716_v17 = vrot.slane %v4715_v53, 4  ;;  %v5323_v51 = vrot.slane %v5321_v29, 4  ;;  %v9740_v48 = vadd.f32 %v9569_v36, %v1353_v30  ;;  %v1356_v14 = vadd.f32 %v9579_v58, %v10105_v63  ;;  %v2265_v43 = vpop.f32.mrf.mxu1  ;;  %v10108_v29 = vld [vmem:[#allocation14_spill] sm:$0xff]  ;;  %v10111_v53 = vld [vmem:[#allocation17_spill] sm:$0xff]  ;;  %v10115_v30 = vld [vmem:[#allocation19_spill] sm:$0xff] }
 0x17b   : > { %v4726_v39 = vrot.slane %v4725_v13, 4  ;;  %v1354_v37 = vadd.f32 %v9585_v8, %v10106_v15  ;;  %8059 = vmatprep.mubr.bf16.mxu1 %v7187_v31  ;;  %v2375_v13 = vadd.f32 %v9594_v6, %v10107_v54  ;;  %v2373_v36 = vadd.f32 %v9607_v38, %v10108_v29  ;;  %v10109_v38 = vld [vmem:[#allocation15_spill] sm:$0xff] }
 0x17c   : > { %v4721_v55 = vsel %vm8397_vm5, %v4716_v17, %v4720_v45  ;;  %v5325_v47 = vsel %vm8378_vm4, %v5323_v51, %v5324_v9  ;;  %v9757_v8 = vadd.f32 %v9581_v12, %v1356_v14  ;;  %v7901_v45 = vpop.f32.mrf.mxu0  ;;  %v7857_v59 = vpop.f32.mrf.mxu1  ;;  %v2376_v56 = vadd.f32 %v9626_v0, %v10109_v38  ;;  %v10117_v17 = vld [vmem:[#allocation20_spill] sm:$0xff]  ;;  %v10118_v51 = vld [vmem:[#allocation21_spill] sm:$0xff]  ;;  %v10120_v15 = vld [vmem:[#allocation23_spill] sm:$0xff] }
 0x17d   : > { %v4731_v58 = vsel %vm8397_vm5, %v4726_v39, %v4730_v23  ;;  %v7292_v50 = vcombine.low %v5322_v21, %v5325_v47  ;;  %v9760_v22 = vadd.f32 %v9587_v41, %v1354_v37  ;;  %v9763_v9 = vadd.f32 %v9615_v57, %v2375_v13 }
 0x17e   : > { %v7188_v46 = vcombine.low %v4721_v55, %v4731_v58  ;;  %v9766_v6 = vadd.f32 %v9628_v61, %v2373_v36  ;;  %v2374_v12 = vadd.f32 %v9631_v10, %v10110_v26  ;;  %v2379_v41 = vadd.f32 %v9641_v42, %v10111_v53  ;;  %v3080_v23 = vpop.f32.mrf.mxu0  ;;  %v2278_v3 = vpop.f32.mrf.mxu1  ;;  %v10122_v36 = vld [vmem:[#allocation25_spill] sm:$0xff]  ;;  %v10123_v58 = vld [vmem:[#allocation26_spill] sm:$0xff] }
 0x17f   : > { %8108 = vmatmul.mubr.bf16.gmra.mxu0 %v7292_v50  ;;  %v2377_v25 = vadd.f32 %v9653_v33, %v9330_v49  ;;  %v2380_v57 = vadd.f32 %v9657_v44, %v9340_v7  ;;  %v9779_v61 = vadd.f32 %v9636_v5, %v2376_v56  ;;  %v2378_v0 = vadd.f32 %v9666_v35, %v9343_v52 }
 0x180   : > { %8060 = vmatmul.mubr.bf16.gmra.mxu1 %v7188_v46  ;;  %v2383_v10 = vadd.f32 %v9681_v32, %v9373_v34  ;;  %v2381_v42 = vadd.f32 %v9700_v2, %v9411_v40  ;;  %v9788_v49 = vadd.f32 %v9647_v27, %v2374_v12  ;;  %v9791_v7 = vadd.f32 %v9659_v19, %v2379_v41  ;;  %v7902_v5 = vpop.f32.mrf.mxu0  ;;  %v7858_v52 = vpop.f32.mrf.mxu1  ;;  %v10112_v19 = vld [vmem:[#allocation29_spill] sm:$0xff]  ;;  %v10113_v32 = vld [vmem:[#allocation18_spill] sm:$0xff]  ;;  %v10126_v41 = vld [vmem:[#allocation3_spill] sm:$0xff] }
 0x181   : > { %v9794_v44 = vadd.f32 %v9670_v18, %v2377_v25  ;;  %v9797_v33 = vadd.f32 %v9689_v62, %v2380_v57  ;;  %v9800_v35 = vadd.f32 %v9702_v60, %v2378_v0  ;;  %v2384_v27 = vadd.f32 %v10112_v19, %v9416_v11  ;;  %v10114_v18 = vld [vmem:[#allocation9_spill] sm:$0xff]  ;;  %v10116_v62 = vld [vmem:[#allocation31_spill] sm:$0xff]  ;;  %v10121_v11 = vld [vmem:[#allocation24_spill] sm:$0xff] }
 0x182   : > { %v9803_v34 = vadd.f32 %v9713_v4, %v2383_v10  ;;  %v9806_v40 = vadd.f32 %v9725_v20, %v2381_v42  ;;  %v2382_v2 = vadd.f32 %v10114_v18, %v10113_v32  ;;  %v2387_v31 = vadd.f32 %v10116_v62, %v10115_v30  ;;  %v3083_v39 = vpop.f32.mrf.mxu0  ;;  %v2281_v63 = vpop.f32.mrf.mxu1  ;;  %v10119_v20 = vld [vmem:[#allocation22_spill] sm:$0xff]  ;;  %v10127_v0 = vld [vmem:[#allocation4_spill] sm:$0xff]  ;;  %v10128_v19 = vld [vmem:[#allocation5_spill] sm:$0xff] }
 0x183   : > { %v2385_v21 = vadd.f32 %v2262_v28, %v10117_v17  ;;  %v2388_v60 = vadd.f32 %v7854_v1, %v10118_v51  ;;  %v9817_v4 = vadd.f32 %v9731_v24, %v2384_v27  ;;  %v2386_v14 = vadd.f32 %v2265_v43, %v10119_v20  ;;  %v10124_v43 = vld [vmem:[#allocation27_spill] sm:$0xff]  ;;  %v10131_v20 = vld [vmem:[#allocation8_spill] sm:$0xff] }
 0x184   : > { %v2391_v37 = vadd.f32 %v7857_v59, %v10120_v15  ;;  %v2389_v55 = vadd.f32 %v2278_v3, %v10121_v11  ;;  %v9822_v47 = vadd.f32 %v3067_v16, %v2382_v2  ;;  %v9824_v54 = vadd.f32 %v7901_v45, %v2387_v31  ;;  %v7861_v1 = vpop.f32.mrf.mxu1  ;;  %v7905_v59 = vpop.f32.mrf.mxu0  ;;  %v10125_v16 = vld [vmem:[#allocation28_spill] sm:$0xff]  ;;  %v10129_v2 = vld [vmem:[#allocation6_spill] sm:$0xff] }
 0x185   : > { %v9826_v13 = vadd.f32 %v3080_v23, %v2385_v21  ;;  %v9828_v28 = vadd.f32 %v7902_v5, %v2388_v60  ;;  %v9830_v29 = vadd.f32 %v3083_v39, %v2386_v14  ;;  %v2392_v24 = vadd.f32 %v7858_v52, %v10122_v36  ;;  %v10130_v21 = vld [vmem:[#allocation7_spill] sm:$0xff] }
 0x186   : > { %v2390_v50 = vadd.f32 %v2281_v63, %v10123_v58  ;;  %v2395_v46 = vadd.f32 %v7861_v1, %v10124_v43  ;;  %v2294_v38 = vpop.f32.mrf.mxu1  ;;  %v9835_v56 = vadd.f32 %v7905_v59, %v2391_v37  ;;  %v3096_v26 = vpop.f32.mrf.mxu0 }
 0x187   : > { %v2393_v45 = vadd.f32 %v2294_v38, %v10125_v16  ;;  %v9838_v53 = vadd.f32 %v3096_v26, %v2389_v55  ;;  %v10132_v55 = vld [vmem:[#allocation30_spill] sm:$0xff] }
 0x188   : > { %v7862_v12 = vpop.f32.mrf.mxu1  ;;  %v7906_v57 = vpop.f32.mrf.mxu0 }
 0x189   : > { %v2396_v25 = vadd.f32 %v7862_v12, %v10126_v41  ;;  %v9841_v3 = vadd.f32 %v7906_v57, %v2392_v24 }
 0x18a   : > { %v2297_v23 = vpop.f32.mrf.mxu1  ;;  %v3099_v42 = vpop.f32.mrf.mxu0 }
 0x18b   : > { %v2394_v10 = vadd.f32 %v2297_v23, %v10127_v0  ;;  %v9844_v52 = vadd.f32 %v3099_v42, %v2390_v50 }
 0x18c   : > { %v7865_v5 = vpop.f32.mrf.mxu1  ;;  %v7909_v18 = vpop.f32.mrf.mxu0 }
 0x18d   : > { %v2399_v27 = vadd.f32 %v7865_v5, %v10128_v19  ;;  %v9848_v62 = vadd.f32 %v7909_v18, %v2395_v46 }
 0x18e   : > { %v2310_v32 = vpop.f32.mrf.mxu1  ;;  %v3112_v17 = vpop.f32.mrf.mxu0 }
 0x18f   : > { %v2397_v30 = vadd.f32 %v2310_v32, %v10129_v2  ;;  %v9851_v60 = vadd.f32 %v3112_v17, %v2393_v45 }
 0x190   : > { %v7866_v31 = vpop.f32.mrf.mxu1  ;;  %v7910_v63 = vpop.f32.mrf.mxu0 }
 0x191   : > { %v2400_v51 = vadd.f32 %v7866_v31, %v10130_v21  ;;  %v9854_v15 = vadd.f32 %v7910_v63, %v2396_v25 }
 0x192   : > { %v2313_v39 = vpop.f32.mrf.mxu1  ;;  %v3115_v11 = vpop.f32.mrf.mxu0 }
 0x193   : > { %v2398_v14 = vadd.f32 %v2313_v39, %v10131_v20  ;;  %v9857_v36 = vadd.f32 %v3115_v11, %v2394_v10 }
 0x194   : > { %v7869_v37 = vpop.f32.mrf.mxu1  ;;  %v7913_v58 = vpop.f32.mrf.mxu0 }
 0x195   : > { %v2403_v1 = vadd.f32 %v7869_v37, %v10132_v55  ;;  %v9860_v43 = vadd.f32 %v7913_v58, %v2399_v27 }
 0x196   : > { %v2326_v24 = vpop.f32.mrf.mxu1  ;;  %v3128_v59 = vpop.f32.mrf.mxu0 }
 0x197   : > { %v2401_v50 = vadd.f32 %v2326_v24, %v9740_v48  ;;  %v9863_v16 = vadd.f32 %v3128_v59, %v2397_v30 }
 0x198   : > { %v7870_v46 = vpop.f32.mrf.mxu1  ;;  %v7914_v26 = vpop.f32.mrf.mxu0 }
 0x199   : > { %v2404_v38 = vadd.f32 %v7870_v46, %v9757_v8  ;;  %v9866_v41 = vadd.f32 %v7914_v26, %v2400_v51 }
 0x19a   : > { %v2329_v45 = vpop.f32.mrf.mxu1  ;;  %v3131_v25 = vpop.f32.mrf.mxu0 }
 0x19b   : > { %v2402_v12 = vadd.f32 %v2329_v45, %v9760_v22  ;;  %v9868_v57 = vadd.f32 %v3131_v25, %v2398_v14 }
 0x19c   : > { %v7917_v23 = vpop.f32.mrf.mxu0  ;;  %v7937_v42 = vpop.f32.mrf.mxu1 }
 0x19d   : > { %v9870_v0 = vadd.f32 %v7917_v23, %v2403_v1  ;;  %v3787_v8 = vadd.f32 %v7937_v42, %v9763_v9 }
 0x19e   : > { %v3144_v48 = vpop.f32.mrf.mxu0  ;;  %v3626_v27 = vpop.f32.mrf.mxu1 }
 0x19f   : > { %v9872_v10 = vadd.f32 %v3144_v48, %v2401_v50  ;;  %v3785_v22 = vadd.f32 %v3626_v27, %v9766_v6 }
 0x1a0   : > { %v7918_v5 = vpop.f32.mrf.mxu0  ;;  %v9880_v2 = vpop.f32.mrf.mxu1 }
 0x1a1   : > { %v9875_v19 = vadd.f32 %v7918_v5, %v2404_v38 }
 0x1a2   : > { %v3147_v32 = vpop.f32.mrf.mxu0  ;;  %v9884_v17 = vpop.f32.mrf.mxu1 }
 0x1a3   : > { %v9878_v18 = vadd.f32 %v3147_v32, %v2402_v12 }
 0x1a4   : > { %v7985_v30 = vpop.f32.mrf.mxu0  ;;  %v7941_v39 = vpop.f32.mrf.mxu1 }
 0x1a5   : > { %v9882_v31 = vadd.f32 %v7985_v30, %v3787_v8  ;;  %v3791_v63 = vadd.f32 %v7941_v39, %v9791_v7 }
 0x1a6   : > { %v4077_v21 = vpop.f32.mrf.mxu0  ;;  %v3642_v20 = vpop.f32.mrf.mxu1 }
 0x1a7   : > { %v9886_v51 = vadd.f32 %v4077_v21, %v3785_v22  ;;  %v3789_v6 = vadd.f32 %v3642_v20, %v9794_v44 }
 0x1a8   : > { %v9888_v9 = vpop.f32.mrf.mxu0  ;;  %v9894_v37 = vpop.f32.mrf.mxu1 }
 0x1aa   : > { %v9891_v14 = vpop.f32.mrf.mxu0  ;;  %v9898_v1 = vpop.f32.mrf.mxu1 }
 0x1ac   : > { %v7989_v11 = vpop.f32.mrf.mxu0  ;;  %v7945_v50 = vpop.f32.mrf.mxu1 }
 0x1ad   : > { %v9896_v55 = vadd.f32 %v7989_v11, %v3791_v63  ;;  %v3795_v7 = vadd.f32 %v7945_v50, %v9803_v34 }
 0x1ae   : > { %v4093_v24 = vpop.f32.mrf.mxu0  ;;  %v3658_v59 = vpop.f32.mrf.mxu1 }
 0x1af   : > { %v9900_v58 = vadd.f32 %v4093_v24, %v3789_v6  ;;  %v3793_v44 = vadd.f32 %v3658_v59, %v9806_v40 }
 0x1b0   : > { %v9902_v46 = vpop.f32.mrf.mxu0  ;;  %v7946_v45 = vpop.f32.mrf.mxu1 }
 0x1b1   : > { %v3796_v12 = vadd.f32 %v7946_v45, %v9817_v4 }
 0x1b2   : > { %v9905_v38 = vpop.f32.mrf.mxu0  ;;  %v9911_v23 = vpop.f32.mrf.mxu1 }
 0x1b4   : > { %v7993_v26 = vpop.f32.mrf.mxu0  ;;  %v7949_v5 = vpop.f32.mrf.mxu1 }
 0x1b5   : > { %v9909_v25 = vadd.f32 %v7993_v26, %v3795_v7  ;;  %v3799_v34 = vadd.f32 %v7949_v5, %v9824_v54 }
 0x1b6   : > { %v4109_v48 = vpop.f32.mrf.mxu0  ;;  %v3674_v32 = vpop.f32.mrf.mxu1 }
 0x1b7   : > { %v9913_v42 = vadd.f32 %v4109_v48, %v3793_v44  ;;  %v3797_v40 = vadd.f32 %v3674_v32, %v9826_v13 }
 0x1b8   : > { %v7994_v8 = vpop.f32.mrf.mxu0  ;;  %v7950_v30 = vpop.f32.mrf.mxu1 }
 0x1b9   : > { %v9916_v27 = vadd.f32 %v7994_v8, %v3796_v12  ;;  %v3800_v21 = vadd.f32 %v7950_v30, %v9828_v28 }
 0x1ba   : > { %v9918_v22 = vpop.f32.mrf.mxu0  ;;  %v3677_v63 = vpop.f32.mrf.mxu1 }
 0x1bb   : > { %v3798_v6 = vadd.f32 %v3677_v63, %v9830_v29 }
 0x1bc   : > { %v7997_v4 = vpop.f32.mrf.mxu0  ;;  %v7953_v54 = vpop.f32.mrf.mxu1 }
 0x1bd   : > { %v9922_v39 = vadd.f32 %v7997_v4, %v3799_v34  ;;  %v3803_v50 = vadd.f32 %v7953_v54, %v9835_v56 }
 0x1be   : > { %v4125_v20 = vpop.f32.mrf.mxu0  ;;  %v3690_v59 = vpop.f32.mrf.mxu1 }
 0x1bf   : > { %v9925_v11 = vadd.f32 %v4125_v20, %v3797_v40  ;;  %v3801_v44 = vadd.f32 %v3690_v59, %v9838_v53 }
 0x1c0   : > { %v7998_v24 = vpop.f32.mrf.mxu0  ;;  %v7954_v28 = vpop.f32.mrf.mxu1 }
 0x1c1   : > { %v9928_v7 = vadd.f32 %v7998_v24, %v3800_v21  ;;  %v3804_v12 = vadd.f32 %v7954_v28, %v9841_v3 }
 0x1c2   : > { %v4128_v13 = vpop.f32.mrf.mxu0  ;;  %v3693_v29 = vpop.f32.mrf.mxu1 }
 0x1c3   : > { %v9931_v45 = vadd.f32 %v4128_v13, %v3798_v6  ;;  %v3802_v8 = vadd.f32 %v3693_v29, %v9844_v52 }
 0x1c4   : > { %v8001_v26 = vpop.f32.mrf.mxu0  ;;  %v7957_v56 = vpop.f32.mrf.mxu1 }
 0x1c5   : > { %v9934_v48 = vadd.f32 %v8001_v26, %v3803_v50  ;;  %v3807_v40 = vadd.f32 %v7957_v56, %v9848_v62 }
 0x1c6   : > { %v4141_v5 = vpop.f32.mrf.mxu0  ;;  %v3706_v53 = vpop.f32.mrf.mxu1 }
 0x1c7   : > { %v9937_v34 = vadd.f32 %v4141_v5, %v3801_v44  ;;  %v3805_v21 = vadd.f32 %v3706_v53, %v9851_v60 }
 0x1c8   : > { %v8002_v32 = vpop.f32.mrf.mxu0  ;;  %v7958_v3 = vpop.f32.mrf.mxu1 }
 0x1c9   : > { %v9940_v30 = vadd.f32 %v8002_v32, %v3804_v12  ;;  %v3808_v6 = vadd.f32 %v7958_v3, %v9854_v15 }
 0x1ca   : > { %v4144_v4 = vpop.f32.mrf.mxu0  ;;  %v3709_v52 = vpop.f32.mrf.mxu1 }
 0x1cb   : > { %v9943_v63 = vadd.f32 %v4144_v4, %v3802_v8  ;;  %v3806_v50 = vadd.f32 %v3709_v52, %v9857_v36 }
 0x1cc   : > { %v8005_v20 = vpop.f32.mrf.mxu0 }
 0x1cd   : > { %v9946_v54 = vadd.f32 %v8005_v20, %v3807_v40 }
 0x1ce   : > { %v4157_v24 = vpop.f32.mrf.mxu0 }
 0x1cf   : > { %v9949_v59 = vadd.f32 %v4157_v24, %v3805_v21  ;;  %v7961_v62 = vpop.f32.mrf.mxu1 }
 0x1d0   : > { %v8006_v13 = vpop.f32.mrf.mxu0  ;;  %v3811_v44 = vadd.f32 %v7961_v62, %v9860_v43 }
 0x1d1   : > { %v9952_v28 = vadd.f32 %v8006_v13, %v3808_v6  ;;  %v3722_v60 = vpop.f32.mrf.mxu1 }
 0x1d2   : > { %v4160_v26 = vpop.f32.mrf.mxu0  ;;  %v3809_v12 = vadd.f32 %v3722_v60, %v9863_v16 }
 0x1d3   : > { %v9955_v29 = vadd.f32 %v4160_v26, %v3806_v50  ;;  %v7962_v15 = vpop.f32.mrf.mxu1 }
 0x1d4   : > { %v3812_v8 = vadd.f32 %v7962_v15, %v9866_v41 }
 0x1d5   : > { %v8009_v5 = vpop.f32.mrf.mxu0  ;;  %v3725_v36 = vpop.f32.mrf.mxu1 }
 0x1d6   : > { %v9958_v56 = vadd.f32 %v8009_v5, %v3811_v44  ;;  %v3810_v40 = vadd.f32 %v3725_v36, %v9868_v57 }
 0x1d7   : > { %v4173_v32 = vpop.f32.mrf.mxu0 }
 0x1d8   : > { %v9961_v53 = vadd.f32 %v4173_v32, %v3809_v12 }
 0x1d9   : > { %v8010_v4 = vpop.f32.mrf.mxu0 }
 0x1da   : > { %v9964_v3 = vadd.f32 %v8010_v4, %v3812_v8 }
 0x1db   : > { %v4176_v20 = vpop.f32.mrf.mxu0 }
 0x1dc   : > { %v9967_v52 = vadd.f32 %v4176_v20, %v3810_v40 }
 0x1dd   : > { %v7965_v43 = vpop.f32.mrf.mxu1  ;;  %v8013_v24 = vpop.f32.mrf.mxu0 }
 0x1de   : > { %v3815_v21 = vadd.f32 %v7965_v43, %v9870_v0  ;;  %v3788_v0 = vadd.f32 %v9880_v2, %v9779_v61 }
 0x1df   : > { %v3738_v16 = vpop.f32.mrf.mxu1  ;;  %v4189_v13 = vpop.f32.mrf.mxu0 }
 0x1e0   : > { %v3813_v6 = vadd.f32 %v3738_v16, %v9872_v10  ;;  %v9970_v62 = vadd.f32 %v8013_v24, %v3815_v21  ;;  %v3786_v10 = vadd.f32 %v9884_v17, %v9788_v49  ;;  %v4239_v8 = vadd.f32 %v9888_v9, %v3788_v0 }
 0x1e1   : > { %v7966_v41 = vpop.f32.mrf.mxu1  ;;  %v8014_v12 = vpop.f32.mrf.mxu0  ;;  %v3792_v49 = vadd.f32 %v9894_v37, %v9797_v33 }
 0x1e2   : > { %v3816_v50 = vadd.f32 %v7966_v41, %v9875_v19  ;;  %v9975_v60 = vadd.f32 %v4189_v13, %v3813_v6  ;;  %v4237_v2 = vadd.f32 %v9891_v14, %v3786_v10 }
 0x1e3   : > { %v3741_v57 = vpop.f32.mrf.mxu1  ;;  %v4192_v5 = vpop.f32.mrf.mxu0  ;;  %v4243_v33 = vadd.f32 %v9902_v46, %v3792_v49 }
 0x1e4   : > { %v3814_v44 = vadd.f32 %v3741_v57, %v9878_v18  ;;  %v9979_v15 = vadd.f32 %v8014_v12, %v3816_v50 }
 0x1e5   : > { %v8033_v26 = vpop.f32.mrf.mxu1 }
 0x1e6   : > { %v9982_v36 = vadd.f32 %v4192_v5, %v3814_v44  ;;  %v5056_v40 = vadd.f32 %v8033_v26, %v9882_v31 }
 0x1e7   : > { %v4895_v19 = vpop.f32.mrf.mxu1 }
 0x1e8   : > { %v5054_v61 = vadd.f32 %v4895_v19, %v9886_v51  ;;  %v3790_v51 = vadd.f32 %v9898_v1, %v9800_v35 }
 0x1e9   : > { %v8034_v18 = vpop.f32.mrf.mxu1 }
 0x1ea   : > { %v5057_v43 = vadd.f32 %v8034_v18, %v4239_v8  ;;  %v4241_v19 = vadd.f32 %v9905_v38, %v3790_v51 }
 0x1eb   : > { %v8081_v32 = vpop.f32.mrf.mxu0  ;;  %v4898_v4 = vpop.f32.mrf.mxu1 }
 0x1ec   : > { %v5055_v17 = vadd.f32 %v4898_v4, %v4237_v2  ;;  %v5650_v6 = vadd.f32 %v8081_v32, %v5056_v40 }
 0x1ed   : > { %v5489_v21 = vpop.f32.mrf.mxu0  ;;  %v8037_v16 = vpop.f32.mrf.mxu1 }
 0x1ee   : > { %v5648_v9 = vadd.f32 %v5489_v21, %v5054_v61  ;;  %v5060_v44 = vadd.f32 %v8037_v16, %v9896_v55  ;;  %v6488_v46 = vmul.f32 %v5650_v6, %v5650_v6 }
 0x1ef   : > { %v8082_v20 = vpop.f32.mrf.mxu0  ;;  %v4911_v24 = vpop.f32.mrf.mxu1 }
 0x1f0   : > { %v5651_v41 = vadd.f32 %v8082_v20, %v5057_v43  ;;  %v5058_v50 = vadd.f32 %v4911_v24, %v9900_v58  ;;  %v6486_v13 = vmul.f32 %v5648_v9, %v5648_v9 }
 0x1f1   : > { %v5492_v31 = vpop.f32.mrf.mxu0  ;;  %v8038_v57 = vpop.f32.mrf.mxu1 }
 0x1f2   : > { %v7376_v14 = vpack.c.bf16 %v5651_v41, %v5650_v6  ;;  %v5649_v37 = vadd.f32 %v5492_v31, %v5055_v17  ;;  %v5061_v12 = vadd.f32 %v8038_v57, %v4243_v33  ;;  %v6489_v58 = vmul.f32 %v5651_v41, %v5651_v41 }
 0x1f3   : > { %v8085_v0 = vpop.f32.mrf.mxu0  ;;  %v4914_v10 = vpop.f32.mrf.mxu1 }
 0x1f4   : > { %7448 = vst [vmem:[%s9995_s19 + $0x8] sm:$0xff] %v7376_v14   ;;  %v7371_v35 = vpack.c.bf16 %v5649_v37, %v5648_v9  ;;  %v6449_v1 = vadd.f32 %v5649_v37, %v5648_v9  ;;  %v6487_v26 = vmul.f32 %v5649_v37, %v5649_v37  ;;  %v5059_v2 = vadd.f32 %v4914_v10, %v4241_v19 }
 0x1f5   : > { %v5505_v5 = vpop.f32.mrf.mxu0  ;;  %v5654_v40 = vadd.f32 %v8085_v0, %v5060_v44 }
 0x1f6   : > { %7372 = vst [vmem:[%s9995_s19] sm:$0xff] %v7371_v35   ;;  %v6450_v8 = vadd.f32 %v6449_v1, %v5650_v6  ;;  %v6518_v18 = vadd.f32 %v6487_v26, %v6486_v13  ;;  %v5652_v32 = vadd.f32 %v5505_v5, %v5058_v50  ;;  %v3794_v6 = vadd.f32 %v9911_v23, %v9822_v47 }
 0x1f7   : > { %v8086_v61 = vpop.f32.mrf.mxu0  ;;  %v6492_v50 = vmul.f32 %v5654_v40, %v5654_v40 }
 0x1f8   : > { %v6519_v55 = vadd.f32 %v6518_v18, %v6488_v46  ;;  %v6451_v43 = vadd.f32 %v6450_v8, %v5651_v41  ;;  %v5655_v4 = vadd.f32 %v8086_v61, %v5061_v12  ;;  %v6490_v17 = vmul.f32 %v5652_v32, %v5652_v32 }
 0x1f9   : > { %v5508_v21 = vpop.f32.mrf.mxu0  ;;  %v4245_v0 = vadd.f32 %v9918_v22, %v3794_v6 }
 0x1fa   : > { %v6452_v49 = vadd.f32 %v6451_v43, %v5652_v32  ;;  %v6520_v16 = vadd.f32 %v6519_v55, %v6489_v58  ;;  %v7386_v38 = vpack.c.bf16 %v5655_v4, %v5654_v40  ;;  %v5653_v9 = vadd.f32 %v5508_v21, %v5059_v2  ;;  %v8041_v51 = vpop.f32.mrf.mxu1 }
 0x1fb   : > { %v8089_v20 = vpop.f32.mrf.mxu0  ;;  %v5064_v35 = vadd.f32 %v8041_v51, %v9909_v25  ;;  %v6493_v23 = vmul.f32 %v5655_v4, %v5655_v4 }
 0x1fc   : > { %v6521_v24 = vadd.f32 %v6520_v16, %v6490_v17  ;;  %7450 = vst [vmem:[%s9995_s19 + $0x18] sm:$0xff] %v7386_v38   ;;  %v7381_v31 = vpack.c.bf16 %v5653_v9, %v5652_v32  ;;  %v6453_v33 = vadd.f32 %v6452_v49, %v5653_v9  ;;  %v6491_v14 = vmul.f32 %v5653_v9, %v5653_v9  ;;  %v4927_v41 = vpop.f32.mrf.mxu1 }
 0x1fd   : > { %v5521_v37 = vpop.f32.mrf.mxu0  ;;  %v5062_v44 = vadd.f32 %v4927_v41, %v9913_v42  ;;  %v5658_v42 = vadd.f32 %v8089_v20, %v5064_v35 }
 0x1fe   : > { %7449 = vst [vmem:[%s9995_s19 + $0x10] sm:$0xff] %v7381_v31   ;;  %v6454_v57 = vadd.f32 %v6453_v33, %v5654_v40  ;;  %v6522_v13 = vadd.f32 %v6521_v24, %v6491_v14  ;;  %v8042_v1 = vpop.f32.mrf.mxu1 }
 0x1ff   : > { %v8090_v47 = vpop.f32.mrf.mxu0  ;;  %v5656_v12 = vadd.f32 %v5521_v37, %v5062_v44  ;;  %v5065_v19 = vadd.f32 %v8042_v1, %v9916_v27  ;;  %v6496_v21 = vmul.f32 %v5658_v42, %v5658_v42 }
 0x200   : > { %v6523_v26 = vadd.f32 %v6522_v13, %v6492_v50  ;;  %v6455_v10 = vadd.f32 %v6454_v57, %v5655_v4  ;;  %v4930_v5 = vpop.f32.mrf.mxu1 }
 0x201   : > { %v6494_v8 = vmul.f32 %v5656_v12, %v5656_v12  ;;  %v5063_v32 = vadd.f32 %v4930_v5, %v4245_v0  ;;  %v5659_v58 = vadd.f32 %v8090_v47, %v5065_v19  ;;  %v5524_v22 = vpop.f32.mrf.mxu0 }
 0x202   : > { %v6456_v46 = vadd.f32 %v6455_v10, %v5656_v12  ;;  %v6524_v18 = vadd.f32 %v6523_v26, %v6493_v23 }
 0x203   : > { %v5657_v25 = vadd.f32 %v5524_v22, %v5063_v32  ;;  %v7396_v2 = vpack.c.bf16 %v5659_v58, %v5658_v42  ;;  %v6497_v38 = vmul.f32 %v5659_v58, %v5659_v58 }
 0x204   : > { %v6525_v61 = vadd.f32 %v6524_v18, %v6494_v8 }
 0x205   : > { %v7391_v55 = vpack.c.bf16 %v5657_v25, %v5656_v12  ;;  %v6457_v40 = vadd.f32 %v6456_v46, %v5657_v25  ;;  %v6495_v43 = vmul.f32 %v5657_v25, %v5657_v25  ;;  %7452 = vst [vmem:[%s9995_s19 + $0x28] sm:$0xff] %v7396_v2  }
 0x207   : > { %v8093_v4 = vpop.f32.mrf.mxu0  ;;  %7451 = vst [vmem:[%s9995_s19 + $0x20] sm:$0xff] %v7391_v55   ;;  %v6458_v27 = vadd.f32 %v6457_v40, %v5658_v42  ;;  %v6526_v49 = vadd.f32 %v6525_v61, %v6495_v43 }
 0x208   : > { %v8045_v17 = vpop.f32.mrf.mxu1 }
 0x209   : > { %v5537_v16 = vpop.f32.mrf.mxu0  ;;  %v6527_v9 = vadd.f32 %v6526_v49, %v6496_v21  ;;  %v5068_v20 = vadd.f32 %v8045_v17, %v9922_v39  ;;  %v6459_v24 = vadd.f32 %v6458_v27, %v5659_v58 }
 0x20a   : > { %v4943_v6 = vpop.f32.mrf.mxu1 }
 0x20b   : > { %v5066_v51 = vadd.f32 %v4943_v6, %v9925_v11  ;;  %v6528_v31 = vadd.f32 %v6527_v9, %v6497_v38  ;;  %v8094_v14 = vpop.f32.mrf.mxu0  ;;  %v5662_v50 = vadd.f32 %v8093_v4, %v5068_v20 }
 0x20c   : > { %v8046_v33 = vpop.f32.mrf.mxu1 }
 0x20d   : > { %v5660_v37 = vadd.f32 %v5537_v16, %v5066_v51  ;;  %v5069_v41 = vadd.f32 %v8046_v33, %v9928_v7  ;;  %v5540_v39 = vpop.f32.mrf.mxu0  ;;  %v6500_v10 = vmul.f32 %v5662_v50, %v5662_v50 }
 0x20e   : > { %v4946_v57 = vpop.f32.mrf.mxu1 }
 0x20f   : > { %v6460_v13 = vadd.f32 %v6459_v24, %v5660_v37  ;;  %v6498_v44 = vmul.f32 %v5660_v37, %v5660_v37  ;;  %v5663_v0 = vadd.f32 %v8094_v14, %v5069_v41  ;;  %v5067_v35 = vadd.f32 %v4946_v57, %v9931_v45 }
 0x211   : > { %v6529_v1 = vadd.f32 %v6528_v31, %v6498_v44  ;;  %v7406_v47 = vpack.c.bf16 %v5663_v0, %v5662_v50  ;;  %v5661_v23 = vadd.f32 %v5540_v39, %v5067_v35  ;;  %v6501_v8 = vmul.f32 %v5663_v0, %v5663_v0 }
 0x213   : > { %7454 = vst [vmem:[%s9995_s19 + $0x38] sm:$0xff] %v7406_v47   ;;  %v7401_v11 = vpack.c.bf16 %v5661_v23, %v5660_v37  ;;  %v6461_v26 = vadd.f32 %v6460_v13, %v5661_v23  ;;  %v6499_v12 = vmul.f32 %v5661_v23, %v5661_v23 }
 0x215   : > { %7453 = vst [vmem:[%s9995_s19 + $0x30] sm:$0xff] %v7401_v11   ;;  %v6462_v19 = vadd.f32 %v6461_v26, %v5662_v50  ;;  %v6530_v7 = vadd.f32 %v6529_v1, %v6499_v12  ;;  %v8097_v5 = vpop.f32.mrf.mxu0 }
 0x216   : > { %v8049_v46 = vpop.f32.mrf.mxu1 }
 0x217   : > { %v6531_v18 = vadd.f32 %v6530_v7, %v6500_v10  ;;  %v5553_v32 = vpop.f32.mrf.mxu0  ;;  %v6463_v42 = vadd.f32 %v6462_v19, %v5663_v0  ;;  %v5072_v45 = vadd.f32 %v8049_v46, %v9934_v48 }
 0x218   : > { %v4959_v58 = vpop.f32.mrf.mxu1 }
 0x219   : > { %v5070_v22 = vadd.f32 %v4959_v58, %v9937_v34  ;;  %v6532_v61 = vadd.f32 %v6531_v18, %v6501_v8  ;;  %v8098_v2 = vpop.f32.mrf.mxu0  ;;  %v5666_v43 = vadd.f32 %v8097_v5, %v5072_v45 }
 0x21a   : > { %v8050_v25 = vpop.f32.mrf.mxu1 }
 0x21b   : > { %v5664_v55 = vadd.f32 %v5553_v32, %v5070_v22  ;;  %v5073_v40 = vadd.f32 %v8050_v25, %v9940_v30  ;;  %v5556_v16 = vpop.f32.mrf.mxu0  ;;  %v6504_v24 = vmul.f32 %v5666_v43, %v5666_v43 }
 0x21c   : > { %v4962_v4 = vpop.f32.mrf.mxu1 }
 0x21d   : > { %v6464_v21 = vadd.f32 %v6463_v42, %v5664_v55  ;;  %v6502_v27 = vmul.f32 %v5664_v55, %v5664_v55  ;;  %v5667_v49 = vadd.f32 %v8098_v2, %v5073_v40  ;;  %v5071_v17 = vadd.f32 %v4962_v4, %v9943_v63 }
 0x21f   : > { %v6533_v48 = vadd.f32 %v6532_v61, %v6502_v27  ;;  %v7416_v38 = vpack.c.bf16 %v5667_v49, %v5666_v43  ;;  %v5665_v9 = vadd.f32 %v5556_v16, %v5071_v17  ;;  %v6505_v14 = vmul.f32 %v5667_v49, %v5667_v49 }
 0x221   : > { %7456 = vst [vmem:[%s9995_s19 + $0x48] sm:$0xff] %v7416_v38   ;;  %v7411_v34 = vpack.c.bf16 %v5665_v9, %v5664_v55  ;;  %v6465_v20 = vadd.f32 %v6464_v21, %v5665_v9  ;;  %v6503_v6 = vmul.f32 %v5665_v9, %v5665_v9 }
 0x223   : > { %7455 = vst [vmem:[%s9995_s19 + $0x40] sm:$0xff] %v7411_v34   ;;  %v6466_v51 = vadd.f32 %v6465_v20, %v5666_v43  ;;  %v6534_v30 = vadd.f32 %v6533_v48, %v6503_v6  ;;  %v8101_v31 = vpop.f32.mrf.mxu0 }
 0x224   : > { %v8053_v33 = vpop.f32.mrf.mxu1 }
 0x225   : > { %v6535_v37 = vadd.f32 %v6534_v30, %v6504_v24  ;;  %v5569_v41 = vpop.f32.mrf.mxu0  ;;  %v6467_v50 = vadd.f32 %v6466_v51, %v5667_v49  ;;  %v5076_v63 = vadd.f32 %v8053_v33, %v9946_v54 }
 0x226   : > { %v4975_v57 = vpop.f32.mrf.mxu1 }
 0x227   : > { %v5074_v13 = vadd.f32 %v4975_v57, %v9949_v59  ;;  %v6536_v44 = vadd.f32 %v6535_v37, %v6505_v14  ;;  %v8102_v35 = vpop.f32.mrf.mxu0  ;;  %v5670_v47 = vadd.f32 %v8101_v31, %v5076_v63 }
 0x228   : > { %v8054_v0 = vpop.f32.mrf.mxu1 }
 0x229   : > { %v5668_v39 = vadd.f32 %v5569_v41, %v5074_v13  ;;  %v5077_v1 = vadd.f32 %v8054_v0, %v9952_v28  ;;  %v5572_v19 = vpop.f32.mrf.mxu0  ;;  %v6508_v18 = vmul.f32 %v5670_v47, %v5670_v47 }
 0x22a   : > { %v4978_v23 = vpop.f32.mrf.mxu1 }
 0x22b   : > { %v6468_v11 = vadd.f32 %v6467_v50, %v5668_v39  ;;  %v6506_v26 = vmul.f32 %v5668_v39, %v5668_v39  ;;  %v5671_v12 = vadd.f32 %v8102_v35, %v5077_v1  ;;  %v5075_v10 = vadd.f32 %v4978_v23, %v9955_v29 }
 0x22d   : > { %v6537_v54 = vadd.f32 %v6536_v44, %v6506_v26  ;;  %v7426_v7 = vpack.c.bf16 %v5671_v12, %v5670_v47  ;;  %v5669_v5 = vadd.f32 %v5572_v19, %v5075_v10  ;;  %v6509_v58 = vmul.f32 %v5671_v12, %v5671_v12 }
 0x22f   : > { %7458 = vst [vmem:[%s9995_s19 + $0x58] sm:$0xff] %v7426_v7   ;;  %v7421_v59 = vpack.c.bf16 %v5669_v5, %v5668_v39  ;;  %v6469_v46 = vadd.f32 %v6468_v11, %v5669_v5  ;;  %v6507_v8 = vmul.f32 %v5669_v5, %v5669_v5 }
 0x231   : > { %7457 = vst [vmem:[%s9995_s19 + $0x50] sm:$0xff] %v7421_v59   ;;  %v6470_v32 = vadd.f32 %v6469_v46, %v5670_v47  ;;  %v6538_v28 = vadd.f32 %v6537_v54, %v6507_v8  ;;  %v8105_v42 = vpop.f32.mrf.mxu0 }
 0x232   : > { %v8057_v45 = vpop.f32.mrf.mxu1 }
 0x233   : > { %v6539_v22 = vadd.f32 %v6538_v28, %v6508_v18  ;;  %v5585_v61 = vpop.f32.mrf.mxu0  ;;  %v6471_v25 = vadd.f32 %v6470_v32, %v5671_v12  ;;  %v5080_v29 = vadd.f32 %v8057_v45, %v9958_v56 }
 0x234   : > { %v4991_v2 = vpop.f32.mrf.mxu1 }
 0x235   : > { %v5078_v55 = vadd.f32 %v4991_v2, %v9961_v53  ;;  %v6540_v40 = vadd.f32 %v6539_v22, %v6509_v58  ;;  %v8106_v4 = vpop.f32.mrf.mxu0  ;;  %v5674_v49 = vadd.f32 %v8105_v42, %v5080_v29 }
 0x236   : > { %v8058_v43 = vpop.f32.mrf.mxu1 }
 0x237   : > { %v5672_v21 = vadd.f32 %v5585_v61, %v5078_v55  ;;  %v5081_v27 = vadd.f32 %v8058_v43, %v9964_v3  ;;  %v5588_v34 = vpop.f32.mrf.mxu0  ;;  %v6512_v30 = vmul.f32 %v5674_v49, %v5674_v49 }
 0x238   : > { %v4994_v17 = vpop.f32.mrf.mxu1 }
 0x239   : > { %v6472_v16 = vadd.f32 %v6471_v25, %v5672_v21  ;;  %v6510_v48 = vmul.f32 %v5672_v21, %v5672_v21  ;;  %v5675_v38 = vadd.f32 %v8106_v4, %v5081_v27  ;;  %v5079_v9 = vadd.f32 %v4994_v17, %v9967_v52 }
 0x23b   : > { %v6541_v56 = vadd.f32 %v6540_v40, %v6510_v48  ;;  %v7436_v20 = vpack.c.bf16 %v5675_v38, %v5674_v49  ;;  %v5673_v6 = vadd.f32 %v5588_v34, %v5079_v9  ;;  %v6513_v37 = vmul.f32 %v5675_v38, %v5675_v38 }
 0x23d   : > { %7460 = vst [vmem:[%s9995_s19 + $0x68] sm:$0xff] %v7436_v20   ;;  %v7431_v53 = vpack.c.bf16 %v5673_v6, %v5672_v21  ;;  %v6473_v24 = vadd.f32 %v6472_v16, %v5673_v6  ;;  %v6511_v51 = vmul.f32 %v5673_v6, %v5673_v6 }
 0x23f   : > { %7459 = vst [vmem:[%s9995_s19 + $0x60] sm:$0xff] %v7431_v53   ;;  %v6474_v31 = vadd.f32 %v6473_v24, %v5674_v49  ;;  %v6542_v3 = vadd.f32 %v6541_v56, %v6511_v51  ;;  %v8109_v33 = vpop.f32.mrf.mxu0 }
 0x240   : > { %v8061_v14 = vpop.f32.mrf.mxu1 }
 0x241   : > { %v6543_v41 = vadd.f32 %v6542_v3, %v6512_v30  ;;  %v5601_v50 = vpop.f32.mrf.mxu0  ;;  %v6475_v63 = vadd.f32 %v6474_v31, %v5675_v38  ;;  %v5084_v52 = vadd.f32 %v8061_v14, %v9970_v62 }
 0x242   : > { %v5007_v57 = vpop.f32.mrf.mxu1 }
 0x243   : > { %v5082_v13 = vadd.f32 %v5007_v57, %v9975_v60  ;;  %v6544_v44 = vadd.f32 %v6543_v41, %v6513_v37  ;;  %v8110_v35 = vpop.f32.mrf.mxu0  ;;  %v5678_v47 = vadd.f32 %v8109_v33, %v5084_v52 }
 0x244   : > { %v8062_v0 = vpop.f32.mrf.mxu1 }
 0x245   : > { %v5676_v39 = vadd.f32 %v5601_v50, %v5082_v13  ;;  %v5085_v1 = vadd.f32 %v8062_v0, %v9979_v15  ;;  %v5604_v19 = vpop.f32.mrf.mxu0  ;;  %v6516_v46 = vmul.f32 %v5678_v47, %v5678_v47 }
 0x246   : > { %v5010_v23 = vpop.f32.mrf.mxu1 }
 0x247   : > { %v6476_v11 = vadd.f32 %v6475_v63, %v5676_v39  ;;  %v6514_v26 = vmul.f32 %v5676_v39, %v5676_v39  ;;  %v5679_v12 = vadd.f32 %v8110_v35, %v5085_v1  ;;  %v5083_v10 = vadd.f32 %v5010_v23, %v9982_v36 }
 0x249   : > { %v6545_v62 = vadd.f32 %v6544_v44, %v6514_v26  ;;  %v7446_v54 = vpack.c.bf16 %v5679_v12, %v5678_v47  ;;  %v5677_v7 = vadd.f32 %v5604_v19, %v5083_v10  ;;  %v6517_v18 = vmul.f32 %v5679_v12, %v5679_v12 }
 0x24b   : > { %7462 = vst [vmem:[%s9995_s19 + $0x78] sm:$0xff] %v7446_v54   ;;  %v7441_v60 = vpack.c.bf16 %v5677_v7, %v5676_v39  ;;  %v6477_v5 = vadd.f32 %v6476_v11, %v5677_v7  ;;  %v6515_v59 = vmul.f32 %v5677_v7, %v5677_v7 }
 0x24d   : > { %7461 = vst [vmem:[%s9995_s19 + $0x70] sm:$0xff] %v7441_v60   ;;  %v6478_v15 = vadd.f32 %v6477_v5, %v5678_v47  ;;  %v6546_v8 = vadd.f32 %v6545_v62, %v6515_v59 }
 0x24f   : > { %v6479_v32 = vadd.f32 %v6478_v15, %v5679_v12  ;;  %v6547_v28 = vadd.f32 %v6546_v8, %v6516_v46 }
 0x251   : > { %v6480_v42 = vrot.slane %v6479_v32, 4  ;;  %v6548_v45 = vadd.f32 %v6547_v28, %v6517_v18 }
 0x253   : > { %v6481_v58 = vadd.f32 %v6480_v42, %v6479_v32  ;;  %v6549_v36 = vrot.slane %v6548_v45, 4 }
 0x255   : > { %v6482_v22 = vrot.slane %v6481_v58, 2  ;;  %v6550_v61 = vadd.f32 %v6549_v36, %v6548_v45 }
 0x257   : > { %v6483_v25 = vadd.f32 %v6482_v22, %v6481_v58  ;;  %v6551_v29 = vrot.slane %v6550_v61, 2 }
 0x259   : > { %v6484_v2 = vrot.slane %v6483_v25, 1  ;;  %v6552_v55 = vadd.f32 %v6551_v29, %v6550_v61 }
 0x25b   : > { %v6553_v40 = vrot.slane %v6552_v55, 1  ;;  %v6485_v43 = vadd.f32 %v6484_v2, %v6483_v25 }
 0x25d   : > { %v6554_v4 = vadd.f32 %v6553_v40, %v6552_v55 }
 0x25f   : > { %v6556_v21 = vsel %vm6555_vm6, %v6485_v43, %v6554_v4 }
 0x260   : > { %6557 = vst [vmem:[%s181_s24] sm:$0x3] %v6556_v21 }
 0x261 PF: > { %s14_s12 = sadd.s32 1, %s8262_s12  }
 0x262   : > { %p11_p4 = scmp.ge.s32.totalorder %s14_s12, 4  }
 0x264   :  { %13 = sbr.rel (!%p11_p4) target bundleno = 1 (0x1), region = 80 }

</bundles_post_ra>
